<compile_context>
chip_gen: v5e
topology: v5e:2x2
jax: 0.10.0
libtpu: 0.0.40
codegen_flags: <defaults>
</compile_context>

<pallas_src>
import functools

import numpy as np
import jax
import jax.numpy as jnp
from jax.experimental import pallas as pl
from jax.experimental.pallas import tpu as pltpu

# ----------------------------- module config --------------------------------
NDF = 4            # ndf (small for the example)
EMB = 16           # cfg.TEXT.EMBEDDING_DIM (small for the example)
LRELU_SLOPE = 0.2

_F16 = NDF * 16            # 64  channels of the image feature map
_FIN = _F16 + EMB          # 80  channels after concatenating the text code
_FMID = NDF * 2            # 8   hidden channels of the joint convs
_H8 = 8                    # spatial resolution entering the head
_H4 = 4                    # spatial resolution after the downsampling resD block


# --------------------- trace-time constant matrices -------------------------
def _sel_matrices(batch, h, w, k, stride, pad):
    """0/1 tap-selection matrices, one per conv tap.

    S[t] has shape (batch*Ho*Wo, batch*h*w); (S[t] @ x_flat) gathers, for every
    output pixel, the input pixel under kernel tap t.  Output rows whose tap
    falls into the zero padding are all-zero rows, so padding comes for free.
    """
    ho = (h + 2 * pad - k) // stride + 1
    wo = (w + 2 * pad - k) // stride + 1
    s = np.zeros((k * k, batch * ho * wo, batch * h * w), np.float32)
    for di in range(k):
        for dj in range(k):
            t = di * k + dj
            for b in range(batch):
                for oh in range(ho):
                    ih = oh * stride + di - pad
                    if not 0 <= ih < h:
                        continue
                    for ow in range(wo):
                        iw = ow * stride + dj - pad
                        if not 0 <= iw < w:
                            continue
                        s[t, b * ho * wo + oh * wo + ow,
                          b * h * w + ih * w + iw] = 1.0
    return s


def _pool_matrix(batch, h, w):
    """(batch*h/2*w/2, batch*h*w) matrix implementing 2x2 average pooling."""
    ho, wo = h // 2, w // 2
    p = np.zeros((batch * ho * wo, batch * h * w), np.float32)
    for b in range(batch):
        for oh in range(ho):
            for ow in range(wo):
                r = b * ho * wo + oh * wo + ow
                for di in range(2):
                    for dj in range(2):
                        p[r, b * h * w + (2 * oh + di) * w + (2 * ow + dj)] = 0.25
    return p


def _expand_matrix(batch, spatial):
    """(batch*spatial, batch): E @ y broadcasts per-batch vectors to every pixel."""
    e = np.zeros((batch * spatial, batch), np.float32)
    for b in range(batch):
        e[b * spatial:(b + 1) * spatial, b] = 1.0
    return e


@functools.lru_cache(maxsize=None)
def _constants(batch):
    e8 = _expand_matrix(batch, _H8 * _H8)
    e4 = _expand_matrix(batch, _H4 * _H4)
    return dict(
        e8=e8, g2=np.ascontiguousarray(e8.T),
        e4=e4, g4=np.ascontiguousarray(e4.T),
        pool=_pool_matrix(batch, _H8, _H8),
        s_att=_sel_matrices(batch, _H8, _H8, 3, 1, 1),   # (9,  B*64, B*64)
        s_r1=_sel_matrices(batch, _H8, _H8, 4, 2, 1),    # (16, B*16, B*64)
        s_33=_sel_matrices(batch, _H4, _H4, 3, 1, 1),    # (9,  B*16, B*16)
    )


# ------------------------------ Pallas kernel --------------------------------
def _fused_kernel(x_ref, y_ref, e8_ref, g2_ref, e4_ref, g4_ref, pool_ref,
                  satt_ref, sr1_ref, s33_ref,
                  wa1x_ref, wa1y_ref, wa2_ref,
                  wsx_ref, wsy_ref, bs_ref,
                  wr1x_ref, wr1y_ref, wr2_ref,
                  wj1x_ref, wj1y_ref, wj2_ref,
                  gamma_ref, o_ref):
    f32 = jnp.float32

    def dot(a, b):
        return jnp.dot(a, b, preferred_element_type=f32)

    def lrelu(v):                               # LeakyReLU(0.2) == max(v, 0.2*v)
        return jnp.maximum(v, LRELU_SLOPE * v)

    x = x_ref[...]                              # (B*64, 64)  image features
    y = y_ref[...]                              # (B, 16)     sentence embedding
    e8 = e8_ref[...]
    y8 = dot(e8, y)                             # (B*64, 16)  text code per pixel

    # -- joint_conv_att: 3x3 conv -> LReLU -> 1x1 conv -> Sigmoid --------------
    # Cout (8) << Cin (80): project channels first, gather 8-lane tensor after.
    a = None
    for t in range(9):                          # static unroll over kernel taps
        v = dot(x, wa1x_ref[t]) + dot(y8, wa1y_ref[t])        # (B*64, 8)
        g = dot(satt_ref[t], v)                                # (B*64, 8)
        a = g if a is None else a + g
    a = lrelu(a)
    logit = dot(a, wa2_ref[...])                               # (B*64, 1)
    sig = 1.0 / (1.0 + jnp.exp(-logit))

    # -- softmax over the 64 spatial positions of each batch element ----------
    # sigmoid output is in (0, 1) so exp() cannot overflow -> no max shift needed
    e = jnp.exp(sig)
    denom = dot(g2_ref[...], e)                                # (B, 1)
    p = e * dot(e8, 1.0 / denom)                               # (B*64, 1)

    # -- re-weight the text branch ---------------------------------------------
    yp = y8 * p                                                # (B*64, 16)

    # -- resD learned shortcut: pool FIRST (linear), then 1x1 conv + bias ------
    xp = dot(pool_ref[...], x)                                 # (B*16, 64)
    ypp = dot(pool_ref[...], yp)                               # (B*16, 16)
    sc = dot(xp, wsx_ref[...]) + dot(ypp, wsy_ref[...]) + bs_ref[...]

    # -- resD residual: 4x4 stride-2 conv (gather first, Ro << Ri) -> LReLU ----
    r = None
    for t in range(16):
        gx = dot(sr1_ref[t], x)                                # (B*16, 64)
        gy = dot(sr1_ref[t], yp)                               # (B*16, 16)
        c = dot(gx, wr1x_ref[t]) + dot(gy, wr1y_ref[t])        # (B*16, 64)
        r = c if r is None else r + c
    r = lrelu(r)

    # -- resD residual: 3x3 conv -> LReLU --------------------------------------
    r2 = None
    for t in range(9):
        c = dot(s33_ref[t], dot(r, wr2_ref[t]))                # (B*16, 64)
        r2 = c if r2 is None else r2 + c
    r2 = lrelu(r2)

    h4 = sc + gamma_ref[0] * r2                                # (B*16, 64)

    # -- joint_conv head: 3x3 conv (project first) -> LReLU -> 4x4 valid conv --
    y4 = dot(e4_ref[...], y)                                   # (B*16, 16)
    j = None
    for t in range(9):
        v = dot(h4, wj1x_ref[t]) + dot(y4, wj1y_ref[t])        # (B*16, 8)
        g = dot(s33_ref[t], v)                                 # (B*16, 8)
        j = g if j is None else j + g
    j = lrelu(j)
    # 4x4 "valid" conv on a 4x4 map: per-row dot with the matching weight row,
    # summed over the 16 spatial rows of each batch element.
    o_ref[...] = jnp.sum(dot(g4_ref[...], j * wj2_ref[...]),
                         axis=-1, keepdims=True)               # (B, 1)


# ------------------------------ wrapper --------------------------------------
_VMEM = pl.BlockSpec(memory_space=pltpu.MemorySpace.VMEM)
_SMEM = pl.BlockSpec(memory_space=pltpu.MemorySpace.SMEM)


def _taps(w_oihw):
    """PyTorch OIHW conv weight -> (kh*kw, Cin, Cout) per-tap matmul weights."""
    co, ci, kh, kw = w_oihw.shape
    return jnp.transpose(w_oihw, (2, 3, 1, 0)).reshape(kh * kw, ci, co)


@jax.jit
def d_get_logits_att(out_nchw, y_, params):
    """out_nchw: (B, ndf*16, 8, 8), y_: (B, EMB)  ->  (B, 1, 1, 1)"""
    B = out_nchw.shape[0]
    c = _constants(B)

    # flat (rows = b*64 + h*8 + w, lanes = channels) layout for the kernel
    x8 = jnp.transpose(out_nchw, (0, 2, 3, 1)).reshape(B * _H8 * _H8, _F16)
    x8 = x8.astype(jnp.float32)
    y = y_.astype(jnp.float32)

    # split every concat-input conv weight into image-part / text-part so the
    # kernel never has to concatenate along the lane axis.
    w_a1 = _taps(params["att1_w"])                           # (9, 80, 8)
    w_a1x, w_a1y = w_a1[:, :_F16, :], w_a1[:, _F16:, :]
    w_a2 = _taps(params["att2_w"])[0]                        # (8, 1)
    w_s = _taps(params["block_s_w"])[0]                      # (80, 64)
    w_sx, w_sy = w_s[:_F16, :], w_s[_F16:, :]
    b_s = params["block_s_b"].reshape(1, _F16)               # (1, 64)
    w_r1 = _taps(params["block_r1_w"])                       # (16, 80, 64)
    w_r1x, w_r1y = w_r1[:, :_F16, :], w_r1[:, _F16:, :]
    w_r2 = _taps(params["block_r2_w"])                       # (9, 64, 64)
    w_j1 = _taps(params["joint1_w"])                         # (9, 80, 8)
    w_j1x, w_j1y = w_j1[:, :_F16, :], w_j1[:, _F16:, :]
    # joint2 is a 4x4 "valid" conv on a 4x4 map -> one weight row per flat row
    w_j2 = jnp.tile(_taps(params["joint2_w"])[:, :, 0], (B, 1))     # (B*16, 8)
    gamma = params["block_gamma"].reshape(1).astype(jnp.float32)    # (1,)

    logits = pl.pallas_call(
        _fused_kernel,
        out_shape=jax.ShapeDtypeStruct((B, 1), jnp.float32),
        in_specs=[_VMEM] * 22 + [_SMEM],
        out_specs=_VMEM,
    )(x8, y, c["e8"], c["g2"], c["e4"], c["g4"], c["pool"],
      c["s_att"], c["s_r1"], c["s_33"],
      w_a1x, w_a1y, w_a2, w_sx, w_sy, b_s,
      w_r1x, w_r1y, w_r2, w_j1x, w_j1y, w_j2, gamma)

    return logits.reshape(B, 1, 1, 1)


# ----------------------------- parameters ------------------------------------
def init_params(key, ndf=NDF, emb=EMB):
    fin = ndf * 16 + emb
    fmid = ndf * 2
    f16 = ndf * 16
    ks = jax.random.split(key, 8)

    def w(k, shape, scale=0.05):
        return scale * jax.random.normal(k, shape, jnp.float32)

    return {
        # joint_conv_att: Conv(fin, ndf*2, 3,1,1) -> LReLU -> Conv(ndf*2, 1, 1,1,0) -> Sigmoid
        "att1_w": w(ks[0], (fmid, fin, 3, 3)),
        "att2_w": w(ks[1], (1, fmid, 1, 1)),
        # resD block (fin -> ndf*16, downsample, learned shortcut)
        "block_r1_w": w(ks[2], (f16, fin, 4, 4)),
        "block_r2_w": w(ks[3], (f16, f16, 3, 3)),
        "block_s_w": w(ks[4], (f16, fin, 1, 1)),
        "block_s_b": w(ks[5], (f16,)),
        "block_gamma": jnp.zeros((1,), jnp.float32),   # nn.Parameter(torch.zeros(1))
        # joint_conv: Conv(fin, ndf*2, 3,1,1) -> LReLU -> Conv(ndf*2, 1, 4,1,0)
        "joint1_w": w(ks[6], (fmid, fin, 3, 3)),
        "joint2_w": w(ks[7], (1, fmid, 4, 4)),
    }


# ----------------------- pure-JAX reference (self-check) ---------------------
def _conv_ref(x, w, b=None, stride=1, pad=0):
    out = jax.lax.conv_general_dilated(
        x, w, window_strides=(stride, stride),
        padding=((pad, pad), (pad, pad)),
        dimension_numbers=("NCHW", "OIHW", "NCHW"))
    if b is not None:
        out = out + b.reshape(1, -1, 1, 1)
    return out


@jax.jit
def _ref_forward(out_nchw, y_, params):
    lrelu = lambda v: jnp.where(v > 0, v, LRELU_SLOPE * v)
    B = out_nchw.shape[0]
    y = jnp.broadcast_to(y_[:, :, None, None], (B, EMB, 8, 8))
    h = jnp.concatenate([out_nchw, y], axis=1)
    p = _conv_ref(h, params["att1_w"], None, 1, 1)
    p = _conv_ref(lrelu(p), params["att2_w"], None, 1, 0)
    p = jax.nn.sigmoid(p)
    p = jax.nn.softmax(p.reshape(B, 1, 64), axis=2).reshape(B, 1, 8, 8)
    y = y * p
    h = jnp.concatenate([out_nchw, y], axis=1)
    s = _conv_ref(h, params["block_s_w"], params["block_s_b"], 1, 0)
    s = s.reshape(B, NDF * 16, 4, 2, 4, 2).mean(axis=(3, 5))
    r = lrelu(_conv_ref(h, params["block_r1_w"], None, 2, 1))
    r = lrelu(_conv_ref(r, params["block_r2_w"], None, 1, 1))
    h = s + params["block_gamma"][0] * r
    y4 = jnp.broadcast_to(y_[:, :, None, None], (B, EMB, 4, 4))
    h = jnp.concatenate([h, y4], axis=1)
    o = lrelu(_conv_ref(h, params["joint1_w"], None, 1, 1))
    return _conv_ref(o, params["joint2_w"], None, 1, 0)


# ----------------------------------- demo ------------------------------------
if __name__ == "__main__":
    key = jax.random.PRNGKey(0)
    k_out, k_y, k_p = jax.random.split(key, 3)

    B = 2
    out_feat = jax.random.normal(k_out, (B, NDF * 16, 8, 8), jnp.float32)  # (2,64,8,8)
    y_sent = jax.random.normal(k_y, (B, EMB), jnp.float32)                 # (2,16)
    params = init_params(k_p)

    logits = d_get_logits_att(out_feat, y_sent, params)
    jax.block_until_ready(logits)
    assert logits.shape == (B, 1, 1, 1), logits.shape
    assert bool(jnp.all(jnp.isfinite(logits)))

    # self-check against a pure-JAX (XLA conv) reference of the same module
    ref = _ref_forward(out_feat, y_sent, params)
    np.testing.assert_allclose(np.asarray(logits), np.asarray(ref),
                               rtol=5e-2, atol=5e-2)

    print("KERNEL_OK")
</pallas_src>

<mosaic_0001>
module attributes {stable_mosaic.version = 11 : i64} {
  func.func @_fused_kernel(%arg0: memref<128x64xf32, #tpu.memory_space<vmem>>, %arg1: memref<2x16xf32, #tpu.memory_space<vmem>>, %arg2: memref<128x2xf32, #tpu.memory_space<vmem>>, %arg3: memref<2x128xf32, #tpu.memory_space<vmem>>, %arg4: memref<32x2xf32, #tpu.memory_space<vmem>>, %arg5: memref<2x32xf32, #tpu.memory_space<vmem>>, %arg6: memref<32x128xf32, #tpu.memory_space<vmem>>, %arg7: memref<9x128x128xf32, #tpu.memory_space<vmem>>, %arg8: memref<16x32x128xf32, #tpu.memory_space<vmem>>, %arg9: memref<9x32x32xf32, #tpu.memory_space<vmem>>, %arg10: memref<9x64x8xf32, #tpu.memory_space<vmem>>, %arg11: memref<9x16x8xf32, #tpu.memory_space<vmem>>, %arg12: memref<8x1xf32, #tpu.memory_space<vmem>>, %arg13: memref<64x64xf32, #tpu.memory_space<vmem>>, %arg14: memref<16x64xf32, #tpu.memory_space<vmem>>, %arg15: memref<1x64xf32, #tpu.memory_space<vmem>>, %arg16: memref<16x64x64xf32, #tpu.memory_space<vmem>>, %arg17: memref<16x16x64xf32, #tpu.memory_space<vmem>>, %arg18: memref<9x64x64xf32, #tpu.memory_space<vmem>>, %arg19: memref<9x64x8xf32, #tpu.memory_space<vmem>>, %arg20: memref<9x16x8xf32, #tpu.memory_space<vmem>>, %arg21: memref<32x8xf32, #tpu.memory_space<vmem>>, %arg22: memref<1xf32, #tpu.memory_space<smem>>, %arg23: memref<2x1xf32, #tpu.memory_space<vmem>>) attributes {dimension_semantics = [], scalar_prefetch = 0 : i64, scratch_operands = 0 : i64, tpu.core_type = #tpu.core_type<tc>} {
    %c0 = arith.constant 0 : index
    %c0_0 = arith.constant 0 : index
    %0 = vector.load %arg0[%c0, %c0_0] : memref<128x64xf32, #tpu.memory_space<vmem>>, vector<128x64xf32>
    %c0_1 = arith.constant 0 : index
    %c0_2 = arith.constant 0 : index
    %1 = vector.load %arg1[%c0_1, %c0_2] : memref<2x16xf32, #tpu.memory_space<vmem>>, vector<2x16xf32>
    %c0_3 = arith.constant 0 : index
    %c0_4 = arith.constant 0 : index
    %2 = vector.load %arg2[%c0_3, %c0_4] : memref<128x2xf32, #tpu.memory_space<vmem>>, vector<128x2xf32>
    %cst = arith.constant dense<0.000000e+00> : vector<128x16xf32>
    %3 = tpu.matmul %2, %1, %cst {dimension_numbers = #tpu.dot_dimension_numbers<[1], [0], [0], [1], [0, 0, 1, 1], [], []>} : vector<128x2xf32>, vector<2x16xf32>, vector<128x16xf32> -> vector<128x16xf32>
    %c0_5 = arith.constant 0 : index
    %c0_6 = arith.constant 0 : index
    %c0_7 = arith.constant 0 : index
    %4 = vector.load %arg10[%c0_5, %c0_6, %c0_7] : memref<9x64x8xf32, #tpu.memory_space<vmem>>, vector<1x64x8xf32>
    %5 = vector.shape_cast %4 : vector<1x64x8xf32> to vector<64x8xf32>
    %cst_8 = arith.constant dense<0.000000e+00> : vector<128x8xf32>
    %6 = tpu.matmul %0, %5, %cst_8 {dimension_numbers = #tpu.dot_dimension_numbers<[1], [0], [0], [1], [0, 0, 1, 1], [], []>} : vector<128x64xf32>, vector<64x8xf32>, vector<128x8xf32> -> vector<128x8xf32>
    %c0_9 = arith.constant 0 : index
    %c0_10 = arith.constant 0 : index
    %c0_11 = arith.constant 0 : index
    %7 = vector.load %arg11[%c0_9, %c0_10, %c0_11] : memref<9x16x8xf32, #tpu.memory_space<vmem>>, vector<1x16x8xf32>
    %8 = vector.shape_cast %7 : vector<1x16x8xf32> to vector<16x8xf32>
    %cst_12 = arith.constant dense<0.000000e+00> : vector<128x8xf32>
    %9 = tpu.matmul %3, %8, %cst_12 {dimension_numbers = #tpu.dot_dimension_numbers<[1], [0], [0], [1], [0, 0, 1, 1], [], []>} : vector<128x16xf32>, vector<16x8xf32>, vector<128x8xf32> -> vector<128x8xf32>
    %10 = arith.addf %6, %9 : vector<128x8xf32>
    %c0_13 = arith.constant 0 : index
    %c0_14 = arith.constant 0 : index
    %c0_15 = arith.constant 0 : index
    %11 = vector.load %arg7[%c0_13, %c0_14, %c0_15] : memref<9x128x128xf32, #tpu.memory_space<vmem>>, vector<1x128x128xf32>
    %12 = vector.shape_cast %11 : vector<1x128x128xf32> to vector<128x128xf32>
    %cst_16 = arith.constant dense<0.000000e+00> : vector<128x8xf32>
    %13 = tpu.matmul %12, %10, %cst_16 {dimension_numbers = #tpu.dot_dimension_numbers<[1], [0], [0], [1], [0, 0, 1, 1], [], []>} : vector<128x128xf32>, vector<128x8xf32>, vector<128x8xf32> -> vector<128x8xf32>
    %c1 = arith.constant 1 : index
    %c0_17 = arith.constant 0 : index
    %c0_18 = arith.constant 0 : index
    %14 = vector.load %arg10[%c1, %c0_17, %c0_18] : memref<9x64x8xf32, #tpu.memory_space<vmem>>, vector<1x64x8xf32>
    %15 = vector.shape_cast %14 : vector<1x64x8xf32> to vector<64x8xf32>
    %cst_19 = arith.constant dense<0.000000e+00> : vector<128x8xf32>
    %16 = tpu.matmul %0, %15, %cst_19 {dimension_numbers = #tpu.dot_dimension_numbers<[1], [0], [0], [1], [0, 0, 1, 1], [], []>} : vector<128x64xf32>, vector<64x8xf32>, vector<128x8xf32> -> vector<128x8xf32>
    %c1_20 = arith.constant 1 : index
    %c0_21 = arith.constant 0 : index
    %c0_22 = arith.constant 0 : index
    %17 = vector.load %arg11[%c1_20, %c0_21, %c0_22] : memref<9x16x8xf32, #tpu.memory_space<vmem>>, vector<1x16x8xf32>
    %18 = vector.shape_cast %17 : vector<1x16x8xf32> to vector<16x8xf32>
    %cst_23 = arith.constant dense<0.000000e+00> : vector<128x8xf32>
    %19 = tpu.matmul %3, %18, %cst_23 {dimension_numbers = #tpu.dot_dimension_numbers<[1], [0], [0], [1], [0, 0, 1, 1], [], []>} : vector<128x16xf32>, vector<16x8xf32>, vector<128x8xf32> -> vector<128x8xf32>
    %20 = arith.addf %16, %19 : vector<128x8xf32>
    %c1_24 = arith.constant 1 : index
    %c0_25 = arith.constant 0 : index
    %c0_26 = arith.constant 0 : index
    %21 = vector.load %arg7[%c1_24, %c0_25, %c0_26] : memref<9x128x128xf32, #tpu.memory_space<vmem>>, vector<1x128x128xf32>
    %22 = vector.shape_cast %21 : vector<1x128x128xf32> to vector<128x128xf32>
    %cst_27 = arith.constant dense<0.000000e+00> : vector<128x8xf32>
    %23 = tpu.matmul %22, %20, %cst_27 {dimension_numbers = #tpu.dot_dimension_numbers<[1], [0], [0], [1], [0, 0, 1, 1], [], []>} : vector<128x128xf32>, vector<128x8xf32>, vector<128x8xf32> -> vector<128x8xf32>
    %24 = arith.addf %13, %23 : vector<128x8xf32>
    %c2 = arith.constant 2 : index
    %c0_28 = arith.constant 0 : index
    %c0_29 = arith.constant 0 : index
    %25 = vector.load %arg10[%c2, %c0_28, %c0_29] : memref<9x64x8xf32, #tpu.memory_space<vmem>>, vector<1x64x8xf32>
    %26 = vector.shape_cast %25 : vector<1x64x8xf32> to vector<64x8xf32>
    %cst_30 = arith.constant dense<0.000000e+00> : vector<128x8xf32>
    %27 = tpu.matmul %0, %26, %cst_30 {dimension_numbers = #tpu.dot_dimension_numbers<[1], [0], [0], [1], [0, 0, 1, 1], [], []>} : vector<128x64xf32>, vector<64x8xf32>, vector<128x8xf32> -> vector<128x8xf32>
    %c2_31 = arith.constant 2 : index
    %c0_32 = arith.constant 0 : index
    %c0_33 = arith.constant 0 : index
    %28 = vector.load %arg11[%c2_31, %c0_32, %c0_33] : memref<9x16x8xf32, #tpu.memory_space<vmem>>, vector<1x16x8xf32>
    %29 = vector.shape_cast %28 : vector<1x16x8xf32> to vector<16x8xf32>
    %cst_34 = arith.constant dense<0.000000e+00> : vector<128x8xf32>
    %30 = tpu.matmul %3, %29, %cst_34 {dimension_numbers = #tpu.dot_dimension_numbers<[1], [0], [0], [1], [0, 0, 1, 1], [], []>} : vector<128x16xf32>, vector<16x8xf32>, vector<128x8xf32> -> vector<128x8xf32>
    %31 = arith.addf %27, %30 : vector<128x8xf32>
    %c2_35 = arith.constant 2 : index
    %c0_36 = arith.constant 0 : index
    %c0_37 = arith.constant 0 : index
    %32 = vector.load %arg7[%c2_35, %c0_36, %c0_37] : memref<9x128x128xf32, #tpu.memory_space<vmem>>, vector<1x128x128xf32>
    %33 = vector.shape_cast %32 : vector<1x128x128xf32> to vector<128x128xf32>
    %cst_38 = arith.constant dense<0.000000e+00> : vector<128x8xf32>
    %34 = tpu.matmul %33, %31, %cst_38 {dimension_numbers = #tpu.dot_dimension_numbers<[1], [0], [0], [1], [0, 0, 1, 1], [], []>} : vector<128x128xf32>, vector<128x8xf32>, vector<128x8xf32> -> vector<128x8xf32>
    %35 = arith.addf %24, %34 : vector<128x8xf32>
    %c3 = arith.constant 3 : index
    %c0_39 = arith.constant 0 : index
    %c0_40 = arith.constant 0 : index
    %36 = vector.load %arg10[%c3, %c0_39, %c0_40] : memref<9x64x8xf32, #tpu.memory_space<vmem>>, vector<1x64x8xf32>
    %37 = vector.shape_cast %36 : vector<1x64x8xf32> to vector<64x8xf32>
    %cst_41 = arith.constant dense<0.000000e+00> : vector<128x8xf32>
    %38 = tpu.matmul %0, %37, %cst_41 {dimension_numbers = #tpu.dot_dimension_numbers<[1], [0], [0], [1], [0, 0, 1, 1], [], []>} : vector<128x64xf32>, vector<64x8xf32>, vector<128x8xf32> -> vector<128x8xf32>
    %c3_42 = arith.constant 3 : index
    %c0_43 = arith.constant 0 : index
    %c0_44 = arith.constant 0 : index
    %39 = vector.load %arg11[%c3_42, %c0_43, %c0_44] : memref<9x16x8xf32, #tpu.memory_space<vmem>>, vector<1x16x8xf32>
    %40 = vector.shape_cast %39 : vector<1x16x8xf32> to vector<16x8xf32>
    %cst_45 = arith.constant dense<0.000000e+00> : vector<128x8xf32>
    %41 = tpu.matmul %3, %40, %cst_45 {dimension_numbers = #tpu.dot_dimension_numbers<[1], [0], [0], [1], [0, 0, 1, 1], [], []>} : vector<128x16xf32>, vector<16x8xf32>, vector<128x8xf32> -> vector<128x8xf32>
    %42 = arith.addf %38, %41 : vector<128x8xf32>
    %c3_46 = arith.constant 3 : index
    %c0_47 = arith.constant 0 : index
    %c0_48 = arith.constant 0 : index
    %43 = vector.load %arg7[%c3_46, %c0_47, %c0_48] : memref<9x128x128xf32, #tpu.memory_space<vmem>>, vector<1x128x128xf32>
    %44 = vector.shape_cast %43 : vector<1x128x128xf32> to vector<128x128xf32>
    %cst_49 = arith.constant dense<0.000000e+00> : vector<128x8xf32>
    %45 = tpu.matmul %44, %42, %cst_49 {dimension_numbers = #tpu.dot_dimension_numbers<[1], [0], [0], [1], [0, 0, 1, 1], [], []>} : vector<128x128xf32>, vector<128x8xf32>, vector<128x8xf32> -> vector<128x8xf32>
    %46 = arith.addf %35, %45 : vector<128x8xf32>
    %c4 = arith.constant 4 : index
    %c0_50 = arith.constant 0 : index
    %c0_51 = arith.constant 0 : index
    %47 = vector.load %arg10[%c4, %c0_50, %c0_51] : memref<9x64x8xf32, #tpu.memory_space<vmem>>, vector<1x64x8xf32>
    %48 = vector.shape_cast %47 : vector<1x64x8xf32> to vector<64x8xf32>
    %cst_52 = arith.constant dense<0.000000e+00> : vector<128x8xf32>
    %49 = tpu.matmul %0, %48, %cst_52 {dimension_numbers = #tpu.dot_dimension_numbers<[1], [0], [0], [1], [0, 0, 1, 1], [], []>} : vector<128x64xf32>, vector<64x8xf32>, vector<128x8xf32> -> vector<128x8xf32>
    %c4_53 = arith.constant 4 : index
    %c0_54 = arith.constant 0 : index
    %c0_55 = arith.constant 0 : index
    %50 = vector.load %arg11[%c4_53, %c0_54, %c0_55] : memref<9x16x8xf32, #tpu.memory_space<vmem>>, vector<1x16x8xf32>
    %51 = vector.shape_cast %50 : vector<1x16x8xf32> to vector<16x8xf32>
    %cst_56 = arith.constant dense<0.000000e+00> : vector<128x8xf32>
    %52 = tpu.matmul %3, %51, %cst_56 {dimension_numbers = #tpu.dot_dimension_numbers<[1], [0], [0], [1], [0, 0, 1, 1], [], []>} : vector<128x16xf32>, vector<16x8xf32>, vector<128x8xf32> -> vector<128x8xf32>
    %53 = arith.addf %49, %52 : vector<128x8xf32>
    %c4_57 = arith.constant 4 : index
    %c0_58 = arith.constant 0 : index
    %c0_59 = arith.constant 0 : index
    %54 = vector.load %arg7[%c4_57, %c0_58, %c0_59] : memref<9x128x128xf32, #tpu.memory_space<vmem>>, vector<1x128x128xf32>
    %55 = vector.shape_cast %54 : vector<1x128x128xf32> to vector<128x128xf32>
    %cst_60 = arith.constant dense<0.000000e+00> : vector<128x8xf32>
    %56 = tpu.matmul %55, %53, %cst_60 {dimension_numbers = #tpu.dot_dimension_numbers<[1], [0], [0], [1], [0, 0, 1, 1], [], []>} : vector<128x128xf32>, vector<128x8xf32>, vector<128x8xf32> -> vector<128x8xf32>
    %57 = arith.addf %46, %56 : vector<128x8xf32>
    %c5 = arith.constant 5 : index
    %c0_61 = arith.constant 0 : index
    %c0_62 = arith.constant 0 : index
    %58 = vector.load %arg10[%c5, %c0_61, %c0_62] : memref<9x64x8xf32, #tpu.memory_space<vmem>>, vector<1x64x8xf32>
    %59 = vector.shape_cast %58 : vector<1x64x8xf32> to vector<64x8xf32>
    %cst_63 = arith.constant dense<0.000000e+00> : vector<128x8xf32>
    %60 = tpu.matmul %0, %59, %cst_63 {dimension_numbers = #tpu.dot_dimension_numbers<[1], [0], [0], [1], [0, 0, 1, 1], [], []>} : vector<128x64xf32>, vector<64x8xf32>, vector<128x8xf32> -> vector<128x8xf32>
    %c5_64 = arith.constant 5 : index
    %c0_65 = arith.constant 0 : index
    %c0_66 = arith.constant 0 : index
    %61 = vector.load %arg11[%c5_64, %c0_65, %c0_66] : memref<9x16x8xf32, #tpu.memory_space<vmem>>, vector<1x16x8xf32>
    %62 = vector.shape_cast %61 : vector<1x16x8xf32> to vector<16x8xf32>
    %cst_67 = arith.constant dense<0.000000e+00> : vector<128x8xf32>
    %63 = tpu.matmul %3, %62, %cst_67 {dimension_numbers = #tpu.dot_dimension_numbers<[1], [0], [0], [1], [0, 0, 1, 1], [], []>} : vector<128x16xf32>, vector<16x8xf32>, vector<128x8xf32> -> vector<128x8xf32>
    %64 = arith.addf %60, %63 : vector<128x8xf32>
    %c5_68 = arith.constant 5 : index
    %c0_69 = arith.constant 0 : index
    %c0_70 = arith.constant 0 : index
    %65 = vector.load %arg7[%c5_68, %c0_69, %c0_70] : memref<9x128x128xf32, #tpu.memory_space<vmem>>, vector<1x128x128xf32>
    %66 = vector.shape_cast %65 : vector<1x128x128xf32> to vector<128x128xf32>
    %cst_71 = arith.constant dense<0.000000e+00> : vector<128x8xf32>
    %67 = tpu.matmul %66, %64, %cst_71 {dimension_numbers = #tpu.dot_dimension_numbers<[1], [0], [0], [1], [0, 0, 1, 1], [], []>} : vector<128x128xf32>, vector<128x8xf32>, vector<128x8xf32> -> vector<128x8xf32>
    %68 = arith.addf %57, %67 : vector<128x8xf32>
    %c6 = arith.constant 6 : index
    %c0_72 = arith.constant 0 : index
    %c0_73 = arith.constant 0 : index
    %69 = vector.load %arg10[%c6, %c0_72, %c0_73] : memref<9x64x8xf32, #tpu.memory_space<vmem>>, vector<1x64x8xf32>
    %70 = vector.shape_cast %69 : vector<1x64x8xf32> to vector<64x8xf32>
    %cst_74 = arith.constant dense<0.000000e+00> : vector<128x8xf32>
    %71 = tpu.matmul %0, %70, %cst_74 {dimension_numbers = #tpu.dot_dimension_numbers<[1], [0], [0], [1], [0, 0, 1, 1], [], []>} : vector<128x64xf32>, vector<64x8xf32>, vector<128x8xf32> -> vector<128x8xf32>
    %c6_75 = arith.constant 6 : index
    %c0_76 = arith.constant 0 : index
    %c0_77 = arith.constant 0 : index
    %72 = vector.load %arg11[%c6_75, %c0_76, %c0_77] : memref<9x16x8xf32, #tpu.memory_space<vmem>>, vector<1x16x8xf32>
    %73 = vector.shape_cast %72 : vector<1x16x8xf32> to vector<16x8xf32>
    %cst_78 = arith.constant dense<0.000000e+00> : vector<128x8xf32>
    %74 = tpu.matmul %3, %73, %cst_78 {dimension_numbers = #tpu.dot_dimension_numbers<[1], [0], [0], [1], [0, 0, 1, 1], [], []>} : vector<128x16xf32>, vector<16x8xf32>, vector<128x8xf32> -> vector<128x8xf32>
    %75 = arith.addf %71, %74 : vector<128x8xf32>
    %c6_79 = arith.constant 6 : index
    %c0_80 = arith.constant 0 : index
    %c0_81 = arith.constant 0 : index
    %76 = vector.load %arg7[%c6_79, %c0_80, %c0_81] : memref<9x128x128xf32, #tpu.memory_space<vmem>>, vector<1x128x128xf32>
    %77 = vector.shape_cast %76 : vector<1x128x128xf32> to vector<128x128xf32>
    %cst_82 = arith.constant dense<0.000000e+00> : vector<128x8xf32>
    %78 = tpu.matmul %77, %75, %cst_82 {dimension_numbers = #tpu.dot_dimension_numbers<[1], [0], [0], [1], [0, 0, 1, 1], [], []>} : vector<128x128xf32>, vector<128x8xf32>, vector<128x8xf32> -> vector<128x8xf32>
    %79 = arith.addf %68, %78 : vector<128x8xf32>
    %c7 = arith.constant 7 : index
    %c0_83 = arith.constant 0 : index
    %c0_84 = arith.constant 0 : index
    %80 = vector.load %arg10[%c7, %c0_83, %c0_84] : memref<9x64x8xf32, #tpu.memory_space<vmem>>, vector<1x64x8xf32>
    %81 = vector.shape_cast %80 : vector<1x64x8xf32> to vector<64x8xf32>
    %cst_85 = arith.constant dense<0.000000e+00> : vector<128x8xf32>
    %82 = tpu.matmul %0, %81, %cst_85 {dimension_numbers = #tpu.dot_dimension_numbers<[1], [0], [0], [1], [0, 0, 1, 1], [], []>} : vector<128x64xf32>, vector<64x8xf32>, vector<128x8xf32> -> vector<128x8xf32>
    %c7_86 = arith.constant 7 : index
    %c0_87 = arith.constant 0 : index
    %c0_88 = arith.constant 0 : index
    %83 = vector.load %arg11[%c7_86, %c0_87, %c0_88] : memref<9x16x8xf32, #tpu.memory_space<vmem>>, vector<1x16x8xf32>
    %84 = vector.shape_cast %83 : vector<1x16x8xf32> to vector<16x8xf32>
    %cst_89 = arith.constant dense<0.000000e+00> : vector<128x8xf32>
    %85 = tpu.matmul %3, %84, %cst_89 {dimension_numbers = #tpu.dot_dimension_numbers<[1], [0], [0], [1], [0, 0, 1, 1], [], []>} : vector<128x16xf32>, vector<16x8xf32>, vector<128x8xf32> -> vector<128x8xf32>
    %86 = arith.addf %82, %85 : vector<128x8xf32>
    %c7_90 = arith.constant 7 : index
    %c0_91 = arith.constant 0 : index
    %c0_92 = arith.constant 0 : index
    %87 = vector.load %arg7[%c7_90, %c0_91, %c0_92] : memref<9x128x128xf32, #tpu.memory_space<vmem>>, vector<1x128x128xf32>
    %88 = vector.shape_cast %87 : vector<1x128x128xf32> to vector<128x128xf32>
    %cst_93 = arith.constant dense<0.000000e+00> : vector<128x8xf32>
    %89 = tpu.matmul %88, %86, %cst_93 {dimension_numbers = #tpu.dot_dimension_numbers<[1], [0], [0], [1], [0, 0, 1, 1], [], []>} : vector<128x128xf32>, vector<128x8xf32>, vector<128x8xf32> -> vector<128x8xf32>
    %90 = arith.addf %79, %89 : vector<128x8xf32>
    %c8 = arith.constant 8 : index
    %c0_94 = arith.constant 0 : index
    %c0_95 = arith.constant 0 : index
    %91 = vector.load %arg10[%c8, %c0_94, %c0_95] : memref<9x64x8xf32, #tpu.memory_space<vmem>>, vector<1x64x8xf32>
    %92 = vector.shape_cast %91 : vector<1x64x8xf32> to vector<64x8xf32>
    %cst_96 = arith.constant dense<0.000000e+00> : vector<128x8xf32>
    %93 = tpu.matmul %0, %92, %cst_96 {dimension_numbers = #tpu.dot_dimension_numbers<[1], [0], [0], [1], [0, 0, 1, 1], [], []>} : vector<128x64xf32>, vector<64x8xf32>, vector<128x8xf32> -> vector<128x8xf32>
    %c8_97 = arith.constant 8 : index
    %c0_98 = arith.constant 0 : index
    %c0_99 = arith.constant 0 : index
    %94 = vector.load %arg11[%c8_97, %c0_98, %c0_99] : memref<9x16x8xf32, #tpu.memory_space<vmem>>, vector<1x16x8xf32>
    %95 = vector.shape_cast %94 : vector<1x16x8xf32> to vector<16x8xf32>
    %cst_100 = arith.constant dense<0.000000e+00> : vector<128x8xf32>
    %96 = tpu.matmul %3, %95, %cst_100 {dimension_numbers = #tpu.dot_dimension_numbers<[1], [0], [0], [1], [0, 0, 1, 1], [], []>} : vector<128x16xf32>, vector<16x8xf32>, vector<128x8xf32> -> vector<128x8xf32>
    %97 = arith.addf %93, %96 : vector<128x8xf32>
    %c8_101 = arith.constant 8 : index
    %c0_102 = arith.constant 0 : index
    %c0_103 = arith.constant 0 : index
    %98 = vector.load %arg7[%c8_101, %c0_102, %c0_103] : memref<9x128x128xf32, #tpu.memory_space<vmem>>, vector<1x128x128xf32>
    %99 = vector.shape_cast %98 : vector<1x128x128xf32> to vector<128x128xf32>
    %cst_104 = arith.constant dense<0.000000e+00> : vector<128x8xf32>
    %100 = tpu.matmul %99, %97, %cst_104 {dimension_numbers = #tpu.dot_dimension_numbers<[1], [0], [0], [1], [0, 0, 1, 1], [], []>} : vector<128x128xf32>, vector<128x8xf32>, vector<128x8xf32> -> vector<128x8xf32>
    %101 = arith.addf %90, %100 : vector<128x8xf32>
    %cst_105 = arith.constant 2.000000e-01 : f32
    %102 = vector.broadcast %cst_105 : f32 to vector<128x8xf32>
    %103 = arith.mulf %102, %101 : vector<128x8xf32>
    %104 = arith.maximumf %101, %103 : vector<128x8xf32>
    %c0_106 = arith.constant 0 : index
    %c0_107 = arith.constant 0 : index
    %105 = vector.load %arg12[%c0_106, %c0_107] : memref<8x1xf32, #tpu.memory_space<vmem>>, vector<8x1xf32>
    %cst_108 = arith.constant dense<0.000000e+00> : vector<128x1xf32>
    %106 = tpu.matmul %104, %105, %cst_108 {dimension_numbers = #tpu.dot_dimension_numbers<[1], [0], [0], [1], [0, 0, 1, 1], [], []>} : vector<128x8xf32>, vector<8x1xf32>, vector<128x1xf32> -> vector<128x1xf32>
    %cst_109 = arith.constant 0.000000e+00 : f32
    %107 = vector.broadcast %cst_109 : f32 to vector<128x1xf32>
    %108 = arith.subf %107, %106 : vector<128x1xf32>
    %109 = math.exp %108 : vector<128x1xf32>
    %cst_110 = arith.constant 1.000000e+00 : f32
    %110 = vector.broadcast %cst_110 : f32 to vector<128x1xf32>
    %111 = arith.addf %110, %109 : vector<128x1xf32>
    %cst_111 = arith.constant 1.000000e+00 : f32
    %112 = vector.broadcast %cst_111 : f32 to vector<128x1xf32>
    %113 = arith.divf %112, %111 : vector<128x1xf32>
    %114 = math.exp %113 : vector<128x1xf32>
    %c0_112 = arith.constant 0 : index
    %c0_113 = arith.constant 0 : index
    %115 = vector.load %arg3[%c0_112, %c0_113] : memref<2x128xf32, #tpu.memory_space<vmem>>, vector<2x128xf32>
    %cst_114 = arith.constant dense<0.000000e+00> : vector<2x1xf32>
    %116 = tpu.matmul %115, %114, %cst_114 {dimension_numbers = #tpu.dot_dimension_numbers<[1], [0], [0], [1], [0, 0, 1, 1], [], []>} : vector<2x128xf32>, vector<128x1xf32>, vector<2x1xf32> -> vector<2x1xf32>
    %cst_115 = arith.constant 1.000000e+00 : f32
    %117 = vector.broadcast %cst_115 : f32 to vector<2x1xf32>
    %118 = arith.divf %117, %116 : vector<2x1xf32>
    %cst_116 = arith.constant dense<0.000000e+00> : vector<128x1xf32>
    %119 = tpu.matmul %2, %118, %cst_116 {dimension_numbers = #tpu.dot_dimension_numbers<[1], [0], [0], [1], [0, 0, 1, 1], [], []>} : vector<128x2xf32>, vector<2x1xf32>, vector<128x1xf32> -> vector<128x1xf32>
    %120 = arith.mulf %114, %119 : vector<128x1xf32>
    %121 = vector.broadcast %120 : vector<128x1xf32> to vector<128x16xf32>
    %122 = arith.mulf %3, %121 : vector<128x16xf32>
    %c0_117 = arith.constant 0 : index
    %c0_118 = arith.constant 0 : index
    %123 = vector.load %arg6[%c0_117, %c0_118] : memref<32x128xf32, #tpu.memory_space<vmem>>, vector<32x128xf32>
    %cst_119 = arith.constant dense<0.000000e+00> : vector<32x64xf32>
    %124 = tpu.matmul %123, %0, %cst_119 {dimension_numbers = #tpu.dot_dimension_numbers<[1], [0], [0], [1], [0, 0, 1, 1], [], []>} : vector<32x128xf32>, vector<128x64xf32>, vector<32x64xf32> -> vector<32x64xf32>
    %c0_120 = arith.constant 0 : index
    %c0_121 = arith.constant 0 : index
    %125 = vector.load %arg6[%c0_120, %c0_121] : memref<32x128xf32, #tpu.memory_space<vmem>>, vector<32x128xf32>
    %cst_122 = arith.constant dense<0.000000e+00> : vector<32x16xf32>
    %126 = tpu.matmul %125, %122, %cst_122 {dimension_numbers = #tpu.dot_dimension_numbers<[1], [0], [0], [1], [0, 0, 1, 1], [], []>} : vector<32x128xf32>, vector<128x16xf32>, vector<32x16xf32> -> vector<32x16xf32>
    %c0_123 = arith.constant 0 : index
    %c0_124 = arith.constant 0 : index
    %127 = vector.load %arg13[%c0_123, %c0_124] : memref<64x64xf32, #tpu.memory_space<vmem>>, vector<64x64xf32>
    %cst_125 = arith.constant dense<0.000000e+00> : vector<32x64xf32>
    %128 = tpu.matmul %124, %127, %cst_125 {dimension_numbers = #tpu.dot_dimension_numbers<[1], [0], [0], [1], [0, 0, 1, 1], [], []>} : vector<32x64xf32>, vector<64x64xf32>, vector<32x64xf32> -> vector<32x64xf32>
    %c0_126 = arith.constant 0 : index
    %c0_127 = arith.constant 0 : index
    %129 = vector.load %arg14[%c0_126, %c0_127] : memref<16x64xf32, #tpu.memory_space<vmem>>, vector<16x64xf32>
    %cst_128 = arith.constant dense<0.000000e+00> : vector<32x64xf32>
    %130 = tpu.matmul %126, %129, %cst_128 {dimension_numbers = #tpu.dot_dimension_numbers<[1], [0], [0], [1], [0, 0, 1, 1], [], []>} : vector<32x16xf32>, vector<16x64xf32>, vector<32x64xf32> -> vector<32x64xf32>
    %131 = arith.addf %128, %130 : vector<32x64xf32>
    %c0_129 = arith.constant 0 : index
    %c0_130 = arith.constant 0 : index
    %132 = vector.load %arg15[%c0_129, %c0_130] : memref<1x64xf32, #tpu.memory_space<vmem>>, vector<1x64xf32>
    %133 = vector.broadcast %132 : vector<1x64xf32> to vector<32x64xf32>
    %134 = arith.addf %131, %133 : vector<32x64xf32>
    %c0_131 = arith.constant 0 : index
    %c0_132 = arith.constant 0 : index
    %c0_133 = arith.constant 0 : index
    %135 = vector.load %arg8[%c0_131, %c0_132, %c0_133] : memref<16x32x128xf32, #tpu.memory_space<vmem>>, vector<1x32x128xf32>
    %136 = vector.shape_cast %135 : vector<1x32x128xf32> to vector<32x128xf32>
    %cst_134 = arith.constant dense<0.000000e+00> : vector<32x64xf32>
    %137 = tpu.matmul %136, %0, %cst_134 {dimension_numbers = #tpu.dot_dimension_numbers<[1], [0], [0], [1], [0, 0, 1, 1], [], []>} : vector<32x128xf32>, vector<128x64xf32>, vector<32x64xf32> -> vector<32x64xf32>
    %c0_135 = arith.constant 0 : index
    %c0_136 = arith.constant 0 : index
    %c0_137 = arith.constant 0 : index
    %138 = vector.load %arg8[%c0_135, %c0_136, %c0_137] : memref<16x32x128xf32, #tpu.memory_space<vmem>>, vector<1x32x128xf32>
    %139 = vector.shape_cast %138 : vector<1x32x128xf32> to vector<32x128xf32>
    %cst_138 = arith.constant dense<0.000000e+00> : vector<32x16xf32>
    %140 = tpu.matmul %139, %122, %cst_138 {dimension_numbers = #tpu.dot_dimension_numbers<[1], [0], [0], [1], [0, 0, 1, 1], [], []>} : vector<32x128xf32>, vector<128x16xf32>, vector<32x16xf32> -> vector<32x16xf32>
    %c0_139 = arith.constant 0 : index
    %c0_140 = arith.constant 0 : index
    %c0_141 = arith.constant 0 : index
    %141 = vector.load %arg16[%c0_139, %c0_140, %c0_141] : memref<16x64x64xf32, #tpu.memory_space<vmem>>, vector<1x64x64xf32>
    %142 = vector.shape_cast %141 : vector<1x64x64xf32> to vector<64x64xf32>
    %cst_142 = arith.constant dense<0.000000e+00> : vector<32x64xf32>
    %143 = tpu.matmul %137, %142, %cst_142 {dimension_numbers = #tpu.dot_dimension_numbers<[1], [0], [0], [1], [0, 0, 1, 1], [], []>} : vector<32x64xf32>, vector<64x64xf32>, vector<32x64xf32> -> vector<32x64xf32>
    %c0_143 = arith.constant 0 : index
    %c0_144 = arith.constant 0 : index
    %c0_145 = arith.constant 0 : index
    %144 = vector.load %arg17[%c0_143, %c0_144, %c0_145] : memref<16x16x64xf32, #tpu.memory_space<vmem>>, vector<1x16x64xf32>
    %145 = vector.shape_cast %144 : vector<1x16x64xf32> to vector<16x64xf32>
    %cst_146 = arith.constant dense<0.000000e+00> : vector<32x64xf32>
    %146 = tpu.matmul %140, %145, %cst_146 {dimension_numbers = #tpu.dot_dimension_numbers<[1], [0], [0], [1], [0, 0, 1, 1], [], []>} : vector<32x16xf32>, vector<16x64xf32>, vector<32x64xf32> -> vector<32x64xf32>
    %147 = arith.addf %143, %146 : vector<32x64xf32>
    %c1_147 = arith.constant 1 : index
    %c0_148 = arith.constant 0 : index
    %c0_149 = arith.constant 0 : index
    %148 = vector.load %arg8[%c1_147, %c0_148, %c0_149] : memref<16x32x128xf32, #tpu.memory_space<vmem>>, vector<1x32x128xf32>
    %149 = vector.shape_cast %148 : vector<1x32x128xf32> to vector<32x128xf32>
    %cst_150 = arith.constant dense<0.000000e+00> : vector<32x64xf32>
    %150 = tpu.matmul %149, %0, %cst_150 {dimension_numbers = #tpu.dot_dimension_numbers<[1], [0], [0], [1], [0, 0, 1, 1], [], []>} : vector<32x128xf32>, vector<128x64xf32>, vector<32x64xf32> -> vector<32x64xf32>
    %c1_151 = arith.constant 1 : index
    %c0_152 = arith.constant 0 : index
    %c0_153 = arith.constant 0 : index
    %151 = vector.load %arg8[%c1_151, %c0_152, %c0_153] : memref<16x32x128xf32, #tpu.memory_space<vmem>>, vector<1x32x128xf32>
    %152 = vector.shape_cast %151 : vector<1x32x128xf32> to vector<32x128xf32>
    %cst_154 = arith.constant dense<0.000000e+00> : vector<32x16xf32>
    %153 = tpu.matmul %152, %122, %cst_154 {dimension_numbers = #tpu.dot_dimension_numbers<[1], [0], [0], [1], [0, 0, 1, 1], [], []>} : vector<32x128xf32>, vector<128x16xf32>, vector<32x16xf32> -> vector<32x16xf32>
    %c1_155 = arith.constant 1 : index
    %c0_156 = arith.constant 0 : index
    %c0_157 = arith.constant 0 : index
    %154 = vector.load %arg16[%c1_155, %c0_156, %c0_157] : memref<16x64x64xf32, #tpu.memory_space<vmem>>, vector<1x64x64xf32>
    %155 = vector.shape_cast %154 : vector<1x64x64xf32> to vector<64x64xf32>
    %cst_158 = arith.constant dense<0.000000e+00> : vector<32x64xf32>
    %156 = tpu.matmul %150, %155, %cst_158 {dimension_numbers = #tpu.dot_dimension_numbers<[1], [0], [0], [1], [0, 0, 1, 1], [], []>} : vector<32x64xf32>, vector<64x64xf32>, vector<32x64xf32> -> vector<32x64xf32>
    %c1_159 = arith.constant 1 : index
    %c0_160 = arith.constant 0 : index
    %c0_161 = arith.constant 0 : index
    %157 = vector.load %arg17[%c1_159, %c0_160, %c0_161] : memref<16x16x64xf32, #tpu.memory_space<vmem>>, vector<1x16x64xf32>
    %158 = vector.shape_cast %157 : vector<1x16x64xf32> to vector<16x64xf32>
    %cst_162 = arith.constant dense<0.000000e+00> : vector<32x64xf32>
    %159 = tpu.matmul %153, %158, %cst_162 {dimension_numbers = #tpu.dot_dimension_numbers<[1], [0], [0], [1], [0, 0, 1, 1], [], []>} : vector<32x16xf32>, vector<16x64xf32>, vector<32x64xf32> -> vector<32x64xf32>
    %160 = arith.addf %156, %159 : vector<32x64xf32>
    %161 = arith.addf %147, %160 : vector<32x64xf32>
    %c2_163 = arith.constant 2 : index
    %c0_164 = arith.constant 0 : index
    %c0_165 = arith.constant 0 : index
    %162 = vector.load %arg8[%c2_163, %c0_164, %c0_165] : memref<16x32x128xf32, #tpu.memory_space<vmem>>, vector<1x32x128xf32>
    %163 = vector.shape_cast %162 : vector<1x32x128xf32> to vector<32x128xf32>
    %cst_166 = arith.constant dense<0.000000e+00> : vector<32x64xf32>
    %164 = tpu.matmul %163, %0, %cst_166 {dimension_numbers = #tpu.dot_dimension_numbers<[1], [0], [0], [1], [0, 0, 1, 1], [], []>} : vector<32x128xf32>, vector<128x64xf32>, vector<32x64xf32> -> vector<32x64xf32>
    %c2_167 = arith.constant 2 : index
    %c0_168 = arith.constant 0 : index
    %c0_169 = arith.constant 0 : index
    %165 = vector.load %arg8[%c2_167, %c0_168, %c0_169] : memref<16x32x128xf32, #tpu.memory_space<vmem>>, vector<1x32x128xf32>
    %166 = vector.shape_cast %165 : vector<1x32x128xf32> to vector<32x128xf32>
    %cst_170 = arith.constant dense<0.000000e+00> : vector<32x16xf32>
    %167 = tpu.matmul %166, %122, %cst_170 {dimension_numbers = #tpu.dot_dimension_numbers<[1], [0], [0], [1], [0, 0, 1, 1], [], []>} : vector<32x128xf32>, vector<128x16xf32>, vector<32x16xf32> -> vector<32x16xf32>
    %c2_171 = arith.constant 2 : index
    %c0_172 = arith.constant 0 : index
    %c0_173 = arith.constant 0 : index
    %168 = vector.load %arg16[%c2_171, %c0_172, %c0_173] : memref<16x64x64xf32, #tpu.memory_space<vmem>>, vector<1x64x64xf32>
    %169 = vector.shape_cast %168 : vector<1x64x64xf32> to vector<64x64xf32>
    %cst_174 = arith.constant dense<0.000000e+00> : vector<32x64xf32>
    %170 = tpu.matmul %164, %169, %cst_174 {dimension_numbers = #tpu.dot_dimension_numbers<[1], [0], [0], [1], [0, 0, 1, 1], [], []>} : vector<32x64xf32>, vector<64x64xf32>, vector<32x64xf32> -> vector<32x64xf32>
    %c2_175 = arith.constant 2 : index
    %c0_176 = arith.constant 0 : index
    %c0_177 = arith.constant 0 : index
    %171 = vector.load %arg17[%c2_175, %c0_176, %c0_177] : memref<16x16x64xf32, #tpu.memory_space<vmem>>, vector<1x16x64xf32>
    %172 = vector.shape_cast %171 : vector<1x16x64xf32> to vector<16x64xf32>
    %cst_178 = arith.constant dense<0.000000e+00> : vector<32x64xf32>
    %173 = tpu.matmul %167, %172, %cst_178 {dimension_numbers = #tpu.dot_dimension_numbers<[1], [0], [0], [1], [0, 0, 1, 1], [], []>} : vector<32x16xf32>, vector<16x64xf32>, vector<32x64xf32> -> vector<32x64xf32>
    %174 = arith.addf %170, %173 : vector<32x64xf32>
    %175 = arith.addf %161, %174 : vector<32x64xf32>
    %c3_179 = arith.constant 3 : index
    %c0_180 = arith.constant 0 : index
    %c0_181 = arith.constant 0 : index
    %176 = vector.load %arg8[%c3_179, %c0_180, %c0_181] : memref<16x32x128xf32, #tpu.memory_space<vmem>>, vector<1x32x128xf32>
    %177 = vector.shape_cast %176 : vector<1x32x128xf32> to vector<32x128xf32>
    %cst_182 = arith.constant dense<0.000000e+00> : vector<32x64xf32>
    %178 = tpu.matmul %177, %0, %cst_182 {dimension_numbers = #tpu.dot_dimension_numbers<[1], [0], [0], [1], [0, 0, 1, 1], [], []>} : vector<32x128xf32>, vector<128x64xf32>, vector<32x64xf32> -> vector<32x64xf32>
    %c3_183 = arith.constant 3 : index
    %c0_184 = arith.constant 0 : index
    %c0_185 = arith.constant 0 : index
    %179 = vector.load %arg8[%c3_183, %c0_184, %c0_185] : memref<16x32x128xf32, #tpu.memory_space<vmem>>, vector<1x32x128xf32>
    %180 = vector.shape_cast %179 : vector<1x32x128xf32> to vector<32x128xf32>
    %cst_186 = arith.constant dense<0.000000e+00> : vector<32x16xf32>
    %181 = tpu.matmul %180, %122, %cst_186 {dimension_numbers = #tpu.dot_dimension_numbers<[1], [0], [0], [1], [0, 0, 1, 1], [], []>} : vector<32x128xf32>, vector<128x16xf32>, vector<32x16xf32> -> vector<32x16xf32>
    %c3_187 = arith.constant 3 : index
    %c0_188 = arith.constant 0 : index
    %c0_189 = arith.constant 0 : index
    %182 = vector.load %arg16[%c3_187, %c0_188, %c0_189] : memref<16x64x64xf32, #tpu.memory_space<vmem>>, vector<1x64x64xf32>
    %183 = vector.shape_cast %182 : vector<1x64x64xf32> to vector<64x64xf32>
    %cst_190 = arith.constant dense<0.000000e+00> : vector<32x64xf32>
    %184 = tpu.matmul %178, %183, %cst_190 {dimension_numbers = #tpu.dot_dimension_numbers<[1], [0], [0], [1], [0, 0, 1, 1], [], []>} : vector<32x64xf32>, vector<64x64xf32>, vector<32x64xf32> -> vector<32x64xf32>
    %c3_191 = arith.constant 3 : index
    %c0_192 = arith.constant 0 : index
    %c0_193 = arith.constant 0 : index
    %185 = vector.load %arg17[%c3_191, %c0_192, %c0_193] : memref<16x16x64xf32, #tpu.memory_space<vmem>>, vector<1x16x64xf32>
    %186 = vector.shape_cast %185 : vector<1x16x64xf32> to vector<16x64xf32>
    %cst_194 = arith.constant dense<0.000000e+00> : vector<32x64xf32>
    %187 = tpu.matmul %181, %186, %cst_194 {dimension_numbers = #tpu.dot_dimension_numbers<[1], [0], [0], [1], [0, 0, 1, 1], [], []>} : vector<32x16xf32>, vector<16x64xf32>, vector<32x64xf32> -> vector<32x64xf32>
    %188 = arith.addf %184, %187 : vector<32x64xf32>
    %189 = arith.addf %175, %188 : vector<32x64xf32>
    %c4_195 = arith.constant 4 : index
    %c0_196 = arith.constant 0 : index
    %c0_197 = arith.constant 0 : index
    %190 = vector.load %arg8[%c4_195, %c0_196, %c0_197] : memref<16x32x128xf32, #tpu.memory_space<vmem>>, vector<1x32x128xf32>
    %191 = vector.shape_cast %190 : vector<1x32x128xf32> to vector<32x128xf32>
    %cst_198 = arith.constant dense<0.000000e+00> : vector<32x64xf32>
    %192 = tpu.matmul %191, %0, %cst_198 {dimension_numbers = #tpu.dot_dimension_numbers<[1], [0], [0], [1], [0, 0, 1, 1], [], []>} : vector<32x128xf32>, vector<128x64xf32>, vector<32x64xf32> -> vector<32x64xf32>
    %c4_199 = arith.constant 4 : index
    %c0_200 = arith.constant 0 : index
    %c0_201 = arith.constant 0 : index
    %193 = vector.load %arg8[%c4_199, %c0_200, %c0_201] : memref<16x32x128xf32, #tpu.memory_space<vmem>>, vector<1x32x128xf32>
    %194 = vector.shape_cast %193 : vector<1x32x128xf32> to vector<32x128xf32>
    %cst_202 = arith.constant dense<0.000000e+00> : vector<32x16xf32>
    %195 = tpu.matmul %194, %122, %cst_202 {dimension_numbers = #tpu.dot_dimension_numbers<[1], [0], [0], [1], [0, 0, 1, 1], [], []>} : vector<32x128xf32>, vector<128x16xf32>, vector<32x16xf32> -> vector<32x16xf32>
    %c4_203 = arith.constant 4 : index
    %c0_204 = arith.constant 0 : index
    %c0_205 = arith.constant 0 : index
    %196 = vector.load %arg16[%c4_203, %c0_204, %c0_205] : memref<16x64x64xf32, #tpu.memory_space<vmem>>, vector<1x64x64xf32>
    %197 = vector.shape_cast %196 : vector<1x64x64xf32> to vector<64x64xf32>
    %cst_206 = arith.constant dense<0.000000e+00> : vector<32x64xf32>
    %198 = tpu.matmul %192, %197, %cst_206 {dimension_numbers = #tpu.dot_dimension_numbers<[1], [0], [0], [1], [0, 0, 1, 1], [], []>} : vector<32x64xf32>, vector<64x64xf32>, vector<32x64xf32> -> vector<32x64xf32>
    %c4_207 = arith.constant 4 : index
    %c0_208 = arith.constant 0 : index
    %c0_209 = arith.constant 0 : index
    %199 = vector.load %arg17[%c4_207, %c0_208, %c0_209] : memref<16x16x64xf32, #tpu.memory_space<vmem>>, vector<1x16x64xf32>
    %200 = vector.shape_cast %199 : vector<1x16x64xf32> to vector<16x64xf32>
    %cst_210 = arith.constant dense<0.000000e+00> : vector<32x64xf32>
    %201 = tpu.matmul %195, %200, %cst_210 {dimension_numbers = #tpu.dot_dimension_numbers<[1], [0], [0], [1], [0, 0, 1, 1], [], []>} : vector<32x16xf32>, vector<16x64xf32>, vector<32x64xf32> -> vector<32x64xf32>
    %202 = arith.addf %198, %201 : vector<32x64xf32>
    %203 = arith.addf %189, %202 : vector<32x64xf32>
    %c5_211 = arith.constant 5 : index
    %c0_212 = arith.constant 0 : index
    %c0_213 = arith.constant 0 : index
    %204 = vector.load %arg8[%c5_211, %c0_212, %c0_213] : memref<16x32x128xf32, #tpu.memory_space<vmem>>, vector<1x32x128xf32>
    %205 = vector.shape_cast %204 : vector<1x32x128xf32> to vector<32x128xf32>
    %cst_214 = arith.constant dense<0.000000e+00> : vector<32x64xf32>
    %206 = tpu.matmul %205, %0, %cst_214 {dimension_numbers = #tpu.dot_dimension_numbers<[1], [0], [0], [1], [0, 0, 1, 1], [], []>} : vector<32x128xf32>, vector<128x64xf32>, vector<32x64xf32> -> vector<32x64xf32>
    %c5_215 = arith.constant 5 : index
    %c0_216 = arith.constant 0 : index
    %c0_217 = arith.constant 0 : index
    %207 = vector.load %arg8[%c5_215, %c0_216, %c0_217] : memref<16x32x128xf32, #tpu.memory_space<vmem>>, vector<1x32x128xf32>
    %208 = vector.shape_cast %207 : vector<1x32x128xf32> to vector<32x128xf32>
    %cst_218 = arith.constant dense<0.000000e+00> : vector<32x16xf32>
    %209 = tpu.matmul %208, %122, %cst_218 {dimension_numbers = #tpu.dot_dimension_numbers<[1], [0], [0], [1], [0, 0, 1, 1], [], []>} : vector<32x128xf32>, vector<128x16xf32>, vector<32x16xf32> -> vector<32x16xf32>
    %c5_219 = arith.constant 5 : index
    %c0_220 = arith.constant 0 : index
    %c0_221 = arith.constant 0 : index
    %210 = vector.load %arg16[%c5_219, %c0_220, %c0_221] : memref<16x64x64xf32, #tpu.memory_space<vmem>>, vector<1x64x64xf32>
    %211 = vector.shape_cast %210 : vector<1x64x64xf32> to vector<64x64xf32>
    %cst_222 = arith.constant dense<0.000000e+00> : vector<32x64xf32>
    %212 = tpu.matmul %206, %211, %cst_222 {dimension_numbers = #tpu.dot_dimension_numbers<[1], [0], [0], [1], [0, 0, 1, 1], [], []>} : vector<32x64xf32>, vector<64x64xf32>, vector<32x64xf32> -> vector<32x64xf32>
    %c5_223 = arith.constant 5 : index
    %c0_224 = arith.constant 0 : index
    %c0_225 = arith.constant 0 : index
    %213 = vector.load %arg17[%c5_223, %c0_224, %c0_225] : memref<16x16x64xf32, #tpu.memory_space<vmem>>, vector<1x16x64xf32>
    %214 = vector.shape_cast %213 : vector<1x16x64xf32> to vector<16x64xf32>
    %cst_226 = arith.constant dense<0.000000e+00> : vector<32x64xf32>
    %215 = tpu.matmul %209, %214, %cst_226 {dimension_numbers = #tpu.dot_dimension_numbers<[1], [0], [0], [1], [0, 0, 1, 1], [], []>} : vector<32x16xf32>, vector<16x64xf32>, vector<32x64xf32> -> vector<32x64xf32>
    %216 = arith.addf %212, %215 : vector<32x64xf32>
    %217 = arith.addf %203, %216 : vector<32x64xf32>
    %c6_227 = arith.constant 6 : index
    %c0_228 = arith.constant 0 : index
    %c0_229 = arith.constant 0 : index
    %218 = vector.load %arg8[%c6_227, %c0_228, %c0_229] : memref<16x32x128xf32, #tpu.memory_space<vmem>>, vector<1x32x128xf32>
    %219 = vector.shape_cast %218 : vector<1x32x128xf32> to vector<32x128xf32>
    %cst_230 = arith.constant dense<0.000000e+00> : vector<32x64xf32>
    %220 = tpu.matmul %219, %0, %cst_230 {dimension_numbers = #tpu.dot_dimension_numbers<[1], [0], [0], [1], [0, 0, 1, 1], [], []>} : vector<32x128xf32>, vector<128x64xf32>, vector<32x64xf32> -> vector<32x64xf32>
    %c6_231 = arith.constant 6 : index
    %c0_232 = arith.constant 0 : index
    %c0_233 = arith.constant 0 : index
    %221 = vector.load %arg8[%c6_231, %c0_232, %c0_233] : memref<16x32x128xf32, #tpu.memory_space<vmem>>, vector<1x32x128xf32>
    %222 = vector.shape_cast %221 : vector<1x32x128xf32> to vector<32x128xf32>
    %cst_234 = arith.constant dense<0.000000e+00> : vector<32x16xf32>
    %223 = tpu.matmul %222, %122, %cst_234 {dimension_numbers = #tpu.dot_dimension_numbers<[1], [0], [0], [1], [0, 0, 1, 1], [], []>} : vector<32x128xf32>, vector<128x16xf32>, vector<32x16xf32> -> vector<32x16xf32>
    %c6_235 = arith.constant 6 : index
    %c0_236 = arith.constant 0 : index
    %c0_237 = arith.constant 0 : index
    %224 = vector.load %arg16[%c6_235, %c0_236, %c0_237] : memref<16x64x64xf32, #tpu.memory_space<vmem>>, vector<1x64x64xf32>
    %225 = vector.shape_cast %224 : vector<1x64x64xf32> to vector<64x64xf32>
    %cst_238 = arith.constant dense<0.000000e+00> : vector<32x64xf32>
    %226 = tpu.matmul %220, %225, %cst_238 {dimension_numbers = #tpu.dot_dimension_numbers<[1], [0], [0], [1], [0, 0, 1, 1], [], []>} : vector<32x64xf32>, vector<64x64xf32>, vector<32x64xf32> -> vector<32x64xf32>
    %c6_239 = arith.constant 6 : index
    %c0_240 = arith.constant 0 : index
    %c0_241 = arith.constant 0 : index
    %227 = vector.load %arg17[%c6_239, %c0_240, %c0_241] : memref<16x16x64xf32, #tpu.memory_space<vmem>>, vector<1x16x64xf32>
    %228 = vector.shape_cast %227 : vector<1x16x64xf32> to vector<16x64xf32>
    %cst_242 = arith.constant dense<0.000000e+00> : vector<32x64xf32>
    %229 = tpu.matmul %223, %228, %cst_242 {dimension_numbers = #tpu.dot_dimension_numbers<[1], [0], [0], [1], [0, 0, 1, 1], [], []>} : vector<32x16xf32>, vector<16x64xf32>, vector<32x64xf32> -> vector<32x64xf32>
    %230 = arith.addf %226, %229 : vector<32x64xf32>
    %231 = arith.addf %217, %230 : vector<32x64xf32>
    %c7_243 = arith.constant 7 : index
    %c0_244 = arith.constant 0 : index
    %c0_245 = arith.constant 0 : index
    %232 = vector.load %arg8[%c7_243, %c0_244, %c0_245] : memref<16x32x128xf32, #tpu.memory_space<vmem>>, vector<1x32x128xf32>
    %233 = vector.shape_cast %232 : vector<1x32x128xf32> to vector<32x128xf32>
    %cst_246 = arith.constant dense<0.000000e+00> : vector<32x64xf32>
    %234 = tpu.matmul %233, %0, %cst_246 {dimension_numbers = #tpu.dot_dimension_numbers<[1], [0], [0], [1], [0, 0, 1, 1], [], []>} : vector<32x128xf32>, vector<128x64xf32>, vector<32x64xf32> -> vector<32x64xf32>
    %c7_247 = arith.constant 7 : index
    %c0_248 = arith.constant 0 : index
    %c0_249 = arith.constant 0 : index
    %235 = vector.load %arg8[%c7_247, %c0_248, %c0_249] : memref<16x32x128xf32, #tpu.memory_space<vmem>>, vector<1x32x128xf32>
    %236 = vector.shape_cast %235 : vector<1x32x128xf32> to vector<32x128xf32>
    %cst_250 = arith.constant dense<0.000000e+00> : vector<32x16xf32>
    %237 = tpu.matmul %236, %122, %cst_250 {dimension_numbers = #tpu.dot_dimension_numbers<[1], [0], [0], [1], [0, 0, 1, 1], [], []>} : vector<32x128xf32>, vector<128x16xf32>, vector<32x16xf32> -> vector<32x16xf32>
    %c7_251 = arith.constant 7 : index
    %c0_252 = arith.constant 0 : index
    %c0_253 = arith.constant 0 : index
    %238 = vector.load %arg16[%c7_251, %c0_252, %c0_253] : memref<16x64x64xf32, #tpu.memory_space<vmem>>, vector<1x64x64xf32>
    %239 = vector.shape_cast %238 : vector<1x64x64xf32> to vector<64x64xf32>
    %cst_254 = arith.constant dense<0.000000e+00> : vector<32x64xf32>
    %240 = tpu.matmul %234, %239, %cst_254 {dimension_numbers = #tpu.dot_dimension_numbers<[1], [0], [0], [1], [0, 0, 1, 1], [], []>} : vector<32x64xf32>, vector<64x64xf32>, vector<32x64xf32> -> vector<32x64xf32>
    %c7_255 = arith.constant 7 : index
    %c0_256 = arith.constant 0 : index
    %c0_257 = arith.constant 0 : index
    %241 = vector.load %arg17[%c7_255, %c0_256, %c0_257] : memref<16x16x64xf32, #tpu.memory_space<vmem>>, vector<1x16x64xf32>
    %242 = vector.shape_cast %241 : vector<1x16x64xf32> to vector<16x64xf32>
    %cst_258 = arith.constant dense<0.000000e+00> : vector<32x64xf32>
    %243 = tpu.matmul %237, %242, %cst_258 {dimension_numbers = #tpu.dot_dimension_numbers<[1], [0], [0], [1], [0, 0, 1, 1], [], []>} : vector<32x16xf32>, vector<16x64xf32>, vector<32x64xf32> -> vector<32x64xf32>
    %244 = arith.addf %240, %243 : vector<32x64xf32>
    %245 = arith.addf %231, %244 : vector<32x64xf32>
    %c8_259 = arith.constant 8 : index
    %c0_260 = arith.constant 0 : index
    %c0_261 = arith.constant 0 : index
    %246 = vector.load %arg8[%c8_259, %c0_260, %c0_261] : memref<16x32x128xf32, #tpu.memory_space<vmem>>, vector<1x32x128xf32>
    %247 = vector.shape_cast %246 : vector<1x32x128xf32> to vector<32x128xf32>
    %cst_262 = arith.constant dense<0.000000e+00> : vector<32x64xf32>
    %248 = tpu.matmul %247, %0, %cst_262 {dimension_numbers = #tpu.dot_dimension_numbers<[1], [0], [0], [1], [0, 0, 1, 1], [], []>} : vector<32x128xf32>, vector<128x64xf32>, vector<32x64xf32> -> vector<32x64xf32>
    %c8_263 = arith.constant 8 : index
    %c0_264 = arith.constant 0 : index
    %c0_265 = arith.constant 0 : index
    %249 = vector.load %arg8[%c8_263, %c0_264, %c0_265] : memref<16x32x128xf32, #tpu.memory_space<vmem>>, vector<1x32x128xf32>
    %250 = vector.shape_cast %249 : vector<1x32x128xf32> to vector<32x128xf32>
    %cst_266 = arith.constant dense<0.000000e+00> : vector<32x16xf32>
    %251 = tpu.matmul %250, %122, %cst_266 {dimension_numbers = #tpu.dot_dimension_numbers<[1], [0], [0], [1], [0, 0, 1, 1], [], []>} : vector<32x128xf32>, vector<128x16xf32>, vector<32x16xf32> -> vector<32x16xf32>
    %c8_267 = arith.constant 8 : index
    %c0_268 = arith.constant 0 : index
    %c0_269 = arith.constant 0 : index
    %252 = vector.load %arg16[%c8_267, %c0_268, %c0_269] : memref<16x64x64xf32, #tpu.memory_space<vmem>>, vector<1x64x64xf32>
    %253 = vector.shape_cast %252 : vector<1x64x64xf32> to vector<64x64xf32>
    %cst_270 = arith.constant dense<0.000000e+00> : vector<32x64xf32>
    %254 = tpu.matmul %248, %253, %cst_270 {dimension_numbers = #tpu.dot_dimension_numbers<[1], [0], [0], [1], [0, 0, 1, 1], [], []>} : vector<32x64xf32>, vector<64x64xf32>, vector<32x64xf32> -> vector<32x64xf32>
    %c8_271 = arith.constant 8 : index
    %c0_272 = arith.constant 0 : index
    %c0_273 = arith.constant 0 : index
    %255 = vector.load %arg17[%c8_271, %c0_272, %c0_273] : memref<16x16x64xf32, #tpu.memory_space<vmem>>, vector<1x16x64xf32>
    %256 = vector.shape_cast %255 : vector<1x16x64xf32> to vector<16x64xf32>
    %cst_274 = arith.constant dense<0.000000e+00> : vector<32x64xf32>
    %257 = tpu.matmul %251, %256, %cst_274 {dimension_numbers = #tpu.dot_dimension_numbers<[1], [0], [0], [1], [0, 0, 1, 1], [], []>} : vector<32x16xf32>, vector<16x64xf32>, vector<32x64xf32> -> vector<32x64xf32>
    %258 = arith.addf %254, %257 : vector<32x64xf32>
    %259 = arith.addf %245, %258 : vector<32x64xf32>
    %c9 = arith.constant 9 : index
    %c0_275 = arith.constant 0 : index
    %c0_276 = arith.constant 0 : index
    %260 = vector.load %arg8[%c9, %c0_275, %c0_276] : memref<16x32x128xf32, #tpu.memory_space<vmem>>, vector<1x32x128xf32>
    %261 = vector.shape_cast %260 : vector<1x32x128xf32> to vector<32x128xf32>
    %cst_277 = arith.constant dense<0.000000e+00> : vector<32x64xf32>
    %262 = tpu.matmul %261, %0, %cst_277 {dimension_numbers = #tpu.dot_dimension_numbers<[1], [0], [0], [1], [0, 0, 1, 1], [], []>} : vector<32x128xf32>, vector<128x64xf32>, vector<32x64xf32> -> vector<32x64xf32>
    %c9_278 = arith.constant 9 : index
    %c0_279 = arith.constant 0 : index
    %c0_280 = arith.constant 0 : index
    %263 = vector.load %arg8[%c9_278, %c0_279, %c0_280] : memref<16x32x128xf32, #tpu.memory_space<vmem>>, vector<1x32x128xf32>
    %264 = vector.shape_cast %263 : vector<1x32x128xf32> to vector<32x128xf32>
    %cst_281 = arith.constant dense<0.000000e+00> : vector<32x16xf32>
    %265 = tpu.matmul %264, %122, %cst_281 {dimension_numbers = #tpu.dot_dimension_numbers<[1], [0], [0], [1], [0, 0, 1, 1], [], []>} : vector<32x128xf32>, vector<128x16xf32>, vector<32x16xf32> -> vector<32x16xf32>
    %c9_282 = arith.constant 9 : index
    %c0_283 = arith.constant 0 : index
    %c0_284 = arith.constant 0 : index
    %266 = vector.load %arg16[%c9_282, %c0_283, %c0_284] : memref<16x64x64xf32, #tpu.memory_space<vmem>>, vector<1x64x64xf32>
    %267 = vector.shape_cast %266 : vector<1x64x64xf32> to vector<64x64xf32>
    %cst_285 = arith.constant dense<0.000000e+00> : vector<32x64xf32>
    %268 = tpu.matmul %262, %267, %cst_285 {dimension_numbers = #tpu.dot_dimension_numbers<[1], [0], [0], [1], [0, 0, 1, 1], [], []>} : vector<32x64xf32>, vector<64x64xf32>, vector<32x64xf32> -> vector<32x64xf32>
    %c9_286 = arith.constant 9 : index
    %c0_287 = arith.constant 0 : index
    %c0_288 = arith.constant 0 : index
    %269 = vector.load %arg17[%c9_286, %c0_287, %c0_288] : memref<16x16x64xf32, #tpu.memory_space<vmem>>, vector<1x16x64xf32>
    %270 = vector.shape_cast %269 : vector<1x16x64xf32> to vector<16x64xf32>
    %cst_289 = arith.constant dense<0.000000e+00> : vector<32x64xf32>
    %271 = tpu.matmul %265, %270, %cst_289 {dimension_numbers = #tpu.dot_dimension_numbers<[1], [0], [0], [1], [0, 0, 1, 1], [], []>} : vector<32x16xf32>, vector<16x64xf32>, vector<32x64xf32> -> vector<32x64xf32>
    %272 = arith.addf %268, %271 : vector<32x64xf32>
    %273 = arith.addf %259, %272 : vector<32x64xf32>
    %c10 = arith.constant 10 : index
    %c0_290 = arith.constant 0 : index
    %c0_291 = arith.constant 0 : index
    %274 = vector.load %arg8[%c10, %c0_290, %c0_291] : memref<16x32x128xf32, #tpu.memory_space<vmem>>, vector<1x32x128xf32>
    %275 = vector.shape_cast %274 : vector<1x32x128xf32> to vector<32x128xf32>
    %cst_292 = arith.constant dense<0.000000e+00> : vector<32x64xf32>
    %276 = tpu.matmul %275, %0, %cst_292 {dimension_numbers = #tpu.dot_dimension_numbers<[1], [0], [0], [1], [0, 0, 1, 1], [], []>} : vector<32x128xf32>, vector<128x64xf32>, vector<32x64xf32> -> vector<32x64xf32>
    %c10_293 = arith.constant 10 : index
    %c0_294 = arith.constant 0 : index
    %c0_295 = arith.constant 0 : index
    %277 = vector.load %arg8[%c10_293, %c0_294, %c0_295] : memref<16x32x128xf32, #tpu.memory_space<vmem>>, vector<1x32x128xf32>
    %278 = vector.shape_cast %277 : vector<1x32x128xf32> to vector<32x128xf32>
    %cst_296 = arith.constant dense<0.000000e+00> : vector<32x16xf32>
    %279 = tpu.matmul %278, %122, %cst_296 {dimension_numbers = #tpu.dot_dimension_numbers<[1], [0], [0], [1], [0, 0, 1, 1], [], []>} : vector<32x128xf32>, vector<128x16xf32>, vector<32x16xf32> -> vector<32x16xf32>
    %c10_297 = arith.constant 10 : index
    %c0_298 = arith.constant 0 : index
    %c0_299 = arith.constant 0 : index
    %280 = vector.load %arg16[%c10_297, %c0_298, %c0_299] : memref<16x64x64xf32, #tpu.memory_space<vmem>>, vector<1x64x64xf32>
    %281 = vector.shape_cast %280 : vector<1x64x64xf32> to vector<64x64xf32>
    %cst_300 = arith.constant dense<0.000000e+00> : vector<32x64xf32>
    %282 = tpu.matmul %276, %281, %cst_300 {dimension_numbers = #tpu.dot_dimension_numbers<[1], [0], [0], [1], [0, 0, 1, 1], [], []>} : vector<32x64xf32>, vector<64x64xf32>, vector<32x64xf32> -> vector<32x64xf32>
    %c10_301 = arith.constant 10 : index
    %c0_302 = arith.constant 0 : index
    %c0_303 = arith.constant 0 : index
    %283 = vector.load %arg17[%c10_301, %c0_302, %c0_303] : memref<16x16x64xf32, #tpu.memory_space<vmem>>, vector<1x16x64xf32>
    %284 = vector.shape_cast %283 : vector<1x16x64xf32> to vector<16x64xf32>
    %cst_304 = arith.constant dense<0.000000e+00> : vector<32x64xf32>
    %285 = tpu.matmul %279, %284, %cst_304 {dimension_numbers = #tpu.dot_dimension_numbers<[1], [0], [0], [1], [0, 0, 1, 1], [], []>} : vector<32x16xf32>, vector<16x64xf32>, vector<32x64xf32> -> vector<32x64xf32>
    %286 = arith.addf %282, %285 : vector<32x64xf32>
    %287 = arith.addf %273, %286 : vector<32x64xf32>
    %c11 = arith.constant 11 : index
    %c0_305 = arith.constant 0 : index
    %c0_306 = arith.constant 0 : index
    %288 = vector.load %arg8[%c11, %c0_305, %c0_306] : memref<16x32x128xf32, #tpu.memory_space<vmem>>, vector<1x32x128xf32>
    %289 = vector.shape_cast %288 : vector<1x32x128xf32> to vector<32x128xf32>
    %cst_307 = arith.constant dense<0.000000e+00> : vector<32x64xf32>
    %290 = tpu.matmul %289, %0, %cst_307 {dimension_numbers = #tpu.dot_dimension_numbers<[1], [0], [0], [1], [0, 0, 1, 1], [], []>} : vector<32x128xf32>, vector<128x64xf32>, vector<32x64xf32> -> vector<32x64xf32>
    %c11_308 = arith.constant 11 : index
    %c0_309 = arith.constant 0 : index
    %c0_310 = arith.constant 0 : index
    %291 = vector.load %arg8[%c11_308, %c0_309, %c0_310] : memref<16x32x128xf32, #tpu.memory_space<vmem>>, vector<1x32x128xf32>
    %292 = vector.shape_cast %291 : vector<1x32x128xf32> to vector<32x128xf32>
    %cst_311 = arith.constant dense<0.000000e+00> : vector<32x16xf32>
    %293 = tpu.matmul %292, %122, %cst_311 {dimension_numbers = #tpu.dot_dimension_numbers<[1], [0], [0], [1], [0, 0, 1, 1], [], []>} : vector<32x128xf32>, vector<128x16xf32>, vector<32x16xf32> -> vector<32x16xf32>
    %c11_312 = arith.constant 11 : index
    %c0_313 = arith.constant 0 : index
    %c0_314 = arith.constant 0 : index
    %294 = vector.load %arg16[%c11_312, %c0_313, %c0_314] : memref<16x64x64xf32, #tpu.memory_space<vmem>>, vector<1x64x64xf32>
    %295 = vector.shape_cast %294 : vector<1x64x64xf32> to vector<64x64xf32>
    %cst_315 = arith.constant dense<0.000000e+00> : vector<32x64xf32>
    %296 = tpu.matmul %290, %295, %cst_315 {dimension_numbers = #tpu.dot_dimension_numbers<[1], [0], [0], [1], [0, 0, 1, 1], [], []>} : vector<32x64xf32>, vector<64x64xf32>, vector<32x64xf32> -> vector<32x64xf32>
    %c11_316 = arith.constant 11 : index
    %c0_317 = arith.constant 0 : index
    %c0_318 = arith.constant 0 : index
    %297 = vector.load %arg17[%c11_316, %c0_317, %c0_318] : memref<16x16x64xf32, #tpu.memory_space<vmem>>, vector<1x16x64xf32>
    %298 = vector.shape_cast %297 : vector<1x16x64xf32> to vector<16x64xf32>
    %cst_319 = arith.constant dense<0.000000e+00> : vector<32x64xf32>
    %299 = tpu.matmul %293, %298, %cst_319 {dimension_numbers = #tpu.dot_dimension_numbers<[1], [0], [0], [1], [0, 0, 1, 1], [], []>} : vector<32x16xf32>, vector<16x64xf32>, vector<32x64xf32> -> vector<32x64xf32>
    %300 = arith.addf %296, %299 : vector<32x64xf32>
    %301 = arith.addf %287, %300 : vector<32x64xf32>
    %c12 = arith.constant 12 : index
    %c0_320 = arith.constant 0 : index
    %c0_321 = arith.constant 0 : index
    %302 = vector.load %arg8[%c12, %c0_320, %c0_321] : memref<16x32x128xf32, #tpu.memory_space<vmem>>, vector<1x32x128xf32>
    %303 = vector.shape_cast %302 : vector<1x32x128xf32> to vector<32x128xf32>
    %cst_322 = arith.constant dense<0.000000e+00> : vector<32x64xf32>
    %304 = tpu.matmul %303, %0, %cst_322 {dimension_numbers = #tpu.dot_dimension_numbers<[1], [0], [0], [1], [0, 0, 1, 1], [], []>} : vector<32x128xf32>, vector<128x64xf32>, vector<32x64xf32> -> vector<32x64xf32>
    %c12_323 = arith.constant 12 : index
    %c0_324 = arith.constant 0 : index
    %c0_325 = arith.constant 0 : index
    %305 = vector.load %arg8[%c12_323, %c0_324, %c0_325] : memref<16x32x128xf32, #tpu.memory_space<vmem>>, vector<1x32x128xf32>
    %306 = vector.shape_cast %305 : vector<1x32x128xf32> to vector<32x128xf32>
    %cst_326 = arith.constant dense<0.000000e+00> : vector<32x16xf32>
    %307 = tpu.matmul %306, %122, %cst_326 {dimension_numbers = #tpu.dot_dimension_numbers<[1], [0], [0], [1], [0, 0, 1, 1], [], []>} : vector<32x128xf32>, vector<128x16xf32>, vector<32x16xf32> -> vector<32x16xf32>
    %c12_327 = arith.constant 12 : index
    %c0_328 = arith.constant 0 : index
    %c0_329 = arith.constant 0 : index
    %308 = vector.load %arg16[%c12_327, %c0_328, %c0_329] : memref<16x64x64xf32, #tpu.memory_space<vmem>>, vector<1x64x64xf32>
    %309 = vector.shape_cast %308 : vector<1x64x64xf32> to vector<64x64xf32>
    %cst_330 = arith.constant dense<0.000000e+00> : vector<32x64xf32>
    %310 = tpu.matmul %304, %309, %cst_330 {dimension_numbers = #tpu.dot_dimension_numbers<[1], [0], [0], [1], [0, 0, 1, 1], [], []>} : vector<32x64xf32>, vector<64x64xf32>, vector<32x64xf32> -> vector<32x64xf32>
    %c12_331 = arith.constant 12 : index
    %c0_332 = arith.constant 0 : index
    %c0_333 = arith.constant 0 : index
    %311 = vector.load %arg17[%c12_331, %c0_332, %c0_333] : memref<16x16x64xf32, #tpu.memory_space<vmem>>, vector<1x16x64xf32>
    %312 = vector.shape_cast %311 : vector<1x16x64xf32> to vector<16x64xf32>
    %cst_334 = arith.constant dense<0.000000e+00> : vector<32x64xf32>
    %313 = tpu.matmul %307, %312, %cst_334 {dimension_numbers = #tpu.dot_dimension_numbers<[1], [0], [0], [1], [0, 0, 1, 1], [], []>} : vector<32x16xf32>, vector<16x64xf32>, vector<32x64xf32> -> vector<32x64xf32>
    %314 = arith.addf %310, %313 : vector<32x64xf32>
    %315 = arith.addf %301, %314 : vector<32x64xf32>
    %c13 = arith.constant 13 : index
    %c0_335 = arith.constant 0 : index
    %c0_336 = arith.constant 0 : index
    %316 = vector.load %arg8[%c13, %c0_335, %c0_336] : memref<16x32x128xf32, #tpu.memory_space<vmem>>, vector<1x32x128xf32>
    %317 = vector.shape_cast %316 : vector<1x32x128xf32> to vector<32x128xf32>
    %cst_337 = arith.constant dense<0.000000e+00> : vector<32x64xf32>
    %318 = tpu.matmul %317, %0, %cst_337 {dimension_numbers = #tpu.dot_dimension_numbers<[1], [0], [0], [1], [0, 0, 1, 1], [], []>} : vector<32x128xf32>, vector<128x64xf32>, vector<32x64xf32> -> vector<32x64xf32>
    %c13_338 = arith.constant 13 : index
    %c0_339 = arith.constant 0 : index
    %c0_340 = arith.constant 0 : index
    %319 = vector.load %arg8[%c13_338, %c0_339, %c0_340] : memref<16x32x128xf32, #tpu.memory_space<vmem>>, vector<1x32x128xf32>
    %320 = vector.shape_cast %319 : vector<1x32x128xf32> to vector<32x128xf32>
    %cst_341 = arith.constant dense<0.000000e+00> : vector<32x16xf32>
    %321 = tpu.matmul %320, %122, %cst_341 {dimension_numbers = #tpu.dot_dimension_numbers<[1], [0], [0], [1], [0, 0, 1, 1], [], []>} : vector<32x128xf32>, vector<128x16xf32>, vector<32x16xf32> -> vector<32x16xf32>
    %c13_342 = arith.constant 13 : index
    %c0_343 = arith.constant 0 : index
    %c0_344 = arith.constant 0 : index
    %322 = vector.load %arg16[%c13_342, %c0_343, %c0_344] : memref<16x64x64xf32, #tpu.memory_space<vmem>>, vector<1x64x64xf32>
    %323 = vector.shape_cast %322 : vector<1x64x64xf32> to vector<64x64xf32>
    %cst_345 = arith.constant dense<0.000000e+00> : vector<32x64xf32>
    %324 = tpu.matmul %318, %323, %cst_345 {dimension_numbers = #tpu.dot_dimension_numbers<[1], [0], [0], [1], [0, 0, 1, 1], [], []>} : vector<32x64xf32>, vector<64x64xf32>, vector<32x64xf32> -> vector<32x64xf32>
    %c13_346 = arith.constant 13 : index
    %c0_347 = arith.constant 0 : index
    %c0_348 = arith.constant 0 : index
    %325 = vector.load %arg17[%c13_346, %c0_347, %c0_348] : memref<16x16x64xf32, #tpu.memory_space<vmem>>, vector<1x16x64xf32>
    %326 = vector.shape_cast %325 : vector<1x16x64xf32> to vector<16x64xf32>
    %cst_349 = arith.constant dense<0.000000e+00> : vector<32x64xf32>
    %327 = tpu.matmul %321, %326, %cst_349 {dimension_numbers = #tpu.dot_dimension_numbers<[1], [0], [0], [1], [0, 0, 1, 1], [], []>} : vector<32x16xf32>, vector<16x64xf32>, vector<32x64xf32> -> vector<32x64xf32>
    %328 = arith.addf %324, %327 : vector<32x64xf32>
    %329 = arith.addf %315, %328 : vector<32x64xf32>
    %c14 = arith.constant 14 : index
    %c0_350 = arith.constant 0 : index
    %c0_351 = arith.constant 0 : index
    %330 = vector.load %arg8[%c14, %c0_350, %c0_351] : memref<16x32x128xf32, #tpu.memory_space<vmem>>, vector<1x32x128xf32>
    %331 = vector.shape_cast %330 : vector<1x32x128xf32> to vector<32x128xf32>
    %cst_352 = arith.constant dense<0.000000e+00> : vector<32x64xf32>
    %332 = tpu.matmul %331, %0, %cst_352 {dimension_numbers = #tpu.dot_dimension_numbers<[1], [0], [0], [1], [0, 0, 1, 1], [], []>} : vector<32x128xf32>, vector<128x64xf32>, vector<32x64xf32> -> vector<32x64xf32>
    %c14_353 = arith.constant 14 : index
    %c0_354 = arith.constant 0 : index
    %c0_355 = arith.constant 0 : index
    %333 = vector.load %arg8[%c14_353, %c0_354, %c0_355] : memref<16x32x128xf32, #tpu.memory_space<vmem>>, vector<1x32x128xf32>
    %334 = vector.shape_cast %333 : vector<1x32x128xf32> to vector<32x128xf32>
    %cst_356 = arith.constant dense<0.000000e+00> : vector<32x16xf32>
    %335 = tpu.matmul %334, %122, %cst_356 {dimension_numbers = #tpu.dot_dimension_numbers<[1], [0], [0], [1], [0, 0, 1, 1], [], []>} : vector<32x128xf32>, vector<128x16xf32>, vector<32x16xf32> -> vector<32x16xf32>
    %c14_357 = arith.constant 14 : index
    %c0_358 = arith.constant 0 : index
    %c0_359 = arith.constant 0 : index
    %336 = vector.load %arg16[%c14_357, %c0_358, %c0_359] : memref<16x64x64xf32, #tpu.memory_space<vmem>>, vector<1x64x64xf32>
    %337 = vector.shape_cast %336 : vector<1x64x64xf32> to vector<64x64xf32>
    %cst_360 = arith.constant dense<0.000000e+00> : vector<32x64xf32>
    %338 = tpu.matmul %332, %337, %cst_360 {dimension_numbers = #tpu.dot_dimension_numbers<[1], [0], [0], [1], [0, 0, 1, 1], [], []>} : vector<32x64xf32>, vector<64x64xf32>, vector<32x64xf32> -> vector<32x64xf32>
    %c14_361 = arith.constant 14 : index
    %c0_362 = arith.constant 0 : index
    %c0_363 = arith.constant 0 : index
    %339 = vector.load %arg17[%c14_361, %c0_362, %c0_363] : memref<16x16x64xf32, #tpu.memory_space<vmem>>, vector<1x16x64xf32>
    %340 = vector.shape_cast %339 : vector<1x16x64xf32> to vector<16x64xf32>
    %cst_364 = arith.constant dense<0.000000e+00> : vector<32x64xf32>
    %341 = tpu.matmul %335, %340, %cst_364 {dimension_numbers = #tpu.dot_dimension_numbers<[1], [0], [0], [1], [0, 0, 1, 1], [], []>} : vector<32x16xf32>, vector<16x64xf32>, vector<32x64xf32> -> vector<32x64xf32>
    %342 = arith.addf %338, %341 : vector<32x64xf32>
    %343 = arith.addf %329, %342 : vector<32x64xf32>
    %c15 = arith.constant 15 : index
    %c0_365 = arith.constant 0 : index
    %c0_366 = arith.constant 0 : index
    %344 = vector.load %arg8[%c15, %c0_365, %c0_366] : memref<16x32x128xf32, #tpu.memory_space<vmem>>, vector<1x32x128xf32>
    %345 = vector.shape_cast %344 : vector<1x32x128xf32> to vector<32x128xf32>
    %cst_367 = arith.constant dense<0.000000e+00> : vector<32x64xf32>
    %346 = tpu.matmul %345, %0, %cst_367 {dimension_numbers = #tpu.dot_dimension_numbers<[1], [0], [0], [1], [0, 0, 1, 1], [], []>} : vector<32x128xf32>, vector<128x64xf32>, vector<32x64xf32> -> vector<32x64xf32>
    %c15_368 = arith.constant 15 : index
    %c0_369 = arith.constant 0 : index
    %c0_370 = arith.constant 0 : index
    %347 = vector.load %arg8[%c15_368, %c0_369, %c0_370] : memref<16x32x128xf32, #tpu.memory_space<vmem>>, vector<1x32x128xf32>
    %348 = vector.shape_cast %347 : vector<1x32x128xf32> to vector<32x128xf32>
    %cst_371 = arith.constant dense<0.000000e+00> : vector<32x16xf32>
    %349 = tpu.matmul %348, %122, %cst_371 {dimension_numbers = #tpu.dot_dimension_numbers<[1], [0], [0], [1], [0, 0, 1, 1], [], []>} : vector<32x128xf32>, vector<128x16xf32>, vector<32x16xf32> -> vector<32x16xf32>
    %c15_372 = arith.constant 15 : index
    %c0_373 = arith.constant 0 : index
    %c0_374 = arith.constant 0 : index
    %350 = vector.load %arg16[%c15_372, %c0_373, %c0_374] : memref<16x64x64xf32, #tpu.memory_space<vmem>>, vector<1x64x64xf32>
    %351 = vector.shape_cast %350 : vector<1x64x64xf32> to vector<64x64xf32>
    %cst_375 = arith.constant dense<0.000000e+00> : vector<32x64xf32>
    %352 = tpu.matmul %346, %351, %cst_375 {dimension_numbers = #tpu.dot_dimension_numbers<[1], [0], [0], [1], [0, 0, 1, 1], [], []>} : vector<32x64xf32>, vector<64x64xf32>, vector<32x64xf32> -> vector<32x64xf32>
    %c15_376 = arith.constant 15 : index
    %c0_377 = arith.constant 0 : index
    %c0_378 = arith.constant 0 : index
    %353 = vector.load %arg17[%c15_376, %c0_377, %c0_378] : memref<16x16x64xf32, #tpu.memory_space<vmem>>, vector<1x16x64xf32>
    %354 = vector.shape_cast %353 : vector<1x16x64xf32> to vector<16x64xf32>
    %cst_379 = arith.constant dense<0.000000e+00> : vector<32x64xf32>
    %355 = tpu.matmul %349, %354, %cst_379 {dimension_numbers = #tpu.dot_dimension_numbers<[1], [0], [0], [1], [0, 0, 1, 1], [], []>} : vector<32x16xf32>, vector<16x64xf32>, vector<32x64xf32> -> vector<32x64xf32>
    %356 = arith.addf %352, %355 : vector<32x64xf32>
    %357 = arith.addf %343, %356 : vector<32x64xf32>
    %cst_380 = arith.constant 2.000000e-01 : f32
    %358 = vector.broadcast %cst_380 : f32 to vector<32x64xf32>
    %359 = arith.mulf %358, %357 : vector<32x64xf32>
    %360 = arith.maximumf %357, %359 : vector<32x64xf32>
    %c0_381 = arith.constant 0 : index
    %c0_382 = arith.constant 0 : index
    %c0_383 = arith.constant 0 : index
    %361 = vector.load %arg9[%c0_381, %c0_382, %c0_383] : memref<9x32x32xf32, #tpu.memory_space<vmem>>, vector<1x32x32xf32>
    %362 = vector.shape_cast %361 : vector<1x32x32xf32> to vector<32x32xf32>
    %c0_384 = arith.constant 0 : index
    %c0_385 = arith.constant 0 : index
    %c0_386 = arith.constant 0 : index
    %363 = vector.load %arg18[%c0_384, %c0_385, %c0_386] : memref<9x64x64xf32, #tpu.memory_space<vmem>>, vector<1x64x64xf32>
    %364 = vector.shape_cast %363 : vector<1x64x64xf32> to vector<64x64xf32>
    %cst_387 = arith.constant dense<0.000000e+00> : vector<32x64xf32>
    %365 = tpu.matmul %360, %364, %cst_387 {dimension_numbers = #tpu.dot_dimension_numbers<[1], [0], [0], [1], [0, 0, 1, 1], [], []>} : vector<32x64xf32>, vector<64x64xf32>, vector<32x64xf32> -> vector<32x64xf32>
    %cst_388 = arith.constant dense<0.000000e+00> : vector<32x64xf32>
    %366 = tpu.matmul %362, %365, %cst_388 {dimension_numbers = #tpu.dot_dimension_numbers<[1], [0], [0], [1], [0, 0, 1, 1], [], []>} : vector<32x32xf32>, vector<32x64xf32>, vector<32x64xf32> -> vector<32x64xf32>
    %c1_389 = arith.constant 1 : index
    %c0_390 = arith.constant 0 : index
    %c0_391 = arith.constant 0 : index
    %367 = vector.load %arg9[%c1_389, %c0_390, %c0_391] : memref<9x32x32xf32, #tpu.memory_space<vmem>>, vector<1x32x32xf32>
    %368 = vector.shape_cast %367 : vector<1x32x32xf32> to vector<32x32xf32>
    %c1_392 = arith.constant 1 : index
    %c0_393 = arith.constant 0 : index
    %c0_394 = arith.constant 0 : index
    %369 = vector.load %arg18[%c1_392, %c0_393, %c0_394] : memref<9x64x64xf32, #tpu.memory_space<vmem>>, vector<1x64x64xf32>
    %370 = vector.shape_cast %369 : vector<1x64x64xf32> to vector<64x64xf32>
    %cst_395 = arith.constant dense<0.000000e+00> : vector<32x64xf32>
    %371 = tpu.matmul %360, %370, %cst_395 {dimension_numbers = #tpu.dot_dimension_numbers<[1], [0], [0], [1], [0, 0, 1, 1], [], []>} : vector<32x64xf32>, vector<64x64xf32>, vector<32x64xf32> -> vector<32x64xf32>
    %cst_396 = arith.constant dense<0.000000e+00> : vector<32x64xf32>
    %372 = tpu.matmul %368, %371, %cst_396 {dimension_numbers = #tpu.dot_dimension_numbers<[1], [0], [0], [1], [0, 0, 1, 1], [], []>} : vector<32x32xf32>, vector<32x64xf32>, vector<32x64xf32> -> vector<32x64xf32>
    %373 = arith.addf %366, %372 : vector<32x64xf32>
    %c2_397 = arith.constant 2 : index
    %c0_398 = arith.constant 0 : index
    %c0_399 = arith.constant 0 : index
    %374 = vector.load %arg9[%c2_397, %c0_398, %c0_399] : memref<9x32x32xf32, #tpu.memory_space<vmem>>, vector<1x32x32xf32>
    %375 = vector.shape_cast %374 : vector<1x32x32xf32> to vector<32x32xf32>
    %c2_400 = arith.constant 2 : index
    %c0_401 = arith.constant 0 : index
    %c0_402 = arith.constant 0 : index
    %376 = vector.load %arg18[%c2_400, %c0_401, %c0_402] : memref<9x64x64xf32, #tpu.memory_space<vmem>>, vector<1x64x64xf32>
    %377 = vector.shape_cast %376 : vector<1x64x64xf32> to vector<64x64xf32>
    %cst_403 = arith.constant dense<0.000000e+00> : vector<32x64xf32>
    %378 = tpu.matmul %360, %377, %cst_403 {dimension_numbers = #tpu.dot_dimension_numbers<[1], [0], [0], [1], [0, 0, 1, 1], [], []>} : vector<32x64xf32>, vector<64x64xf32>, vector<32x64xf32> -> vector<32x64xf32>
    %cst_404 = arith.constant dense<0.000000e+00> : vector<32x64xf32>
    %379 = tpu.matmul %375, %378, %cst_404 {dimension_numbers = #tpu.dot_dimension_numbers<[1], [0], [0], [1], [0, 0, 1, 1], [], []>} : vector<32x32xf32>, vector<32x64xf32>, vector<32x64xf32> -> vector<32x64xf32>
    %380 = arith.addf %373, %379 : vector<32x64xf32>
    %c3_405 = arith.constant 3 : index
    %c0_406 = arith.constant 0 : index
    %c0_407 = arith.constant 0 : index
    %381 = vector.load %arg9[%c3_405, %c0_406, %c0_407] : memref<9x32x32xf32, #tpu.memory_space<vmem>>, vector<1x32x32xf32>
    %382 = vector.shape_cast %381 : vector<1x32x32xf32> to vector<32x32xf32>
    %c3_408 = arith.constant 3 : index
    %c0_409 = arith.constant 0 : index
    %c0_410 = arith.constant 0 : index
    %383 = vector.load %arg18[%c3_408, %c0_409, %c0_410] : memref<9x64x64xf32, #tpu.memory_space<vmem>>, vector<1x64x64xf32>
    %384 = vector.shape_cast %383 : vector<1x64x64xf32> to vector<64x64xf32>
    %cst_411 = arith.constant dense<0.000000e+00> : vector<32x64xf32>
    %385 = tpu.matmul %360, %384, %cst_411 {dimension_numbers = #tpu.dot_dimension_numbers<[1], [0], [0], [1], [0, 0, 1, 1], [], []>} : vector<32x64xf32>, vector<64x64xf32>, vector<32x64xf32> -> vector<32x64xf32>
    %cst_412 = arith.constant dense<0.000000e+00> : vector<32x64xf32>
    %386 = tpu.matmul %382, %385, %cst_412 {dimension_numbers = #tpu.dot_dimension_numbers<[1], [0], [0], [1], [0, 0, 1, 1], [], []>} : vector<32x32xf32>, vector<32x64xf32>, vector<32x64xf32> -> vector<32x64xf32>
    %387 = arith.addf %380, %386 : vector<32x64xf32>
    %c4_413 = arith.constant 4 : index
    %c0_414 = arith.constant 0 : index
    %c0_415 = arith.constant 0 : index
    %388 = vector.load %arg9[%c4_413, %c0_414, %c0_415] : memref<9x32x32xf32, #tpu.memory_space<vmem>>, vector<1x32x32xf32>
    %389 = vector.shape_cast %388 : vector<1x32x32xf32> to vector<32x32xf32>
    %c4_416 = arith.constant 4 : index
    %c0_417 = arith.constant 0 : index
    %c0_418 = arith.constant 0 : index
    %390 = vector.load %arg18[%c4_416, %c0_417, %c0_418] : memref<9x64x64xf32, #tpu.memory_space<vmem>>, vector<1x64x64xf32>
    %391 = vector.shape_cast %390 : vector<1x64x64xf32> to vector<64x64xf32>
    %cst_419 = arith.constant dense<0.000000e+00> : vector<32x64xf32>
    %392 = tpu.matmul %360, %391, %cst_419 {dimension_numbers = #tpu.dot_dimension_numbers<[1], [0], [0], [1], [0, 0, 1, 1], [], []>} : vector<32x64xf32>, vector<64x64xf32>, vector<32x64xf32> -> vector<32x64xf32>
    %cst_420 = arith.constant dense<0.000000e+00> : vector<32x64xf32>
    %393 = tpu.matmul %389, %392, %cst_420 {dimension_numbers = #tpu.dot_dimension_numbers<[1], [0], [0], [1], [0, 0, 1, 1], [], []>} : vector<32x32xf32>, vector<32x64xf32>, vector<32x64xf32> -> vector<32x64xf32>
    %394 = arith.addf %387, %393 : vector<32x64xf32>
    %c5_421 = arith.constant 5 : index
    %c0_422 = arith.constant 0 : index
    %c0_423 = arith.constant 0 : index
    %395 = vector.load %arg9[%c5_421, %c0_422, %c0_423] : memref<9x32x32xf32, #tpu.memory_space<vmem>>, vector<1x32x32xf32>
    %396 = vector.shape_cast %395 : vector<1x32x32xf32> to vector<32x32xf32>
    %c5_424 = arith.constant 5 : index
    %c0_425 = arith.constant 0 : index
    %c0_426 = arith.constant 0 : index
    %397 = vector.load %arg18[%c5_424, %c0_425, %c0_426] : memref<9x64x64xf32, #tpu.memory_space<vmem>>, vector<1x64x64xf32>
    %398 = vector.shape_cast %397 : vector<1x64x64xf32> to vector<64x64xf32>
    %cst_427 = arith.constant dense<0.000000e+00> : vector<32x64xf32>
    %399 = tpu.matmul %360, %398, %cst_427 {dimension_numbers = #tpu.dot_dimension_numbers<[1], [0], [0], [1], [0, 0, 1, 1], [], []>} : vector<32x64xf32>, vector<64x64xf32>, vector<32x64xf32> -> vector<32x64xf32>
    %cst_428 = arith.constant dense<0.000000e+00> : vector<32x64xf32>
    %400 = tpu.matmul %396, %399, %cst_428 {dimension_numbers = #tpu.dot_dimension_numbers<[1], [0], [0], [1], [0, 0, 1, 1], [], []>} : vector<32x32xf32>, vector<32x64xf32>, vector<32x64xf32> -> vector<32x64xf32>
    %401 = arith.addf %394, %400 : vector<32x64xf32>
    %c6_429 = arith.constant 6 : index
    %c0_430 = arith.constant 0 : index
    %c0_431 = arith.constant 0 : index
    %402 = vector.load %arg9[%c6_429, %c0_430, %c0_431] : memref<9x32x32xf32, #tpu.memory_space<vmem>>, vector<1x32x32xf32>
    %403 = vector.shape_cast %402 : vector<1x32x32xf32> to vector<32x32xf32>
    %c6_432 = arith.constant 6 : index
    %c0_433 = arith.constant 0 : index
    %c0_434 = arith.constant 0 : index
    %404 = vector.load %arg18[%c6_432, %c0_433, %c0_434] : memref<9x64x64xf32, #tpu.memory_space<vmem>>, vector<1x64x64xf32>
    %405 = vector.shape_cast %404 : vector<1x64x64xf32> to vector<64x64xf32>
    %cst_435 = arith.constant dense<0.000000e+00> : vector<32x64xf32>
    %406 = tpu.matmul %360, %405, %cst_435 {dimension_numbers = #tpu.dot_dimension_numbers<[1], [0], [0], [1], [0, 0, 1, 1], [], []>} : vector<32x64xf32>, vector<64x64xf32>, vector<32x64xf32> -> vector<32x64xf32>
    %cst_436 = arith.constant dense<0.000000e+00> : vector<32x64xf32>
    %407 = tpu.matmul %403, %406, %cst_436 {dimension_numbers = #tpu.dot_dimension_numbers<[1], [0], [0], [1], [0, 0, 1, 1], [], []>} : vector<32x32xf32>, vector<32x64xf32>, vector<32x64xf32> -> vector<32x64xf32>
    %408 = arith.addf %401, %407 : vector<32x64xf32>
    %c7_437 = arith.constant 7 : index
    %c0_438 = arith.constant 0 : index
    %c0_439 = arith.constant 0 : index
    %409 = vector.load %arg9[%c7_437, %c0_438, %c0_439] : memref<9x32x32xf32, #tpu.memory_space<vmem>>, vector<1x32x32xf32>
    %410 = vector.shape_cast %409 : vector<1x32x32xf32> to vector<32x32xf32>
    %c7_440 = arith.constant 7 : index
    %c0_441 = arith.constant 0 : index
    %c0_442 = arith.constant 0 : index
    %411 = vector.load %arg18[%c7_440, %c0_441, %c0_442] : memref<9x64x64xf32, #tpu.memory_space<vmem>>, vector<1x64x64xf32>
    %412 = vector.shape_cast %411 : vector<1x64x64xf32> to vector<64x64xf32>
    %cst_443 = arith.constant dense<0.000000e+00> : vector<32x64xf32>
    %413 = tpu.matmul %360, %412, %cst_443 {dimension_numbers = #tpu.dot_dimension_numbers<[1], [0], [0], [1], [0, 0, 1, 1], [], []>} : vector<32x64xf32>, vector<64x64xf32>, vector<32x64xf32> -> vector<32x64xf32>
    %cst_444 = arith.constant dense<0.000000e+00> : vector<32x64xf32>
    %414 = tpu.matmul %410, %413, %cst_444 {dimension_numbers = #tpu.dot_dimension_numbers<[1], [0], [0], [1], [0, 0, 1, 1], [], []>} : vector<32x32xf32>, vector<32x64xf32>, vector<32x64xf32> -> vector<32x64xf32>
    %415 = arith.addf %408, %414 : vector<32x64xf32>
    %c8_445 = arith.constant 8 : index
    %c0_446 = arith.constant 0 : index
    %c0_447 = arith.constant 0 : index
    %416 = vector.load %arg9[%c8_445, %c0_446, %c0_447] : memref<9x32x32xf32, #tpu.memory_space<vmem>>, vector<1x32x32xf32>
    %417 = vector.shape_cast %416 : vector<1x32x32xf32> to vector<32x32xf32>
    %c8_448 = arith.constant 8 : index
    %c0_449 = arith.constant 0 : index
    %c0_450 = arith.constant 0 : index
    %418 = vector.load %arg18[%c8_448, %c0_449, %c0_450] : memref<9x64x64xf32, #tpu.memory_space<vmem>>, vector<1x64x64xf32>
    %419 = vector.shape_cast %418 : vector<1x64x64xf32> to vector<64x64xf32>
    %cst_451 = arith.constant dense<0.000000e+00> : vector<32x64xf32>
    %420 = tpu.matmul %360, %419, %cst_451 {dimension_numbers = #tpu.dot_dimension_numbers<[1], [0], [0], [1], [0, 0, 1, 1], [], []>} : vector<32x64xf32>, vector<64x64xf32>, vector<32x64xf32> -> vector<32x64xf32>
    %cst_452 = arith.constant dense<0.000000e+00> : vector<32x64xf32>
    %421 = tpu.matmul %417, %420, %cst_452 {dimension_numbers = #tpu.dot_dimension_numbers<[1], [0], [0], [1], [0, 0, 1, 1], [], []>} : vector<32x32xf32>, vector<32x64xf32>, vector<32x64xf32> -> vector<32x64xf32>
    %422 = arith.addf %415, %421 : vector<32x64xf32>
    %cst_453 = arith.constant 2.000000e-01 : f32
    %423 = vector.broadcast %cst_453 : f32 to vector<32x64xf32>
    %424 = arith.mulf %423, %422 : vector<32x64xf32>
    %425 = arith.maximumf %422, %424 : vector<32x64xf32>
    %c0_454 = arith.constant 0 : index
    %426 = memref.load %arg22[%c0_454] : memref<1xf32, #tpu.memory_space<smem>>
    %427 = vector.broadcast %426 : f32 to vector<32x64xf32>
    %428 = arith.mulf %427, %425 : vector<32x64xf32>
    %429 = arith.addf %134, %428 : vector<32x64xf32>
    %c0_455 = arith.constant 0 : index
    %c0_456 = arith.constant 0 : index
    %430 = vector.load %arg4[%c0_455, %c0_456] : memref<32x2xf32, #tpu.memory_space<vmem>>, vector<32x2xf32>
    %cst_457 = arith.constant dense<0.000000e+00> : vector<32x16xf32>
    %431 = tpu.matmul %430, %1, %cst_457 {dimension_numbers = #tpu.dot_dimension_numbers<[1], [0], [0], [1], [0, 0, 1, 1], [], []>} : vector<32x2xf32>, vector<2x16xf32>, vector<32x16xf32> -> vector<32x16xf32>
    %c0_458 = arith.constant 0 : index
    %c0_459 = arith.constant 0 : index
    %c0_460 = arith.constant 0 : index
    %432 = vector.load %arg19[%c0_458, %c0_459, %c0_460] : memref<9x64x8xf32, #tpu.memory_space<vmem>>, vector<1x64x8xf32>
    %433 = vector.shape_cast %432 : vector<1x64x8xf32> to vector<64x8xf32>
    %cst_461 = arith.constant dense<0.000000e+00> : vector<32x8xf32>
    %434 = tpu.matmul %429, %433, %cst_461 {dimension_numbers = #tpu.dot_dimension_numbers<[1], [0], [0], [1], [0, 0, 1, 1], [], []>} : vector<32x64xf32>, vector<64x8xf32>, vector<32x8xf32> -> vector<32x8xf32>
    %c0_462 = arith.constant 0 : index
    %c0_463 = arith.constant 0 : index
    %c0_464 = arith.constant 0 : index
    %435 = vector.load %arg20[%c0_462, %c0_463, %c0_464] : memref<9x16x8xf32, #tpu.memory_space<vmem>>, vector<1x16x8xf32>
    %436 = vector.shape_cast %435 : vector<1x16x8xf32> to vector<16x8xf32>
    %cst_465 = arith.constant dense<0.000000e+00> : vector<32x8xf32>
    %437 = tpu.matmul %431, %436, %cst_465 {dimension_numbers = #tpu.dot_dimension_numbers<[1], [0], [0], [1], [0, 0, 1, 1], [], []>} : vector<32x16xf32>, vector<16x8xf32>, vector<32x8xf32> -> vector<32x8xf32>
    %438 = arith.addf %434, %437 : vector<32x8xf32>
    %c0_466 = arith.constant 0 : index
    %c0_467 = arith.constant 0 : index
    %c0_468 = arith.constant 0 : index
    %439 = vector.load %arg9[%c0_466, %c0_467, %c0_468] : memref<9x32x32xf32, #tpu.memory_space<vmem>>, vector<1x32x32xf32>
    %440 = vector.shape_cast %439 : vector<1x32x32xf32> to vector<32x32xf32>
    %cst_469 = arith.constant dense<0.000000e+00> : vector<32x8xf32>
    %441 = tpu.matmul %440, %438, %cst_469 {dimension_numbers = #tpu.dot_dimension_numbers<[1], [0], [0], [1], [0, 0, 1, 1], [], []>} : vector<32x32xf32>, vector<32x8xf32>, vector<32x8xf32> -> vector<32x8xf32>
    %c1_470 = arith.constant 1 : index
    %c0_471 = arith.constant 0 : index
    %c0_472 = arith.constant 0 : index
    %442 = vector.load %arg19[%c1_470, %c0_471, %c0_472] : memref<9x64x8xf32, #tpu.memory_space<vmem>>, vector<1x64x8xf32>
    %443 = vector.shape_cast %442 : vector<1x64x8xf32> to vector<64x8xf32>
    %cst_473 = arith.constant dense<0.000000e+00> : vector<32x8xf32>
    %444 = tpu.matmul %429, %443, %cst_473 {dimension_numbers = #tpu.dot_dimension_numbers<[1], [0], [0], [1], [0, 0, 1, 1], [], []>} : vector<32x64xf32>, vector<64x8xf32>, vector<32x8xf32> -> vector<32x8xf32>
    %c1_474 = arith.constant 1 : index
    %c0_475 = arith.constant 0 : index
    %c0_476 = arith.constant 0 : index
    %445 = vector.load %arg20[%c1_474, %c0_475, %c0_476] : memref<9x16x8xf32, #tpu.memory_space<vmem>>, vector<1x16x8xf32>
    %446 = vector.shape_cast %445 : vector<1x16x8xf32> to vector<16x8xf32>
    %cst_477 = arith.constant dense<0.000000e+00> : vector<32x8xf32>
    %447 = tpu.matmul %431, %446, %cst_477 {dimension_numbers = #tpu.dot_dimension_numbers<[1], [0], [0], [1], [0, 0, 1, 1], [], []>} : vector<32x16xf32>, vector<16x8xf32>, vector<32x8xf32> -> vector<32x8xf32>
    %448 = arith.addf %444, %447 : vector<32x8xf32>
    %c1_478 = arith.constant 1 : index
    %c0_479 = arith.constant 0 : index
    %c0_480 = arith.constant 0 : index
    %449 = vector.load %arg9[%c1_478, %c0_479, %c0_480] : memref<9x32x32xf32, #tpu.memory_space<vmem>>, vector<1x32x32xf32>
    %450 = vector.shape_cast %449 : vector<1x32x32xf32> to vector<32x32xf32>
    %cst_481 = arith.constant dense<0.000000e+00> : vector<32x8xf32>
    %451 = tpu.matmul %450, %448, %cst_481 {dimension_numbers = #tpu.dot_dimension_numbers<[1], [0], [0], [1], [0, 0, 1, 1], [], []>} : vector<32x32xf32>, vector<32x8xf32>, vector<32x8xf32> -> vector<32x8xf32>
    %452 = arith.addf %441, %451 : vector<32x8xf32>
    %c2_482 = arith.constant 2 : index
    %c0_483 = arith.constant 0 : index
    %c0_484 = arith.constant 0 : index
    %453 = vector.load %arg19[%c2_482, %c0_483, %c0_484] : memref<9x64x8xf32, #tpu.memory_space<vmem>>, vector<1x64x8xf32>
    %454 = vector.shape_cast %453 : vector<1x64x8xf32> to vector<64x8xf32>
    %cst_485 = arith.constant dense<0.000000e+00> : vector<32x8xf32>
    %455 = tpu.matmul %429, %454, %cst_485 {dimension_numbers = #tpu.dot_dimension_numbers<[1], [0], [0], [1], [0, 0, 1, 1], [], []>} : vector<32x64xf32>, vector<64x8xf32>, vector<32x8xf32> -> vector<32x8xf32>
    %c2_486 = arith.constant 2 : index
    %c0_487 = arith.constant 0 : index
    %c0_488 = arith.constant 0 : index
    %456 = vector.load %arg20[%c2_486, %c0_487, %c0_488] : memref<9x16x8xf32, #tpu.memory_space<vmem>>, vector<1x16x8xf32>
    %457 = vector.shape_cast %456 : vector<1x16x8xf32> to vector<16x8xf32>
    %cst_489 = arith.constant dense<0.000000e+00> : vector<32x8xf32>
    %458 = tpu.matmul %431, %457, %cst_489 {dimension_numbers = #tpu.dot_dimension_numbers<[1], [0], [0], [1], [0, 0, 1, 1], [], []>} : vector<32x16xf32>, vector<16x8xf32>, vector<32x8xf32> -> vector<32x8xf32>
    %459 = arith.addf %455, %458 : vector<32x8xf32>
    %c2_490 = arith.constant 2 : index
    %c0_491 = arith.constant 0 : index
    %c0_492 = arith.constant 0 : index
    %460 = vector.load %arg9[%c2_490, %c0_491, %c0_492] : memref<9x32x32xf32, #tpu.memory_space<vmem>>, vector<1x32x32xf32>
    %461 = vector.shape_cast %460 : vector<1x32x32xf32> to vector<32x32xf32>
    %cst_493 = arith.constant dense<0.000000e+00> : vector<32x8xf32>
    %462 = tpu.matmul %461, %459, %cst_493 {dimension_numbers = #tpu.dot_dimension_numbers<[1], [0], [0], [1], [0, 0, 1, 1], [], []>} : vector<32x32xf32>, vector<32x8xf32>, vector<32x8xf32> -> vector<32x8xf32>
    %463 = arith.addf %452, %462 : vector<32x8xf32>
    %c3_494 = arith.constant 3 : index
    %c0_495 = arith.constant 0 : index
    %c0_496 = arith.constant 0 : index
    %464 = vector.load %arg19[%c3_494, %c0_495, %c0_496] : memref<9x64x8xf32, #tpu.memory_space<vmem>>, vector<1x64x8xf32>
    %465 = vector.shape_cast %464 : vector<1x64x8xf32> to vector<64x8xf32>
    %cst_497 = arith.constant dense<0.000000e+00> : vector<32x8xf32>
    %466 = tpu.matmul %429, %465, %cst_497 {dimension_numbers = #tpu.dot_dimension_numbers<[1], [0], [0], [1], [0, 0, 1, 1], [], []>} : vector<32x64xf32>, vector<64x8xf32>, vector<32x8xf32> -> vector<32x8xf32>
    %c3_498 = arith.constant 3 : index
    %c0_499 = arith.constant 0 : index
    %c0_500 = arith.constant 0 : index
    %467 = vector.load %arg20[%c3_498, %c0_499, %c0_500] : memref<9x16x8xf32, #tpu.memory_space<vmem>>, vector<1x16x8xf32>
    %468 = vector.shape_cast %467 : vector<1x16x8xf32> to vector<16x8xf32>
    %cst_501 = arith.constant dense<0.000000e+00> : vector<32x8xf32>
    %469 = tpu.matmul %431, %468, %cst_501 {dimension_numbers = #tpu.dot_dimension_numbers<[1], [0], [0], [1], [0, 0, 1, 1], [], []>} : vector<32x16xf32>, vector<16x8xf32>, vector<32x8xf32> -> vector<32x8xf32>
    %470 = arith.addf %466, %469 : vector<32x8xf32>
    %c3_502 = arith.constant 3 : index
    %c0_503 = arith.constant 0 : index
    %c0_504 = arith.constant 0 : index
    %471 = vector.load %arg9[%c3_502, %c0_503, %c0_504] : memref<9x32x32xf32, #tpu.memory_space<vmem>>, vector<1x32x32xf32>
    %472 = vector.shape_cast %471 : vector<1x32x32xf32> to vector<32x32xf32>
    %cst_505 = arith.constant dense<0.000000e+00> : vector<32x8xf32>
    %473 = tpu.matmul %472, %470, %cst_505 {dimension_numbers = #tpu.dot_dimension_numbers<[1], [0], [0], [1], [0, 0, 1, 1], [], []>} : vector<32x32xf32>, vector<32x8xf32>, vector<32x8xf32> -> vector<32x8xf32>
    %474 = arith.addf %463, %473 : vector<32x8xf32>
    %c4_506 = arith.constant 4 : index
    %c0_507 = arith.constant 0 : index
    %c0_508 = arith.constant 0 : index
    %475 = vector.load %arg19[%c4_506, %c0_507, %c0_508] : memref<9x64x8xf32, #tpu.memory_space<vmem>>, vector<1x64x8xf32>
    %476 = vector.shape_cast %475 : vector<1x64x8xf32> to vector<64x8xf32>
    %cst_509 = arith.constant dense<0.000000e+00> : vector<32x8xf32>
    %477 = tpu.matmul %429, %476, %cst_509 {dimension_numbers = #tpu.dot_dimension_numbers<[1], [0], [0], [1], [0, 0, 1, 1], [], []>} : vector<32x64xf32>, vector<64x8xf32>, vector<32x8xf32> -> vector<32x8xf32>
    %c4_510 = arith.constant 4 : index
    %c0_511 = arith.constant 0 : index
    %c0_512 = arith.constant 0 : index
    %478 = vector.load %arg20[%c4_510, %c0_511, %c0_512] : memref<9x16x8xf32, #tpu.memory_space<vmem>>, vector<1x16x8xf32>
    %479 = vector.shape_cast %478 : vector<1x16x8xf32> to vector<16x8xf32>
    %cst_513 = arith.constant dense<0.000000e+00> : vector<32x8xf32>
    %480 = tpu.matmul %431, %479, %cst_513 {dimension_numbers = #tpu.dot_dimension_numbers<[1], [0], [0], [1], [0, 0, 1, 1], [], []>} : vector<32x16xf32>, vector<16x8xf32>, vector<32x8xf32> -> vector<32x8xf32>
    %481 = arith.addf %477, %480 : vector<32x8xf32>
    %c4_514 = arith.constant 4 : index
    %c0_515 = arith.constant 0 : index
    %c0_516 = arith.constant 0 : index
    %482 = vector.load %arg9[%c4_514, %c0_515, %c0_516] : memref<9x32x32xf32, #tpu.memory_space<vmem>>, vector<1x32x32xf32>
    %483 = vector.shape_cast %482 : vector<1x32x32xf32> to vector<32x32xf32>
    %cst_517 = arith.constant dense<0.000000e+00> : vector<32x8xf32>
    %484 = tpu.matmul %483, %481, %cst_517 {dimension_numbers = #tpu.dot_dimension_numbers<[1], [0], [0], [1], [0, 0, 1, 1], [], []>} : vector<32x32xf32>, vector<32x8xf32>, vector<32x8xf32> -> vector<32x8xf32>
    %485 = arith.addf %474, %484 : vector<32x8xf32>
    %c5_518 = arith.constant 5 : index
    %c0_519 = arith.constant 0 : index
    %c0_520 = arith.constant 0 : index
    %486 = vector.load %arg19[%c5_518, %c0_519, %c0_520] : memref<9x64x8xf32, #tpu.memory_space<vmem>>, vector<1x64x8xf32>
    %487 = vector.shape_cast %486 : vector<1x64x8xf32> to vector<64x8xf32>
    %cst_521 = arith.constant dense<0.000000e+00> : vector<32x8xf32>
    %488 = tpu.matmul %429, %487, %cst_521 {dimension_numbers = #tpu.dot_dimension_numbers<[1], [0], [0], [1], [0, 0, 1, 1], [], []>} : vector<32x64xf32>, vector<64x8xf32>, vector<32x8xf32> -> vector<32x8xf32>
    %c5_522 = arith.constant 5 : index
    %c0_523 = arith.constant 0 : index
    %c0_524 = arith.constant 0 : index
    %489 = vector.load %arg20[%c5_522, %c0_523, %c0_524] : memref<9x16x8xf32, #tpu.memory_space<vmem>>, vector<1x16x8xf32>
    %490 = vector.shape_cast %489 : vector<1x16x8xf32> to vector<16x8xf32>
    %cst_525 = arith.constant dense<0.000000e+00> : vector<32x8xf32>
    %491 = tpu.matmul %431, %490, %cst_525 {dimension_numbers = #tpu.dot_dimension_numbers<[1], [0], [0], [1], [0, 0, 1, 1], [], []>} : vector<32x16xf32>, vector<16x8xf32>, vector<32x8xf32> -> vector<32x8xf32>
    %492 = arith.addf %488, %491 : vector<32x8xf32>
    %c5_526 = arith.constant 5 : index
    %c0_527 = arith.constant 0 : index
    %c0_528 = arith.constant 0 : index
    %493 = vector.load %arg9[%c5_526, %c0_527, %c0_528] : memref<9x32x32xf32, #tpu.memory_space<vmem>>, vector<1x32x32xf32>
    %494 = vector.shape_cast %493 : vector<1x32x32xf32> to vector<32x32xf32>
    %cst_529 = arith.constant dense<0.000000e+00> : vector<32x8xf32>
    %495 = tpu.matmul %494, %492, %cst_529 {dimension_numbers = #tpu.dot_dimension_numbers<[1], [0], [0], [1], [0, 0, 1, 1], [], []>} : vector<32x32xf32>, vector<32x8xf32>, vector<32x8xf32> -> vector<32x8xf32>
    %496 = arith.addf %485, %495 : vector<32x8xf32>
    %c6_530 = arith.constant 6 : index
    %c0_531 = arith.constant 0 : index
    %c0_532 = arith.constant 0 : index
    %497 = vector.load %arg19[%c6_530, %c0_531, %c0_532] : memref<9x64x8xf32, #tpu.memory_space<vmem>>, vector<1x64x8xf32>
    %498 = vector.shape_cast %497 : vector<1x64x8xf32> to vector<64x8xf32>
    %cst_533 = arith.constant dense<0.000000e+00> : vector<32x8xf32>
    %499 = tpu.matmul %429, %498, %cst_533 {dimension_numbers = #tpu.dot_dimension_numbers<[1], [0], [0], [1], [0, 0, 1, 1], [], []>} : vector<32x64xf32>, vector<64x8xf32>, vector<32x8xf32> -> vector<32x8xf32>
    %c6_534 = arith.constant 6 : index
    %c0_535 = arith.constant 0 : index
    %c0_536 = arith.constant 0 : index
    %500 = vector.load %arg20[%c6_534, %c0_535, %c0_536] : memref<9x16x8xf32, #tpu.memory_space<vmem>>, vector<1x16x8xf32>
    %501 = vector.shape_cast %500 : vector<1x16x8xf32> to vector<16x8xf32>
    %cst_537 = arith.constant dense<0.000000e+00> : vector<32x8xf32>
    %502 = tpu.matmul %431, %501, %cst_537 {dimension_numbers = #tpu.dot_dimension_numbers<[1], [0], [0], [1], [0, 0, 1, 1], [], []>} : vector<32x16xf32>, vector<16x8xf32>, vector<32x8xf32> -> vector<32x8xf32>
    %503 = arith.addf %499, %502 : vector<32x8xf32>
    %c6_538 = arith.constant 6 : index
    %c0_539 = arith.constant 0 : index
    %c0_540 = arith.constant 0 : index
    %504 = vector.load %arg9[%c6_538, %c0_539, %c0_540] : memref<9x32x32xf32, #tpu.memory_space<vmem>>, vector<1x32x32xf32>
    %505 = vector.shape_cast %504 : vector<1x32x32xf32> to vector<32x32xf32>
    %cst_541 = arith.constant dense<0.000000e+00> : vector<32x8xf32>
    %506 = tpu.matmul %505, %503, %cst_541 {dimension_numbers = #tpu.dot_dimension_numbers<[1], [0], [0], [1], [0, 0, 1, 1], [], []>} : vector<32x32xf32>, vector<32x8xf32>, vector<32x8xf32> -> vector<32x8xf32>
    %507 = arith.addf %496, %506 : vector<32x8xf32>
    %c7_542 = arith.constant 7 : index
    %c0_543 = arith.constant 0 : index
    %c0_544 = arith.constant 0 : index
    %508 = vector.load %arg19[%c7_542, %c0_543, %c0_544] : memref<9x64x8xf32, #tpu.memory_space<vmem>>, vector<1x64x8xf32>
    %509 = vector.shape_cast %508 : vector<1x64x8xf32> to vector<64x8xf32>
    %cst_545 = arith.constant dense<0.000000e+00> : vector<32x8xf32>
    %510 = tpu.matmul %429, %509, %cst_545 {dimension_numbers = #tpu.dot_dimension_numbers<[1], [0], [0], [1], [0, 0, 1, 1], [], []>} : vector<32x64xf32>, vector<64x8xf32>, vector<32x8xf32> -> vector<32x8xf32>
    %c7_546 = arith.constant 7 : index
    %c0_547 = arith.constant 0 : index
    %c0_548 = arith.constant 0 : index
    %511 = vector.load %arg20[%c7_546, %c0_547, %c0_548] : memref<9x16x8xf32, #tpu.memory_space<vmem>>, vector<1x16x8xf32>
    %512 = vector.shape_cast %511 : vector<1x16x8xf32> to vector<16x8xf32>
    %cst_549 = arith.constant dense<0.000000e+00> : vector<32x8xf32>
    %513 = tpu.matmul %431, %512, %cst_549 {dimension_numbers = #tpu.dot_dimension_numbers<[1], [0], [0], [1], [0, 0, 1, 1], [], []>} : vector<32x16xf32>, vector<16x8xf32>, vector<32x8xf32> -> vector<32x8xf32>
    %514 = arith.addf %510, %513 : vector<32x8xf32>
    %c7_550 = arith.constant 7 : index
    %c0_551 = arith.constant 0 : index
    %c0_552 = arith.constant 0 : index
    %515 = vector.load %arg9[%c7_550, %c0_551, %c0_552] : memref<9x32x32xf32, #tpu.memory_space<vmem>>, vector<1x32x32xf32>
    %516 = vector.shape_cast %515 : vector<1x32x32xf32> to vector<32x32xf32>
    %cst_553 = arith.constant dense<0.000000e+00> : vector<32x8xf32>
    %517 = tpu.matmul %516, %514, %cst_553 {dimension_numbers = #tpu.dot_dimension_numbers<[1], [0], [0], [1], [0, 0, 1, 1], [], []>} : vector<32x32xf32>, vector<32x8xf32>, vector<32x8xf32> -> vector<32x8xf32>
    %518 = arith.addf %507, %517 : vector<32x8xf32>
    %c8_554 = arith.constant 8 : index
    %c0_555 = arith.constant 0 : index
    %c0_556 = arith.constant 0 : index
    %519 = vector.load %arg19[%c8_554, %c0_555, %c0_556] : memref<9x64x8xf32, #tpu.memory_space<vmem>>, vector<1x64x8xf32>
    %520 = vector.shape_cast %519 : vector<1x64x8xf32> to vector<64x8xf32>
    %cst_557 = arith.constant dense<0.000000e+00> : vector<32x8xf32>
    %521 = tpu.matmul %429, %520, %cst_557 {dimension_numbers = #tpu.dot_dimension_numbers<[1], [0], [0], [1], [0, 0, 1, 1], [], []>} : vector<32x64xf32>, vector<64x8xf32>, vector<32x8xf32> -> vector<32x8xf32>
    %c8_558 = arith.constant 8 : index
    %c0_559 = arith.constant 0 : index
    %c0_560 = arith.constant 0 : index
    %522 = vector.load %arg20[%c8_558, %c0_559, %c0_560] : memref<9x16x8xf32, #tpu.memory_space<vmem>>, vector<1x16x8xf32>
    %523 = vector.shape_cast %522 : vector<1x16x8xf32> to vector<16x8xf32>
    %cst_561 = arith.constant dense<0.000000e+00> : vector<32x8xf32>
    %524 = tpu.matmul %431, %523, %cst_561 {dimension_numbers = #tpu.dot_dimension_numbers<[1], [0], [0], [1], [0, 0, 1, 1], [], []>} : vector<32x16xf32>, vector<16x8xf32>, vector<32x8xf32> -> vector<32x8xf32>
    %525 = arith.addf %521, %524 : vector<32x8xf32>
    %c8_562 = arith.constant 8 : index
    %c0_563 = arith.constant 0 : index
    %c0_564 = arith.constant 0 : index
    %526 = vector.load %arg9[%c8_562, %c0_563, %c0_564] : memref<9x32x32xf32, #tpu.memory_space<vmem>>, vector<1x32x32xf32>
    %527 = vector.shape_cast %526 : vector<1x32x32xf32> to vector<32x32xf32>
    %cst_565 = arith.constant dense<0.000000e+00> : vector<32x8xf32>
    %528 = tpu.matmul %527, %525, %cst_565 {dimension_numbers = #tpu.dot_dimension_numbers<[1], [0], [0], [1], [0, 0, 1, 1], [], []>} : vector<32x32xf32>, vector<32x8xf32>, vector<32x8xf32> -> vector<32x8xf32>
    %529 = arith.addf %518, %528 : vector<32x8xf32>
    %cst_566 = arith.constant 2.000000e-01 : f32
    %530 = vector.broadcast %cst_566 : f32 to vector<32x8xf32>
    %531 = arith.mulf %530, %529 : vector<32x8xf32>
    %532 = arith.maximumf %529, %531 : vector<32x8xf32>
    %c0_567 = arith.constant 0 : index
    %c0_568 = arith.constant 0 : index
    %533 = vector.load %arg5[%c0_567, %c0_568] : memref<2x32xf32, #tpu.memory_space<vmem>>, vector<2x32xf32>
    %c0_569 = arith.constant 0 : index
    %c0_570 = arith.constant 0 : index
    %534 = vector.load %arg21[%c0_569, %c0_570] : memref<32x8xf32, #tpu.memory_space<vmem>>, vector<32x8xf32>
    %535 = arith.mulf %532, %534 : vector<32x8xf32>
    %cst_571 = arith.constant dense<0.000000e+00> : vector<2x8xf32>
    %536 = tpu.matmul %533, %535, %cst_571 {dimension_numbers = #tpu.dot_dimension_numbers<[1], [0], [0], [1], [0, 0, 1, 1], [], []>} : vector<2x32xf32>, vector<32x8xf32>, vector<2x8xf32> -> vector<2x8xf32>
    %cst_572 = arith.constant dense<0.000000e+00> : vector<2xf32>
    %537 = vector.multi_reduction <add>, %536, %cst_572 [1] : vector<2x8xf32> to vector<2xf32>
    %538 = vector.shape_cast %537 : vector<2xf32> to vector<2x1xf32>
    %c0_573 = arith.constant 0 : index
    %c0_574 = arith.constant 0 : index
    %539 = vector.load %arg23[%c0_573, %c0_574] : memref<2x1xf32, #tpu.memory_space<vmem>>, vector<2x1xf32>
    tpu.vector_store %arg23[%c0_573, %c0_574], %538 {strides = array<i32>} : memref<2x1xf32, #tpu.memory_space<vmem>>, vector<2x1xf32>,
    return
  }
}

</mosaic_0001>

<bundles_post_ra>
// kernel: d_get_logits_att.1
= control target key start
LH: loop header
LB: loop body
LE: loop exit
PB: predicated region body
PF: predicated region fallthrough
CT: control target
= control target key end

     0   :  { %vm15965_vm0 = vcmask 1041408   ;;  %vm15964_vm1 = vcmask 15360   ;;  %vm15963_vm2 = vcmask 523264   ;;  %vm15962_vm3 = vcmask 130048   ;;  %s15852_s1 = inlined_call_operand.vmem [shape: f32[2,16], index: 1, kind: input, shape index: {}]   ;;  %s15853_s10 = inlined_call_operand.vmem [shape: f32[9,64,8], index: 10, kind: input, shape index: {}]   ;;  %s15854_s2 = inlined_call_operand.vmem [shape: f32[128,2], index: 2, kind: input, shape index: {}]   ;;  %s15855_s0 = inlined_call_operand.vmem [shape: f32[128,64], index: 0, kind: input, shape index: {}]   ;;  %s15856_s11 = inlined_call_operand.vmem [shape: f32[9,16,8], index: 11, kind: input, shape index: {}]   ;;  %s15857_s7 = inlined_call_operand.vmem [shape: f32[9,128,128], index: 7, kind: input, shape index: {}]   ;;  %s15858_s12 = inlined_call_operand.vmem [shape: f32[8,1], index: 12, kind: input, shape index: {}]   ;;  %s15859_s3 = inlined_call_operand.vmem [shape: f32[2,128], index: 3, kind: input, shape index: {}]   ;;  %s15860_s6 = inlined_call_operand.vmem [shape: f32[32,128], index: 6, kind: input, shape index: {}]   ;;  %s15861_s13 = inlined_call_operand.vmem [shape: f32[64,64], index: 13, kind: input, shape index: {}]   ;;  %s15862_s8 = inlined_call_operand.vmem [shape: f32[16,32,128], index: 8, kind: input, shape index: {}]   ;;  %s15863_s14 = inlined_call_operand.vmem [shape: f32[16,64], index: 14, kind: input, shape index: {}]   ;;  %s15864_s15 = inlined_call_operand.vmem [shape: f32[1,64], index: 15, kind: input, shape index: {}]   ;;  %s15865_s16 = inlined_call_operand.vmem [shape: f32[16,64,64], index: 16, kind: input, shape index: {}]   ;;  %s15866_s17 = inlined_call_operand.vmem [shape: f32[16,16,64], index: 17, kind: input, shape index: {}]   ;;  %s15867_s18 = inlined_call_operand.vmem [shape: f32[9,64,64], index: 18, kind: input, shape index: {}]   ;;  %s15868_s9 = inlined_call_operand.vmem [shape: f32[9,32,32], index: 9, kind: input, shape index: {}]   ;;  %s15869_s4 = inlined_call_operand.vmem [shape: f32[32,2], index: 4, kind: input, shape index: {}]   ;;  %s15870_s20 = inlined_call_operand.vmem [shape: f32[9,16,8], index: 20, kind: input, shape index: {}]   ;;  %s15871_s19 = inlined_call_operand.vmem [shape: f32[9,64,8], index: 19, kind: input, shape index: {}]   ;;  %s15872_s22 = inlined_call_operand.<no memory space> [shape: f32[1], index: 22, kind: input, shape index: {}]   ;;  %s15873_s21 = inlined_call_operand.vmem [shape: f32[32,8], index: 21, kind: input, shape index: {}]   ;;  %s15874_s5 = inlined_call_operand.vmem [shape: f32[2,32], index: 5, kind: input, shape index: {}]   ;;  %s15875_s23 = inlined_call_operand.vmem [shape: f32[2,1], index: 23, kind: output, shape index: {}]  }
   0x1   :  { %15977 = sst [smem:[#allocation73_spill]] %s15852_s1  ;;  %vm2482_vm4 = vcmask 64512  }
   0x2   :  { %15978 = sst [smem:[#allocation74_spill]] %s15853_s10 }
   0x3   :  { %15979 = sst [smem:[#allocation75_spill]] %s15854_s2 }
   0x4   :  { %15980 = sst [smem:[#allocation76_spill]] %s15855_s0 }
   0x5   :  { %15981 = sst [smem:[#allocation77_spill]] %s15856_s11 }
   0x6   :  { %15982 = sst [smem:[#allocation78_spill]] %s15857_s7 }
   0x7   :  { %15983 = sst [smem:[#allocation79_spill]] %s15858_s12 }
   0x8   :  { %15984 = sst [smem:[#allocation80_spill]] %s15859_s3 }
   0x9   :  { %15985 = sst [smem:[#allocation81_spill]] %s15875_s23 }
   0xa   :  { %s15986_s24 = sld [smem:[#allocation73_spill]] }
   0xb   :  { %s15987_s10 = sld [smem:[#allocation74_spill]] }
   0xc   :  { %s15988_s12 = sld [smem:[#allocation75_spill]] }
   0xd   :  { %s15989_s11 = sld [smem:[#allocation76_spill]] }
   0xe   :  { %s16000_s3 = sld [smem:[#allocation77_spill]] }
   0xf   :  { %s16035_s30 = sld [smem:[#allocation78_spill]] }
  0x10   :  { %v91_v0 = vld [vmem:[%s15986_s24] sm:$0x3]  ;;  %s16242_s25 = sld [smem:[#allocation79_spill]] }
  0x11   :  { %v233_v1 = vld [vmem:[%s15987_s10 + $0x38] sm:$0xff]  ;;  %7736 = vmatpush.msk.msra.mxu0 %vm15965_vm0, %v91_v0  ;;  %v232_v3 = vld [vmem:[%s15987_s10 + $0x30] sm:$0xff]  ;;  %v231_v4 = vld [vmem:[%s15987_s10 + $0x28] sm:$0xff] }
  0x12   :  { %v92_v2 = vld [vmem:[%s15988_s12] sm:$0xff]  ;;  %407 = vmatpush.msra.mxu2 %v233_v1  ;;  %v229_v6 = vld [vmem:[%s15987_s10 + $0x18] sm:$0xff]  ;;  %v93_v7 = vld [vmem:[%s15988_s12 + $0x8] sm:$0xff] }
  0x13   :  { %7737 = vmatmul.msk.f32.vlgmr.msra.gmra.mxu0 %vm15964_vm1, %v92_v2  ;;  %v230_v5 = vld [vmem:[%s15987_s10 + $0x20] sm:$0xff]  ;;  %v228_v8 = vld [vmem:[%s15987_s10 + $0x10] sm:$0xff]  ;;  %v227_v9 = vld [vmem:[%s15987_s10 + $0x8] sm:$0xff] }
  0x14   :  { %408 = vmatpush.msra.mxu2 %v232_v3  ;;  %v226_v10 = vld [vmem:[%s15987_s10] sm:$0xff]  ;;  %v94_v12 = vld [vmem:[%s15988_s12 + $0x10] sm:$0xff]  ;;  %v9373_v13 = vld [vmem:[%s15989_s11 + $0x8] sm:$0xff] }
  0x15   :  { %v9362_v11 = vld [vmem:[%s15989_s11] sm:$0xff]  ;;  %15991 = vst [vmem:[#allocation4_spill] sm:$0xff] %v9373_v13  ;;  %v95_v14 = vld [vmem:[%s15988_s12 + $0x18] sm:$0xff]  ;;  %v9384_v15 = vld [vmem:[%s15989_s11 + $0x10] sm:$0xff] }
  0x16   :  { %409 = vmatpush.msra.mxu2 %v231_v4  ;;  %15990 = vst [vmem:[#allocation3_spill] sm:$0xff] %v9362_v11  ;;  %v96_v16 = vld [vmem:[%s15988_s12 + $0x20] sm:$0xff]  ;;  %v9395_v17 = vld [vmem:[%s15989_s11 + $0x18] sm:$0xff]  ;;  %v97_v18 = vld [vmem:[%s15988_s12 + $0x28] sm:$0xff] }
  0x17   :  { %15992 = vst [vmem:[#allocation5_spill] sm:$0xff] %v9384_v15  ;;  %v9406_v19 = vld [vmem:[%s15989_s11 + $0x20] sm:$0xff]  ;;  %v98_v20 = vld [vmem:[%s15988_s12 + $0x30] sm:$0xff]  ;;  %v9417_v21 = vld [vmem:[%s15989_s11 + $0x28] sm:$0xff] }
  0x18   :  { %410 = vmatpush.msra.mxu2 %v230_v5  ;;  %15993 = vst [vmem:[#allocation6_spill] sm:$0xff] %v9395_v17  ;;  %v99_v22 = vld [vmem:[%s15988_s12 + $0x38] sm:$0xff]  ;;  %v9428_v23 = vld [vmem:[%s15989_s11 + $0x30] sm:$0xff]  ;;  %v100_v24 = vld [vmem:[%s15988_s12 + $0x40] sm:$0xff] }
  0x19   :  { %15994 = vst [vmem:[#allocation7_spill] sm:$0xff] %v9406_v19  ;;  %v9439_v25 = vld [vmem:[%s15989_s11 + $0x38] sm:$0xff]  ;;  %v101_v26 = vld [vmem:[%s15988_s12 + $0x48] sm:$0xff]  ;;  %v9450_v27 = vld [vmem:[%s15989_s11 + $0x40] sm:$0xff] }
  0x1a   :  { %411 = vmatpush.msra.mxu2 %v229_v6  ;;  %15995 = vst [vmem:[#allocation8_spill] sm:$0xff] %v9417_v21  ;;  %v102_v28 = vld [vmem:[%s15988_s12 + $0x50] sm:$0xff]  ;;  %v7792_v29 = vld [vmem:[%s15987_s10 + $0x78] sm:$0xff]  ;;  %v7790_v31 = vld [vmem:[%s15987_s10 + $0x68] sm:$0xff] }
  0x1b   :  { %7738 = vmatmul.msk.f32.gmra.mxu0 %vm15964_vm1, %v93_v7  ;;  %15996 = vst [vmem:[#allocation9_spill] sm:$0xff] %v9428_v23  ;;  %v7791_v30 = vld [vmem:[%s15987_s10 + $0x70] sm:$0xff]  ;;  %v9470_v32 = vld [vmem:[%s15989_s11 + $0x48] sm:$0xff]  ;;  %v103_v33 = vld [vmem:[%s15988_s12 + $0x58] sm:$0xff] }
  0x1c   :  { %412 = vmatpush.msra.mxu2 %v228_v8  ;;  %15997 = vst [vmem:[#allocation10_spill] sm:$0xff] %v9439_v25  ;;  %565 = vmatpush.msrb.mxu0 %v7792_v29  ;;  %v7789_v34 = vld [vmem:[%s15987_s10 + $0x60] sm:$0xff]  ;;  %v7788_v35 = vld [vmem:[%s15987_s10 + $0x58] sm:$0xff]  ;;  %v235_v36 = vld [vmem:[%s16000_s3 + $0x8] sm:$0xff] }
  0x1d   :  { %15998 = vst [vmem:[#allocation11_spill] sm:$0xff] %v9450_v27  ;;  %v7794_v37 = vld [vmem:[%s16000_s3 + $0x18] sm:$0xff]  ;;  %299 = vmatpush.msra.mxu1 %v235_v36  ;;  %v7787_v38 = vld [vmem:[%s15987_s10 + $0x50] sm:$0xff]  ;;  %v234_v40 = vld [vmem:[%s16000_s3] sm:$0xff] }
  0x1e   :  { %413 = vmatpush.msra.mxu2 %v227_v9  ;;  %15999 = vst [vmem:[#allocation12_spill] sm:$0xff] %v9470_v32  ;;  %566 = vmatpush.msrb.mxu0 %v7791_v30  ;;  %v9496_v39 = vld [vmem:[%s15989_s11 + $0x50] sm:$0xff]  ;;  %v7786_v42 = vld [vmem:[%s15987_s10 + $0x48] sm:$0xff]  ;;  %v104_v43 = vld [vmem:[%s15988_s12 + $0x60] sm:$0xff] }
  0x1f   :  { %506 = vmatpush.msra.mxu3 %v7794_v37  ;;  %16001 = vst [vmem:[#allocation13_spill] sm:$0xff] %v9496_v39  ;;  %v7793_v41 = vld [vmem:[%s16000_s3 + $0x10] sm:$0xff]  ;;  %300 = vmatpush.msra.mxu1 %v234_v40  ;;  %v7785_v44 = vld [vmem:[%s15987_s10 + $0x40] sm:$0xff]  ;;  %v9519_v45 = vld [vmem:[%s15989_s11 + $0x58] sm:$0xff] }
  0x20   :  { %414 = vmatpush.msra.mxu2 %v226_v10  ;;  %567 = vmatpush.msrb.mxu0 %v7790_v31  ;;  %16002 = vst [vmem:[#allocation14_spill] sm:$0xff] %v9519_v45  ;;  %v105_v46 = vld [vmem:[%s15988_s12 + $0x68] sm:$0xff]  ;;  %v9533_v48 = vld [vmem:[%s15989_s11 + $0x60] sm:$0xff]  ;;  %v106_v49 = vld [vmem:[%s15988_s12 + $0x70] sm:$0xff] }
  0x21   :  { %7769 = vmatmul.msk.f32.vlgmr.msra.gmra.mxu2 %vm15963_vm2, %v9362_v11  ;;  %507 = vmatpush.msra.mxu3 %v7793_v41  ;;  %v7852_v47 = vld [vmem:[%s16000_s3 + $0x28] sm:$0xff]  ;;  %16003 = vst [vmem:[#allocation15_spill] sm:$0xff] %v9533_v48  ;;  %v7851_v50 = vld [vmem:[%s16000_s3 + $0x20] sm:$0xff]  ;;  %v107_v52 = vld [vmem:[%s15988_s12 + $0x78] sm:$0xff] }
  0x22   :  { %568 = vmatpush.msrb.mxu0 %v7789_v34  ;;  %795 = vmatpush.msrb.mxu2 %v7852_v47  ;;  %v9547_v51 = vld [vmem:[%s15989_s11 + $0x68] sm:$0xff]  ;;  %v9558_v53 = vld [vmem:[%s15989_s11 + $0x70] sm:$0xff]  ;;  %v9573_v55 = vld [vmem:[%s15989_s11 + $0x78] sm:$0xff] }
  0x23   :  { %7739 = vmatmul.msk.f32.gmra.mxu0 %vm15964_vm1, %v94_v12  ;;  %16004 = vst [vmem:[#allocation16_spill] sm:$0xff] %v9547_v51  ;;  %v7850_v4 = vld [vmem:[%s15987_s10 + $0xb8] sm:$0xff]  ;;  %v7849_v5 = vld [vmem:[%s15987_s10 + $0xb0] sm:$0xff]  ;;  %v7848_v8 = vld [vmem:[%s15987_s10 + $0xa8] sm:$0xff] }
  0x24   :  { %569 = vmatpush.msrb.mxu0 %v7788_v35  ;;  %796 = vmatpush.msrb.mxu2 %v7851_v50  ;;  %16005 = vst [vmem:[#allocation17_spill] sm:$0xff] %v9558_v53  ;;  %v7847_v9 = vld [vmem:[%s15987_s10 + $0xa0] sm:$0xff]  ;;  %v7846_v10 = vld [vmem:[%s15987_s10 + $0x98] sm:$0xff]  ;;  %v7845_v12 = vld [vmem:[%s15987_s10 + $0x90] sm:$0xff] }
  0x26   :  { %570 = vmatpush.msrb.mxu0 %v7787_v38 }
  0x28   :  { %571 = vmatpush.msrb.mxu0 %v7786_v42 }
  0x29   :  { %7770 = vmatmul.msk.f32.gmra.mxu2 %vm15963_vm2, %v9373_v13 }
  0x2a   :  { %572 = vmatpush.msrb.mxu0 %v7785_v44 }
  0x2b   :  { %7740 = vmatmul.msk.f32.gmra.mxu0 %vm15964_vm1, %v95_v14 }
  0x2c   :  { %854 = vmatpush.msra.mxu0 %v7850_v4 }
  0x2e   :  { %855 = vmatpush.msra.mxu0 %v7849_v5 }
  0x30   :  { %856 = vmatpush.msra.mxu0 %v7848_v8 }
  0x31   :  { %7771 = vmatmul.msk.f32.gmra.mxu2 %vm15963_vm2, %v9384_v15 }
  0x32   :  { %857 = vmatpush.msra.mxu0 %v7847_v9 }
  0x33   :  { %7741 = vmatmul.msk.f32.gmra.mxu0 %vm15964_vm1, %v96_v16 }
  0x34   :  { %858 = vmatpush.msra.mxu0 %v7846_v10 }
  0x36   :  { %859 = vmatpush.msra.mxu0 %v7845_v12 }
  0x39   :  { %7772 = vmatmul.msk.f32.gmra.mxu2 %vm15963_vm2, %v9395_v17 }
  0x3b   :  { %7742 = vmatmul.msk.f32.gmra.mxu0 %vm15964_vm1, %v97_v18  ;;  %v7844_v18 = vld [vmem:[%s15987_s10 + $0x88] sm:$0xff] }
  0x3c   :  { %860 = vmatpush.msra.mxu0 %v7844_v18 }
  0x41   :  { %7773 = vmatmul.msk.f32.gmra.mxu2 %vm15963_vm2, %v9406_v19 }
  0x43   :  { %7743 = vmatmul.msk.f32.gmra.mxu0 %vm15964_vm1, %v98_v20  ;;  %v7843_v20 = vld [vmem:[%s15987_s10 + $0x80] sm:$0xff] }
  0x44   :  { %861 = vmatpush.msra.mxu0 %v7843_v20 }
  0x49   :  { %7774 = vmatmul.msk.f32.gmra.mxu2 %vm15963_vm2, %v9417_v21 }
  0x4b   :  { %7744 = vmatmul.msk.f32.gmra.mxu0 %vm15964_vm1, %v99_v22 }
  0x51   :  { %7775 = vmatmul.msk.f32.gmra.mxu2 %vm15963_vm2, %v9428_v23 }
  0x53   :  { %7745 = vmatmul.msk.f32.gmra.mxu0 %vm15964_vm1, %v100_v24 }
  0x59   :  { %7776 = vmatmul.msk.f32.gmra.mxu2 %vm15963_vm2, %v9439_v25 }
  0x5b   :  { %7746 = vmatmul.msk.f32.gmra.mxu0 %vm15964_vm1, %v101_v26 }
  0x61   :  { %7777 = vmatmul.msk.f32.gmra.mxu2 %vm15963_vm2, %v9450_v27 }
  0x63   :  { %7747 = vmatmul.msk.f32.gmra.mxu0 %vm15964_vm1, %v102_v28 }
  0x69   :  { %7778 = vmatmul.msk.f32.gmra.mxu2 %vm15963_vm2, %v9470_v32 }
  0x6b   :  { %7748 = vmatmul.msk.f32.gmra.mxu0 %vm15964_vm1, %v103_v33 }
  0x71   :  { %7779 = vmatmul.msk.f32.gmra.mxu2 %vm15963_vm2, %v9496_v39 }
  0x73   :  { %7749 = vmatmul.msk.f32.gmra.mxu0 %vm15964_vm1, %v104_v43 }
  0x79   :  { %7780 = vmatmul.msk.f32.gmra.mxu2 %vm15963_vm2, %v9519_v45 }
  0x7b   :  { %7750 = vmatmul.msk.f32.gmra.mxu0 %vm15964_vm1, %v105_v46 }
  0x81   :  { %7781 = vmatmul.msk.f32.gmra.mxu2 %vm15963_vm2, %v9533_v48 }
  0x83   :  { %7751 = vmatmul.msk.f32.gmra.mxu0 %vm15964_vm1, %v106_v49 }
  0x89   :  { %7782 = vmatmul.msk.f32.gmra.mxu2 %vm15963_vm2, %v9547_v51 }
  0x8b   :  { %7752 = vmatmul.msk.f32.gmra.mxu0 %vm15964_vm1, %v107_v52 }
  0x90   :  { %v9560_v54 = vpop.f32.mrf.mxu0 }
  0x91   :  { %16006 = vst [vmem:[#allocation18_spill] sm:$0xff] %v9560_v54  ;;  %7753 = vmatmul.msk.f32.vlgmr.msra.gmra.mxu1 %vm15962_vm3, %v9560_v54  ;;  %7783 = vmatmul.msk.f32.gmra.mxu2 %vm15963_vm2, %v9558_v53 }
  0x92   :  { %7795 = vmatmul.msk.f32.vlgmr.msra.gmra.mxu3 %vm15962_vm3, %v9560_v54 }
  0x93   :  { %7811 = vmatmul.msk.f32.vlgmr.msrb.gmra.mxu0 %vm15963_vm2, %v9362_v11 }
  0x98   :  { %v9575_v56 = vpop.f32.mrf.mxu0 }
  0x99   :  { %16007 = vst [vmem:[#allocation19_spill] sm:$0xff] %v9575_v56  ;;  %7754 = vmatmul.msk.f32.gmra.mxu1 %vm15962_vm3, %v9575_v56  ;;  %7784 = vmatmul.msk.f32.gmra.mxu2 %vm15963_vm2, %v9573_v55 }
  0x9a   :  { %7796 = vmatmul.msk.f32.gmra.mxu3 %vm15962_vm3, %v9575_v56 }
  0x9b   :  { %7812 = vmatmul.msk.f32.gmra.mxu0 %vm15963_vm2, %v9373_v13 }
  0xa0   :  { %v9585_v57 = vpop.f32.mrf.mxu0 }
  0xa1   :  { %16008 = vst [vmem:[#allocation20_spill] sm:$0xff] %v9585_v57  ;;  %7755 = vmatmul.msk.f32.gmra.mxu1 %vm15962_vm3, %v9585_v57  ;;  %7853 = vmatmul.msk.f32.vlgmr.msrb.gmra.mxu2 %vm15962_vm3, %v9560_v54 }
  0xa2   :  { %7797 = vmatmul.msk.f32.gmra.mxu3 %vm15962_vm3, %v9585_v57 }
  0xa3   :  { %7813 = vmatmul.msk.f32.gmra.mxu0 %vm15963_vm2, %v9384_v15 }
  0xa4   :  { %v9651_v0 = vpop.f32.mrf.mxu2 }
  0xa5   :  { %16015 = vst [vmem:[#allocation27_spill] sm:$0xff] %v9651_v0 }
  0xa8   :  { %v9595_v58 = vpop.f32.mrf.mxu0 }
  0xa9   :  { %16009 = vst [vmem:[#allocation21_spill] sm:$0xff] %v9595_v58  ;;  %7756 = vmatmul.msk.f32.gmra.mxu1 %vm15962_vm3, %v9595_v58  ;;  %7854 = vmatmul.msk.f32.gmra.mxu2 %vm15962_vm3, %v9575_v56 }
  0xaa   :  { %7798 = vmatmul.msk.f32.gmra.mxu3 %vm15962_vm3, %v9595_v58 }
  0xab   :  { %7814 = vmatmul.msk.f32.gmra.mxu0 %vm15963_vm2, %v9395_v17 }
  0xac   :  { %v9667_v2 = vpop.f32.mrf.mxu2 }
  0xb0   :  { %v9605_v59 = vpop.f32.mrf.mxu0 }
  0xb1   :  { %16010 = vst [vmem:[#allocation22_spill] sm:$0xff] %v9605_v59  ;;  %7757 = vmatmul.msk.f32.gmra.mxu1 %vm15962_vm3, %v9605_v59  ;;  %7855 = vmatmul.msk.f32.gmra.mxu2 %vm15962_vm3, %v9585_v57 }
  0xb2   :  { %7799 = vmatmul.msk.f32.gmra.mxu3 %vm15962_vm3, %v9605_v59 }
  0xb3   :  { %7815 = vmatmul.msk.f32.gmra.mxu0 %vm15963_vm2, %v9406_v19 }
  0xb4   :  { %v9685_v6 = vpop.f32.mrf.mxu2 }
  0xb8   :  { %v9615_v60 = vpop.f32.mrf.mxu0 }
  0xb9   :  { %16011 = vst [vmem:[#allocation23_spill] sm:$0xff] %v9615_v60  ;;  %7758 = vmatmul.msk.f32.gmra.mxu1 %vm15962_vm3, %v9615_v60  ;;  %7856 = vmatmul.msk.f32.gmra.mxu2 %vm15962_vm3, %v9595_v58 }
  0xba   :  { %7800 = vmatmul.msk.f32.gmra.mxu3 %vm15962_vm3, %v9615_v60 }
  0xbb   :  { %7816 = vmatmul.msk.f32.gmra.mxu0 %vm15963_vm2, %v9417_v21 }
  0xbc   :  { %v9709_v14 = vpop.f32.mrf.mxu2 }
  0xc0   :  { %v9625_v61 = vpop.f32.mrf.mxu0 }
  0xc1   :  { %16012 = vst [vmem:[#allocation24_spill] sm:$0xff] %v9625_v61  ;;  %7759 = vmatmul.msk.f32.gmra.mxu1 %vm15962_vm3, %v9625_v61  ;;  %7857 = vmatmul.msk.f32.gmra.mxu2 %vm15962_vm3, %v9605_v59 }
  0xc2   :  { %7801 = vmatmul.msk.f32.gmra.mxu3 %vm15962_vm3, %v9625_v61 }
  0xc3   :  { %7817 = vmatmul.msk.f32.gmra.mxu0 %vm15963_vm2, %v9428_v23 }
  0xc4   :  { %v9733_v24 = vpop.f32.mrf.mxu2 }
  0xc8   :  { %v9635_v62 = vpop.f32.mrf.mxu0 }
  0xc9   :  { %16013 = vst [vmem:[#allocation25_spill] sm:$0xff] %v9635_v62  ;;  %7760 = vmatmul.msk.f32.gmra.mxu1 %vm15962_vm3, %v9635_v62  ;;  %7858 = vmatmul.msk.f32.gmra.mxu2 %vm15962_vm3, %v9615_v60 }
  0xca   :  { %7802 = vmatmul.msk.f32.gmra.mxu3 %vm15962_vm3, %v9635_v62 }
  0xcb   :  { %7818 = vmatmul.msk.f32.gmra.mxu0 %vm15963_vm2, %v9439_v25 }
  0xcc   :  { %v9749_v28 = vpop.f32.mrf.mxu2 }
  0xd0   :  { %v9645_v63 = vpop.f32.mrf.mxu0 }
  0xd1   :  { %16014 = vst [vmem:[#allocation26_spill] sm:$0xff] %v9645_v63  ;;  %7761 = vmatmul.msk.f32.gmra.mxu1 %vm15962_vm3, %v9645_v63  ;;  %7859 = vmatmul.msk.f32.gmra.mxu2 %vm15962_vm3, %v9625_v61 }
  0xd2   :  { %7803 = vmatmul.msk.f32.gmra.mxu3 %vm15962_vm3, %v9645_v63 }
  0xd3   :  { %7819 = vmatmul.msk.f32.gmra.mxu0 %vm15963_vm2, %v9450_v27 }
  0xd4   :  { %v9761_v30 = vpop.f32.mrf.mxu2 }
  0xd8   :  { %v9657_v1 = vpop.f32.mrf.mxu0 }
  0xd9   :  { %16016 = vst [vmem:[#allocation28_spill] sm:$0xff] %v9657_v1  ;;  %7762 = vmatmul.msk.f32.gmra.mxu1 %vm15962_vm3, %v9657_v1  ;;  %7860 = vmatmul.msk.f32.gmra.mxu2 %vm15962_vm3, %v9635_v62 }
  0xda   :  { %7804 = vmatmul.msk.f32.gmra.mxu3 %vm15962_vm3, %v9657_v1 }
  0xdb   :  { %7820 = vmatmul.msk.f32.gmra.mxu0 %vm15963_vm2, %v9470_v32 }
  0xdc   :  { %v9775_v36 = vpop.f32.mrf.mxu2 }
  0xe0   :  { %v9669_v3 = vpop.f32.mrf.mxu0 }
  0xe1   :  { %16017 = vst [vmem:[#allocation29_spill] sm:$0xff] %v9669_v3  ;;  %7763 = vmatmul.msk.f32.gmra.mxu1 %vm15962_vm3, %v9669_v3  ;;  %7861 = vmatmul.msk.f32.gmra.mxu2 %vm15962_vm3, %v9645_v63 }
  0xe2   :  { %7805 = vmatmul.msk.f32.gmra.mxu3 %vm15962_vm3, %v9669_v3 }
  0xe3   :  { %7821 = vmatmul.msk.f32.gmra.mxu0 %vm15963_vm2, %v9496_v39 }
  0xe4   :  { %v9789_v42 = vpop.f32.mrf.mxu2 }
  0xe8   :  { %v9687_v7 = vpop.f32.mrf.mxu0 }
  0xe9   :  { %16018 = vst [vmem:[#allocation30_spill] sm:$0xff] %v9687_v7  ;;  %7764 = vmatmul.msk.f32.gmra.mxu1 %vm15962_vm3, %v9687_v7  ;;  %7862 = vmatmul.msk.f32.gmra.mxu2 %vm15962_vm3, %v9657_v1 }
  0xea   :  { %7806 = vmatmul.msk.f32.gmra.mxu3 %vm15962_vm3, %v9687_v7 }
  0xeb   :  { %7822 = vmatmul.msk.f32.gmra.mxu0 %vm15963_vm2, %v9519_v45 }
  0xec   :  { %v9801_v47 = vpop.f32.mrf.mxu2 }
  0xf0   :  { %v9711_v16 = vpop.f32.mrf.mxu0 }
  0xf1   :  { %16019 = vst [vmem:[#allocation31_spill] sm:$0xff] %v9711_v16  ;;  %7765 = vmatmul.msk.f32.gmra.mxu1 %vm15962_vm3, %v9711_v16  ;;  %7863 = vmatmul.msk.f32.gmra.mxu2 %vm15962_vm3, %v9669_v3 }
  0xf2   :  { %7807 = vmatmul.msk.f32.gmra.mxu3 %vm15962_vm3, %v9711_v16 }
  0xf3   :  { %7823 = vmatmul.msk.f32.gmra.mxu0 %vm15963_vm2, %v9533_v48 }
  0xf4   :  { %v9813_v5 = vpop.f32.mrf.mxu2 }
  0xf8   :  { %v9727_v22 = vpop.f32.mrf.mxu0 }
  0xf9   :  { %16020 = vst [vmem:[#allocation32_spill] sm:$0xff] %v9727_v22  ;;  %7766 = vmatmul.msk.f32.gmra.mxu1 %vm15962_vm3, %v9727_v22  ;;  %7864 = vmatmul.msk.f32.gmra.mxu2 %vm15962_vm3, %v9687_v7 }
  0xfa   :  { %7808 = vmatmul.msk.f32.gmra.mxu3 %vm15962_vm3, %v9727_v22 }
  0xfb   :  { %7824 = vmatmul.msk.f32.gmra.mxu0 %vm15963_vm2, %v9547_v51 }
  0xfc   :  { %v449_v18 = vpop.f32.mrf.mxu2 }
 0x100   :  { %v9739_v26 = vpop.f32.mrf.mxu0 }
 0x101   :  { %16021 = vst [vmem:[#allocation33_spill] sm:$0xff] %v9739_v26  ;;  %7767 = vmatmul.msk.f32.gmra.mxu1 %vm15962_vm3, %v9739_v26  ;;  %7865 = vmatmul.msk.f32.gmra.mxu2 %vm15962_vm3, %v9711_v16 }
 0x102   :  { %7809 = vmatmul.msk.f32.gmra.mxu3 %vm15962_vm3, %v9739_v26 }
 0x103   :  { %7825 = vmatmul.msk.f32.gmra.mxu0 %vm15963_vm2, %v9558_v53 }
 0x104   :  { %v452_v16 = vpop.f32.mrf.mxu2 }
 0x108   :  { %v9751_v29 = vpop.f32.mrf.mxu0 }
 0x109   :  { %16022 = vst [vmem:[#allocation34_spill] sm:$0xff] %v9751_v29  ;;  %7768 = vmatmul.msk.f32.gmra.mxu1 %vm15962_vm3, %v9751_v29  ;;  %7866 = vmatmul.msk.f32.gmra.mxu2 %vm15962_vm3, %v9727_v22 }
 0x10a   :  { %7810 = vmatmul.msk.f32.gmra.mxu3 %vm15962_vm3, %v9751_v29 }
 0x10b   :  { %7826 = vmatmul.msk.f32.gmra.mxu0 %vm15963_vm2, %v9573_v55 }
 0x10c   :  { %v455_v63 = vpop.f32.mrf.mxu2 }
 0x10e   :  { %v9763_v31 = vpop.f32.mrf.mxu1 }
 0x110   :  { %v9765_v33 = vpop.f32.mrf.mxu0 }
 0x111   :  { %16023 = vst [vmem:[#allocation35_spill] sm:$0xff] %v9765_v33  ;;  %7867 = vmatmul.msk.f32.gmra.mxu2 %vm15962_vm3, %v9739_v26 }
 0x113   :  { %7869 = vmatmul.msk.f32.vlgmr.msra.gmra.mxu0 %vm15963_vm2, %v9362_v11 }
 0x115   :  { %v9771_v34 = vpop.f32.mrf.mxu3 }
 0x116   :  { %16024 = vst [vmem:[#allocation36_spill] sm:$0xff] %v9771_v34  ;;  %v9773_v35 = vpop.f32.mrf.mxu1 }
 0x118   :  { %v9777_v37 = vpop.f32.mrf.mxu0 }
 0x119   :  { %16025 = vst [vmem:[#allocation37_spill] sm:$0xff] %v9777_v37  ;;  %7868 = vmatmul.msk.f32.gmra.mxu2 %vm15962_vm3, %v9751_v29 }
 0x11b   :  { %7870 = vmatmul.msk.f32.gmra.mxu0 %vm15963_vm2, %v9373_v13 }
 0x11d   :  { %v9783_v38 = vpop.f32.mrf.mxu3 }
 0x11e   :  { %16026 = vst [vmem:[#allocation38_spill] sm:$0xff] %v9783_v38  ;;  %v9785_v40 = vpop.f32.mrf.mxu1 }
 0x120   :  { %v9787_v41 = vpop.f32.mrf.mxu0 }
 0x121   :  { %16027 = vst [vmem:[#allocation39_spill] sm:$0xff] %v9787_v41 }
 0x123   :  { %7871 = vmatmul.msk.f32.gmra.mxu0 %vm15963_vm2, %v9384_v15 }
 0x125   :  { %v9793_v43 = vpop.f32.mrf.mxu3 }
 0x126   :  { %16028 = vst [vmem:[#allocation40_spill] sm:$0xff] %v9793_v43  ;;  %v9795_v44 = vpop.f32.mrf.mxu1 }
 0x128   :  { %v9797_v46 = vpop.f32.mrf.mxu0 }
 0x129   :  { %16029 = vst [vmem:[#allocation41_spill] sm:$0xff] %v9797_v46 }
 0x12b   :  { %7872 = vmatmul.msk.f32.gmra.mxu0 %vm15963_vm2, %v9395_v17 }
 0x12d   :  { %v9803_v49 = vpop.f32.mrf.mxu3 }
 0x12e   :  { %16030 = vst [vmem:[#allocation42_spill] sm:$0xff] %v9803_v49  ;;  %v9805_v50 = vpop.f32.mrf.mxu1 }
 0x130   :  { %v9807_v52 = vpop.f32.mrf.mxu0 }
 0x133   :  { %7873 = vmatmul.msk.f32.gmra.mxu0 %vm15963_vm2, %v9406_v19 }
 0x135   :  { %v9811_v4 = vpop.f32.mrf.mxu3 }
 0x136   :  { %v9815_v8 = vpop.f32.mrf.mxu1 }
 0x138   :  { %v9817_v9 = vpop.f32.mrf.mxu0 }
 0x13b   :  { %7874 = vmatmul.msk.f32.gmra.mxu0 %vm15963_vm2, %v9417_v21 }
 0x13d   :  { %v9821_v10 = vpop.f32.mrf.mxu3 }
 0x13e   :  { %v9823_v12 = vpop.f32.mrf.mxu1 }
 0x140   :  { %v9825_v20 = vpop.f32.mrf.mxu0 }
 0x143   :  { %7875 = vmatmul.msk.f32.gmra.mxu0 %vm15963_vm2, %v9428_v23 }
 0x145   :  { %v9829_v29 = vpop.f32.mrf.mxu3 }
 0x146   :  { %v9831_v26 = vpop.f32.mrf.mxu1 }
 0x148   :  { %v9833_v22 = vpop.f32.mrf.mxu0 }
 0x14b   :  { %7876 = vmatmul.msk.f32.gmra.mxu0 %vm15963_vm2, %v9439_v25  ;;  %v458_v25 = vpop.f32.mrf.mxu2 }
 0x14d   :  { %v9837_v7 = vpop.f32.mrf.mxu3 }
 0x14e   :  { %v326_v3 = vpop.f32.mrf.mxu1 }
 0x150   :  { %v9839_v1 = vpop.f32.mrf.mxu0 }
 0x153   :  { %7877 = vmatmul.msk.f32.gmra.mxu0 %vm15963_vm2, %v9450_v27  ;;  %v461_v27 = vpop.f32.mrf.mxu2 }
 0x155   :  { %v9843_v62 = vpop.f32.mrf.mxu3 }
 0x156   :  { %v329_v61 = vpop.f32.mrf.mxu1 }
 0x158   :  { %v9845_v60 = vpop.f32.mrf.mxu0 }
 0x15b   :  { %7878 = vmatmul.msk.f32.gmra.mxu0 %vm15963_vm2, %v9470_v32  ;;  %v9855_v15 = vpop.f32.mrf.mxu2 }
 0x15c   :  { %16031 = vst [vmem:[#allocation43_spill] sm:$0xff] %v9855_v15 }
 0x15d   :  { %v9849_v59 = vpop.f32.mrf.mxu3 }
 0x15e   :  { %v332_v58 = vpop.f32.mrf.mxu1 }
 0x160   :  { %v604_v23 = vpop.f32.mrf.mxu0 }
 0x163   :  { %7879 = vmatmul.msk.f32.gmra.mxu0 %vm15963_vm2, %v9496_v39  ;;  %v9861_v39 = vpop.f32.mrf.mxu2 }
 0x164   :  { %16032 = vst [vmem:[#allocation44_spill] sm:$0xff] %v9861_v39 }
 0x165   :  { %v539_v57 = vpop.f32.mrf.mxu3 }
 0x166   :  { %v335_v21 = vpop.f32.mrf.mxu1 }
 0x167   :  { %v450_v0 = vadd.f32 %v449_v18, %v335_v21 }
 0x168   :  { %v607_v56 = vpop.f32.mrf.mxu0 }
 0x16b   :  { %7880 = vmatmul.msk.f32.gmra.mxu0 %vm15963_vm2, %v9519_v45  ;;  %v9865_v38 = vpop.f32.mrf.mxu2 }
 0x16c   :  { %16033 = vst [vmem:[#allocation45_spill] sm:$0xff] %v9865_v38 }
 0x16d   :  { %v542_v19 = vpop.f32.mrf.mxu3 }
 0x16e   :  { %v338_v54 = vpop.f32.mrf.mxu1  ;;  %v608_v21 = vadd.f32 %v607_v56, %v542_v19  ;;  %v432_v19 = vadd.f32 %v9749_v28, %v9815_v8  ;;  %v596_v56 = vadd.f32 %v9833_v22, %v9837_v7 }
 0x16f   :  { %v453_v46 = vadd.f32 %v452_v16, %v338_v54  ;;  %v605_v54 = vadd.f32 %v604_v23, %v539_v57  ;;  %v429_v23 = vadd.f32 %v9733_v24, %v9805_v50  ;;  %v426_v57 = vadd.f32 %v9709_v14, %v9795_v44  ;;  %v16036_v14 = vld [vmem:[#allocation42_spill] sm:$0xff]  ;;  %v16037_v16 = vld [vmem:[#allocation41_spill] sm:$0xff]  ;;  %v16038_v24 = vld [vmem:[#allocation40_spill] sm:$0xff] }
 0x170   :  { %v610_v17 = vpop.f32.mrf.mxu0  ;;  %v584_v22 = vadd.f32 %v16037_v16, %v16036_v14  ;;  %v7905_v14 = vld [vmem:[%s15987_s10 + $0xe0] sm:$0xff] }
 0x173   :  { %7881 = vmatmul.msk.f32.gmra.mxu0 %vm15963_vm2, %v9533_v48 }
 0x175   :  { %v545_v32 = vpop.f32.mrf.mxu3 }
 0x176   :  { %v341_v13 = vpop.f32.mrf.mxu1 }
 0x178   :  { %v613_v11 = vpop.f32.mrf.mxu0 }
 0x17b   :  { %7882 = vmatmul.msk.f32.gmra.mxu0 %vm15963_vm2, %v9547_v51  ;;  %v456_v51 = vadd.f32 %v455_v63, %v341_v13  ;;  %v444_v13 = vadd.f32 %v9801_v47, %v329_v61  ;;  %v423_v61 = vadd.f32 %v9685_v6, %v9785_v40  ;;  %v420_v63 = vadd.f32 %v9667_v2, %v9773_v35  ;;  %v464_v6 = vld [vmem:[%s16035_s30] sm:$0xff]  ;;  %v7829_v47 = vld [vmem:[%s16035_s30 + $0x90] sm:$0xff] }
 0x17d   :  { %v548_v33 = vpop.f32.mrf.mxu3 }
 0x17e   :  { %v344_v34 = vpop.f32.mrf.mxu1 }
 0x17f   :  { %v459_v43 = vadd.f32 %v458_v25, %v344_v34  ;;  %v447_v25 = vadd.f32 %v9813_v5, %v332_v58  ;;  %v16043_v34 = vld [vmem:[#allocation35_spill] sm:$0xff] }
 0x180   :  { %v616_v37 = vpop.f32.mrf.mxu0  ;;  %v468_v5 = vld [vmem:[%s16035_s30 + $0x20] sm:$0xff] }
 0x183   :  { %7883 = vmatmul.msk.f32.gmra.mxu0 %vm15963_vm2, %v9558_v53  ;;  %v9869_v53 = vpop.f32.mrf.mxu2 }
 0x185   :  { %v551_v45 = vpop.f32.mrf.mxu3 }
 0x186   :  { %v347_v15 = vpop.f32.mrf.mxu1 }
 0x187   :  { %v462_v41 = vadd.f32 %v461_v27, %v347_v15  ;;  %v617_v15 = vadd.f32 %v616_v37, %v551_v45  ;;  %v614_v27 = vadd.f32 %v613_v11, %v548_v33  ;;  %v435_v11 = vadd.f32 %v9761_v30, %v9823_v12  ;;  %v16041_v30 = vld [vmem:[#allocation37_spill] sm:$0xff]  ;;  %v16042_v33 = vld [vmem:[#allocation36_spill] sm:$0xff] }
 0x188   :  { %v619_v48 = vpop.f32.mrf.mxu0  ;;  %v575_v35 = vadd.f32 %v16043_v34, %v16042_v33  ;;  %v465_v37 = vld [vmem:[%s16035_s30 + $0x8] sm:$0xff]  ;;  %v7901_v33 = vld [vmem:[%s15987_s10 + $0xc0] sm:$0xff] }
 0x189   :  { %704 = vmatpush.msrb.mxu3 %v462_v41  ;;  %v469_v12 = vld [vmem:[%s16035_s30 + $0x28] sm:$0xff] }
 0x18b   :  { %705 = vmatpush.msrb.mxu3 %v459_v43  ;;  %7884 = vmatmul.msk.f32.gmra.mxu0 %vm15963_vm2, %v9573_v55  ;;  %v9882_v58 = vpop.f32.mrf.mxu2  ;;  %v466_v43 = vld [vmem:[%s16035_s30 + $0x10] sm:$0xff] }
 0x18d   :  { %v554_v39 = vpop.f32.mrf.mxu3  ;;  %706 = vmatpush.msrb.mxu3 %v456_v51  ;;  %v611_v51 = vadd.f32 %v610_v17, %v545_v32  ;;  %v602_v17 = vadd.f32 %v9845_v60, %v9849_v59  ;;  %v599_v32 = vadd.f32 %v9839_v1, %v9843_v62  ;;  %v593_v60 = vadd.f32 %v9825_v20, %v9829_v29  ;;  %v16040_v29 = vld [vmem:[#allocation38_spill] sm:$0xff]  ;;  %v7832_v20 = vld [vmem:[%s16035_s30 + $0xa8] sm:$0xff] }
 0x18e   :  { %v620_v49 = vadd.f32 %v619_v48, %v554_v39  ;;  %v441_v39 = vadd.f32 %v9789_v42, %v326_v3  ;;  %v438_v48 = vadd.f32 %v9775_v36, %v9831_v26  ;;  %v590_v62 = vadd.f32 %v9817_v9, %v9821_v10  ;;  %v16034_v3 = vld [vmem:[#allocation27_spill] sm:$0xff]  ;;  %v7828_v42 = vld [vmem:[%s16035_s30 + $0x88] sm:$0xff] }
 0x18f   :  { %707 = vmatpush.msrb.mxu3 %v453_v46  ;;  %v587_v1 = vadd.f32 %v9807_v52, %v9811_v4  ;;  %v417_v7 = vadd.f32 %v16034_v3, %v9763_v31  ;;  %v16039_v26 = vld [vmem:[#allocation39_spill] sm:$0xff]  ;;  %v578_v31 = vadd.f32 %v16041_v30, %v16040_v29  ;;  %v7830_v4 = vld [vmem:[%s16035_s30 + $0x98] sm:$0xff]  ;;  %v7902_v30 = vld [vmem:[%s15987_s10 + $0xc8] sm:$0xff] }
 0x190   :  { %639 = vmatpush.msrb.mxu1 %v620_v49  ;;  %v9871_v38 = vpop.f32.mrf.mxu0  ;;  %v581_v28 = vadd.f32 %v16039_v26, %v16038_v24  ;;  %v7827_v36 = vld [vmem:[%s16035_s30 + $0x80] sm:$0xff]  ;;  %v467_v49 = vld [vmem:[%s16035_s30 + $0x18] sm:$0xff]  ;;  %v7903_v24 = vld [vmem:[%s15987_s10 + $0xd0] sm:$0xff] }
 0x191   :  { %708 = vmatpush.msrb.mxu3 %v450_v0  ;;  %v7831_v10 = vld [vmem:[%s16035_s30 + $0xa0] sm:$0xff]  ;;  %v475_v3 = vld [vmem:[%s16035_s30 + $0x58] sm:$0xff] }
 0x192   :  { %640 = vmatpush.msrb.mxu1 %v617_v15  ;;  %v470_v15 = vld [vmem:[%s16035_s30 + $0x30] sm:$0xff]  ;;  %v7838_v26 = vld [vmem:[%s16035_s30 + $0xd8] sm:$0xff] }
 0x193   :  { %709 = vmatpush.msrb.mxu3 %v447_v25  ;;  %v9906_v0 = vpop.f32.mrf.mxu2  ;;  %v7910_v29 = vld [vmem:[%s16000_s3 + $0x38] sm:$0xff] }
 0x194   :  { %641 = vmatpush.msrb.mxu1 %v614_v27 }
 0x195   :  { %710 = vmatpush.msrb.mxu3 %v444_v13  ;;  %v7833_v13 = vld [vmem:[%s16035_s30 + $0xb0] sm:$0xff] }
 0x196   :  { %642 = vmatpush.msrb.mxu1 %v611_v51  ;;  %v471_v51 = vld [vmem:[%s16035_s30 + $0x38] sm:$0xff] }
 0x197   :  { %711 = vmatpush.msrb.mxu3 %v441_v39 }
 0x198   :  { %643 = vmatpush.msrb.mxu1 %v608_v21  ;;  %v9878_v45 = vpop.f32.mrf.mxu0 }
 0x199   :  { %712 = vmatpush.msrb.mxu3 %v438_v48  ;;  %v7834_v48 = vld [vmem:[%s16035_s30 + $0xb8] sm:$0xff] }
 0x19a   :  { %644 = vmatpush.msrb.mxu1 %v605_v54  ;;  %v472_v54 = vld [vmem:[%s16035_s30 + $0x40] sm:$0xff] }
 0x19b   :  { %713 = vmatpush.msrb.mxu3 %v435_v11  ;;  %v9931_v40 = vpop.f32.mrf.mxu2 }
 0x19c   :  { %645 = vmatpush.msrb.mxu1 %v602_v17 }
 0x19d   :  { %714 = vmatpush.msrb.mxu3 %v432_v19  ;;  %v7835_v19 = vld [vmem:[%s16035_s30 + $0xc0] sm:$0xff] }
 0x19e   :  { %646 = vmatpush.msrb.mxu1 %v599_v32  ;;  %v473_v32 = vld [vmem:[%s16035_s30 + $0x48] sm:$0xff] }
 0x19f   :  { %715 = vmatpush.msrb.mxu3 %v429_v23 }
 0x1a0   :  { %647 = vmatpush.msrb.mxu1 %v596_v56  ;;  %v9896_v59 = vpop.f32.mrf.mxu0 }
 0x1a1   :  { %716 = vmatpush.msrb.mxu3 %v426_v57  ;;  %v7836_v57 = vld [vmem:[%s16035_s30 + $0xc8] sm:$0xff] }
 0x1a2   :  { %648 = vmatpush.msrb.mxu1 %v593_v60  ;;  %v474_v60 = vld [vmem:[%s16035_s30 + $0x50] sm:$0xff] }
 0x1a3   :  { %717 = vmatpush.msrb.mxu3 %v423_v61  ;;  %v9941_v44 = vpop.f32.mrf.mxu2 }
 0x1a4   :  { %649 = vmatpush.msrb.mxu1 %v590_v62  ;;  %v7908_v62 = vld [vmem:[%s15987_s10 + $0xf8] sm:$0xff] }
 0x1a5   :  { %718 = vmatpush.msrb.mxu3 %v420_v63  ;;  %1094 = vmatpush.msra.mxu2 %v7908_v62  ;;  %v7907_v63 = vld [vmem:[%s15987_s10 + $0xf0] sm:$0xff] }
 0x1a6   :  { %650 = vmatpush.msrb.mxu1 %v587_v1  ;;  %v7837_v1 = vld [vmem:[%s16035_s30 + $0xd0] sm:$0xff] }
 0x1a7   :  { %719 = vmatpush.msrb.mxu3 %v417_v7  ;;  %1095 = vmatpush.msra.mxu2 %v7907_v63  ;;  %v7906_v7 = vld [vmem:[%s15987_s10 + $0xe8] sm:$0xff]  ;;  %v16063_v62 = vld [vmem:[#allocation21_spill] sm:$0xff]  ;;  %v16064_v63 = vld [vmem:[#allocation10_spill] sm:$0xff] }
 0x1a8   :  { %651 = vmatpush.msrb.mxu1 %v584_v22  ;;  %720 = vmatmul.f32.vlgmr.msrb.gmra.mxu3 %v464_v6  ;;  %v9917_v2 = vpop.f32.mrf.mxu0  ;;  %v7904_v22 = vld [vmem:[%s15987_s10 + $0xd8] sm:$0xff] }
 0x1a9   :  { %1096 = vmatpush.msra.mxu2 %v7906_v7  ;;  %1035 = vmatpush.msra.mxu3 %v7910_v29  ;;  %v7888_v7 = vld [vmem:[%s16035_s30 + $0x118] sm:$0xff] }
 0x1aa   :  { %652 = vmatpush.msrb.mxu1 %v581_v28  ;;  %v476_v28 = vld [vmem:[%s16035_s30 + $0x60] sm:$0xff] }
 0x1ab   :  { %v9953_v52 = vpop.f32.mrf.mxu2  ;;  %1097 = vmatpush.msra.mxu2 %v7905_v14  ;;  %v16068_v14 = vld [vmem:[#allocation11_spill] sm:$0xff] }
 0x1ac   :  { %653 = vmatpush.msrb.mxu1 %v578_v31  ;;  %v7909_v31 = vld [vmem:[%s16000_s3 + $0x30] sm:$0xff] }
 0x1ad   :  { %1098 = vmatpush.msra.mxu2 %v7904_v22  ;;  %1036 = vmatpush.msra.mxu3 %v7909_v31  ;;  %v7890_v31 = vld [vmem:[%s16035_s30 + $0x128] sm:$0xff] }
 0x1ae   :  { %654 = vmatpush.msrb.mxu1 %v575_v35 }
 0x1af   :  { %655 = vmatmul.f32.vlgmr.msrb.gmra.mxu1 %v7827_v36  ;;  %1099 = vmatpush.msra.mxu2 %v7903_v24  ;;  %v7889_v24 = vld [vmem:[%s16035_s30 + $0x120] sm:$0xff] }
 0x1b0   :  { %723 = vmatmul.f32.gmra.mxu3 %v465_v37  ;;  %v9933_v41 = vpop.f32.mrf.mxu0  ;;  %v16044_v37 = vld [vmem:[#allocation3_spill] sm:$0xff] }
 0x1b1   :  { %1100 = vmatpush.msra.mxu2 %v7902_v30 }
 0x1b3   :  { %v9963_v9 = vpop.f32.mrf.mxu2  ;;  %1101 = vmatpush.msra.mxu2 %v7901_v33  ;;  %v16075_v33 = vld [vmem:[#allocation24_spill] sm:$0xff] }
 0x1b4   :  { %7927 = vmatmul.msk.f32.vlgmr.msra.gmra.mxu2 %vm15963_vm2, %v16044_v37  ;;  %v7891_v37 = vld [vmem:[%s16035_s30 + $0x130] sm:$0xff] }
 0x1b7   :  { %658 = vmatmul.f32.gmra.mxu1 %v7828_v42 }
 0x1b8   :  { %726 = vmatmul.f32.gmra.mxu3 %v466_v43  ;;  %v9943_v46 = vpop.f32.mrf.mxu0  ;;  %v7839_v43 = vld [vmem:[%s16035_s30 + $0xe0] sm:$0xff] }
 0x1bb   :  { %v9979_v25 = vpop.f32.mrf.mxu2 }
 0x1bf   :  { %661 = vmatmul.f32.gmra.mxu1 %v7829_v47  ;;  %v477_v47 = vld [vmem:[%s16035_s30 + $0x68] sm:$0xff] }
 0x1c0   :  { %729 = vmatmul.f32.gmra.mxu3 %v467_v49  ;;  %v9951_v50 = vpop.f32.mrf.mxu0 }
 0x1c3   :  { %v9989_v39 = vpop.f32.mrf.mxu2 }
 0x1c7   :  { %664 = vmatmul.f32.gmra.mxu1 %v7830_v4 }
 0x1c8   :  { %732 = vmatmul.f32.gmra.mxu3 %v468_v5  ;;  %v9961_v8 = vpop.f32.mrf.mxu0  ;;  %v16045_v5 = vld [vmem:[#allocation4_spill] sm:$0xff] }
 0x1c9   :  { %7928 = vmatmul.msk.f32.gmra.mxu2 %vm15963_vm2, %v16045_v5  ;;  %v16083_v5 = vld [vmem:[#allocation26_spill] sm:$0xff] }
 0x1cb   :  { %v834_v17 = vpop.f32.mrf.mxu2 }
 0x1cf   :  { %667 = vmatmul.f32.gmra.mxu1 %v7831_v10 }
 0x1d0   :  { %735 = vmatmul.f32.gmra.mxu3 %v469_v12  ;;  %v9971_v18 = vpop.f32.mrf.mxu0 }
 0x1d3   :  { %v837_v56 = vpop.f32.mrf.mxu2 }
 0x1d7   :  { %670 = vmatmul.f32.gmra.mxu1 %v7832_v20  ;;  %v7840_v20 = vld [vmem:[%s16035_s30 + $0xe8] sm:$0xff] }
 0x1d8   :  { %738 = vmatmul.f32.gmra.mxu3 %v470_v15  ;;  %v9981_v27 = vpop.f32.mrf.mxu0  ;;  %v478_v15 = vld [vmem:[%s16035_s30 + $0x70] sm:$0xff] }
 0x1db   :  { %v840_v6 = vpop.f32.mrf.mxu2 }
 0x1df   :  { %673 = vmatmul.f32.gmra.mxu1 %v7833_v13  ;;  %v891_v13 = vadd.f32 %v9981_v27, %v9963_v9  ;;  %v7841_v9 = vld [vmem:[%s16035_s30 + $0xf0] sm:$0xff] }
 0x1e0   :  { %741 = vmatmul.f32.gmra.mxu3 %v471_v51  ;;  %v9991_v21 = vpop.f32.mrf.mxu0  ;;  %v888_v51 = vadd.f32 %v9971_v18, %v9953_v52  ;;  %v479_v52 = vld [vmem:[%s16035_s30 + $0x78] sm:$0xff]  ;;  %v879_v18 = vadd.f32 %v9943_v46, %v9906_v0  ;;  %v16049_v46 = vld [vmem:[#allocation44_spill] sm:$0xff] }
 0x1e1   :  { %v894_v12 = vadd.f32 %v9991_v21, %v9979_v25  ;;  %v16046_v25 = vld [vmem:[#allocation5_spill] sm:$0xff]  ;;  %v882_v21 = vadd.f32 %v9951_v50, %v9931_v40  ;;  %v16047_v40 = vld [vmem:[#allocation6_spill] sm:$0xff]  ;;  %v873_v50 = vadd.f32 %v9917_v2, %v9869_v53  ;;  %v16052_v53 = vld [vmem:[#allocation7_spill] sm:$0xff] }
 0x1e2   :  { %7929 = vmatmul.msk.f32.gmra.mxu2 %vm15963_vm2, %v16046_v25  ;;  %v7842_v0 = vld [vmem:[%s16035_s30 + $0xf8] sm:$0xff] }
 0x1e3   :  { %v843_v34 = vpop.f32.mrf.mxu2 }
 0x1e7   :  { %676 = vmatmul.f32.gmra.mxu1 %v7834_v48 }
 0x1e8   :  { %744 = vmatmul.f32.gmra.mxu3 %v472_v54  ;;  %v896_v11 = vpop.f32.mrf.mxu0  ;;  %v16051_v54 = vld [vmem:[#allocation18_spill] sm:$0xff] }
 0x1e9   :  { %v897_v10 = vadd.f32 %v896_v11, %v9989_v39  ;;  %v885_v39 = vadd.f32 %v9961_v8, %v9941_v44  ;;  %v876_v44 = vadd.f32 %v9933_v41, %v9882_v58  ;;  %v16048_v8 = vld [vmem:[#allocation45_spill] sm:$0xff]  ;;  %v867_v58 = vadd.f32 %v9878_v45, %v16049_v46  ;;  %v16050_v41 = vld [vmem:[#allocation43_spill] sm:$0xff]  ;;  %v16095_v46 = vld [vmem:[#allocation30_spill] sm:$0xff] }
 0x1ea   :  { %7930 = vmatmul.msk.f32.gmra.mxu2 %vm15963_vm2, %v16047_v40  ;;  %v870_v27 = vadd.f32 %v9896_v59, %v16048_v8  ;;  %v864_v48 = vadd.f32 %v9871_v38, %v16050_v41  ;;  %v7885_v45 = vld [vmem:[%s16035_s30 + $0x100] sm:$0xff]  ;;  %v16056_v38 = vld [vmem:[#allocation8_spill] sm:$0xff]  ;;  %v7965_v40 = vld [vmem:[%s15987_s10 + $0x130] sm:$0xff] }
 0x1eb   :  { %v16055_v11 = vld [vmem:[#allocation19_spill] sm:$0xff]  ;;  %v7895_v8 = vld [vmem:[%s16035_s30 + $0x150] sm:$0xff] }
 0x1ef   :  { %679 = vmatmul.f32.gmra.mxu1 %v7835_v19 }
 0x1f0   :  { %747 = vmatmul.f32.gmra.mxu3 %v473_v32  ;;  %v899_v23 = vpop.f32.mrf.mxu0  ;;  %v7886_v32 = vld [vmem:[%s16035_s30 + $0x108] sm:$0xff] }
 0x1f1   :  { %v900_v4 = vadd.f32 %v899_v23, %v834_v17  ;;  %v16059_v23 = vld [vmem:[#allocation20_spill] sm:$0xff] }
 0x1f2   :  { %7931 = vmatmul.msk.f32.gmra.mxu2 %vm15963_vm2, %v16052_v53 }
 0x1f7   :  { %682 = vmatmul.f32.gmra.mxu1 %v7836_v57 }
 0x1f8   :  { %750 = vmatmul.f32.gmra.mxu3 %v474_v60  ;;  %v902_v61 = vpop.f32.mrf.mxu0 }
 0x1f9   :  { %v903_v49 = vadd.f32 %v902_v61, %v837_v56  ;;  %v16060_v56 = vld [vmem:[#allocation9_spill] sm:$0xff] }
 0x1fa   :  { %7932 = vmatmul.msk.f32.gmra.mxu2 %vm15963_vm2, %v16056_v38  ;;  %v7887_v61 = vld [vmem:[%s16035_s30 + $0x110] sm:$0xff]  ;;  %v7960_v38 = vld [vmem:[%s15987_s10 + $0x108] sm:$0xff] }
 0x1ff   :  { %685 = vmatmul.f32.gmra.mxu1 %v7837_v1 }
 0x200   :  { %753 = vmatmul.f32.gmra.mxu3 %v475_v3  ;;  %v905_v16 = vpop.f32.mrf.mxu0 }
 0x201   :  { %v906_v42 = vadd.f32 %v905_v16, %v840_v6  ;;  %v16067_v6 = vld [vmem:[#allocation22_spill] sm:$0xff] }
 0x202   :  { %7933 = vmatmul.msk.f32.gmra.mxu2 %vm15963_vm2, %v16060_v56 }
 0x207   :  { %688 = vmatmul.f32.gmra.mxu1 %v7838_v26  ;;  %v16071_v26 = vld [vmem:[#allocation23_spill] sm:$0xff] }
 0x208   :  { %756 = vmatmul.f32.gmra.mxu3 %v476_v28  ;;  %v908_v35 = vpop.f32.mrf.mxu0  ;;  %v16072_v28 = vld [vmem:[#allocation12_spill] sm:$0xff] }
 0x209   :  { %v909_v36 = vadd.f32 %v908_v35, %v843_v34  ;;  %v16076_v34 = vld [vmem:[#allocation13_spill] sm:$0xff] }
 0x20a   :  { %7934 = vmatmul.msk.f32.gmra.mxu2 %vm15963_vm2, %v16064_v63 }
 0x20b   :  { %928 = vmatpush.msra.mxu1 %v909_v36 }
 0x20d   :  { %929 = vmatpush.msra.mxu1 %v906_v42  ;;  %v16079_v42 = vld [vmem:[#allocation25_spill] sm:$0xff] }
 0x20f   :  { %691 = vmatmul.f32.gmra.mxu1 %v7839_v43  ;;  %v16080_v43 = vld [vmem:[#allocation14_spill] sm:$0xff] }
 0x210   :  { %930 = vmatpush.msra.mxu1 %v903_v49  ;;  %759 = vmatmul.f32.gmra.mxu3 %v477_v47 }
 0x212   :  { %931 = vmatpush.msra.mxu1 %v900_v4  ;;  %7935 = vmatmul.msk.f32.gmra.mxu2 %vm15963_vm2, %v16068_v14  ;;  %v7892_v4 = vld [vmem:[%s16035_s30 + $0x138] sm:$0xff] }
 0x214   :  { %932 = vmatpush.msra.mxu1 %v897_v10  ;;  %v16084_v10 = vld [vmem:[#allocation15_spill] sm:$0xff] }
 0x216   :  { %933 = vmatpush.msra.mxu1 %v894_v12 }
 0x217   :  { %694 = vmatmul.f32.gmra.mxu1 %v7840_v20 }
 0x218   :  { %934 = vmatpush.msra.mxu1 %v891_v13  ;;  %762 = vmatmul.f32.gmra.mxu3 %v478_v15  ;;  %v7893_v15 = vld [vmem:[%s16035_s30 + $0x140] sm:$0xff]  ;;  %v16087_v13 = vld [vmem:[#allocation28_spill] sm:$0xff] }
 0x21a   :  { %935 = vmatpush.msra.mxu1 %v888_v51  ;;  %7936 = vmatmul.msk.f32.gmra.mxu2 %vm15963_vm2, %v16072_v28  ;;  %v16088_v51 = vld [vmem:[#allocation16_spill] sm:$0xff] }
 0x21b   :  { %v16101_v28 = vld [vmem:[#allocation32_spill] sm:$0xff] }
 0x21c   :  { %936 = vmatpush.msra.mxu1 %v885_v39 }
 0x21e   :  { %937 = vmatpush.msra.mxu1 %v882_v21  ;;  %v7894_v21 = vld [vmem:[%s16035_s30 + $0x148] sm:$0xff] }
 0x21f   :  { %697 = vmatmul.f32.gmra.mxu1 %v7841_v9  ;;  %v16091_v9 = vld [vmem:[#allocation29_spill] sm:$0xff] }
 0x220   :  { %938 = vmatpush.msra.mxu1 %v879_v18  ;;  %765 = vmatmul.f32.gmra.mxu3 %v479_v52  ;;  %v7966_v52 = vld [vmem:[%s15987_s10 + $0x138] sm:$0xff]  ;;  %v16092_v18 = vld [vmem:[#allocation17_spill] sm:$0xff] }
 0x221   :  { %1334 = vmatpush.msrb.mxu3 %v7966_v52  ;;  %v16107_v52 = vld [vmem:[#allocation34_spill] sm:$0xff] }
 0x222   :  { %939 = vmatpush.msra.mxu1 %v876_v44  ;;  %7937 = vmatmul.msk.f32.gmra.mxu2 %vm15963_vm2, %v16076_v34 }
 0x223   :  { %1335 = vmatpush.msrb.mxu3 %v7965_v40 }
 0x224   :  { %940 = vmatpush.msra.mxu1 %v873_v50 }
 0x226   :  { %941 = vmatpush.msra.mxu1 %v870_v27  ;;  %v7964_v27 = vld [vmem:[%s15987_s10 + $0x128] sm:$0xff] }
 0x227   :  { %700 = vmatmul.f32.gmra.mxu1 %v7842_v0  ;;  %1336 = vmatpush.msrb.mxu3 %v7964_v27  ;;  %v7963_v0 = vld [vmem:[%s15987_s10 + $0x120] sm:$0xff] }
 0x228   :  { %942 = vmatpush.msra.mxu1 %v867_v58  ;;  %7911 = vmatmul.msk.f32.vlgmr.msra.gmra.mxu3 %vm15962_vm3, %v16051_v54  ;;  %v7962_v58 = vld [vmem:[%s15987_s10 + $0x118] sm:$0xff]  ;;  %v10312_v27 = vld [vmem:[%s15989_s11] sm:$0xff] }
 0x229   :  { %1337 = vmatpush.msrb.mxu3 %v7963_v0 }
 0x22a   :  { %943 = vmatpush.msra.mxu1 %v864_v48  ;;  %7938 = vmatmul.msk.f32.gmra.mxu2 %vm15963_vm2, %v16080_v43  ;;  %v7961_v48 = vld [vmem:[%s15987_s10 + $0x110] sm:$0xff] }
 0x22b   :  { %v10109_v59 = vpop.f32.mrf.mxu3  ;;  %1338 = vmatpush.msrb.mxu3 %v7962_v58 }
 0x22c   :  { %16053 = vst [vmem:[#allocation27_spill] sm:$0xff] %v10109_v59  ;;  %v10111_v2 = vpop.f32.mrf.mxu1 }
 0x22d   :  { %16054 = vst [vmem:[#allocation42_spill] sm:$0xff] %v10111_v2  ;;  %1339 = vmatpush.msrb.mxu3 %v7961_v48 }
 0x22f   :  { %944 = vmatmul.f32.vlgmr.msra.gmra.mxu1 %v7885_v45  ;;  %v7896_v45 = vld [vmem:[%s16035_s30 + $0x158] sm:$0xff]  ;;  %1340 = vmatpush.msrb.mxu3 %v7960_v38 }
 0x230   :  { %7912 = vmatmul.msk.f32.gmra.mxu3 %vm15962_vm3, %v16055_v11 }
 0x232   :  { %7939 = vmatmul.msk.f32.gmra.mxu2 %vm15963_vm2, %v16084_v10 }
 0x233   :  { %v10120_v17 = vpop.f32.mrf.mxu3 }
 0x234   :  { %16057 = vst [vmem:[#allocation41_spill] sm:$0xff] %v10120_v17  ;;  %v10122_v19 = vpop.f32.mrf.mxu1 }
 0x235   :  { %16058 = vst [vmem:[#allocation40_spill] sm:$0xff] %v10122_v19 }
 0x237   :  { %947 = vmatmul.f32.gmra.mxu1 %v7886_v32  ;;  %v16098_v32 = vld [vmem:[#allocation31_spill] sm:$0xff]  ;;  %v10273_v14 = vpop.f32.mrf.mxu2 }
 0x238   :  { %7913 = vmatmul.msk.f32.gmra.mxu3 %vm15962_vm3, %v16059_v23 }
 0x23a   :  { %7940 = vmatmul.msk.f32.gmra.mxu2 %vm15963_vm2, %v16088_v51  ;;  %v7899_v51 = vld [vmem:[%s16035_s30 + $0x170] sm:$0xff] }
 0x23b   :  { %v10131_v57 = vpop.f32.mrf.mxu3 }
 0x23c   :  { %16061 = vst [vmem:[#allocation39_spill] sm:$0xff] %v10131_v57  ;;  %v10133_v60 = vpop.f32.mrf.mxu1 }
 0x23d   :  { %16062 = vst [vmem:[#allocation38_spill] sm:$0xff] %v10133_v60 }
 0x23f   :  { %950 = vmatmul.f32.gmra.mxu1 %v7887_v61  ;;  %v7968_v61 = vld [vmem:[%s16000_s3 + $0x48] sm:$0xff] }
 0x240   :  { %7914 = vmatmul.msk.f32.gmra.mxu3 %vm15962_vm3, %v16063_v62  ;;  %1275 = vmatpush.msrb.mxu1 %v7968_v61 }
 0x242   :  { %7941 = vmatmul.msk.f32.gmra.mxu2 %vm15963_vm2, %v16092_v18 }
 0x243   :  { %v10142_v1 = vpop.f32.mrf.mxu3 }
 0x244   :  { %16065 = vst [vmem:[#allocation37_spill] sm:$0xff] %v10142_v1  ;;  %v10144_v3 = vpop.f32.mrf.mxu1 }
 0x245   :  { %16066 = vst [vmem:[#allocation36_spill] sm:$0xff] %v10144_v3 }
 0x247   :  { %953 = vmatmul.f32.gmra.mxu1 %v7888_v7  ;;  %v7897_v7 = vld [vmem:[%s16035_s30 + $0x160] sm:$0xff] }
 0x248   :  { %7915 = vmatmul.msk.f32.gmra.mxu3 %vm15962_vm3, %v16067_v6 }
 0x24a   :  { %7942 = vmatmul.msk.f32.gmra.mxu2 %vm15963_vm2, %v9573_v55  ;;  %v7959_v55 = vld [vmem:[%s15987_s10 + $0x100] sm:$0xff] }
 0x24b   :  { %v10153_v16 = vpop.f32.mrf.mxu3  ;;  %1341 = vmatpush.msrb.mxu3 %v7959_v55 }
 0x24c   :  { %16069 = vst [vmem:[#allocation35_spill] sm:$0xff] %v10153_v16  ;;  %v10155_v22 = vpop.f32.mrf.mxu1  ;;  %v10287_v43 = vpop.f32.mrf.mxu2 }
 0x24d   :  { %16070 = vst [vmem:[#allocation3_spill] sm:$0xff] %v10155_v22 }
 0x24f   :  { %956 = vmatmul.f32.gmra.mxu1 %v7889_v24  ;;  %v7967_v24 = vld [vmem:[%s16000_s3 + $0x40] sm:$0xff] }
 0x250   :  { %7916 = vmatmul.msk.f32.gmra.mxu3 %vm15962_vm3, %v16071_v26  ;;  %1276 = vmatpush.msrb.mxu1 %v7967_v24 }
 0x253   :  { %v10164_v29 = vpop.f32.mrf.mxu3 }
 0x254   :  { %16073 = vst [vmem:[#allocation4_spill] sm:$0xff] %v10164_v29  ;;  %v10166_v30 = vpop.f32.mrf.mxu1 }
 0x255   :  { %16074 = vst [vmem:[#allocation5_spill] sm:$0xff] %v10166_v30 }
 0x257   :  { %959 = vmatmul.f32.gmra.mxu1 %v7890_v31 }
 0x258   :  { %7917 = vmatmul.msk.f32.gmra.mxu3 %vm15962_vm3, %v16075_v33 }
 0x25b   :  { %v10175_v35 = vpop.f32.mrf.mxu3 }
 0x25c   :  { %16077 = vst [vmem:[#allocation6_spill] sm:$0xff] %v10175_v35  ;;  %v10177_v36 = vpop.f32.mrf.mxu1 }
 0x25d   :  { %16078 = vst [vmem:[#allocation45_spill] sm:$0xff] %v10177_v36 }
 0x25f   :  { %962 = vmatmul.f32.gmra.mxu1 %v7891_v37  ;;  %v7898_v37 = vld [vmem:[%s16035_s30 + $0x168] sm:$0xff] }
 0x260   :  { %7918 = vmatmul.msk.f32.gmra.mxu3 %vm15962_vm3, %v16079_v42 }
 0x263   :  { %v10186_v47 = vpop.f32.mrf.mxu3 }
 0x264   :  { %16081 = vst [vmem:[#allocation44_spill] sm:$0xff] %v10186_v47  ;;  %v10188_v49 = vpop.f32.mrf.mxu1 }
 0x265   :  { %16082 = vst [vmem:[#allocation43_spill] sm:$0xff] %v10188_v49 }
 0x267   :  { %965 = vmatmul.f32.gmra.mxu1 %v7892_v4  ;;  %v16104_v4 = vld [vmem:[#allocation33_spill] sm:$0xff] }
 0x268   :  { %7919 = vmatmul.msk.f32.gmra.mxu3 %vm15962_vm3, %v16083_v5 }
 0x26b   :  { %v10197_v12 = vpop.f32.mrf.mxu3 }
 0x26c   :  { %16085 = vst [vmem:[#allocation7_spill] sm:$0xff] %v10197_v12  ;;  %v10199_v20 = vpop.f32.mrf.mxu1  ;;  %v10415_v12 = vld [vmem:[%s15989_s11 + $0x38] sm:$0xff] }
 0x26d   :  { %16086 = vst [vmem:[#allocation8_spill] sm:$0xff] %v10199_v20 }
 0x26f   :  { %968 = vmatmul.f32.gmra.mxu1 %v7893_v15 }
 0x270   :  { %7920 = vmatmul.msk.f32.gmra.mxu3 %vm15962_vm3, %v16087_v13 }
 0x273   :  { %v10208_v25 = vpop.f32.mrf.mxu3 }
 0x274   :  { %16089 = vst [vmem:[#allocation9_spill] sm:$0xff] %v10208_v25  ;;  %v10210_v39 = vpop.f32.mrf.mxu1 }
 0x275   :  { %16090 = vst [vmem:[#allocation10_spill] sm:$0xff] %v10210_v39 }
 0x277   :  { %971 = vmatmul.f32.gmra.mxu1 %v7894_v21  ;;  %v10298_v21 = vpop.f32.mrf.mxu2 }
 0x278   :  { %7921 = vmatmul.msk.f32.gmra.mxu3 %vm15962_vm3, %v16091_v9 }
 0x27b   :  { %v10222_v44 = vpop.f32.mrf.mxu3 }
 0x27c   :  { %16093 = vst [vmem:[#allocation11_spill] sm:$0xff] %v10222_v44  ;;  %v10227_v50 = vpop.f32.mrf.mxu1  ;;  %v10400_v44 = vld [vmem:[%s15989_s11 + $0x30] sm:$0xff] }
 0x27d   :  { %16094 = vst [vmem:[#allocation12_spill] sm:$0xff] %v10227_v50 }
 0x27f   :  { %974 = vmatmul.f32.gmra.mxu1 %v7895_v8  ;;  %v7900_v8 = vld [vmem:[%s16035_s30 + $0x178] sm:$0xff]  ;;  %v10316_v0 = vpop.f32.mrf.mxu2 }
 0x280   :  { %7922 = vmatmul.msk.f32.gmra.mxu3 %vm15962_vm3, %v16095_v46 }
 0x283   :  { %v10245_v41 = vpop.f32.mrf.mxu3 }
 0x284   :  { %16096 = vst [vmem:[#allocation13_spill] sm:$0xff] %v10245_v41  ;;  %v10250_v53 = vpop.f32.mrf.mxu1 }
 0x285   :  { %16097 = vst [vmem:[#allocation14_spill] sm:$0xff] %v10250_v53 }
 0x287   :  { %977 = vmatmul.f32.gmra.mxu1 %v7896_v45  ;;  %v10327_v45 = vld [vmem:[%s15989_s11 + $0x8] sm:$0xff]  ;;  %v10333_v55 = vpop.f32.mrf.mxu2 }
 0x288   :  { %7923 = vmatmul.msk.f32.gmra.mxu3 %vm15962_vm3, %v16098_v32 }
 0x28b   :  { %v10263_v56 = vpop.f32.mrf.mxu3 }
 0x28c   :  { %16099 = vst [vmem:[#allocation15_spill] sm:$0xff] %v10263_v56  ;;  %v10268_v63 = vpop.f32.mrf.mxu1  ;;  %v10385_v56 = vld [vmem:[%s15989_s11 + $0x28] sm:$0xff] }
 0x28d   :  { %16100 = vst [vmem:[#allocation16_spill] sm:$0xff] %v10268_v63 }
 0x28f   :  { %980 = vmatmul.f32.gmra.mxu1 %v7897_v7  ;;  %v10342_v7 = vld [vmem:[%s15989_s11 + $0x10] sm:$0xff] }
 0x290   :  { %7924 = vmatmul.msk.f32.gmra.mxu3 %vm15962_vm3, %v16101_v28 }
 0x293   :  { %v10280_v31 = vpop.f32.mrf.mxu3 }
 0x294   :  { %16102 = vst [vmem:[#allocation17_spill] sm:$0xff] %v10280_v31  ;;  %v10282_v34 = vpop.f32.mrf.mxu1 }
 0x295   :  { %16103 = vst [vmem:[#allocation46_spill] sm:$0xff] %v10282_v34 }
 0x297   :  { %983 = vmatmul.f32.gmra.mxu1 %v7898_v37 }
 0x298   :  { %7925 = vmatmul.msk.f32.gmra.mxu3 %vm15962_vm3, %v16104_v4 }
 0x29b   :  { %v10291_v10 = vpop.f32.mrf.mxu3 }
 0x29c   :  { %16105 = vst [vmem:[#allocation47_spill] sm:$0xff] %v10291_v10  ;;  %v10293_v15 = vpop.f32.mrf.mxu1 }
 0x29d   :  { %16106 = vst [vmem:[#allocation48_spill] sm:$0xff] %v10293_v15  ;;  %v10372_v15 = vld [vmem:[%s15989_s11 + $0x20] sm:$0xff] }
 0x29f   :  { %986 = vmatmul.f32.gmra.mxu1 %v7899_v51  ;;  %v10350_v51 = vpop.f32.mrf.mxu2 }
 0x2a0   :  { %7926 = vmatmul.msk.f32.gmra.mxu3 %vm15962_vm3, %v16107_v52 }
 0x2a3   :  { %v10302_v18 = vpop.f32.mrf.mxu3 }
 0x2a4   :  { %16108 = vst [vmem:[#allocation34_spill] sm:$0xff] %v10302_v18  ;;  %v10304_v40 = vpop.f32.mrf.mxu1 }
 0x2a5   :  { %16109 = vst [vmem:[#allocation49_spill] sm:$0xff] %v10304_v40 }
 0x2a7   :  { %989 = vmatmul.f32.gmra.mxu1 %v7900_v8  ;;  %v10357_v8 = vld [vmem:[%s15989_s11 + $0x18] sm:$0xff]  ;;  %v10367_v10 = vpop.f32.mrf.mxu2 }
 0x2a8   :  { %7985 = vmatmul.msk.f32.vlgmr.msrb.gmra.mxu3 %vm15963_vm2, %v10312_v27 }
 0x2ab   :  { %v10318_v58 = vpop.f32.mrf.mxu3 }
 0x2ac   :  { %v10320_v48 = vpop.f32.mrf.mxu1 }
 0x2ad   :  { %16110 = vst [vmem:[#allocation50_spill] sm:$0xff] %v10320_v48 }
 0x2af   :  { %7969 = vmatmul.msk.f32.vlgmr.msrb.gmra.mxu1 %vm15962_vm3, %v16051_v54  ;;  %v10389_v63 = vpop.f32.mrf.mxu2 }
 0x2b0   :  { %7986 = vmatmul.msk.f32.gmra.mxu3 %vm15963_vm2, %v10327_v45 }
 0x2b3   :  { %v10331_v38 = vpop.f32.mrf.mxu3 }
 0x2b4   :  { %v10335_v61 = vpop.f32.mrf.mxu1 }
 0x2b5   :  { %16111 = vst [vmem:[#allocation51_spill] sm:$0xff] %v10335_v61 }
 0x2b7   :  { %7970 = vmatmul.msk.f32.gmra.mxu1 %vm15962_vm3, %v16055_v11  ;;  %v10406_v25 = vpop.f32.mrf.mxu2 }
 0x2b8   :  { %7987 = vmatmul.msk.f32.gmra.mxu3 %vm15963_vm2, %v10342_v7 }
 0x2bb   :  { %v10346_v24 = vpop.f32.mrf.mxu3 }
 0x2bc   :  { %v10348_v37 = vpop.f32.mrf.mxu1 }
 0x2bd   :  { %16112 = vst [vmem:[#allocation52_spill] sm:$0xff] %v10348_v37 }
 0x2bf   :  { %7971 = vmatmul.msk.f32.gmra.mxu1 %vm15962_vm3, %v16059_v23  ;;  %v1130_v49 = vpop.f32.mrf.mxu2 }
 0x2c0   :  { %7988 = vmatmul.msk.f32.gmra.mxu3 %vm15963_vm2, %v10357_v8 }
 0x2c3   :  { %v10361_v18 = vpop.f32.mrf.mxu3 }
 0x2c4   :  { %v10363_v40 = vpop.f32.mrf.mxu1 }
 0x2c5   :  { %16113 = vst [vmem:[#allocation53_spill] sm:$0xff] %v10363_v40 }
 0x2c7   :  { %7972 = vmatmul.msk.f32.gmra.mxu1 %vm15962_vm3, %v16063_v62 }
 0x2c8   :  { %7989 = vmatmul.msk.f32.gmra.mxu3 %vm15963_vm2, %v10372_v15 }
 0x2cb   :  { %v10376_v31 = vpop.f32.mrf.mxu3 }
 0x2cc   :  { %v10378_v34 = vpop.f32.mrf.mxu1 }
 0x2cd   :  { %16114 = vst [vmem:[#allocation54_spill] sm:$0xff] %v10378_v34 }
 0x2cf   :  { %7973 = vmatmul.msk.f32.gmra.mxu1 %vm15962_vm3, %v16067_v6 }
 0x2d0   :  { %7990 = vmatmul.msk.f32.gmra.mxu3 %vm15963_vm2, %v10385_v56 }
 0x2d3   :  { %v10391_v41 = vpop.f32.mrf.mxu3 }
 0x2d4   :  { %v10393_v53 = vpop.f32.mrf.mxu1 }
 0x2d5   :  { %16115 = vst [vmem:[#allocation55_spill] sm:$0xff] %v10393_v53  ;;  %v1133_v53 = vpop.f32.mrf.mxu2 }
 0x2d7   :  { %7974 = vmatmul.msk.f32.gmra.mxu1 %vm15962_vm3, %v16071_v26 }
 0x2d8   :  { %7991 = vmatmul.msk.f32.gmra.mxu3 %vm15963_vm2, %v10400_v44 }
 0x2db   :  { %v10404_v50 = vpop.f32.mrf.mxu3 }
 0x2dc   :  { %v10408_v39 = vpop.f32.mrf.mxu1 }
 0x2dd   :  { %16116 = vst [vmem:[#allocation56_spill] sm:$0xff] %v10408_v39  ;;  %v10428_v39 = vld [vmem:[%s15989_s11 + $0x40] sm:$0xff]  ;;  %v1136_v34 = vpop.f32.mrf.mxu2 }
 0x2df   :  { %7975 = vmatmul.msk.f32.gmra.mxu1 %vm15962_vm3, %v16075_v33 }
 0x2e0   :  { %7992 = vmatmul.msk.f32.gmra.mxu3 %vm15963_vm2, %v10415_v12 }
 0x2e3   :  { %v10419_v20 = vpop.f32.mrf.mxu3 }
 0x2e4   :  { %v10421_v47 = vpop.f32.mrf.mxu1 }
 0x2e5   :  { %16117 = vst [vmem:[#allocation57_spill] sm:$0xff] %v10421_v47  ;;  %v10439_v47 = vld [vmem:[%s15989_s11 + $0x48] sm:$0xff]  ;;  %v1139_v1 = vpop.f32.mrf.mxu2 }
 0x2e7   :  { %7976 = vmatmul.msk.f32.gmra.mxu1 %vm15962_vm3, %v16079_v42 }
 0x2e8   :  { %7993 = vmatmul.msk.f32.gmra.mxu3 %vm15963_vm2, %v10428_v39 }
 0x2eb   :  { %v1062_v35 = vpop.f32.mrf.mxu3 }
 0x2ec   :  { %v10432_v36 = vpop.f32.mrf.mxu1 }
 0x2ed   :  { %16118 = vst [vmem:[#allocation58_spill] sm:$0xff] %v10432_v36  ;;  %v10450_v36 = vld [vmem:[%s15989_s11 + $0x50] sm:$0xff]  ;;  %v1142_v60 = vpop.f32.mrf.mxu2 }
 0x2ef   :  { %7977 = vmatmul.msk.f32.gmra.mxu1 %vm15962_vm3, %v16083_v5 }
 0x2f0   :  { %7994 = vmatmul.msk.f32.gmra.mxu3 %vm15963_vm2, %v10439_v47 }
 0x2f3   :  { %v1065_v29 = vpop.f32.mrf.mxu3 }
 0x2f4   :  { %v10443_v30 = vpop.f32.mrf.mxu1 }
 0x2f5   :  { %16119 = vst [vmem:[#allocation59_spill] sm:$0xff] %v10443_v30  ;;  %v10461_v30 = vld [vmem:[%s15989_s11 + $0x58] sm:$0xff]  ;;  %v1145_v19 = vpop.f32.mrf.mxu2 }
 0x2f7   :  { %7978 = vmatmul.msk.f32.gmra.mxu1 %vm15962_vm3, %v16087_v13 }
 0x2f8   :  { %7995 = vmatmul.msk.f32.gmra.mxu3 %vm15963_vm2, %v10450_v36 }
 0x2fb   :  { %v1068_v16 = vpop.f32.mrf.mxu3 }
 0x2fc   :  { %v10454_v22 = vpop.f32.mrf.mxu1 }
 0x2fd   :  { %16120 = vst [vmem:[#allocation60_spill] sm:$0xff] %v10454_v22  ;;  %v10472_v22 = vld [vmem:[%s15989_s11 + $0x60] sm:$0xff]  ;;  %v1148_v2 = vpop.f32.mrf.mxu2 }
 0x2fe   :  { %16122 = vst [vmem:[#allocation62_spill] sm:$0xff] %v10472_v22 }
 0x2ff   :  { %7979 = vmatmul.msk.f32.gmra.mxu1 %vm15962_vm3, %v16091_v9 }
 0x300   :  { %7996 = vmatmul.msk.f32.gmra.mxu3 %vm15963_vm2, %v10461_v30 }
 0x303   :  { %v1071_v40 = vpop.f32.mrf.mxu3 }
 0x304   :  { %v10465_v3 = vpop.f32.mrf.mxu1 }
 0x305   :  { %16121 = vst [vmem:[#allocation61_spill] sm:$0xff] %v10465_v3  ;;  %v10483_v3 = vld [vmem:[%s15989_s11 + $0x68] sm:$0xff] }
 0x306   :  { %16124 = vst [vmem:[#allocation64_spill] sm:$0xff] %v10483_v3 }
 0x307   :  { %7980 = vmatmul.msk.f32.gmra.mxu1 %vm15962_vm3, %v16095_v46 }
 0x308   :  { %7997 = vmatmul.msk.f32.gmra.mxu3 %vm15963_vm2, %v10472_v22  ;;  %v1131_v22 = vadd.f32 %v1130_v49, %v1065_v29  ;;  %v1110_v29 = vadd.f32 %v10298_v21, %v10346_v24  ;;  %v1104_v49 = vadd.f32 %v10273_v14, %v10318_v58  ;;  %v7949_v58 = vld [vmem:[%s16035_s30 + $0x1b0] sm:$0xff] }
 0x30b   :  { %v1074_v37 = vpop.f32.mrf.mxu3 }
 0x30c   :  { %v10476_v57 = vpop.f32.mrf.mxu1 }
 0x30d   :  { %16123 = vst [vmem:[#allocation63_spill] sm:$0xff] %v10476_v57  ;;  %v10494_v57 = vld [vmem:[%s15989_s11 + $0x70] sm:$0xff] }
 0x30e   :  { %16126 = vst [vmem:[#allocation66_spill] sm:$0xff] %v10494_v57 }
 0x30f   :  { %7981 = vmatmul.msk.f32.gmra.mxu1 %vm15962_vm3, %v16098_v32 }
 0x310   :  { %7998 = vmatmul.msk.f32.gmra.mxu3 %vm15963_vm2, %v10483_v3  ;;  %v1137_v3 = vadd.f32 %v1136_v34, %v1071_v40 }
 0x313   :  { %v1077_v61 = vpop.f32.mrf.mxu3 }
 0x314   :  { %v10487_v17 = vpop.f32.mrf.mxu1 }
 0x315   :  { %16125 = vst [vmem:[#allocation65_spill] sm:$0xff] %v10487_v17  ;;  %v10505_v17 = vld [vmem:[%s15989_s11 + $0x78] sm:$0xff] }
 0x316   :  { %16128 = vst [vmem:[#allocation68_spill] sm:$0xff] %v10505_v17 }
 0x317   :  { %7982 = vmatmul.msk.f32.gmra.mxu1 %vm15962_vm3, %v16101_v28 }
 0x318   :  { %7999 = vmatmul.msk.f32.gmra.mxu3 %vm15963_vm2, %v10494_v57 }
 0x31b   :  { %v1080_v48 = vpop.f32.mrf.mxu3 }
 0x31c   :  { %v10498_v59 = vpop.f32.mrf.mxu1  ;;  %v1146_v57 = vadd.f32 %v1145_v19, %v1080_v48 }
 0x31d   :  { %16127 = vst [vmem:[#allocation67_spill] sm:$0xff] %v10498_v59  ;;  %v1143_v59 = vadd.f32 %v1142_v60, %v1077_v61 }
 0x31f   :  { %7983 = vmatmul.msk.f32.gmra.mxu1 %vm15962_vm3, %v16104_v4  ;;  %v1140_v4 = vadd.f32 %v1139_v1, %v1074_v37  ;;  %v1119_v1 = vadd.f32 %v10350_v51, %v10391_v41  ;;  %v7951_v37 = vld [vmem:[%s16035_s30 + $0x1c0] sm:$0xff] }
 0x320   :  { %8000 = vmatmul.msk.f32.gmra.mxu3 %vm15963_vm2, %v10505_v17  ;;  %v1134_v17 = vadd.f32 %v1133_v53, %v1068_v16  ;;  %v1113_v16 = vadd.f32 %v10316_v0, %v10361_v18  ;;  %v7948_v18 = vld [vmem:[%s16035_s30 + $0x1a8] sm:$0xff] }
 0x323   :  { %v1083_v28 = vpop.f32.mrf.mxu3 }
 0x324   :  { %v10509_v32 = vpop.f32.mrf.mxu1  ;;  %v1149_v46 = vadd.f32 %v1148_v2, %v1083_v28  ;;  %v1128_v2 = vadd.f32 %v10406_v25, %v1062_v35  ;;  %v1107_v35 = vadd.f32 %v10287_v43, %v10331_v38 }
 0x325   :  { %16129 = vst [vmem:[#allocation69_spill] sm:$0xff] %v10509_v32  ;;  %v16151_v32 = vld [vmem:[#allocation41_spill] sm:$0xff] }
 0x326   :  { %1168 = vmatpush.msrb.mxu0 %v1149_v46  ;;  %v7944_v46 = vld [vmem:[%s16035_s30 + $0x188] sm:$0xff] }
 0x327   :  { %7984 = vmatmul.msk.f32.gmra.mxu1 %vm15962_vm3, %v16107_v52 }
 0x328   :  { %1169 = vmatpush.msrb.mxu0 %v1146_v57  ;;  %v1125_v57 = vadd.f32 %v10389_v63, %v10419_v20  ;;  %v7943_v20 = vld [vmem:[%s16035_s30 + $0x180] sm:$0xff]  ;;  %v7945_v63 = vld [vmem:[%s16035_s30 + $0x190] sm:$0xff] }
 0x32a   :  { %1170 = vmatpush.msrb.mxu0 %v1143_v59  ;;  %v1122_v59 = vadd.f32 %v10367_v10, %v10404_v50 }
 0x32b   :  { %v10513_v9 = vpop.f32.mrf.mxu3 }
 0x32c   :  { %v10515_v13 = vpop.f32.mrf.mxu1  ;;  %1171 = vmatpush.msrb.mxu0 %v1140_v4  ;;  %v7947_v4 = vld [vmem:[%s16035_s30 + $0x1a0] sm:$0xff] }
 0x32e   :  { %1172 = vmatpush.msrb.mxu0 %v1137_v3 }
 0x330   :  { %1173 = vmatpush.msrb.mxu0 %v1134_v17  ;;  %v1116_v17 = vadd.f32 %v10333_v55, %v10376_v31  ;;  %v7946_v31 = vld [vmem:[%s16035_s30 + $0x198] sm:$0xff] }
 0x331   :  { %v7950_v55 = vld [vmem:[%s16035_s30 + $0x1b8] sm:$0xff] }
 0x332   :  { %1174 = vmatpush.msrb.mxu0 %v1131_v22 }
 0x333   :  { %v10518_v19 = vpop.f32.mrf.mxu3 }
 0x334   :  { %v10522_v60 = vpop.f32.mrf.mxu1  ;;  %1175 = vmatpush.msrb.mxu0 %v1128_v2 }
 0x336   :  { %1176 = vmatpush.msrb.mxu0 %v1125_v57  ;;  %v7952_v57 = vld [vmem:[%s16035_s30 + $0x1c8] sm:$0xff] }
 0x338   :  { %1177 = vmatpush.msrb.mxu0 %v1122_v59 }
 0x33a   :  { %1178 = vmatpush.msrb.mxu0 %v1119_v1 }
 0x33b   :  { %v10530_v3 = vpop.f32.mrf.mxu3 }
 0x33c   :  { %v10534_v22 = vpop.f32.mrf.mxu1  ;;  %1179 = vmatpush.msrb.mxu0 %v1116_v17  ;;  %v7953_v17 = vld [vmem:[%s16035_s30 + $0x1d0] sm:$0xff] }
 0x33e   :  { %1180 = vmatpush.msrb.mxu0 %v1113_v16 }
 0x340   :  { %1181 = vmatpush.msrb.mxu0 %v1110_v29 }
 0x342   :  { %1182 = vmatpush.msrb.mxu0 %v1107_v35  ;;  %v8024_v35 = vld [vmem:[%s15987_s10 + $0x178] sm:$0xff] }
 0x343   :  { %v10545_v25 = vpop.f32.mrf.mxu3  ;;  %1574 = vmatpush.msra.mxu1 %v8024_v35 }
 0x344   :  { %v10547_v50 = vpop.f32.mrf.mxu1  ;;  %1183 = vmatpush.msrb.mxu0 %v1104_v49  ;;  %v8023_v49 = vld [vmem:[%s15987_s10 + $0x170] sm:$0xff] }
 0x345   :  { %1184 = vmatmul.f32.vlgmr.msrb.gmra.mxu0 %v7943_v20  ;;  %1575 = vmatpush.msra.mxu1 %v8023_v49  ;;  %v7954_v20 = vld [vmem:[%s16035_s30 + $0x1d8] sm:$0xff]  ;;  %v8025_v49 = vld [vmem:[%s16000_s3 + $0x50] sm:$0xff] }
 0x34b   :  { %v10552_v41 = vpop.f32.mrf.mxu3 }
 0x34c   :  { %v10554_v53 = vpop.f32.mrf.mxu1 }
 0x34d   :  { %1187 = vmatmul.f32.gmra.mxu0 %v7944_v46  ;;  %v8022_v46 = vld [vmem:[%s15987_s10 + $0x168] sm:$0xff] }
 0x34e   :  { %1576 = vmatpush.msra.mxu1 %v8022_v46 }
 0x353   :  { %v10559_v14 = vpop.f32.mrf.mxu3 }
 0x354   :  { %v10561_v28 = vpop.f32.mrf.mxu1 }
 0x355   :  { %1190 = vmatmul.f32.gmra.mxu0 %v7945_v63 }
 0x35b   :  { %v10566_v34 = vpop.f32.mrf.mxu3 }
 0x35c   :  { %v10568_v43 = vpop.f32.mrf.mxu1 }
 0x35d   :  { %1193 = vmatmul.f32.gmra.mxu0 %v7946_v31 }
 0x363   :  { %v10573_v10 = vpop.f32.mrf.mxu3 }
 0x364   :  { %v10575_v21 = vpop.f32.mrf.mxu1 }
 0x365   :  { %1196 = vmatmul.f32.gmra.mxu0 %v7947_v4  ;;  %v8021_v4 = vld [vmem:[%s15987_s10 + $0x160] sm:$0xff] }
 0x366   :  { %1577 = vmatpush.msra.mxu1 %v8021_v4 }
 0x36b   :  { %v10580_v40 = vpop.f32.mrf.mxu3 }
 0x36c   :  { %v10582_v0 = vpop.f32.mrf.mxu1 }
 0x36d   :  { %1199 = vmatmul.f32.gmra.mxu0 %v7948_v18  ;;  %v8020_v18 = vld [vmem:[%s15987_s10 + $0x158] sm:$0xff] }
 0x36e   :  { %1578 = vmatpush.msra.mxu1 %v8020_v18 }
 0x373   :  { %v1370_v48 = vpop.f32.mrf.mxu3 }
 0x374   :  { %v1305_v38 = vpop.f32.mrf.mxu1 }
 0x375   :  { %1202 = vmatmul.f32.gmra.mxu0 %v7949_v58  ;;  %v8019_v58 = vld [vmem:[%s15987_s10 + $0x150] sm:$0xff] }
 0x376   :  { %1579 = vmatpush.msra.mxu1 %v8019_v58  ;;  %v7956_v58 = vld [vmem:[%s16035_s30 + $0x1e8] sm:$0xff] }
 0x37b   :  { %v1373_v61 = vpop.f32.mrf.mxu3 }
 0x37c   :  { %v1308_v24 = vpop.f32.mrf.mxu1 }
 0x37d   :  { %1205 = vmatmul.f32.gmra.mxu0 %v7950_v55  ;;  %v7955_v55 = vld [vmem:[%s16035_s30 + $0x1e0] sm:$0xff] }
 0x383   :  { %v1376_v51 = vpop.f32.mrf.mxu3 }
 0x384   :  { %v1311_v2 = vpop.f32.mrf.mxu1 }
 0x385   :  { %1208 = vmatmul.f32.gmra.mxu0 %v7951_v37  ;;  %v8026_v37 = vld [vmem:[%s16000_s3 + $0x58] sm:$0xff] }
 0x386   :  { %1515 = vmatpush.msra.mxu0 %v8026_v37 }
 0x388   :  { %1516 = vmatpush.msra.mxu0 %v8025_v49  ;;  %v8010_v49 = vld [vmem:[%s16035_s30 + $0x248] sm:$0xff] }
 0x38b   :  { %v1379_v59 = vpop.f32.mrf.mxu3 }
 0x38c   :  { %v1314_v1 = vpop.f32.mrf.mxu1 }
 0x38d   :  { %1211 = vmatmul.f32.gmra.mxu0 %v7952_v57  ;;  %v8018_v57 = vld [vmem:[%s15987_s10 + $0x148] sm:$0xff]  ;;  %v1380_v37 = vadd.f32 %v1379_v59, %v1314_v1  ;;  %v8008_v59 = vld [vmem:[%s16035_s30 + $0x238] sm:$0xff] }
 0x38e   :  { %1580 = vmatpush.msra.mxu1 %v8018_v57  ;;  %v1377_v57 = vadd.f32 %v1376_v51, %v1311_v2  ;;  %v1365_v51 = vadd.f32 %v10573_v10, %v10575_v21  ;;  %v1356_v10 = vadd.f32 %v10552_v41, %v10554_v53  ;;  %v1353_v21 = vadd.f32 %v10545_v25, %v10547_v50  ;;  %v8001_v25 = vld [vmem:[%s16035_s30 + $0x200] sm:$0xff] }
 0x38f   :  { %v1344_v41 = vadd.f32 %v10513_v9, %v10515_v13  ;;  %v8003_v9 = vld [vmem:[%s16035_s30 + $0x210] sm:$0xff]  ;;  %v8005_v53 = vld [vmem:[%s16035_s30 + $0x220] sm:$0xff] }
 0x393   :  { %v1382_v16 = vpop.f32.mrf.mxu3 }
 0x394   :  { %v1317_v29 = vpop.f32.mrf.mxu1 }
 0x395   :  { %1214 = vmatmul.f32.gmra.mxu0 %v7953_v17  ;;  %v1383_v18 = vadd.f32 %v1382_v16, %v1317_v29  ;;  %v7957_v16 = vld [vmem:[%s16035_s30 + $0x1f0] sm:$0xff]  ;;  %v1368_v29 = vadd.f32 %v10580_v40, %v10582_v0  ;;  %v7958_v40 = vld [vmem:[%s16035_s30 + $0x1f8] sm:$0xff]  ;;  %v8006_v0 = vld [vmem:[%s16035_s30 + $0x228] sm:$0xff] }
 0x39b   :  { %v1385_v63 = vpop.f32.mrf.mxu3 }
 0x39c   :  { %v1320_v31 = vpop.f32.mrf.mxu1 }
 0x39d   :  { %1217 = vmatmul.f32.gmra.mxu0 %v7954_v20  ;;  %v8017_v20 = vld [vmem:[%s15987_s10 + $0x140] sm:$0xff]  ;;  %v1386_v4 = vadd.f32 %v1385_v63, %v1320_v31  ;;  %v16130_v31 = vld [vmem:[#allocation62_spill] sm:$0xff] }
 0x39e   :  { %1581 = vmatpush.msra.mxu1 %v8017_v20  ;;  %v8009_v63 = vld [vmem:[%s16035_s30 + $0x240] sm:$0xff]  ;;  %v16132_v20 = vld [vmem:[#allocation28_spill] sm:$0xff] }
 0x39f   :  { %8043 = vmatmul.msk.f32.vlgmr.msra.gmra.mxu1 %vm15963_vm2, %v10312_v27 }
 0x3a3   :  { %v1388_v17 = vpop.f32.mrf.mxu3 }
 0x3a4   :  { %v1323_v35 = vpop.f32.mrf.mxu1 }
 0x3a5   :  { %v1389_v46 = vadd.f32 %v1388_v17, %v1323_v35  ;;  %1220 = vmatmul.f32.gmra.mxu0 %v7955_v55  ;;  %v1374_v55 = vadd.f32 %v1373_v61, %v1308_v24  ;;  %v1371_v17 = vadd.f32 %v1370_v48, %v1305_v38  ;;  %v1362_v48 = vadd.f32 %v10566_v34, %v10568_v43  ;;  %v8007_v24 = vld [vmem:[%s16035_s30 + $0x230] sm:$0xff] }
 0x3a6   :  { %v1359_v38 = vadd.f32 %v10559_v14, %v10561_v28  ;;  %v1350_v14 = vadd.f32 %v10530_v3, %v10534_v22  ;;  %v1347_v28 = vadd.f32 %v10518_v19, %v10522_v60  ;;  %v8002_v60 = vld [vmem:[%s16035_s30 + $0x208] sm:$0xff]  ;;  %v8004_v22 = vld [vmem:[%s16035_s30 + $0x218] sm:$0xff] }
 0x3a7   :  { %1408 = vmatpush.msrb.mxu2 %v1389_v46  ;;  %8044 = vmatmul.msk.f32.gmra.mxu1 %vm15963_vm2, %v10327_v45  ;;  %v16133_v46 = vld [vmem:[#allocation64_spill] sm:$0xff] }
 0x3a9   :  { %1409 = vmatpush.msrb.mxu2 %v1386_v4 }
 0x3ab   :  { %1410 = vmatpush.msrb.mxu2 %v1383_v18  ;;  %v8011_v18 = vld [vmem:[%s16035_s30 + $0x250] sm:$0xff] }
 0x3ad   :  { %1411 = vmatpush.msrb.mxu2 %v1380_v37  ;;  %1223 = vmatmul.f32.gmra.mxu0 %v7956_v58  ;;  %v16135_v58 = vld [vmem:[#allocation29_spill] sm:$0xff]  ;;  %v16136_v37 = vld [vmem:[#allocation66_spill] sm:$0xff] }
 0x3af   :  { %1412 = vmatpush.msrb.mxu2 %v1377_v57  ;;  %8045 = vmatmul.msk.f32.gmra.mxu1 %vm15963_vm2, %v10342_v7 }
 0x3b1   :  { %1413 = vmatpush.msrb.mxu2 %v1374_v55  ;;  %v8012_v55 = vld [vmem:[%s16035_s30 + $0x258] sm:$0xff] }
 0x3b3   :  { %1414 = vmatpush.msrb.mxu2 %v1371_v17  ;;  %v8082_v17 = vld [vmem:[%s15987_s10 + $0x1b8] sm:$0xff] }
 0x3b4   :  { %1814 = vmatpush.msrb.mxu0 %v8082_v17 }
 0x3b5   :  { %1415 = vmatpush.msrb.mxu2 %v1368_v29  ;;  %1226 = vmatmul.f32.gmra.mxu0 %v7957_v16  ;;  %v16138_v16 = vld [vmem:[#allocation30_spill] sm:$0xff]  ;;  %v16139_v29 = vld [vmem:[#allocation68_spill] sm:$0xff] }
 0x3b7   :  { %1416 = vmatpush.msrb.mxu2 %v1365_v51  ;;  %8046 = vmatmul.msk.f32.gmra.mxu1 %vm15963_vm2, %v10357_v8  ;;  %v8081_v51 = vld [vmem:[%s15987_s10 + $0x1b0] sm:$0xff] }
 0x3b8   :  { %1815 = vmatpush.msrb.mxu0 %v8081_v51  ;;  %v8016_v51 = vld [vmem:[%s16035_s30 + $0x278] sm:$0xff] }
 0x3b9   :  { %1417 = vmatpush.msrb.mxu2 %v1362_v48  ;;  %v8080_v48 = vld [vmem:[%s15987_s10 + $0x1a8] sm:$0xff] }
 0x3ba   :  { %1816 = vmatpush.msrb.mxu0 %v8080_v48 }
 0x3bb   :  { %1418 = vmatpush.msrb.mxu2 %v1359_v38 }
 0x3bd   :  { %1419 = vmatpush.msrb.mxu2 %v1356_v10  ;;  %1229 = vmatmul.f32.gmra.mxu0 %v7958_v40  ;;  %v8084_v40 = vld [vmem:[%s16000_s3 + $0x68] sm:$0xff]  ;;  %v8079_v10 = vld [vmem:[%s15987_s10 + $0x1a0] sm:$0xff] }
 0x3be   :  { %1817 = vmatpush.msrb.mxu0 %v8079_v10  ;;  %v16147_v10 = vld [vmem:[#allocation42_spill] sm:$0xff] }
 0x3bf   :  { %1420 = vmatpush.msrb.mxu2 %v1353_v21  ;;  %8047 = vmatmul.msk.f32.gmra.mxu1 %vm15963_vm2, %v10372_v15  ;;  %v8013_v21 = vld [vmem:[%s16035_s30 + $0x260] sm:$0xff] }
 0x3c1   :  { %1421 = vmatpush.msrb.mxu2 %v1350_v14 }
 0x3c2   :  { %v10668_v34 = vpop.f32.mrf.mxu0 }
 0x3c3   :  { %1422 = vmatpush.msrb.mxu2 %v1347_v28  ;;  %v8083_v28 = vld [vmem:[%s16000_s3 + $0x60] sm:$0xff] }
 0x3c5   :  { %1423 = vmatpush.msrb.mxu2 %v1344_v41  ;;  %8027 = vmatmul.msk.f32.vlgmr.msra.gmra.mxu0 %vm15962_vm3, %v16051_v54  ;;  %v8078_v41 = vld [vmem:[%s15987_s10 + $0x198] sm:$0xff] }
 0x3c6   :  { %1424 = vmatmul.f32.vlgmr.msrb.gmra.mxu2 %v8001_v25  ;;  %v16141_v25 = vld [vmem:[#allocation31_spill] sm:$0xff]  ;;  %1818 = vmatpush.msrb.mxu0 %v8078_v41  ;;  %v16149_v41 = vld [vmem:[#allocation50_spill] sm:$0xff] }
 0x3c7   :  { %8048 = vmatmul.msk.f32.gmra.mxu1 %vm15963_vm2, %v10385_v56  ;;  %1755 = vmatpush.msra.mxu2 %v8084_v40 }
 0x3c9   :  { %1756 = vmatpush.msra.mxu2 %v8083_v28 }
 0x3ca   :  { %v10679_v19 = vpop.f32.mrf.mxu0 }
 0x3cd   :  { %8028 = vmatmul.msk.f32.gmra.mxu0 %vm15962_vm3, %v16055_v11 }
 0x3ce   :  { %1427 = vmatmul.f32.gmra.mxu2 %v8002_v60  ;;  %v8077_v60 = vld [vmem:[%s15987_s10 + $0x190] sm:$0xff] }
 0x3cf   :  { %8049 = vmatmul.msk.f32.gmra.mxu1 %vm15963_vm2, %v10400_v44  ;;  %1819 = vmatpush.msrb.mxu0 %v8077_v60 }
 0x3d2   :  { %v10688_v13 = vpop.f32.mrf.mxu0 }
 0x3d5   :  { %8029 = vmatmul.msk.f32.gmra.mxu0 %vm15962_vm3, %v16059_v23 }
 0x3d6   :  { %1430 = vmatmul.f32.gmra.mxu2 %v8003_v9  ;;  %v8076_v9 = vld [vmem:[%s15987_s10 + $0x188] sm:$0xff] }
 0x3d7   :  { %8050 = vmatmul.msk.f32.gmra.mxu1 %vm15963_vm2, %v10415_v12  ;;  %1820 = vmatpush.msrb.mxu0 %v8076_v9 }
 0x3da   :  { %v10697_v3 = vpop.f32.mrf.mxu0 }
 0x3dd   :  { %8030 = vmatmul.msk.f32.gmra.mxu0 %vm15962_vm3, %v16063_v62 }
 0x3de   :  { %1433 = vmatmul.f32.gmra.mxu2 %v8004_v22 }
 0x3df   :  { %8051 = vmatmul.msk.f32.gmra.mxu1 %vm15963_vm2, %v10428_v39 }
 0x3e2   :  { %v10706_v50 = vpop.f32.mrf.mxu0 }
 0x3e5   :  { %8031 = vmatmul.msk.f32.gmra.mxu0 %vm15962_vm3, %v16067_v6 }
 0x3e6   :  { %1436 = vmatmul.f32.gmra.mxu2 %v8005_v53  ;;  %v8075_v53 = vld [vmem:[%s15987_s10 + $0x180] sm:$0xff] }
 0x3e7   :  { %8052 = vmatmul.msk.f32.gmra.mxu1 %vm15963_vm2, %v10439_v47  ;;  %1821 = vmatpush.msrb.mxu0 %v8075_v53 }
 0x3ea   :  { %v10715_v43 = vpop.f32.mrf.mxu0 }
 0x3ed   :  { %8032 = vmatmul.msk.f32.gmra.mxu0 %vm15962_vm3, %v16071_v26 }
 0x3ee   :  { %1439 = vmatmul.f32.gmra.mxu2 %v8006_v0  ;;  %v8014_v0 = vld [vmem:[%s16035_s30 + $0x268] sm:$0xff] }
 0x3ef   :  { %8053 = vmatmul.msk.f32.gmra.mxu1 %vm15963_vm2, %v10450_v36 }
 0x3f2   :  { %v10724_v61 = vpop.f32.mrf.mxu0 }
 0x3f5   :  { %8033 = vmatmul.msk.f32.gmra.mxu0 %vm15962_vm3, %v16075_v33 }
 0x3f6   :  { %1442 = vmatmul.f32.gmra.mxu2 %v8007_v24 }
 0x3f7   :  { %8054 = vmatmul.msk.f32.gmra.mxu1 %vm15963_vm2, %v10461_v30 }
 0x3fa   :  { %v10733_v2 = vpop.f32.mrf.mxu0 }
 0x3fd   :  { %8034 = vmatmul.msk.f32.gmra.mxu0 %vm15962_vm3, %v16079_v42 }
 0x3fe   :  { %1445 = vmatmul.f32.gmra.mxu2 %v8008_v59  ;;  %v16143_v59 = vld [vmem:[#allocation32_spill] sm:$0xff] }
 0x3ff   :  { %8055 = vmatmul.msk.f32.gmra.mxu1 %vm15963_vm2, %v16130_v31 }
 0x402   :  { %v10742_v1 = vpop.f32.mrf.mxu0 }
 0x405   :  { %8035 = vmatmul.msk.f32.gmra.mxu0 %vm15962_vm3, %v16083_v5 }
 0x406   :  { %1448 = vmatmul.f32.gmra.mxu2 %v8009_v63 }
 0x407   :  { %8056 = vmatmul.msk.f32.gmra.mxu1 %vm15963_vm2, %v16133_v46 }
 0x40a   :  { %v10751_v35 = vpop.f32.mrf.mxu0 }
 0x40b   :  { %16131 = vst [vmem:[#allocation62_spill] sm:$0xff] %v10751_v35 }
 0x40d   :  { %8036 = vmatmul.msk.f32.gmra.mxu0 %vm15962_vm3, %v16132_v20 }
 0x40e   :  { %1451 = vmatmul.f32.gmra.mxu2 %v8010_v49  ;;  %v8015_v49 = vld [vmem:[%s16035_s30 + $0x270] sm:$0xff] }
 0x40f   :  { %8057 = vmatmul.msk.f32.gmra.mxu1 %vm15963_vm2, %v16136_v37 }
 0x412   :  { %v10760_v4 = vpop.f32.mrf.mxu0 }
 0x413   :  { %16134 = vst [vmem:[#allocation64_spill] sm:$0xff] %v10760_v4 }
 0x415   :  { %8037 = vmatmul.msk.f32.gmra.mxu0 %vm15962_vm3, %v16135_v58 }
 0x416   :  { %1454 = vmatmul.f32.gmra.mxu2 %v8011_v18  ;;  %v16145_v18 = vld [vmem:[#allocation33_spill] sm:$0xff] }
 0x417   :  { %8058 = vmatmul.msk.f32.gmra.mxu1 %vm15963_vm2, %v16139_v29 }
 0x41a   :  { %v10769_v57 = vpop.f32.mrf.mxu0 }
 0x41b   :  { %16137 = vst [vmem:[#allocation66_spill] sm:$0xff] %v10769_v57  ;;  %v16166_v57 = vld [vmem:[#allocation6_spill] sm:$0xff] }
 0x41c   :  { %v10798_v14 = vpop.f32.mrf.mxu1 }
 0x41d   :  { %8038 = vmatmul.msk.f32.gmra.mxu0 %vm15962_vm3, %v16138_v16 }
 0x41e   :  { %1457 = vmatmul.f32.gmra.mxu2 %v8012_v55 }
 0x422   :  { %v10787_v38 = vpop.f32.mrf.mxu0 }
 0x423   :  { %16140 = vst [vmem:[#allocation68_spill] sm:$0xff] %v10787_v38  ;;  %v16163_v38 = vld [vmem:[#allocation4_spill] sm:$0xff] }
 0x424   :  { %v10822_v24 = vpop.f32.mrf.mxu1 }
 0x425   :  { %8039 = vmatmul.msk.f32.gmra.mxu0 %vm15962_vm3, %v16141_v25 }
 0x426   :  { %1460 = vmatmul.f32.gmra.mxu2 %v8013_v21  ;;  %v16148_v21 = vld [vmem:[#allocation27_spill] sm:$0xff] }
 0x427   :  { %v722_v28 = vadd.f32 %v16148_v21, %v16147_v10 }
 0x429   :  { %v993_v60 = vadd.f32 %v16149_v41, %v722_v28 }
 0x42a   :  { %v10814_v22 = vpop.f32.mrf.mxu0 }
 0x42b   :  { %16142 = vst [vmem:[#allocation70_spill] sm:$0xff] %v10814_v22  ;;  %v1233_v9 = vadd.f32 %v10668_v34, %v993_v60 }
 0x42c   :  { %v10833_v55 = vpop.f32.mrf.mxu1 }
 0x42d   :  { %8040 = vmatmul.msk.f32.gmra.mxu0 %vm15962_vm3, %v16143_v59 }
 0x42e   :  { %1463 = vmatmul.f32.gmra.mxu2 %v8014_v0 }
 0x432   :  { %v10826_v63 = vpop.f32.mrf.mxu0 }
 0x433   :  { %16144 = vst [vmem:[#allocation71_spill] sm:$0xff] %v10826_v63 }
 0x434   :  { %v10842_v48 = vpop.f32.mrf.mxu1 }
 0x435   :  { %8041 = vmatmul.msk.f32.gmra.mxu0 %vm15962_vm3, %v16145_v18 }
 0x436   :  { %1466 = vmatmul.f32.gmra.mxu2 %v8015_v49 }
 0x43a   :  { %v10835_v17 = vpop.f32.mrf.mxu0 }
 0x43b   :  { %16146 = vst [vmem:[#allocation72_spill] sm:$0xff] %v10835_v17  ;;  %v16150_v17 = vld [vmem:[#allocation40_spill] sm:$0xff] }
 0x43c   :  { %v725_v10 = vadd.f32 %v16151_v32, %v16150_v17  ;;  %v16155_v32 = vld [vmem:[#allocation52_spill] sm:$0xff] }
 0x43d   :  { %8042 = vmatmul.msk.f32.gmra.mxu0 %vm15962_vm3, %v16107_v52 }
 0x43e   :  { %1469 = vmatmul.f32.gmra.mxu2 %v8016_v51  ;;  %v10858_v51 = vpop.f32.mrf.mxu1 }
 0x442   :  { %v10844_v40 = vpop.f32.mrf.mxu0 }
 0x445   :  { %8101 = vmatmul.msk.f32.vlgmr.msrb.gmra.mxu0 %vm15963_vm2, %v10312_v27  ;;  %v16152_v27 = vld [vmem:[#allocation51_spill] sm:$0xff] }
 0x446   :  { %8085 = vmatmul.msk.f32.vlgmr.msra.gmra.mxu2 %vm15962_vm3, %v16051_v54  ;;  %v994_v21 = vadd.f32 %v16152_v27, %v725_v10  ;;  %v10874_v22 = vpop.f32.mrf.mxu1 }
 0x448   :  { %v1234_v34 = vadd.f32 %v10679_v19, %v994_v21  ;;  %v16156_v21 = vld [vmem:[#allocation36_spill] sm:$0xff] }
 0x449   :  { %v1425_v53 = vpop.f32.mrf.mxu2 }
 0x44a   :  { %v10854_v0 = vadd.f32 %v1425_v53, %v1233_v9  ;;  %v10856_v49 = vpop.f32.mrf.mxu0  ;;  %v16153_v9 = vld [vmem:[#allocation38_spill] sm:$0xff]  ;;  %v16154_v53 = vld [vmem:[#allocation39_spill] sm:$0xff] }
 0x44b   :  { %v728_v63 = vadd.f32 %v16154_v53, %v16153_v9  ;;  %v16158_v9 = vld [vmem:[#allocation53_spill] sm:$0xff] }
 0x44d   :  { %8102 = vmatmul.msk.f32.gmra.mxu0 %vm15963_vm2, %v10327_v45  ;;  %v995_v45 = vadd.f32 %v16155_v32, %v728_v63 }
 0x44e   :  { %8086 = vmatmul.msk.f32.gmra.mxu2 %vm15962_vm3, %v16055_v11  ;;  %v10893_v63 = vpop.f32.mrf.mxu1 }
 0x44f   :  { %v1235_v19 = vadd.f32 %v10688_v13, %v995_v45 }
 0x451   :  { %v1428_v28 = vpop.f32.mrf.mxu2 }
 0x452   :  { %v10868_v41 = vadd.f32 %v1428_v28, %v1234_v34  ;;  %v10870_v60 = vpop.f32.mrf.mxu0  ;;  %v16157_v34 = vld [vmem:[#allocation37_spill] sm:$0xff] }
 0x453   :  { %v731_v28 = vadd.f32 %v16157_v34, %v16156_v21 }
 0x455   :  { %8103 = vmatmul.msk.f32.gmra.mxu0 %vm15963_vm2, %v10342_v7  ;;  %v996_v7 = vadd.f32 %v16158_v9, %v731_v28 }
 0x456   :  { %8087 = vmatmul.msk.f32.gmra.mxu2 %vm15962_vm3, %v16059_v23  ;;  %v10908_v9 = vpop.f32.mrf.mxu1 }
 0x457   :  { %v1236_v13 = vadd.f32 %v10697_v3, %v996_v7 }
 0x459   :  { %v1431_v17 = vpop.f32.mrf.mxu2 }
 0x45a   :  { %v10882_v10 = vadd.f32 %v1431_v17, %v1235_v19  ;;  %v10884_v27 = vpop.f32.mrf.mxu0  ;;  %v16159_v19 = vld [vmem:[#allocation3_spill] sm:$0xff] }
 0x45b   :  { %v16160_v17 = vld [vmem:[#allocation35_spill] sm:$0xff] }
 0x45c   :  { %v734_v21 = vadd.f32 %v16160_v17, %v16159_v19 }
 0x45d   :  { %8104 = vmatmul.msk.f32.gmra.mxu0 %vm15963_vm2, %v10357_v8  ;;  %v16161_v8 = vld [vmem:[#allocation54_spill] sm:$0xff] }
 0x45e   :  { %8088 = vmatmul.msk.f32.gmra.mxu2 %vm15962_vm3, %v16063_v62  ;;  %v997_v34 = vadd.f32 %v16161_v8, %v734_v21 }
 0x460   :  { %v1237_v28 = vadd.f32 %v10706_v50, %v997_v34 }
 0x461   :  { %v1434_v53 = vpop.f32.mrf.mxu2 }
 0x462   :  { %v10896_v32 = vadd.f32 %v1434_v53, %v1236_v13  ;;  %v10898_v45 = vpop.f32.mrf.mxu0  ;;  %v16162_v53 = vld [vmem:[#allocation5_spill] sm:$0xff] }
 0x463   :  { %v737_v19 = vadd.f32 %v16163_v38, %v16162_v53 }
 0x465   :  { %8105 = vmatmul.msk.f32.gmra.mxu0 %vm15963_vm2, %v10372_v15  ;;  %v16164_v15 = vld [vmem:[#allocation55_spill] sm:$0xff] }
 0x466   :  { %8089 = vmatmul.msk.f32.gmra.mxu2 %vm15962_vm3, %v16067_v6  ;;  %v998_v17 = vadd.f32 %v16164_v15, %v737_v19 }
 0x468   :  { %v1238_v50 = vadd.f32 %v10715_v43, %v998_v17 }
 0x469   :  { %v1437_v3 = vpop.f32.mrf.mxu2 }
 0x46a   :  { %v10910_v7 = vadd.f32 %v1437_v3, %v1237_v28  ;;  %v10912_v13 = vpop.f32.mrf.mxu0  ;;  %v10926_v28 = vpop.f32.mrf.mxu1  ;;  %v16165_v3 = vld [vmem:[#allocation45_spill] sm:$0xff] }
 0x46b   :  { %v740_v38 = vadd.f32 %v16166_v57, %v16165_v3 }
 0x46d   :  { %8106 = vmatmul.msk.f32.gmra.mxu0 %vm15963_vm2, %v10385_v56  ;;  %v16167_v56 = vld [vmem:[#allocation56_spill] sm:$0xff] }
 0x46e   :  { %8090 = vmatmul.msk.f32.gmra.mxu2 %vm15962_vm3, %v16071_v26  ;;  %v999_v53 = vadd.f32 %v16167_v56, %v740_v38 }
 0x470   :  { %v1239_v43 = vadd.f32 %v10724_v61, %v999_v53 }
 0x471   :  { %v1440_v21 = vpop.f32.mrf.mxu2 }
 0x472   :  { %v10922_v8 = vadd.f32 %v1440_v21, %v1238_v50  ;;  %v10924_v34 = vpop.f32.mrf.mxu0  ;;  %v16168_v50 = vld [vmem:[#allocation43_spill] sm:$0xff]  ;;  %v16169_v21 = vld [vmem:[#allocation44_spill] sm:$0xff]  ;;  %v1610_v35 = vpop.f32.mrf.mxu1 }
 0x473   :  { %v743_v4 = vadd.f32 %v16169_v21, %v16168_v50 }
 0x475   :  { %8107 = vmatmul.msk.f32.gmra.mxu0 %vm15963_vm2, %v10400_v44  ;;  %v16170_v44 = vld [vmem:[#allocation57_spill] sm:$0xff] }
 0x476   :  { %8091 = vmatmul.msk.f32.gmra.mxu2 %vm15962_vm3, %v16075_v33  ;;  %v1000_v57 = vadd.f32 %v16170_v44, %v743_v4 }
 0x478   :  { %v1240_v3 = vadd.f32 %v10733_v2, %v1000_v57 }
 0x479   :  { %v1443_v19 = vpop.f32.mrf.mxu2 }
 0x47a   :  { %v10936_v15 = vadd.f32 %v1443_v19, %v1239_v43  ;;  %v10938_v17 = vpop.f32.mrf.mxu0  ;;  %v1613_v53 = vpop.f32.mrf.mxu1 }
 0x47d   :  { %8108 = vmatmul.msk.f32.gmra.mxu0 %vm15963_vm2, %v10415_v12 }
 0x47e   :  { %8092 = vmatmul.msk.f32.gmra.mxu2 %vm15962_vm3, %v16079_v42 }
 0x481   :  { %v1446_v61 = vpop.f32.mrf.mxu2 }
 0x482   :  { %v10948_v38 = vadd.f32 %v1446_v61, %v1240_v3  ;;  %v1542_v56 = vpop.f32.mrf.mxu0  ;;  %v1616_v2 = vpop.f32.mrf.mxu1 }
 0x485   :  { %8109 = vmatmul.msk.f32.gmra.mxu0 %vm15963_vm2, %v10428_v39 }
 0x486   :  { %8093 = vmatmul.msk.f32.gmra.mxu2 %vm15962_vm3, %v16083_v5 }
 0x489   :  { %v10954_v43 = vpop.f32.mrf.mxu2 }
 0x48a   :  { %v1545_v12 = vpop.f32.mrf.mxu0  ;;  %v1619_v21 = vpop.f32.mrf.mxu1 }
 0x48d   :  { %8110 = vmatmul.msk.f32.gmra.mxu0 %vm15963_vm2, %v10439_v47 }
 0x48e   :  { %8094 = vmatmul.msk.f32.gmra.mxu2 %vm15962_vm3, %v16132_v20 }
 0x491   :  { %v10960_v4 = vpop.f32.mrf.mxu2 }
 0x492   :  { %v1548_v19 = vpop.f32.mrf.mxu0  ;;  %v1622_v57 = vpop.f32.mrf.mxu1 }
 0x495   :  { %8111 = vmatmul.msk.f32.gmra.mxu0 %vm15963_vm2, %v10450_v36 }
 0x496   :  { %8095 = vmatmul.msk.f32.gmra.mxu2 %vm15962_vm3, %v16135_v58 }
 0x499   :  { %v10966_v39 = vpop.f32.mrf.mxu2 }
 0x49a   :  { %16171 = vst [vmem:[#allocation42_spill] sm:$0xff] %v10966_v39  ;;  %v1551_v50 = vpop.f32.mrf.mxu0 }
 0x49d   :  { %8112 = vmatmul.msk.f32.gmra.mxu0 %vm15963_vm2, %v10461_v30  ;;  %v1625_v30 = vpop.f32.mrf.mxu1 }
 0x49e   :  { %8096 = vmatmul.msk.f32.gmra.mxu2 %vm15962_vm3, %v16138_v16 }
 0x4a1   :  { %v10972_v47 = vpop.f32.mrf.mxu2 }
 0x4a2   :  { %16172 = vst [vmem:[#allocation27_spill] sm:$0xff] %v10972_v47  ;;  %v1554_v44 = vpop.f32.mrf.mxu0 }
 0x4a5   :  { %8113 = vmatmul.msk.f32.gmra.mxu0 %vm15963_vm2, %v16130_v31  ;;  %v1628_v31 = vpop.f32.mrf.mxu1 }
 0x4a6   :  { %8097 = vmatmul.msk.f32.gmra.mxu2 %vm15962_vm3, %v16141_v25 }
 0x4a9   :  { %v10978_v36 = vpop.f32.mrf.mxu2 }
 0x4aa   :  { %16173 = vst [vmem:[#allocation50_spill] sm:$0xff] %v10978_v36  ;;  %v1557_v3 = vpop.f32.mrf.mxu0 }
 0x4ad   :  { %8114 = vmatmul.msk.f32.gmra.mxu0 %vm15963_vm2, %v16133_v46  ;;  %v1623_v46 = vadd.f32 %v1622_v57, %v1557_v3  ;;  %v8065_v57 = vld [vmem:[%s16035_s30 + $0x2b0] sm:$0xff] }
 0x4ae   :  { %8098 = vmatmul.msk.f32.gmra.mxu2 %vm15962_vm3, %v16143_v59  ;;  %v1617_v59 = vadd.f32 %v1616_v2, %v1551_v50 }
 0x4b1   :  { %v10984_v61 = vpop.f32.mrf.mxu2 }
 0x4b2   :  { %16174 = vst [vmem:[#allocation40_spill] sm:$0xff] %v10984_v61  ;;  %v1560_v47 = vpop.f32.mrf.mxu0  ;;  %v1620_v61 = vadd.f32 %v1619_v21, %v1554_v44  ;;  %v1602_v21 = vadd.f32 %v10893_v63, %v10924_v34  ;;  %v1590_v63 = vadd.f32 %v10833_v55, %v10870_v60  ;;  %v8062_v34 = vld [vmem:[%s16035_s30 + $0x298] sm:$0xff] }
 0x4b3   :  { %v1626_v39 = vadd.f32 %v1625_v30, %v1560_v47  ;;  %v1611_v47 = vadd.f32 %v1610_v35, %v1545_v12  ;;  %v1596_v35 = vadd.f32 %v10858_v51, %v10898_v45  ;;  %v1584_v51 = vadd.f32 %v10798_v14, %v10844_v40  ;;  %v8061_v40 = vld [vmem:[%s16035_s30 + $0x290] sm:$0xff] }
 0x4b5   :  { %8115 = vmatmul.msk.f32.gmra.mxu0 %vm15963_vm2, %v16136_v37 }
 0x4b6   :  { %8099 = vmatmul.msk.f32.gmra.mxu2 %vm15962_vm3, %v16145_v18 }
 0x4b9   :  { %v10990_v25 = vpop.f32.mrf.mxu2 }
 0x4ba   :  { %16175 = vst [vmem:[#allocation41_spill] sm:$0xff] %v10990_v25  ;;  %v1563_v36 = vpop.f32.mrf.mxu0  ;;  %v1614_v25 = vadd.f32 %v1613_v53, %v1548_v19  ;;  %v8063_v53 = vld [vmem:[%s16035_s30 + $0x2a0] sm:$0xff]  ;;  %v8064_v19 = vld [vmem:[%s16035_s30 + $0x2a8] sm:$0xff] }
 0x4bb   :  { %v1629_v16 = vadd.f32 %v1628_v31, %v1563_v36 }
 0x4bd   :  { %1648 = vmatpush.msra.mxu3 %v1629_v16  ;;  %8116 = vmatmul.msk.f32.gmra.mxu0 %vm15963_vm2, %v16139_v29  ;;  %v1608_v16 = vadd.f32 %v10926_v28, %v1542_v56 }
 0x4be   :  { %8100 = vmatmul.msk.f32.gmra.mxu2 %vm15962_vm3, %v16107_v52 }
 0x4bf   :  { %1649 = vmatpush.msra.mxu3 %v1626_v39  ;;  %v1605_v39 = vadd.f32 %v10908_v9, %v10938_v17  ;;  %v1593_v9 = vadd.f32 %v10842_v48, %v10884_v27 }
 0x4c1   :  { %v10996_v37 = vpop.f32.mrf.mxu2  ;;  %1650 = vmatpush.msra.mxu3 %v1623_v46 }
 0x4c2   :  { %v10998_v18 = vpop.f32.mrf.mxu0 }
 0x4c3   :  { %1651 = vmatpush.msra.mxu3 %v1620_v61  ;;  %v8066_v61 = vld [vmem:[%s16035_s30 + $0x2b8] sm:$0xff] }
 0x4c5   :  { %1652 = vmatpush.msra.mxu3 %v1617_v59  ;;  %v1599_v59 = vadd.f32 %v10874_v22, %v10912_v13  ;;  %v1587_v22 = vadd.f32 %v10822_v24, %v10856_v49  ;;  %v8059_v13 = vld [vmem:[%s16035_s30 + $0x280] sm:$0xff]  ;;  %v8060_v24 = vld [vmem:[%s16035_s30 + $0x288] sm:$0xff] }
 0x4c7   :  { %1653 = vmatpush.msra.mxu3 %v1614_v25 }
 0x4c9   :  { %v11001_v29 = vpop.f32.mrf.mxu2  ;;  %1654 = vmatpush.msra.mxu3 %v1611_v47  ;;  %v8067_v47 = vld [vmem:[%s16035_s30 + $0x2c0] sm:$0xff] }
 0x4ca   :  { %v11003_v36 = vpop.f32.mrf.mxu0 }
 0x4cb   :  { %1655 = vmatpush.msra.mxu3 %v1608_v16 }
 0x4cd   :  { %1656 = vmatpush.msra.mxu3 %v1605_v39 }
 0x4cf   :  { %1657 = vmatpush.msra.mxu3 %v1602_v21  ;;  %v8068_v21 = vld [vmem:[%s16035_s30 + $0x2c8] sm:$0xff] }
 0x4d1   :  { %v11013_v25 = vpop.f32.mrf.mxu2  ;;  %1658 = vmatpush.msra.mxu3 %v1599_v59 }
 0x4d2   :  { %v11015_v28 = vpop.f32.mrf.mxu0 }
 0x4d3   :  { %1659 = vmatpush.msra.mxu3 %v1596_v35 }
 0x4d5   :  { %1660 = vmatpush.msra.mxu3 %v1593_v9  ;;  %v8069_v9 = vld [vmem:[%s16035_s30 + $0x2d0] sm:$0xff] }
 0x4d7   :  { %1661 = vmatpush.msra.mxu3 %v1590_v63 }
 0x4d9   :  { %v11025_v45 = vpop.f32.mrf.mxu2  ;;  %1662 = vmatpush.msra.mxu3 %v1587_v22  ;;  %v8140_v22 = vld [vmem:[%s15987_s10 + $0x1f8] sm:$0xff] }
 0x4da   :  { %v11030_v48 = vpop.f32.mrf.mxu0  ;;  %2054 = vmatpush.msrb.mxu2 %v8140_v22  ;;  %v8141_v22 = vld [vmem:[%s16000_s3 + $0x70] sm:$0xff] }
 0x4db   :  { %1663 = vmatpush.msra.mxu3 %v1584_v51  ;;  %v8139_v51 = vld [vmem:[%s15987_s10 + $0x1f0] sm:$0xff] }
 0x4dc   :  { %1664 = vmatmul.f32.vlgmr.msra.gmra.mxu3 %v8059_v13  ;;  %2055 = vmatpush.msrb.mxu2 %v8139_v51  ;;  %v8133_v51 = vld [vmem:[%s15987_s10 + $0x1c0] sm:$0xff] }
 0x4e1   :  { %v11032_v55 = vpop.f32.mrf.mxu2 }
 0x4e2   :  { %v11037_v49 = vpop.f32.mrf.mxu0 }
 0x4e4   :  { %1667 = vmatmul.f32.gmra.mxu3 %v8060_v24  ;;  %v8070_v24 = vld [vmem:[%s16035_s30 + $0x2d8] sm:$0xff] }
 0x4e9   :  { %v11039_v14 = vpop.f32.mrf.mxu2 }
 0x4ea   :  { %v11044_v60 = vpop.f32.mrf.mxu0 }
 0x4ec   :  { %1670 = vmatmul.f32.gmra.mxu3 %v8061_v40  ;;  %v8138_v40 = vld [vmem:[%s15987_s10 + $0x1e8] sm:$0xff] }
 0x4ed   :  { %2056 = vmatpush.msrb.mxu2 %v8138_v40 }
 0x4f1   :  { %v11046_v27 = vpop.f32.mrf.mxu2 }
 0x4f2   :  { %v11051_v17 = vpop.f32.mrf.mxu0 }
 0x4f4   :  { %1673 = vmatmul.f32.gmra.mxu3 %v8062_v34  ;;  %v8137_v34 = vld [vmem:[%s15987_s10 + $0x1e0] sm:$0xff] }
 0x4f5   :  { %2057 = vmatpush.msrb.mxu2 %v8137_v34 }
 0x4f9   :  { %v11053_v56 = vpop.f32.mrf.mxu2 }
 0x4fa   :  { %v11058_v12 = vpop.f32.mrf.mxu0 }
 0x4fc   :  { %1676 = vmatmul.f32.gmra.mxu3 %v8063_v53 }
 0x501   :  { %v11060_v2 = vpop.f32.mrf.mxu2 }
 0x502   :  { %v11065_v50 = vpop.f32.mrf.mxu0 }
 0x504   :  { %1679 = vmatmul.f32.gmra.mxu3 %v8064_v19  ;;  %v8136_v19 = vld [vmem:[%s15987_s10 + $0x1d8] sm:$0xff] }
 0x505   :  { %2058 = vmatpush.msrb.mxu2 %v8136_v19  ;;  %v8072_v19 = vld [vmem:[%s16035_s30 + $0x2e8] sm:$0xff] }
 0x509   :  { %v11067_v44 = vpop.f32.mrf.mxu2 }
 0x50a   :  { %v11072_v3 = vpop.f32.mrf.mxu0 }
 0x50c   :  { %1682 = vmatmul.f32.gmra.mxu3 %v8065_v57  ;;  %v8135_v57 = vld [vmem:[%s15987_s10 + $0x1d0] sm:$0xff] }
 0x50d   :  { %2059 = vmatpush.msrb.mxu2 %v8135_v57 }
 0x511   :  { %v11074_v30 = vpop.f32.mrf.mxu2 }
 0x512   :  { %v1853_v31 = vpop.f32.mrf.mxu0 }
 0x514   :  { %1685 = vmatmul.f32.gmra.mxu3 %v8066_v61 }
 0x519   :  { %v1788_v46 = vpop.f32.mrf.mxu2 }
 0x51a   :  { %v1856_v16 = vpop.f32.mrf.mxu0 }
 0x51c   :  { %1688 = vmatmul.f32.gmra.mxu3 %v8067_v47  ;;  %v8071_v47 = vld [vmem:[%s16035_s30 + $0x2e0] sm:$0xff] }
 0x521   :  { %v1791_v39 = vpop.f32.mrf.mxu2 }
 0x522   :  { %v1859_v59 = vpop.f32.mrf.mxu0 }
 0x524   :  { %1691 = vmatmul.f32.gmra.mxu3 %v8068_v21  ;;  %v8142_v21 = vld [vmem:[%s16000_s3 + $0x78] sm:$0xff] }
 0x525   :  { %1995 = vmatpush.msrb.mxu3 %v8142_v21 }
 0x527   :  { %1996 = vmatpush.msrb.mxu3 %v8141_v22 }
 0x529   :  { %v1794_v35 = vpop.f32.mrf.mxu2 }
 0x52a   :  { %v1862_v63 = vpop.f32.mrf.mxu0  ;;  %v1860_v22 = vadd.f32 %v1859_v59, %v1794_v35  ;;  %v1851_v59 = vadd.f32 %v11072_v3, %v11074_v30  ;;  %v1848_v35 = vadd.f32 %v11065_v50, %v11067_v44  ;;  %v11165_v3 = vld [vmem:[%s15989_s11 + $0x18] sm:$0xff]  ;;  %v1839_v50 = vadd.f32 %v11044_v60, %v11046_v27  ;;  %v11182_v60 = vld [vmem:[%s15989_s11 + $0x20] sm:$0xff]  ;;  %v8119_v27 = vld [vmem:[%s16035_s30 + $0x310] sm:$0xff] }
 0x52b   :  { %v8120_v30 = vld [vmem:[%s16035_s30 + $0x318] sm:$0xff] }
 0x52c   :  { %1694 = vmatmul.f32.gmra.mxu3 %v8069_v9  ;;  %v8134_v9 = vld [vmem:[%s15987_s10 + $0x1c8] sm:$0xff] }
 0x52d   :  { %2060 = vmatpush.msrb.mxu2 %v8134_v9 }
 0x52f   :  { %2061 = vmatpush.msrb.mxu2 %v8133_v51  ;;  %v8073_v51 = vld [vmem:[%s16035_s30 + $0x2f0] sm:$0xff] }
 0x531   :  { %v1797_v13 = vpop.f32.mrf.mxu2 }
 0x532   :  { %v1865_v53 = vpop.f32.mrf.mxu0  ;;  %v1863_v9 = vadd.f32 %v1862_v63, %v1797_v13  ;;  %v8121_v13 = vld [vmem:[%s16035_s30 + $0x320] sm:$0xff] }
 0x534   :  { %1697 = vmatmul.f32.gmra.mxu3 %v8070_v24  ;;  %v11127_v24 = vld [vmem:[%s15989_s11] sm:$0xff] }
 0x535   :  { %8159 = vmatmul.msk.f32.vlgmr.msrb.gmra.mxu2 %vm15963_vm2, %v11127_v24 }
 0x539   :  { %v1800_v61 = vpop.f32.mrf.mxu2 }
 0x53a   :  { %v1868_v40 = vpop.f32.mrf.mxu0  ;;  %v1866_v21 = vadd.f32 %v1865_v53, %v1800_v61  ;;  %v1854_v53 = vadd.f32 %v1853_v31, %v1788_v46  ;;  %v11147_v61 = vld [vmem:[%s15989_s11 + $0x10] sm:$0xff]  ;;  %v8074_v31 = vld [vmem:[%s16035_s30 + $0x2f8] sm:$0xff]  ;;  %v1845_v46 = vadd.f32 %v11058_v12, %v11060_v2  ;;  %v1836_v12 = vadd.f32 %v11037_v49, %v11039_v14 }
 0x53b   :  { %v1827_v49 = vadd.f32 %v11003_v36, %v11013_v25  ;;  %v11201_v36 = vld [vmem:[%s15989_s11 + $0x28] sm:$0xff]  ;;  %v11216_v25 = vld [vmem:[%s15989_s11 + $0x30] sm:$0xff]  ;;  %v11231_v2 = vld [vmem:[%s15989_s11 + $0x38] sm:$0xff] }
 0x53c   :  { %1700 = vmatmul.f32.gmra.mxu3 %v8071_v47  ;;  %v11137_v47 = vld [vmem:[%s15989_s11 + $0x8] sm:$0xff] }
 0x53d   :  { %8160 = vmatmul.msk.f32.gmra.mxu2 %vm15963_vm2, %v11137_v47 }
 0x541   :  { %v1803_v34 = vpop.f32.mrf.mxu2 }
 0x542   :  { %v1869_v57 = vadd.f32 %v1868_v40, %v1803_v34  ;;  %v1857_v40 = vadd.f32 %v1856_v16, %v1791_v39  ;;  %v1842_v16 = vadd.f32 %v11051_v17, %v11053_v56  ;;  %v1833_v17 = vadd.f32 %v11030_v48, %v11032_v55  ;;  %v8117_v55 = vld [vmem:[%s16035_s30 + $0x300] sm:$0xff]  ;;  %v11261_v34 = vld [vmem:[%s15989_s11 + $0x48] sm:$0xff] }
 0x543   :  { %v1830_v56 = vadd.f32 %v11015_v28, %v11025_v45  ;;  %v1824_v28 = vadd.f32 %v10998_v18, %v11001_v29  ;;  %v8118_v29 = vld [vmem:[%s16035_s30 + $0x308] sm:$0xff]  ;;  %v11246_v39 = vld [vmem:[%s15989_s11 + $0x40] sm:$0xff] }
 0x544   :  { %1888 = vmatpush.msrb.mxu1 %v1869_v57  ;;  %1703 = vmatmul.f32.gmra.mxu3 %v8072_v19  ;;  %v8122_v57 = vld [vmem:[%s16035_s30 + $0x328] sm:$0xff] }
 0x545   :  { %8161 = vmatmul.msk.f32.gmra.mxu2 %vm15963_vm2, %v11147_v61 }
 0x546   :  { %1889 = vmatpush.msrb.mxu1 %v1866_v21  ;;  %v11276_v21 = vld [vmem:[%s15989_s11 + $0x50] sm:$0xff] }
 0x548   :  { %1890 = vmatpush.msrb.mxu1 %v1863_v9 }
 0x54a   :  { %1891 = vmatpush.msrb.mxu1 %v1860_v22  ;;  %v8123_v22 = vld [vmem:[%s16035_s30 + $0x330] sm:$0xff] }
 0x54c   :  { %1892 = vmatpush.msrb.mxu1 %v1857_v40  ;;  %1706 = vmatmul.f32.gmra.mxu3 %v8073_v51  ;;  %v11291_v51 = vld [vmem:[%s15989_s11 + $0x58] sm:$0xff] }
 0x54d   :  { %8162 = vmatmul.msk.f32.gmra.mxu2 %vm15963_vm2, %v11165_v3 }
 0x54e   :  { %1893 = vmatpush.msrb.mxu1 %v1854_v53  ;;  %v16180_v53 = vld [vmem:[#allocation8_spill] sm:$0xff] }
 0x550   :  { %1894 = vmatpush.msrb.mxu1 %v1851_v59 }
 0x552   :  { %1895 = vmatpush.msrb.mxu1 %v1848_v35 }
 0x554   :  { %1896 = vmatpush.msrb.mxu1 %v1845_v46  ;;  %1709 = vmatmul.f32.gmra.mxu3 %v8074_v31  ;;  %v8124_v31 = vld [vmem:[%s16035_s30 + $0x338] sm:$0xff] }
 0x555   :  { %8163 = vmatmul.msk.f32.gmra.mxu2 %vm15963_vm2, %v11182_v60  ;;  %v16183_v46 = vld [vmem:[#allocation58_spill] sm:$0xff] }
 0x556   :  { %1897 = vmatpush.msrb.mxu1 %v1842_v16 }
 0x558   :  { %1898 = vmatpush.msrb.mxu1 %v1839_v50 }
 0x55a   :  { %1899 = vmatpush.msrb.mxu1 %v1836_v12  ;;  %v11310_v12 = vld [vmem:[%s15989_s11 + $0x60] sm:$0xff] }
 0x55c   :  { %1900 = vmatpush.msrb.mxu1 %v1833_v17  ;;  %8143 = vmatmul.msk.f32.vlgmr.msrb.gmra.mxu3 %vm15962_vm3, %v16051_v54 }
 0x55d   :  { %8164 = vmatmul.msk.f32.gmra.mxu2 %vm15963_vm2, %v11201_v36 }
 0x55e   :  { %1901 = vmatpush.msrb.mxu1 %v1830_v56  ;;  %v16184_v56 = vld [vmem:[#allocation10_spill] sm:$0xff] }
 0x55f   :  { %v1665_v48 = vpop.f32.mrf.mxu3 }
 0x560   :  { %v11191_v45 = vadd.f32 %v1665_v48, %v10854_v0  ;;  %1902 = vmatpush.msrb.mxu1 %v1827_v49  ;;  %v16185_v49 = vld [vmem:[#allocation9_spill] sm:$0xff] }
 0x561   :  { %v749_v48 = vadd.f32 %v16185_v49, %v16184_v56  ;;  %v8127_v49 = vld [vmem:[%s16035_s30 + $0x350] sm:$0xff] }
 0x562   :  { %1903 = vmatpush.msrb.mxu1 %v1824_v28 }
 0x563   :  { %1904 = vmatmul.f32.vlgmr.msrb.gmra.mxu1 %v8117_v55  ;;  %v16187_v55 = vld [vmem:[#allocation59_spill] sm:$0xff] }
 0x564   :  { %8144 = vmatmul.msk.f32.gmra.mxu3 %vm15962_vm3, %v16055_v11 }
 0x565   :  { %8165 = vmatmul.msk.f32.gmra.mxu2 %vm15963_vm2, %v11216_v25 }
 0x567   :  { %v1668_v18 = vpop.f32.mrf.mxu3 }
 0x568   :  { %v11206_v0 = vadd.f32 %v1668_v18, %v10868_v41  ;;  %v1002_v18 = vadd.f32 %v16187_v55, %v749_v48  ;;  %v8196_v48 = vld [vmem:[%s15987_s10 + $0x228] sm:$0xff] }
 0x56b   :  { %1907 = vmatmul.f32.gmra.mxu1 %v8118_v29  ;;  %v16188_v29 = vld [vmem:[#allocation62_spill] sm:$0xff] }
 0x56c   :  { %8145 = vmatmul.msk.f32.gmra.mxu3 %vm15962_vm3, %v16059_v23 }
 0x56d   :  { %8166 = vmatmul.msk.f32.gmra.mxu2 %vm15963_vm2, %v11231_v2 }
 0x56f   :  { %v1671_v14 = vpop.f32.mrf.mxu3 }
 0x570   :  { %v11221_v41 = vadd.f32 %v1671_v14, %v10882_v10  ;;  %v1242_v14 = vadd.f32 %v16188_v29, %v1002_v18  ;;  %v8195_v18 = vld [vmem:[%s15987_s10 + $0x220] sm:$0xff]  ;;  %v16199_v29 = vld [vmem:[#allocation66_spill] sm:$0xff] }
 0x573   :  { %1910 = vmatmul.f32.gmra.mxu1 %v8119_v27  ;;  %v1482_v27 = vadd.f32 %v10960_v4, %v1242_v14  ;;  %v8198_v4 = vld [vmem:[%s15987_s10 + $0x238] sm:$0xff] }
 0x574   :  { %8146 = vmatmul.msk.f32.gmra.mxu3 %vm15962_vm3, %v16063_v62 }
 0x575   :  { %8167 = vmatmul.msk.f32.gmra.mxu2 %vm15963_vm2, %v11246_v39  ;;  %2294 = vmatpush.msra.mxu3 %v8198_v4 }
 0x577   :  { %v1674_v44 = vpop.f32.mrf.mxu3 }
 0x578   :  { %v11236_v10 = vadd.f32 %v1674_v44, %v10896_v32 }
 0x57a   :  { %16176 = vst [vmem:[#allocation51_spill] sm:$0xff] %v11236_v10 }
 0x57b   :  { %1913 = vmatmul.f32.gmra.mxu1 %v8120_v30  ;;  %v16189_v30 = vld [vmem:[#allocation12_spill] sm:$0xff] }
 0x57c   :  { %8147 = vmatmul.msk.f32.gmra.mxu3 %vm15962_vm3, %v16067_v6 }
 0x57d   :  { %8168 = vmatmul.msk.f32.gmra.mxu2 %vm15963_vm2, %v11261_v34 }
 0x57f   :  { %v1677_v63 = vpop.f32.mrf.mxu3 }
 0x580   :  { %v11251_v32 = vadd.f32 %v1677_v63, %v10910_v7  ;;  %v16190_v63 = vld [vmem:[#allocation11_spill] sm:$0xff] }
 0x582   :  { %16177 = vst [vmem:[#allocation38_spill] sm:$0xff] %v11251_v32 }
 0x583   :  { %1916 = vmatmul.f32.gmra.mxu1 %v8121_v13  ;;  %v752_v13 = vadd.f32 %v16190_v63, %v16189_v30  ;;  %v11382_v30 = vld [vmem:[%s15989_s11 + $0x78] sm:$0xff]  ;;  %v16201_v63 = vld [vmem:[#allocation27_spill] sm:$0xff] }
 0x584   :  { %8148 = vmatmul.msk.f32.gmra.mxu3 %vm15962_vm3, %v16071_v26 }
 0x585   :  { %8169 = vmatmul.msk.f32.gmra.mxu2 %vm15963_vm2, %v11276_v21 }
 0x587   :  { %v1680_v19 = vpop.f32.mrf.mxu3 }
 0x588   :  { %v11266_v7 = vadd.f32 %v1680_v19, %v10922_v8 }
 0x58a   :  { %16178 = vst [vmem:[#allocation39_spill] sm:$0xff] %v11266_v7 }
 0x58b   :  { %1919 = vmatmul.f32.gmra.mxu1 %v8122_v57  ;;  %v8126_v57 = vld [vmem:[%s16035_s30 + $0x348] sm:$0xff] }
 0x58c   :  { %8149 = vmatmul.msk.f32.gmra.mxu3 %vm15962_vm3, %v16075_v33 }
 0x58d   :  { %8170 = vmatmul.msk.f32.gmra.mxu2 %vm15963_vm2, %v11291_v51 }
 0x58f   :  { %v1683_v9 = vpop.f32.mrf.mxu3 }
 0x590   :  { %v11281_v8 = vadd.f32 %v1683_v9, %v10936_v15  ;;  %v16181_v15 = vld [vmem:[#allocation7_spill] sm:$0xff]  ;;  %v16192_v9 = vld [vmem:[#allocation60_spill] sm:$0xff] }
 0x591   :  { %v746_v59 = vadd.f32 %v16181_v15, %v16180_v53  ;;  %v11351_v15 = vld [vmem:[%s15989_s11 + $0x70] sm:$0xff] }
 0x592   :  { %16179 = vst [vmem:[#allocation52_spill] sm:$0xff] %v11281_v8 }
 0x593   :  { %1922 = vmatmul.f32.gmra.mxu1 %v8123_v22  ;;  %v1001_v16 = vadd.f32 %v16183_v46, %v746_v59  ;;  %v1003_v22 = vadd.f32 %v16192_v9, %v752_v13  ;;  %v16194_v59 = vld [vmem:[#allocation42_spill] sm:$0xff]  ;;  %v8193_v9 = vld [vmem:[%s15987_s10 + $0x210] sm:$0xff] }
 0x594   :  { %8150 = vmatmul.msk.f32.gmra.mxu3 %vm15962_vm3, %v16079_v42 }
 0x595   :  { %v1241_v50 = vadd.f32 %v10742_v1, %v1001_v16  ;;  %8171 = vmatmul.msk.f32.gmra.mxu2 %vm15963_vm2, %v11310_v12  ;;  %v8125_v1 = vld [vmem:[%s16035_s30 + $0x340] sm:$0xff]  ;;  %v8197_v16 = vld [vmem:[%s15987_s10 + $0x230] sm:$0xff] }
 0x596   :  { %2295 = vmatpush.msra.mxu3 %v8197_v16 }
 0x597   :  { %v1686_v40 = vpop.f32.mrf.mxu3 }
 0x598   :  { %v11298_v35 = vadd.f32 %v1686_v40, %v10948_v38  ;;  %v1481_v38 = vadd.f32 %v10954_v43, %v1241_v50  ;;  %v11329_v43 = vld [vmem:[%s15989_s11 + $0x68] sm:$0xff]  ;;  %v16195_v50 = vld [vmem:[#allocation14_spill] sm:$0xff]  ;;  %2296 = vmatpush.msra.mxu3 %v8196_v48 }
 0x599   :  { %v16193_v40 = vld [vmem:[#allocation64_spill] sm:$0xff]  ;;  %v16208_v48 = vld [vmem:[#allocation50_spill] sm:$0xff] }
 0x59a   :  { %16182 = vst [vmem:[#allocation36_spill] sm:$0xff] %v11298_v35  ;;  %v1243_v53 = vadd.f32 %v16193_v40, %v1003_v22  ;;  %2297 = vmatpush.msra.mxu3 %v8195_v18  ;;  %v16202_v22 = vld [vmem:[#allocation16_spill] sm:$0xff]  ;;  %v16203_v40 = vld [vmem:[#allocation15_spill] sm:$0xff] }
 0x59b   :  { %1925 = vmatmul.f32.gmra.mxu1 %v8124_v31  ;;  %v8200_v18 = vld [vmem:[%s16000_s3 + $0x88] sm:$0xff] }
 0x59c   :  { %8151 = vmatmul.msk.f32.gmra.mxu3 %vm15962_vm3, %v16083_v5  ;;  %v1483_v31 = vadd.f32 %v16194_v59, %v1243_v53  ;;  %v758_v53 = vadd.f32 %v16203_v40, %v16202_v22  ;;  %v8128_v59 = vld [vmem:[%s16035_s30 + $0x358] sm:$0xff]  ;;  %2235 = vmatpush.msra.mxu1 %v8200_v18  ;;  %v16212_v22 = vld [vmem:[#allocation65_spill] sm:$0xff] }
 0x59d   :  { %8172 = vmatmul.msk.f32.gmra.mxu2 %vm15963_vm2, %v11329_v43 }
 0x59f   :  { %v1689_v17 = vpop.f32.mrf.mxu3 }
 0x5a0   :  { %v11317_v28 = vadd.f32 %v1689_v17, %v1481_v38  ;;  %v16196_v38 = vld [vmem:[#allocation13_spill] sm:$0xff] }
 0x5a1   :  { %v755_v17 = vadd.f32 %v16196_v38, %v16195_v50  ;;  %v8191_v50 = vld [vmem:[%s15987_s10 + $0x200] sm:$0xff]  ;;  %v16206_v38 = vld [vmem:[#allocation68_spill] sm:$0xff] }
 0x5a2   :  { %16186 = vst [vmem:[#allocation37_spill] sm:$0xff] %v11317_v28 }
 0x5a3   :  { %1928 = vmatmul.f32.gmra.mxu1 %v8125_v1  ;;  %v16198_v1 = vld [vmem:[#allocation61_spill] sm:$0xff] }
 0x5a4   :  { %8152 = vmatmul.msk.f32.gmra.mxu3 %vm15962_vm3, %v16132_v20  ;;  %v1004_v55 = vadd.f32 %v16198_v1, %v755_v17 }
 0x5a5   :  { %8173 = vmatmul.msk.f32.gmra.mxu2 %vm15963_vm2, %v11351_v15 }
 0x5a6   :  { %v1244_v14 = vadd.f32 %v16199_v29, %v1004_v55  ;;  %v16209_v29 = vld [vmem:[#allocation46_spill] sm:$0xff] }
 0x5a7   :  { %v1692_v44 = vpop.f32.mrf.mxu3 }
 0x5a8   :  { %v11336_v19 = vadd.f32 %v1692_v44, %v1482_v27  ;;  %v16200_v27 = vld [vmem:[#allocation30_spill] sm:$0xff]  ;;  %v1484_v13 = vadd.f32 %v16201_v63, %v1244_v14  ;;  %v16210_v14 = vld [vmem:[#allocation17_spill] sm:$0xff] }
 0x5a9   :  { %v8194_v44 = vld [vmem:[%s15987_s10 + $0x218] sm:$0xff] }
 0x5aa   :  { %16191 = vst [vmem:[#allocation53_spill] sm:$0xff] %v11336_v19  ;;  %2298 = vmatpush.msra.mxu3 %v8194_v44  ;;  %v761_v44 = vadd.f32 %v16210_v14, %v16209_v29  ;;  %v16219_v29 = vld [vmem:[#allocation67_spill] sm:$0xff] }
 0x5ab   :  { %1931 = vmatmul.f32.gmra.mxu1 %v8126_v57 }
 0x5ac   :  { %8153 = vmatmul.msk.f32.gmra.mxu3 %vm15962_vm3, %v16135_v58  ;;  %v1006_v40 = vadd.f32 %v16212_v22, %v761_v44  ;;  %v16220_v44 = vld [vmem:[#allocation71_spill] sm:$0xff]  ;;  %v16222_v22 = vld [vmem:[#allocation41_spill] sm:$0xff] }
 0x5ad   :  { %8174 = vmatmul.msk.f32.gmra.mxu2 %vm15963_vm2, %v11382_v30  ;;  %2299 = vmatpush.msra.mxu3 %v8193_v9  ;;  %v8199_v9 = vld [vmem:[%s16000_s3 + $0x80] sm:$0xff]  ;;  %s16313_s3 = sld [smem:[#allocation80_spill]] }
 0x5ae   :  { %2236 = vmatpush.msra.mxu1 %v8199_v9  ;;  %v16221_v9 = vld [vmem:[#allocation33_spill] sm:$0xff] }
 0x5af   :  { %v1695_v46 = vpop.f32.mrf.mxu3 }
 0x5b0   :  { %v11361_v56 = vadd.f32 %v1695_v46, %v1483_v31  ;;  %v8192_v31 = vld [vmem:[%s15987_s10 + $0x208] sm:$0xff]  ;;  %v16205_v46 = vld [vmem:[#allocation63_spill] sm:$0xff] }
 0x5b1   :  { %v1005_v16 = vadd.f32 %v16205_v46, %v758_v53  ;;  %2300 = vmatpush.msra.mxu3 %v8192_v31  ;;  %v16213_v53 = vld [vmem:[#allocation70_spill] sm:$0xff]  ;;  %v16214_v31 = vld [vmem:[#allocation32_spill] sm:$0xff] }
 0x5b2   :  { %16197 = vst [vmem:[#allocation3_spill] sm:$0xff] %v11361_v56  ;;  %v16215_v46 = vld [vmem:[#allocation40_spill] sm:$0xff] }
 0x5b3   :  { %1934 = vmatmul.f32.gmra.mxu1 %v8127_v49  ;;  %v1245_v17 = vadd.f32 %v16206_v38, %v1005_v16  ;;  %v16207_v49 = vld [vmem:[#allocation31_spill] sm:$0xff]  ;;  %2301 = vmatpush.msra.mxu3 %v8191_v50  ;;  %v16216_v38 = vld [vmem:[#allocation48_spill] sm:$0xff] }
 0x5b4   :  { %8154 = vmatmul.msk.f32.gmra.mxu3 %vm15962_vm3, %v16200_v27 }
 0x5b5   :  { %v1485_v1 = vadd.f32 %v16208_v48, %v1245_v17  ;;  %v16217_v17 = vld [vmem:[#allocation47_spill] sm:$0xff] }
 0x5b6   :  { %v764_v48 = vadd.f32 %v16217_v17, %v16216_v38  ;;  %v8131_v38 = vld [vmem:[%s16035_s30 + $0x370] sm:$0xff] }
 0x5b7   :  { %v1698_v57 = vpop.f32.mrf.mxu3  ;;  %v16226_v17 = vld [vmem:[#allocation69_spill] sm:$0xff] }
 0x5b8   :  { %v11392_v4 = vadd.f32 %v1698_v57, %v1484_v13  ;;  %v8129_v13 = vld [vmem:[%s16035_s30 + $0x360] sm:$0xff]  ;;  %v11418_v57 = vpop.f32.mrf.mxu2  ;;  %v1007_v14 = vadd.f32 %v16219_v29, %v764_v48  ;;  %v16227_v29 = vld [vmem:[#allocation72_spill] sm:$0xff] }
 0x5ba   :  { %16204 = vst [vmem:[#allocation35_spill] sm:$0xff] %v11392_v4 }
 0x5bb   :  { %1937 = vmatmul.f32.gmra.mxu1 %v8128_v59  ;;  %v1246_v59 = vadd.f32 %v16213_v53, %v1006_v40 }
 0x5bc   :  { %8155 = vmatmul.msk.f32.gmra.mxu3 %vm15962_vm3, %v16207_v49 }
 0x5bd   :  { %v1486_v16 = vadd.f32 %v16215_v46, %v1246_v59  ;;  %v16223_v59 = vld [vmem:[#allocation49_spill] sm:$0xff]  ;;  %v16224_v46 = vld [vmem:[#allocation34_spill] sm:$0xff] }
 0x5bf   :  { %v1701_v55 = vpop.f32.mrf.mxu3 }
 0x5c0   :  { %v11413_v63 = vadd.f32 %v1701_v55, %v1485_v1  ;;  %v8130_v55 = vld [vmem:[%s16035_s30 + $0x368] sm:$0xff]  ;;  %v11435_v18 = vpop.f32.mrf.mxu2 }
 0x5c2   :  { %16211 = vst [vmem:[#allocation54_spill] sm:$0xff] %v11413_v63 }
 0x5c3   :  { %1940 = vmatmul.f32.gmra.mxu1 %v8129_v13  ;;  %v1247_v13 = vadd.f32 %v16220_v44, %v1007_v14 }
 0x5c4   :  { %8156 = vmatmul.msk.f32.gmra.mxu3 %vm15962_vm3, %v16214_v31 }
 0x5c5   :  { %v1487_v40 = vadd.f32 %v16222_v22, %v1247_v13 }
 0x5c7   :  { %v1704_v50 = vpop.f32.mrf.mxu3 }
 0x5c8   :  { %v11430_v1 = vadd.f32 %v1704_v50, %v1486_v16  ;;  %v767_v16 = vadd.f32 %v16224_v46, %v16223_v59 }
 0x5ca   :  { %16218 = vst [vmem:[#allocation5_spill] sm:$0xff] %v11430_v1  ;;  %v1008_v48 = vadd.f32 %v16226_v17, %v767_v16 }
 0x5cb   :  { %1943 = vmatmul.f32.gmra.mxu1 %v8130_v55  ;;  %v11450_v55 = vpop.f32.mrf.mxu2 }
 0x5cc   :  { %8157 = vmatmul.msk.f32.gmra.mxu3 %vm15962_vm3, %v16221_v9  ;;  %v1248_v14 = vadd.f32 %v16227_v29, %v1008_v48 }
 0x5ce   :  { %v1488_v44 = vadd.f32 %v10996_v37, %v1248_v14 }
 0x5cf   :  { %v1707_v53 = vpop.f32.mrf.mxu3 }
 0x5d0   :  { %v11444_v50 = vadd.f32 %v1707_v53, %v1487_v40  ;;  %v8132_v40 = vld [vmem:[%s16035_s30 + $0x378] sm:$0xff] }
 0x5d2   :  { %16225 = vst [vmem:[#allocation4_spill] sm:$0xff] %v11444_v50 }
 0x5d3   :  { %1946 = vmatmul.f32.gmra.mxu1 %v8131_v38  ;;  %v11463_v53 = vpop.f32.mrf.mxu2 }
 0x5d4   :  { %8158 = vmatmul.msk.f32.gmra.mxu3 %vm15962_vm3, %v16107_v52 }
 0x5d7   :  { %v1710_v13 = vpop.f32.mrf.mxu3 }
 0x5d8   :  { %v11456_v22 = vadd.f32 %v1710_v13, %v1488_v44 }
 0x5da   :  { %16228 = vst [vmem:[#allocation55_spill] sm:$0xff] %v11456_v22 }
 0x5db   :  { %1949 = vmatmul.f32.gmra.mxu1 %v8132_v40  ;;  %v11475_v16 = vpop.f32.mrf.mxu2 }
 0x5dc   :  { %8217 = vmatmul.msk.f32.vlgmr.msra.gmra.mxu3 %vm15963_vm2, %v11127_v24 }
 0x5df   :  { %v11465_v59 = vpop.f32.mrf.mxu3 }
 0x5e0   :  { %v11467_v46 = vpop.f32.mrf.mxu1 }
 0x5e3   :  { %8201 = vmatmul.msk.f32.vlgmr.msra.gmra.mxu1 %vm15962_vm3, %v16051_v54  ;;  %v11487_v29 = vpop.f32.mrf.mxu2 }
 0x5e4   :  { %8218 = vmatmul.msk.f32.gmra.mxu3 %vm15963_vm2, %v11137_v47 }
 0x5e7   :  { %v11473_v37 = vpop.f32.mrf.mxu3 }
 0x5e8   :  { %v11477_v38 = vpop.f32.mrf.mxu1 }
 0x5eb   :  { %8202 = vmatmul.msk.f32.gmra.mxu1 %vm15962_vm3, %v16055_v11  ;;  %v11499_v13 = vpop.f32.mrf.mxu2 }
 0x5ec   :  { %8219 = vmatmul.msk.f32.gmra.mxu3 %vm15963_vm2, %v11147_v61 }
 0x5ef   :  { %v11483_v17 = vpop.f32.mrf.mxu3 }
 0x5f0   :  { %v11485_v48 = vpop.f32.mrf.mxu1 }
 0x5f1   :  { %16229 = vst [vmem:[#allocation45_spill] sm:$0xff] %v11485_v48 }
 0x5f3   :  { %8203 = vmatmul.msk.f32.gmra.mxu1 %vm15962_vm3, %v16059_v23  ;;  %v11511_v11 = vpop.f32.mrf.mxu2 }
 0x5f4   :  { %8220 = vmatmul.msk.f32.gmra.mxu3 %vm15963_vm2, %v11165_v3 }
 0x5f7   :  { %v11493_v14 = vpop.f32.mrf.mxu3 }
 0x5f8   :  { %v11495_v44 = vpop.f32.mrf.mxu1 }
 0x5f9   :  { %16230 = vst [vmem:[#allocation6_spill] sm:$0xff] %v11495_v44 }
 0x5fb   :  { %8204 = vmatmul.msk.f32.gmra.mxu1 %vm15962_vm3, %v16063_v62  ;;  %v2087_v50 = vpop.f32.mrf.mxu2 }
 0x5fc   :  { %8221 = vmatmul.msk.f32.gmra.mxu3 %vm15963_vm2, %v11182_v60 }
 0x5ff   :  { %v11503_v40 = vpop.f32.mrf.mxu3 }
 0x600   :  { %v11505_v54 = vpop.f32.mrf.mxu1 }
 0x601   :  { %16231 = vst [vmem:[#allocation56_spill] sm:$0xff] %v11505_v54 }
 0x603   :  { %8205 = vmatmul.msk.f32.gmra.mxu1 %vm15962_vm3, %v16067_v6  ;;  %v2090_v4 = vpop.f32.mrf.mxu2 }
 0x604   :  { %8222 = vmatmul.msk.f32.gmra.mxu3 %vm15963_vm2, %v11201_v36 }
 0x607   :  { %v11513_v23 = vpop.f32.mrf.mxu3 }
 0x608   :  { %v11515_v62 = vpop.f32.mrf.mxu1 }
 0x609   :  { %16232 = vst [vmem:[#allocation43_spill] sm:$0xff] %v11515_v62 }
 0x60b   :  { %8206 = vmatmul.msk.f32.gmra.mxu1 %vm15962_vm3, %v16071_v26 }
 0x60c   :  { %8223 = vmatmul.msk.f32.gmra.mxu3 %vm15963_vm2, %v11216_v25 }
 0x60f   :  { %v11521_v22 = vpop.f32.mrf.mxu3 }
 0x610   :  { %v11523_v1 = vpop.f32.mrf.mxu1 }
 0x611   :  { %16233 = vst [vmem:[#allocation44_spill] sm:$0xff] %v11523_v1 }
 0x613   :  { %8207 = vmatmul.msk.f32.gmra.mxu1 %vm15962_vm3, %v16075_v33  ;;  %v2093_v33 = vpop.f32.mrf.mxu2 }
 0x614   :  { %8224 = vmatmul.msk.f32.gmra.mxu3 %vm15963_vm2, %v11231_v2 }
 0x617   :  { %v2019_v6 = vpop.f32.mrf.mxu3 }
 0x618   :  { %v11529_v63 = vpop.f32.mrf.mxu1 }
 0x619   :  { %16234 = vst [vmem:[#allocation57_spill] sm:$0xff] %v11529_v63 }
 0x61b   :  { %8208 = vmatmul.msk.f32.gmra.mxu1 %vm15962_vm3, %v16079_v42  ;;  %v2096_v42 = vpop.f32.mrf.mxu2 }
 0x61c   :  { %8225 = vmatmul.msk.f32.gmra.mxu3 %vm15963_vm2, %v11246_v39 }
 0x61f   :  { %v2022_v26 = vpop.f32.mrf.mxu3 }
 0x620   :  { %v11535_v56 = vpop.f32.mrf.mxu1 }
 0x621   :  { %16235 = vst [vmem:[#allocation8_spill] sm:$0xff] %v11535_v56 }
 0x623   :  { %8209 = vmatmul.msk.f32.gmra.mxu1 %vm15962_vm3, %v16083_v5  ;;  %v2099_v56 = vpop.f32.mrf.mxu2 }
 0x624   :  { %8226 = vmatmul.msk.f32.gmra.mxu3 %vm15963_vm2, %v11261_v34 }
 0x627   :  { %v2025_v19 = vpop.f32.mrf.mxu3 }
 0x628   :  { %v11541_v28 = vpop.f32.mrf.mxu1  ;;  %v2091_v48 = vadd.f32 %v2090_v4, %v2025_v19  ;;  %v8176_v19 = vld [vmem:[%s16035_s30 + $0x388] sm:$0xff] }
 0x629   :  { %16236 = vst [vmem:[#allocation7_spill] sm:$0xff] %v11541_v28 }
 0x62b   :  { %8210 = vmatmul.msk.f32.gmra.mxu1 %vm15962_vm3, %v16132_v20 }
 0x62c   :  { %8227 = vmatmul.msk.f32.gmra.mxu3 %vm15963_vm2, %v11276_v21 }
 0x62f   :  { %v2028_v63 = vpop.f32.mrf.mxu3 }
 0x630   :  { %v11547_v35 = vpop.f32.mrf.mxu1  ;;  %v2094_v10 = vadd.f32 %v2093_v33, %v2028_v63  ;;  %v2076_v33 = vadd.f32 %v11475_v16, %v11503_v40 }
 0x631   :  { %16237 = vst [vmem:[#allocation58_spill] sm:$0xff] %v11547_v35  ;;  %v2102_v35 = vpop.f32.mrf.mxu2 }
 0x633   :  { %8211 = vmatmul.msk.f32.gmra.mxu1 %vm15962_vm3, %v16135_v58 }
 0x634   :  { %8228 = vmatmul.msk.f32.gmra.mxu3 %vm15963_vm2, %v11291_v51 }
 0x637   :  { %v2031_v5 = vpop.f32.mrf.mxu3 }
 0x638   :  { %v11553_v1 = vpop.f32.mrf.mxu1 }
 0x639   :  { %16238 = vst [vmem:[#allocation10_spill] sm:$0xff] %v11553_v1 }
 0x63b   :  { %8212 = vmatmul.msk.f32.gmra.mxu1 %vm15962_vm3, %v16200_v27  ;;  %v2105_v27 = vpop.f32.mrf.mxu2 }
 0x63c   :  { %8229 = vmatmul.msk.f32.gmra.mxu3 %vm15963_vm2, %v11310_v12 }
 0x63f   :  { %v2034_v20 = vpop.f32.mrf.mxu3 }
 0x640   :  { %v11559_v28 = vpop.f32.mrf.mxu1  ;;  %v2100_v32 = vadd.f32 %v2099_v56, %v2034_v20  ;;  %v2064_v20 = vadd.f32 %v11418_v57, %v11465_v59 }
 0x641   :  { %16239 = vst [vmem:[#allocation9_spill] sm:$0xff] %v11559_v28 }
 0x643   :  { %8213 = vmatmul.msk.f32.gmra.mxu1 %vm15962_vm3, %v16207_v49  ;;  %v2108_v49 = vpop.f32.mrf.mxu2 }
 0x644   :  { %8230 = vmatmul.msk.f32.gmra.mxu3 %vm15963_vm2, %v11329_v43 }
 0x647   :  { %v2037_v58 = vpop.f32.mrf.mxu3 }
 0x648   :  { %v11565_v8 = vpop.f32.mrf.mxu1 }
 0x649   :  { %16240 = vst [vmem:[#allocation59_spill] sm:$0xff] %v11565_v8 }
 0x64b   :  { %8214 = vmatmul.msk.f32.gmra.mxu1 %vm15962_vm3, %v16214_v31  ;;  %v2103_v31 = vadd.f32 %v2102_v35, %v2037_v58 }
 0x64c   :  { %8231 = vmatmul.msk.f32.gmra.mxu3 %vm15963_vm2, %v11351_v15 }
 0x64f   :  { %v2040_v1 = vpop.f32.mrf.mxu3 }
 0x650   :  { %v11571_v62 = vpop.f32.mrf.mxu1  ;;  %v2106_v54 = vadd.f32 %v2105_v27, %v2040_v1  ;;  %v2085_v27 = vadd.f32 %v11511_v11, %v2019_v6  ;;  %v2073_v11 = vadd.f32 %v11463_v53, %v11493_v14 }
 0x651   :  { %16241 = vst [vmem:[#allocation62_spill] sm:$0xff] %v11571_v62 }
 0x653   :  { %8215 = vmatmul.msk.f32.gmra.mxu1 %vm15962_vm3, %v16221_v9  ;;  %v2097_v9 = vadd.f32 %v2096_v42, %v2031_v5  ;;  %v2079_v42 = vadd.f32 %v11487_v29, %v11513_v23  ;;  %v2070_v5 = vadd.f32 %v11450_v55, %v11483_v17  ;;  %v2067_v23 = vadd.f32 %v11435_v18, %v11473_v37  ;;  %v8181_v37 = vld [vmem:[%s16035_s30 + $0x3b0] sm:$0xff] }
 0x654   :  { %8232 = vmatmul.msk.f32.gmra.mxu3 %vm15963_vm2, %v11382_v30 }
 0x657   :  { %v2043_v28 = vpop.f32.mrf.mxu3 }
 0x658   :  { %v11577_v7 = vpop.f32.mrf.mxu1  ;;  %v2109_v8 = vadd.f32 %v2108_v49, %v2043_v28  ;;  %v2088_v28 = vadd.f32 %v2087_v50, %v2022_v26  ;;  %v8177_v49 = vld [vmem:[%s16035_s30 + $0x390] sm:$0xff] }
 0x65a   :  { %2128 = vmatpush.msra.mxu0 %v2109_v8 }
 0x65b   :  { %8216 = vmatmul.msk.f32.gmra.mxu1 %vm15962_vm3, %v16107_v52 }
 0x65c   :  { %2129 = vmatpush.msra.mxu0 %v2106_v54  ;;  %v2082_v54 = vadd.f32 %v11499_v13, %v11521_v22  ;;  %v8180_v22 = vld [vmem:[%s16035_s30 + $0x3a8] sm:$0xff]  ;;  %v8183_v13 = vld [vmem:[%s16035_s30 + $0x3c0] sm:$0xff] }
 0x65e   :  { %2130 = vmatpush.msra.mxu0 %v2103_v31  ;;  %v8178_v31 = vld [vmem:[%s16035_s30 + $0x398] sm:$0xff] }
 0x65f   :  { %v11581_v62 = vpop.f32.mrf.mxu3 }
 0x660   :  { %v11583_v44 = vpop.f32.mrf.mxu1  ;;  %2131 = vmatpush.msra.mxu0 %v2100_v32 }
 0x662   :  { %2132 = vmatpush.msra.mxu0 %v2097_v9  ;;  %v8179_v9 = vld [vmem:[%s16035_s30 + $0x3a0] sm:$0xff] }
 0x664   :  { %2133 = vmatpush.msra.mxu0 %v2094_v10  ;;  %v8175_v10 = vld [vmem:[%s16035_s30 + $0x380] sm:$0xff] }
 0x666   :  { %2134 = vmatpush.msra.mxu0 %v2091_v48  ;;  %v8182_v48 = vld [vmem:[%s16035_s30 + $0x3b8] sm:$0xff] }
 0x667   :  { %v11585_v8 = vpop.f32.mrf.mxu3 }
 0x668   :  { %v11588_v58 = vpop.f32.mrf.mxu1  ;;  %2135 = vmatpush.msra.mxu0 %v2088_v28 }
 0x66a   :  { %2136 = vmatpush.msra.mxu0 %v2085_v27  ;;  %v8184_v27 = vld [vmem:[%s16035_s30 + $0x3c8] sm:$0xff] }
 0x66c   :  { %2137 = vmatpush.msra.mxu0 %v2082_v54 }
 0x66e   :  { %2138 = vmatpush.msra.mxu0 %v2079_v42 }
 0x66f   :  { %v11596_v26 = vpop.f32.mrf.mxu3 }
 0x670   :  { %v11600_v6 = vpop.f32.mrf.mxu1  ;;  %2139 = vmatpush.msra.mxu0 %v2076_v33  ;;  %v8185_v33 = vld [vmem:[%s16035_s30 + $0x3d0] sm:$0xff] }
 0x672   :  { %2140 = vmatpush.msra.mxu0 %v2073_v11 }
 0x674   :  { %2141 = vmatpush.msra.mxu0 %v2070_v5 }
 0x676   :  { %2142 = vmatpush.msra.mxu0 %v2067_v23  ;;  %v8186_v23 = vld [vmem:[%s16035_s30 + $0x3d8] sm:$0xff] }
 0x677   :  { %v11611_v32 = vpop.f32.mrf.mxu3 }
 0x678   :  { %v11613_v35 = vpop.f32.mrf.mxu1  ;;  %2143 = vmatpush.msra.mxu0 %v2064_v20 }
 0x679   :  { %2144 = vmatmul.f32.vlgmr.msra.gmra.mxu0 %v8175_v10 }
 0x67f   :  { %v11618_v56 = vpop.f32.mrf.mxu3 }
 0x680   :  { %v11620_v4 = vpop.f32.mrf.mxu1 }
 0x681   :  { %2147 = vmatmul.f32.gmra.mxu0 %v8176_v19  ;;  %v8187_v19 = vld [vmem:[%s16035_s30 + $0x3e0] sm:$0xff] }
 0x687   :  { %v11625_v63 = vpop.f32.mrf.mxu3 }
 0x688   :  { %v11627_v57 = vpop.f32.mrf.mxu1 }
 0x689   :  { %2150 = vmatmul.f32.gmra.mxu0 %v8177_v49 }
 0x68f   :  { %v2321_v1 = vpop.f32.mrf.mxu3 }
 0x690   :  { %v2256_v18 = vpop.f32.mrf.mxu1 }
 0x691   :  { %2153 = vmatmul.f32.gmra.mxu0 %v8178_v31 }
 0x697   :  { %v2324_v50 = vpop.f32.mrf.mxu3 }
 0x698   :  { %v2259_v55 = vpop.f32.mrf.mxu1 }
 0x699   :  { %2156 = vmatmul.f32.gmra.mxu0 %v8179_v9 }
 0x69f   :  { %v2327_v53 = vpop.f32.mrf.mxu3 }
 0x6a0   :  { %v2262_v59 = vpop.f32.mrf.mxu1 }
 0x6a1   :  { %2159 = vmatmul.f32.gmra.mxu0 %v8180_v22 }
 0x6a7   :  { %v2330_v16 = vpop.f32.mrf.mxu3 }
 0x6a8   :  { %v2265_v17 = vpop.f32.mrf.mxu1 }
 0x6a9   :  { %2162 = vmatmul.f32.gmra.mxu0 %v8181_v37 }
 0x6af   :  { %v2333_v29 = vpop.f32.mrf.mxu3 }
 0x6b0   :  { %v2268_v14 = vpop.f32.mrf.mxu1 }
 0x6b1   :  { %2165 = vmatmul.f32.gmra.mxu0 %v8182_v48  ;;  %v8188_v48 = vld [vmem:[%s16035_s30 + $0x3e8] sm:$0xff] }
 0x6b7   :  { %v2336_v40 = vpop.f32.mrf.mxu3 }
 0x6b8   :  { %v2271_v28 = vpop.f32.mrf.mxu1 }
 0x6b9   :  { %2168 = vmatmul.f32.gmra.mxu0 %v8183_v13 }
 0x6bf   :  { %v2339_v54 = vpop.f32.mrf.mxu3 }
 0x6c0   :  { %v2274_v42 = vpop.f32.mrf.mxu1 }
 0x6c1   :  { %2171 = vmatmul.f32.gmra.mxu0 %v8184_v27  ;;  %v2340_v13 = vadd.f32 %v2339_v54, %v2274_v42  ;;  %v2337_v27 = vadd.f32 %v2336_v40, %v2271_v28  ;;  %v2319_v40 = vadd.f32 %v11625_v63, %v11627_v57  ;;  %v2307_v63 = vadd.f32 %v11585_v8, %v11588_v58  ;;  %v16243_v54 = vld [vmem:[#allocation45_spill] sm:$0xff] }
 0x6c2   :  { %v2304_v57 = vadd.f32 %v11581_v62, %v11583_v44  ;;  %v8235_v62 = vld [vmem:[%s16035_s30 + $0x410] sm:$0xff]  ;;  %v8248_v44 = vld [vmem:[%s16035_s30 + $0x478] sm:$0xff]  ;;  %v1953_v58 = vadd.f32 %v11467_v46, %v11191_v45  ;;  %v1955_v42 = vadd.f32 %v16243_v54, %v11221_v41  ;;  %v16257_v54 = vld [vmem:[#allocation7_spill] sm:$0xff] }
 0x6c3   :  { %v16246_v41 = vld [vmem:[#allocation38_spill] sm:$0xff] }
 0x6c7   :  { %v2342_v11 = vpop.f32.mrf.mxu3 }
 0x6c8   :  { %v2277_v5 = vpop.f32.mrf.mxu1 }
 0x6c9   :  { %2174 = vmatmul.f32.gmra.mxu0 %v8185_v33  ;;  %v2343_v37 = vadd.f32 %v2342_v11, %v2277_v5  ;;  %v2334_v33 = vadd.f32 %v2333_v29, %v2268_v14  ;;  %v2325_v11 = vadd.f32 %v2324_v50, %v2259_v55  ;;  %v2322_v5 = vadd.f32 %v2321_v1, %v2256_v18 }
 0x6ca   :  { %v2310_v1 = vadd.f32 %v11596_v26, %v11600_v6  ;;  %v8234_v26 = vld [vmem:[%s16035_s30 + $0x408] sm:$0xff]  ;;  %v1954_v18 = vadd.f32 %v11477_v38, %v11206_v0  ;;  %v16244_v0 = vld [vmem:[#allocation51_spill] sm:$0xff]  ;;  %v16245_v38 = vld [vmem:[#allocation6_spill] sm:$0xff] }
 0x6cf   :  { %v2345_v20 = vpop.f32.mrf.mxu3 }
 0x6d0   :  { %v2280_v10 = vpop.f32.mrf.mxu1 }
 0x6d1   :  { %2177 = vmatmul.f32.gmra.mxu0 %v8186_v23  ;;  %v2346_v22 = vadd.f32 %v2345_v20, %v2280_v10  ;;  %v2331_v23 = vadd.f32 %v2330_v16, %v2265_v17  ;;  %v8189_v20 = vld [vmem:[%s16035_s30 + $0x3f0] sm:$0xff]  ;;  %v2328_v10 = vadd.f32 %v2327_v53, %v2262_v59  ;;  %v8190_v16 = vld [vmem:[%s16035_s30 + $0x3f8] sm:$0xff]  ;;  %v2316_v17 = vadd.f32 %v11618_v56, %v11620_v4  ;;  %v8233_v56 = vld [vmem:[%s16035_s30 + $0x400] sm:$0xff] }
 0x6d2   :  { %v2313_v53 = vadd.f32 %v11611_v32, %v11613_v35 }
 0x6d7   :  { %v2348_v49 = vpop.f32.mrf.mxu3 }
 0x6d8   :  { %v2283_v31 = vpop.f32.mrf.mxu1 }
 0x6d9   :  { %v2349_v9 = vadd.f32 %v2348_v49, %v2283_v31  ;;  %2180 = vmatmul.f32.gmra.mxu0 %v8187_v19 }
 0x6db   :  { %2368 = vmatpush.msra.mxu2 %v2349_v9 }
 0x6dd   :  { %2369 = vmatpush.msra.mxu2 %v2346_v22  ;;  %v1956_v22 = vadd.f32 %v16245_v38, %v16244_v0  ;;  %v16258_v0 = vld [vmem:[#allocation3_spill] sm:$0xff]  ;;  %v16259_v38 = vld [vmem:[#allocation58_spill] sm:$0xff] }
 0x6df   :  { %2370 = vmatpush.msra.mxu2 %v2343_v37 }
 0x6e1   :  { %2371 = vmatpush.msra.mxu2 %v2340_v13  ;;  %2183 = vmatmul.f32.gmra.mxu0 %v8188_v48 }
 0x6e3   :  { %2372 = vmatpush.msra.mxu2 %v2337_v27 }
 0x6e5   :  { %2373 = vmatpush.msra.mxu2 %v2334_v33 }
 0x6e7   :  { %2374 = vmatpush.msra.mxu2 %v2331_v23 }
 0x6e9   :  { %2375 = vmatpush.msra.mxu2 %v2328_v10  ;;  %2186 = vmatmul.f32.gmra.mxu0 %v8189_v20  ;;  %v16247_v20 = vld [vmem:[#allocation56_spill] sm:$0xff] }
 0x6ea   :  { %v1957_v10 = vadd.f32 %v16247_v20, %v16246_v41  ;;  %v16261_v41 = vld [vmem:[#allocation10_spill] sm:$0xff] }
 0x6eb   :  { %2376 = vmatpush.msra.mxu2 %v2325_v11 }
 0x6ed   :  { %2377 = vmatpush.msra.mxu2 %v2322_v5 }
 0x6ef   :  { %2378 = vmatpush.msra.mxu2 %v2319_v40 }
 0x6f1   :  { %2379 = vmatpush.msra.mxu2 %v2316_v17  ;;  %2189 = vmatmul.f32.gmra.mxu0 %v8190_v16 }
 0x6f3   :  { %2380 = vmatpush.msra.mxu2 %v2313_v53 }
 0x6f5   :  { %2381 = vmatpush.msra.mxu2 %v2310_v1  ;;  %v16248_v1 = vld [vmem:[#allocation39_spill] sm:$0xff] }
 0x6f7   :  { %2382 = vmatpush.msra.mxu2 %v2307_v63  ;;  %v16249_v63 = vld [vmem:[#allocation43_spill] sm:$0xff] }
 0x6f9   :  { %2383 = vmatpush.msra.mxu2 %v2304_v57  ;;  %v1958_v57 = vadd.f32 %v16249_v63, %v16248_v1  ;;  %v16263_v1 = vld [vmem:[#allocation9_spill] sm:$0xff] }
 0x6fa   :  { %2384 = vmatmul.f32.vlgmr.msra.gmra.mxu2 %v8233_v56 }
 0x6fb   :  { %3152 = vmatpush.msrb.mxu2 %v11382_v30 }
 0x6fd   :  { %3153 = vmatpush.msrb.mxu2 %v11351_v15  ;;  %v8247_v15 = vld [vmem:[%s16035_s30 + $0x470] sm:$0xff] }
 0x6ff   :  { %3154 = vmatpush.msrb.mxu2 %v11329_v43 }
 0x701   :  { %3155 = vmatpush.msrb.mxu2 %v11310_v12  ;;  %v8236_v12 = vld [vmem:[%s16035_s30 + $0x418] sm:$0xff] }
 0x702   :  { %2387 = vmatmul.f32.gmra.mxu2 %v8234_v26 }
 0x703   :  { %3156 = vmatpush.msrb.mxu2 %v11291_v51  ;;  %v2481_v51 = vld [vmem:[%s16242_s25] sm:$0xff] }
 0x704   :  { %2546 = vmatpush.msrb.mxu0 %v2481_v51  ;;  %v16253_v51 = vld [vmem:[#allocation57_spill] sm:$0xff] }
 0x705   :  { %3157 = vmatpush.msrb.mxu2 %v11276_v21  ;;  %v8246_v21 = vld [vmem:[%s16035_s30 + $0x468] sm:$0xff] }
 0x707   :  { %3158 = vmatpush.msrb.mxu2 %v11261_v34  ;;  %v2145_v34 = vpop.f32.mrf.mxu0 }
 0x708   :  { %v2193_v6 = vadd.f32 %v2145_v34, %v1953_v58 }
 0x709   :  { %3159 = vmatpush.msrb.mxu2 %v11246_v39  ;;  %v8237_v39 = vld [vmem:[%s16035_s30 + $0x420] sm:$0xff] }
 0x70a   :  { %2390 = vmatmul.f32.gmra.mxu2 %v8235_v62 }
 0x70b   :  { %3160 = vmatpush.msrb.mxu2 %v11231_v2  ;;  %v8245_v2 = vld [vmem:[%s16035_s30 + $0x460] sm:$0xff] }
 0x70d   :  { %3161 = vmatpush.msrb.mxu2 %v11216_v25  ;;  %v8244_v25 = vld [vmem:[%s16035_s30 + $0x458] sm:$0xff] }
 0x70f   :  { %3162 = vmatpush.msrb.mxu2 %v11201_v36  ;;  %v8238_v36 = vld [vmem:[%s16035_s30 + $0x428] sm:$0xff]  ;;  %v2148_v43 = vpop.f32.mrf.mxu0 }
 0x710   :  { %v2194_v59 = vadd.f32 %v2148_v43, %v1954_v18 }
 0x711   :  { %3163 = vmatpush.msrb.mxu2 %v11182_v60  ;;  %v8243_v60 = vld [vmem:[%s16035_s30 + $0x450] sm:$0xff] }
 0x712   :  { %2393 = vmatmul.f32.gmra.mxu2 %v8236_v12 }
 0x713   :  { %3164 = vmatpush.msrb.mxu2 %v11165_v3  ;;  %v8239_v3 = vld [vmem:[%s16035_s30 + $0x430] sm:$0xff] }
 0x715   :  { %3165 = vmatpush.msrb.mxu2 %v11147_v61  ;;  %v8240_v61 = vld [vmem:[%s16035_s30 + $0x438] sm:$0xff] }
 0x717   :  { %3166 = vmatpush.msrb.mxu2 %v11137_v47  ;;  %v8242_v47 = vld [vmem:[%s16035_s30 + $0x448] sm:$0xff]  ;;  %v2151_v30 = vpop.f32.mrf.mxu0 }
 0x718   :  { %v2195_v46 = vadd.f32 %v2151_v30, %v1955_v42 }
 0x719   :  { %3167 = vmatpush.msrb.mxu2 %v11127_v24  ;;  %v8241_v24 = vld [vmem:[%s16035_s30 + $0x440] sm:$0xff] }
 0x71a   :  { %2396 = vmatmul.f32.gmra.mxu2 %v8237_v39 }
 0x71f   :  { %v2154_v8 = vpop.f32.mrf.mxu0 }
 0x720   :  { %v2196_v48 = vadd.f32 %v2154_v8, %v1956_v22  ;;  %v1963_v22 = vadd.f32 %v16259_v38, %v16258_v0 }
 0x722   :  { %2399 = vmatmul.f32.gmra.mxu2 %v8238_v36  ;;  %v16250_v36 = vld [vmem:[#allocation52_spill] sm:$0xff] }
 0x727   :  { %v2157_v55 = vpop.f32.mrf.mxu0 }
 0x728   :  { %v2197_v5 = vadd.f32 %v2157_v55, %v1957_v10 }
 0x72a   :  { %2402 = vmatmul.f32.gmra.mxu2 %v8239_v3  ;;  %v16251_v3 = vld [vmem:[#allocation44_spill] sm:$0xff] }
 0x72f   :  { %v2160_v19 = vpop.f32.mrf.mxu0 }
 0x730   :  { %v2198_v26 = vadd.f32 %v2160_v19, %v1958_v57 }
 0x732   :  { %2405 = vmatmul.f32.gmra.mxu2 %v8240_v61  ;;  %v1959_v61 = vadd.f32 %v16251_v3, %v16250_v36  ;;  %v16264_v36 = vld [vmem:[#allocation5_spill] sm:$0xff]  ;;  %v16265_v3 = vld [vmem:[#allocation59_spill] sm:$0xff] }
 0x737   :  { %v2163_v33 = vpop.f32.mrf.mxu0 }
 0x73a   :  { %2408 = vmatmul.f32.gmra.mxu2 %v8241_v24 }
 0x73f   :  { %v2166_v53 = vpop.f32.mrf.mxu0 }
 0x742   :  { %2411 = vmatmul.f32.gmra.mxu2 %v8242_v47 }
 0x747   :  { %v2169_v47 = vpop.f32.mrf.mxu0 }
 0x74a   :  { %2414 = vmatmul.f32.gmra.mxu2 %v8243_v60  ;;  %v2199_v60 = vadd.f32 %v2163_v33, %v1959_v61  ;;  %v1966_v61 = vadd.f32 %v16265_v3, %v16264_v36 }
 0x752   :  { %2417 = vmatmul.f32.gmra.mxu2 %v8244_v25 }
 0x75a   :  { %2420 = vmatmul.f32.gmra.mxu2 %v8245_v2 }
 0x762   :  { %2423 = vmatmul.f32.gmra.mxu2 %v8246_v21  ;;  %v16252_v21 = vld [vmem:[#allocation36_spill] sm:$0xff] }
 0x763   :  { %v1960_v43 = vadd.f32 %v16253_v51, %v16252_v21  ;;  %v16266_v21 = vld [vmem:[#allocation4_spill] sm:$0xff]  ;;  %v16267_v51 = vld [vmem:[#allocation62_spill] sm:$0xff] }
 0x765   :  { %v2200_v30 = vadd.f32 %v2166_v53, %v1960_v43  ;;  %v16262_v53 = vld [vmem:[#allocation54_spill] sm:$0xff]  ;;  %v1967_v43 = vadd.f32 %v16267_v51, %v16266_v21 }
 0x766   :  { %v1965_v63 = vadd.f32 %v16263_v1, %v16262_v53 }
 0x76a   :  { %2426 = vmatmul.f32.gmra.mxu2 %v8247_v15 }
 0x772   :  { %2429 = vmatmul.f32.gmra.mxu2 %v8248_v44  ;;  %v2172_v44 = vpop.f32.mrf.mxu0 }
 0x77d   :  { %v2385_v32 = vpop.f32.mrf.mxu2 }
 0x77e   :  { %v2433_v35 = vadd.f32 %v2385_v32, %v2193_v6  ;;  %v16254_v32 = vld [vmem:[#allocation37_spill] sm:$0xff] }
 0x780   :  { %v2449_v4 = vmul.f32 0.2, %v2433_v35 }
 0x782   :  { %v2465_v50 = vmax.f32 %v2433_v35, %v2449_v4  ;;  %v16255_v35 = vld [vmem:[#allocation8_spill] sm:$0xff] }
 0x783   :  { %v1961_v4 = vadd.f32 %v16255_v35, %v16254_v32  ;;  %v16268_v32 = vld [vmem:[#allocation55_spill] sm:$0xff] }
 0x784   :  { %8249 = vmatmul.msk.f32.vlgmr.msrb.gmra.mxu0 %vm2482_vm4, %v2465_v50  ;;  %v1968_v35 = vadd.f32 %v11577_v7, %v16268_v32 }
 0x785   :  { %v2388_v29 = vpop.f32.mrf.mxu2  ;;  %v2201_v50 = vadd.f32 %v2169_v47, %v1961_v4 }
 0x786   :  { %v2434_v14 = vadd.f32 %v2388_v29, %v2194_v59  ;;  %v2175_v29 = vpop.f32.mrf.mxu0 }
 0x788   :  { %v2450_v28 = vmul.f32 0.2, %v2434_v14 }
 0x78a   :  { %v2466_v45 = vmax.f32 %v2434_v14, %v2450_v28  ;;  %v16256_v28 = vld [vmem:[#allocation53_spill] sm:$0xff] }
 0x78b   :  { %v1962_v42 = vadd.f32 %v16257_v54, %v16256_v28 }
 0x78c   :  { %8250 = vmatmul.msk.f32.gmra.mxu0 %vm2482_vm4, %v2466_v45 }
 0x78d   :  { %v2391_v49 = vpop.f32.mrf.mxu2 }
 0x78e   :  { %v2435_v31 = vadd.f32 %v2391_v49, %v2195_v46  ;;  %v2202_v46 = vadd.f32 %v2172_v44, %v1962_v42 }
 0x790   :  { %v2451_v9 = vmul.f32 0.2, %v2435_v31 }
 0x792   :  { %v2467_v37 = vmax.f32 %v2435_v31, %v2451_v9  ;;  %v2178_v9 = vpop.f32.mrf.mxu0 }
 0x794   :  { %8251 = vmatmul.msk.f32.gmra.mxu0 %vm2482_vm4, %v2467_v37 }
 0x795   :  { %v2394_v13 = vpop.f32.mrf.mxu2 }
 0x796   :  { %v2436_v27 = vadd.f32 %v2394_v13, %v2196_v48  ;;  %v2203_v48 = vadd.f32 %v2175_v29, %v1963_v22 }
 0x798   :  { %v2452_v23 = vmul.f32 0.2, %v2436_v27 }
 0x79a   :  { %v2468_v11 = vmax.f32 %v2436_v27, %v2452_v23  ;;  %v16260_v23 = vld [vmem:[#allocation35_spill] sm:$0xff] }
 0x79b   :  { %v1964_v20 = vadd.f32 %v16261_v41, %v16260_v23 }
 0x79c   :  { %8252 = vmatmul.msk.f32.gmra.mxu0 %vm2482_vm4, %v2468_v11  ;;  %v2181_v11 = vpop.f32.mrf.mxu0 }
 0x79d   :  { %v2397_v40 = vpop.f32.mrf.mxu2 }
 0x79e   :  { %v2437_v16 = vadd.f32 %v2397_v40, %v2197_v5  ;;  %v2204_v5 = vadd.f32 %v2178_v9, %v1964_v20 }
 0x7a0   :  { %v2453_v17 = vmul.f32 0.2, %v2437_v16 }
 0x7a2   :  { %v2469_v56 = vmax.f32 %v2437_v16, %v2453_v17 }
 0x7a4   :  { %8253 = vmatmul.msk.f32.gmra.mxu0 %vm2482_vm4, %v2469_v56  ;;  %v2205_v56 = vadd.f32 %v2181_v11, %v1965_v63 }
 0x7a5   :  { %v2400_v62 = vpop.f32.mrf.mxu2 }
 0x7a6   :  { %v2438_v12 = vadd.f32 %v2400_v62, %v2198_v26  ;;  %v2184_v26 = vpop.f32.mrf.mxu0 }
 0x7a7   :  { %v2206_v47 = vadd.f32 %v2184_v26, %v1966_v61 }
 0x7a8   :  { %v2454_v39 = vmul.f32 0.2, %v2438_v12 }
 0x7aa   :  { %v2470_v24 = vmax.f32 %v2438_v12, %v2454_v39 }
 0x7ac   :  { %8254 = vmatmul.msk.f32.gmra.mxu0 %vm2482_vm4, %v2470_v24 }
 0x7ad   :  { %v2403_v25 = vpop.f32.mrf.mxu2 }
 0x7ae   :  { %v2439_v2 = vadd.f32 %v2403_v25, %v2199_v60 }
 0x7b0   :  { %v2455_v34 = vmul.f32 0.2, %v2439_v2 }
 0x7b2   :  { %v2471_v15 = vmax.f32 %v2439_v2, %v2455_v34  ;;  %v2187_v2 = vpop.f32.mrf.mxu0 }
 0x7b4   :  { %8255 = vmatmul.msk.f32.gmra.mxu0 %vm2482_vm4, %v2471_v15 }
 0x7b5   :  { %v2406_v8 = vpop.f32.mrf.mxu2 }
 0x7b6   :  { %v2440_v58 = vadd.f32 %v2406_v8, %v2200_v30  ;;  %v2207_v30 = vadd.f32 %v2187_v2, %v1967_v43 }
 0x7b8   :  { %v2456_v6 = vmul.f32 0.2, %v2440_v58 }
 0x7ba   :  { %v2472_v18 = vmax.f32 %v2440_v58, %v2456_v6  ;;  %v2190_v6 = vpop.f32.mrf.mxu0 }
 0x7bc   :  { %8256 = vmatmul.msk.f32.gmra.mxu0 %vm2482_vm4, %v2472_v18  ;;  %v2208_v18 = vadd.f32 %v2190_v6, %v1968_v35 }
 0x7bd   :  { %v2409_v55 = vpop.f32.mrf.mxu2 }
 0x7be   :  { %v2441_v59 = vadd.f32 %v2409_v55, %v2201_v50 }
 0x7c0   :  { %v2457_v14 = vmul.f32 0.2, %v2441_v59 }
 0x7c2   :  { %v2473_v45 = vmax.f32 %v2441_v59, %v2457_v14 }
 0x7c4   :  { %8257 = vmatmul.msk.f32.gmra.mxu0 %vm2482_vm4, %v2473_v45 }
 0x7c5   :  { %v2412_v19 = vpop.f32.mrf.mxu2 }
 0x7c6   :  { %v2442_v49 = vadd.f32 %v2412_v19, %v2202_v46 }
 0x7c8   :  { %v2458_v31 = vmul.f32 0.2, %v2442_v49 }
 0x7ca   :  { %v2474_v37 = vmax.f32 %v2442_v49, %v2458_v31 }
 0x7cc   :  { %8258 = vmatmul.msk.f32.gmra.mxu0 %vm2482_vm4, %v2474_v37 }
 0x7cd   :  { %v2415_v13 = vpop.f32.mrf.mxu2 }
 0x7ce   :  { %v2443_v27 = vadd.f32 %v2415_v13, %v2203_v48 }
 0x7d0   :  { %v2459_v33 = vmul.f32 0.2, %v2443_v27 }
 0x7d2   :  { %v2475_v10 = vmax.f32 %v2443_v27, %v2459_v33 }
 0x7d4   :  { %8259 = vmatmul.msk.f32.gmra.mxu0 %vm2482_vm4, %v2475_v10 }
 0x7d5   :  { %v2418_v40 = vpop.f32.mrf.mxu2 }
 0x7d6   :  { %v2444_v16 = vadd.f32 %v2418_v40, %v2204_v5 }
 0x7d8   :  { %v2460_v17 = vmul.f32 0.2, %v2444_v16 }
 0x7da   :  { %v2476_v57 = vmax.f32 %v2444_v16, %v2460_v17 }
 0x7dc   :  { %8260 = vmatmul.msk.f32.gmra.mxu0 %vm2482_vm4, %v2476_v57 }
 0x7dd   :  { %v2421_v62 = vpop.f32.mrf.mxu2 }
 0x7de   :  { %v2445_v12 = vadd.f32 %v2421_v62, %v2205_v56 }
 0x7e0   :  { %v2461_v39 = vmul.f32 0.2, %v2445_v12 }
 0x7e2   :  { %v2477_v24 = vmax.f32 %v2445_v12, %v2461_v39 }
 0x7e4   :  { %8261 = vmatmul.msk.f32.gmra.mxu0 %vm2482_vm4, %v2477_v24 }
 0x7e5   :  { %v2424_v60 = vpop.f32.mrf.mxu2 }
 0x7e6   :  { %v2446_v25 = vadd.f32 %v2424_v60, %v2206_v47 }
 0x7e8   :  { %v2462_v34 = vmul.f32 0.2, %v2446_v25 }
 0x7ea   :  { %v2478_v15 = vmax.f32 %v2446_v25, %v2462_v34 }
 0x7ec   :  { %8262 = vmatmul.msk.f32.gmra.mxu0 %vm2482_vm4, %v2478_v15 }
 0x7ed   :  { %v2427_v44 = vpop.f32.mrf.mxu2 }
 0x7ee   :  { %v2447_v8 = vadd.f32 %v2427_v44, %v2207_v30 }
 0x7f0   :  { %v2463_v58 = vmul.f32 0.2, %v2447_v8 }
 0x7f2   :  { %v2479_v4 = vmax.f32 %v2447_v8, %v2463_v58 }
 0x7f4   :  { %8263 = vmatmul.msk.f32.gmra.mxu0 %vm2482_vm4, %v2479_v4 }
 0x7f5   :  { %v2430_v50 = vpop.f32.mrf.mxu2 }
 0x7f6   :  { %v2448_v55 = vadd.f32 %v2430_v50, %v2208_v18 }
 0x7f8   :  { %v2464_v59 = vmul.f32 0.2, %v2448_v55 }
 0x7fa   :  { %v2480_v29 = vmax.f32 %v2448_v55, %v2464_v59 }
 0x7fc   :  { %8264 = vmatmul.msk.f32.gmra.mxu0 %vm2482_vm4, %v2480_v29 }
 0x801   :  { %v2548_v14 = vpop.f32.mrf.mxu0 }
 0x802   :  { %v2596_v9 = vsub.f32 0.0, %v2548_v14 }
 0x804   :  { %v2612_v38 = vmul.f32 1.442695, %v2596_v9 }
 0x806   :  { %8995 = vpow2.f32 %v2612_v38 }
 0x809   :  { %v2551_v28 = vpop.f32.mrf.mxu0 }
 0x80a   :  { %v2597_v22 = vsub.f32 0.0, %v2551_v28 }
 0x80c   :  { %v2614_v37 = vmul.f32 1.442695, %v2597_v22  ;;  %v8996_v13 = vpop.eup %8995 }
 0x80d   :  { %v11795_v41 = vadd.f32 1.0, %v8996_v13 }
 0x80e   :  { %8997 = vpow2.f32 %v2614_v37 }
 0x80f   :  { %8999 = vrcp.f32 %v11795_v41 }
 0x811   :  { %v2554_v54 = vpop.f32.mrf.mxu0 }
 0x812   :  { %v2598_v27 = vsub.f32 0.0, %v2554_v54 }
 0x814   :  { %v2616_v10 = vmul.f32 1.442695, %v2598_v27  ;;  %v8998_v16 = vpop.eup %8997 }
 0x815   :  { %v11798_v26 = vadd.f32 1.0, %v8998_v16  ;;  %v11800_v24 = vpop.eup %8999 }
 0x816   :  { %9001 = vpow2.f32 %v2616_v10  ;;  %v2661_v37 = vmul.f32 %v11800_v24, %v11795_v41 }
 0x819   :  { %v2557_v42 = vpop.f32.mrf.mxu0 }
 0x81a   :  { %v2599_v33 = vsub.f32 0.0, %v2557_v42 }
 0x81c   :  { %v2618_v5 = vmul.f32 1.442695, %v2599_v33  ;;  %v9002_v25 = vpop.eup %9001 }
 0x81d   :  { %v11803_v44 = vadd.f32 1.0, %v9002_v25 }
 0x81e   :  { %9003 = vpow2.f32 %v2618_v5 }
 0x821   :  { %v2560_v45 = vpop.f32.mrf.mxu0 }
 0x822   :  { %v2600_v23 = vsub.f32 0.0, %v2560_v45 }
 0x824   :  { %v2620_v17 = vmul.f32 1.442695, %v2600_v23  ;;  %v9004_v34 = vpop.eup %9003 }
 0x825   :  { %v11805_v58 = vadd.f32 1.0, %v9004_v34 }
 0x826   :  { %9005 = vpow2.f32 %v2620_v17  ;;  %v2662_v17 = vsub.f32 1.0, %v2661_v37 }
 0x829   :  { %v2563_v46 = vpop.f32.mrf.mxu0 }
 0x82a   :  { %v2601_v20 = vsub.f32 0.0, %v2563_v46 }
 0x82c   :  { %v2622_v1 = vmul.f32 1.442695, %v2601_v20  ;;  %v9006_v51 = vpop.eup %9005 }
 0x82d   :  { %v11809_v32 = vadd.f32 1.0, %v9006_v51 }
 0x82e   :  { %9007 = vpow2.f32 %v2622_v1 }
 0x831   :  { %v2566_v19 = vpop.f32.mrf.mxu0 }
 0x832   :  { %v2602_v11 = vsub.f32 0.0, %v2566_v19 }
 0x834   :  { %v2624_v57 = vmul.f32 1.442695, %v2602_v11  ;;  %v9008_v30 = vpop.eup %9007 }
 0x835   :  { %v11811_v4 = vadd.f32 1.0, %v9008_v30 }
 0x836   :  { %9009 = vpow2.f32 %v2624_v57 }
 0x837   :  { %9011 = vrcp.f32 %v11798_v26 }
 0x839   :  { %v2569_v49 = vpop.f32.mrf.mxu0 }
 0x83a   :  { %v2603_v53 = vsub.f32 0.0, %v2569_v49 }
 0x83c   :  { %v2626_v12 = vmul.f32 1.442695, %v2603_v53  ;;  %v9010_v8 = vpop.eup %9009 }
 0x83d   :  { %v11807_v6 = vpop.eup %9011  ;;  %v11814_v50 = vadd.f32 1.0, %v9010_v8 }
 0x83e   :  { %9013 = vpow2.f32 %v2626_v12  ;;  %v2676_v33 = vmul.f32 %v11807_v6, %v11798_v26 }
 0x841   :  { %v2572_v31 = vpop.f32.mrf.mxu0 }
 0x842   :  { %v2604_v63 = vsub.f32 0.0, %v2572_v31 }
 0x844   :  { %v2628_v39 = vmul.f32 1.442695, %v2604_v63  ;;  %v9014_v35 = vpop.eup %9013  ;;  %v2677_v63 = vsub.f32 1.0, %v2676_v33 }
 0x845   :  { %v11818_v28 = vadd.f32 1.0, %v9014_v35 }
 0x846   :  { %9015 = vpow2.f32 %v2628_v39 }
 0x849   :  { %v2575_v7 = vpop.f32.mrf.mxu0 }
 0x84a   :  { %v2605_v56 = vsub.f32 0.0, %v2575_v7 }
 0x84c   :  { %v2630_v3 = vmul.f32 1.442695, %v2605_v56  ;;  %v9016_v18 = vpop.eup %9015 }
 0x84d   :  { %v11821_v42 = vadd.f32 1.0, %v9016_v18 }
 0x84e   :  { %9017 = vpow2.f32 %v2630_v3 }
 0x851   :  { %v2578_v0 = vpop.f32.mrf.mxu0 }
 0x852   :  { %v2606_v62 = vsub.f32 0.0, %v2578_v0 }
 0x854   :  { %v2632_v47 = vmul.f32 1.442695, %v2606_v62  ;;  %v9018_v59 = vpop.eup %9017 }
 0x855   :  { %v11824_v19 = vadd.f32 1.0, %v9018_v59 }
 0x856   :  { %9019 = vpow2.f32 %v2632_v47 }
 0x857   :  { %vm2800_vm2 = vweird.f32 %v11824_v19 }
 0x859   :  { %v2581_v48 = vpop.f32.mrf.mxu0 }
 0x85a   :  { %v2607_v61 = vsub.f32 0.0, %v2581_v48 }
 0x85c   :  { %v2634_v43 = vmul.f32 1.442695, %v2607_v61  ;;  %v9020_v14 = vpop.eup %9019  ;;  %v11877_v61 = vmul.f32 %v11800_v24, %v2662_v17 }
 0x85d   :  { %v11826_v31 = vadd.f32 1.0, %v9020_v14 }
 0x85f   :  { %vm2815_vm14 = vweird.f32 %v11826_v31 }
 0x861   :  { %v2584_v40 = vpop.f32.mrf.mxu0 }
 0x862   :  { %v2608_v36 = vsub.f32 0.0, %v2584_v40 }
 0x864   :  { %v2636_v21 = vmul.f32 1.442695, %v2608_v36 }
 0x869   :  { %v2587_v60 = vpop.f32.mrf.mxu0 }
 0x86a   :  { %v2609_v2 = vsub.f32 0.0, %v2587_v60 }
 0x86c   :  { %v2638_v15 = vmul.f32 1.442695, %v2609_v2  ;;  %v11885_v2 = vmul.f32 %v11807_v6, %v2677_v63 }
 0x86e   :  { %9021 = vpow2.f32 %v2638_v15 }
 0x86f   :  { %9023 = vpow2.f32 %v2636_v21 }
 0x870   :  { %9025 = vpow2.f32 %v2634_v43 }
 0x871   :  { %9027 = vrcp.f32 %v11803_v44  ;;  %v2590_v55 = vpop.f32.mrf.mxu0 }
 0x872   :  { %9029 = vrcp.f32 %v11805_v58  ;;  %v2610_v29 = vsub.f32 0.0, %v2590_v55 }
 0x873   :  { %9031 = vrcp.f32 %v11809_v32 }
 0x874   :  { %v9022_v54 = vpop.eup %9021  ;;  %9033 = vrcp.f32 %v11811_v4  ;;  %v2640_v45 = vmul.f32 1.442695, %v2610_v29 }
 0x875   :  { %v9024_v46 = vpop.eup %9023  ;;  %9035 = vrcp.f32 %v11814_v50  ;;  %v11831_v9 = vadd.f32 1.0, %v9022_v54 }
 0x876   :  { %v9026_v49 = vpop.eup %9025  ;;  %9037 = vpow2.f32 %v2640_v45  ;;  %v11836_v38 = vadd.f32 1.0, %v9024_v46 }
 0x877   :  { %v11828_v7 = vpop.eup %9027  ;;  %9039 = vrcp.f32 %v11818_v28  ;;  %v11843_v48 = vadd.f32 1.0, %v9026_v49  ;;  %vm2860_vm11 = vweird.f32 %v11831_v9  ;;  %v2864_v8 = vand.u32 2147483647, %v11831_v9 }
 0x878   :  { %v11833_v0 = vpop.eup %9029  ;;  %9041 = vrcp.f32 %v11821_v42  ;;  %v2691_v10 = vmul.f32 %v11828_v7, %v11803_v44  ;;  %vm2845_vm6 = vweird.f32 %v11836_v38 }
 0x879   :  { %v11838_v22 = vpop.eup %9031  ;;  %9043 = vrcp.f32 %v11824_v19  ;;  %v2593_v13 = vpop.f32.mrf.mxu0  ;;  %v2706_v5 = vmul.f32 %v11833_v0, %v11805_v58  ;;  %vm2830_vm8 = vweird.f32 %v11843_v48 }
 0x87a   :  { %v11845_v27 = vpop.eup %9033  ;;  %9045 = vrcp.f32 %v11826_v31  ;;  %v2611_v23 = vsub.f32 0.0, %v2593_v13  ;;  %v2692_v56 = vsub.f32 1.0, %v2691_v10  ;;  %v2721_v62 = vmul.f32 %v11838_v22, %v11809_v32 }
 0x87b   :  { %v11850_v20 = vpop.eup %9035  ;;  %9047 = vrcp.f32 %v11831_v9  ;;  %v2707_v39 = vsub.f32 1.0, %v2706_v5  ;;  %v2736_v36 = vmul.f32 %v11845_v27, %v11811_v4  ;;  %v2866_v13 = vand.u32 2147483648, %v11831_v9 }
 0x87c   :  { %v9038_v11 = vpop.eup %9037  ;;  %9049 = vrcp.f32 %v11836_v38  ;;  %v2642_v40 = vmul.f32 1.442695, %v2611_v23  ;;  %v2751_v60 = vmul.f32 %v11850_v20, %v11814_v50  ;;  %v11894_v15 = vmul.f32 %v11828_v7, %v2692_v56 }
 0x87d   :  { %v11858_v16 = vpop.eup %9039  ;;  %9051 = vrcp.f32 %v11843_v48  ;;  %v11861_v53 = vadd.f32 1.0, %v9038_v11  ;;  %v2722_v30 = vsub.f32 1.0, %v2721_v62  ;;  %v11900_v55 = vmul.f32 %v11833_v0, %v2707_v39 }
 0x87e   :  { %v11863_v1 = vpop.eup %9041  ;;  %9053 = vpow2.f32 %v2642_v40  ;;  %v2766_v51 = vmul.f32 %v11858_v16, %v11818_v28  ;;  %v2737_v59 = vsub.f32 1.0, %v2736_v36  ;;  %v2752_v45 = vsub.f32 1.0, %v2751_v60 }
 0x87f   :  { %v11865_v57 = vpop.eup %9043  ;;  %9055 = vrcp.f32 %v11861_v53  ;;  %v2781_v35 = vmul.f32 %v11863_v1, %v11821_v42  ;;  %v11920_v11 = vmul.f32 %v11838_v22, %v2722_v30  ;;  %vm2875_vm15 = vweird.f32 %v11861_v53 }
 0x880   :  { %v11870_v12 = vpop.eup %9045  ;;  %v2796_v29 = vmul.f32 %v11865_v57, %v11824_v19  ;;  %v2767_v33 = vsub.f32 1.0, %v2766_v51  ;;  %v11925_v17 = vmul.f32 %v11845_v27, %v2737_v59  ;;  %v11928_v39 = vmul.f32 %v11850_v20, %v2752_v45 }
 0x881   :  { %v11874_v3 = vpop.eup %9047  ;;  %v2811_v46 = vmul.f32 %v11870_v12, %v11826_v31  ;;  %v2782_v40 = vsub.f32 1.0, %v2781_v35  ;;  %vm2816_vm7 = vweird.f32 %v11870_v12  ;;  %vm2801_vm13 = vweird.f32 %v11865_v57 }
 0x882   :  { %v11882_v25 = vpop.eup %9049  ;;  %v2856_v14 = vmul.f32 %v11874_v3, %v11831_v9  ;;  %v2797_v63 = vsub.f32 1.0, %v2796_v29  ;;  %v11932_v30 = vmul.f32 %v11858_v16, %v2767_v33  ;;  %v2836_v33 = vand.u32 2147483648, %v11843_v48 }
 0x883   :  { %v11891_v43 = vpop.eup %9051  ;;  %v2841_v49 = vmul.f32 %v11882_v25, %v11836_v38  ;;  %v2812_v60 = vsub.f32 1.0, %v2811_v46  ;;  %v11937_v59 = vmul.f32 %v11863_v1, %v2782_v40  ;;  %vm2846_vm10 = vweird.f32 %v11882_v25 }
 0x884   :  { %v9054_v18 = vpop.eup %9053  ;;  %v2826_v23 = vmul.f32 %v11891_v43, %v11843_v48  ;;  %v2857_v56 = vsub.f32 1.0, %v2856_v14  ;;  %v2798_v46 = vmul.f32 %v11865_v57, %v2797_v63  ;;  %vm2831_vm5 = vweird.f32 %v11891_v43 }
 0x885   :  { %v11906_v54 = vpop.eup %9055  ;;  %v11912_v37 = vadd.f32 1.0, %v9054_v18  ;;  %v2842_v51 = vsub.f32 1.0, %v2841_v49  ;;  %v2834_v49 = vand.u32 2147483647, %v11843_v48  ;;  %vm2861_vm12 = vweird.f32 %v11874_v3 }
 0x886   :  { %v2871_v10 = vmul.f32 %v11906_v54, %v11861_v53  ;;  %v2827_v18 = vsub.f32 1.0, %v2826_v23  ;;  %vm2876_vm9 = vweird.f32 %v11906_v54  ;;  %v2849_v35 = vand.u32 2147483647, %v11836_v38 }
 0x887   :  { %9057 = vrcp.f32 %v11912_v37  ;;  %v2843_v40 = vmul.f32 %v11882_v25, %v2842_v51  ;;  %vm11970_vm4 = vmor %vm2875_vm15, %vm2876_vm9  ;;  %v2896_v36 = vand.u32 2147483648, %v11912_v37  ;;  %v2851_v29 = vand.u32 2147483648, %v11836_v38 }
 0x888   :  { %v2872_v62 = vsub.f32 1.0, %v2871_v10  ;;  %v2858_v10 = vmul.f32 %v11874_v3, %v2857_v56  ;;  %v2828_v34 = vmul.f32 %v11891_v43, %v2827_v18  ;;  %vm11988_vm9 = vmor %vm2860_vm11, %vm2861_vm12  ;;  %vm2890_vm11 = vweird.f32 %v11912_v37 }
 0x889   :  { %v2844_v21 = vadd.f32 %v11882_v25, %v2843_v40  ;;  %vm2865_vm15 = vcmp.eq.f32.partialorder %v2864_v8, 8.507059e+37  ;;  %v16281_v48 = vand.u32 2147483648, %v11826_v31 }
 0x88a   :  { %v2873_v47 = vmul.f32 %v11906_v54, %v2872_v62  ;;  %v2813_v62 = vmul.f32 %v11870_v12, %v2812_v60  ;;  %v2881_v60 = vand.u32 2147483648, %v11861_v53  ;;  %v2859_v51 = vadd.f32 %v11874_v3, %v2858_v10 }
 0x88b   :  { %v2894_v10 = vand.u32 2147483647, %v11912_v37 }
 0x88c   :  { %v2874_v63 = vadd.f32 %v11906_v54, %v2873_v47  ;;  %v2879_v47 = vand.u32 2147483647, %v11861_v53  ;;  %v2863_v9 = vsel %vm11988_vm9, %v11874_v3, %v2859_v51  ;;  %v2814_v5 = vadd.f32 %v11870_v12, %v2813_v62 }
 0x88d   :  { %v9058_v23 = vpop.eup %9057  ;;  %vm2895_vm0 = vcmp.eq.f32.partialorder %v2894_v10, 8.507059e+37  ;;  %v2799_v3 = vadd.f32 %v11865_v57, %v2798_v46  ;;  %vm2755_vm9 = vweird.f32 %v11814_v50  ;;  %v2784_v46 = vadd.f32 %v11863_v1, %v11937_v59 }
 0x88e   :  { %v2886_v56 = vmul.f32 %v9058_v23, %v11912_v37  ;;  %vm2891_vm1 = vweird.f32 %v9058_v23  ;;  %v2878_v40 = vsel %vm11970_vm4, %v11906_v54, %v2874_v63  ;;  %vm11998_vm4 = vmor %vm2845_vm6, %vm2846_vm10  ;;  %vm2880_vm3 = vcmp.eq.f32.partialorder %v2879_v47, 8.507059e+37 }
 0x88f   :  { %v2867_v63 = vor.u32 1.1754944e-38, %v2866_v13  ;;  %vm2892_vm12 = vmor %vm2890_vm11, %vm2891_vm1  ;;  %vm2756_vm6 = vweird.f32 %v11850_v20  ;;  %vm2770_vm10 = vweird.f32 %v11818_v28  ;;  %v2848_v37 = vsel %vm11998_vm4, %v11882_v25, %v2844_v21 }
 0x890   :  { %v2887_v18 = vsub.f32 1.0, %v2886_v56  ;;  %v2829_v56 = vadd.f32 %v11891_v43, %v2828_v34  ;;  %vm12018_vm1 = vmor %vm2830_vm8, %vm2831_vm5  ;;  %vm2850_vm11 = vcmp.eq.f32.partialorder %v2849_v35, 8.507059e+37  ;;  %v2837_v35 = vor.u32 1.1754944e-38, %v2836_v33 }
 0x891   :  { %v2868_v62 = vsel %vm2865_vm15, %v2867_v63, %v2863_v9  ;;  %vm2726_vm5 = vweird.f32 %v11838_v22  ;;  %vm2740_vm8 = vweird.f32 %v11811_v4  ;;  %vm2835_vm15 = vcmp.eq.f32.partialorder %v2834_v49, 8.507059e+37 }
 0x892   :  { %v2888_v53 = vmul.f32 %v9058_v23, %v2887_v18  ;;  %v2882_v18 = vor.u32 1.1754944e-38, %v2881_v60  ;;  %v2897_v60 = vor.u32 1.1754944e-38, %v2896_v36  ;;  %v2852_v36 = vor.u32 1.1754944e-38, %v2851_v29 }
 0x893   :  { %v2833_v21 = vsel %vm12018_vm1, %v11891_v43, %v2829_v56  ;;  %v2926_v43 = vmul.f32 1.442695, %v2868_v62  ;;  %v2769_v51 = vadd.f32 %v11858_v16, %v11932_v30  ;;  %v2791_v47 = vand.u32 2147483648, %v11821_v42 }
 0x894   :  { %v2889_v54 = vadd.f32 %v9058_v23, %v2888_v53  ;;  %v2883_v45 = vsel %vm2880_vm3, %v2882_v18, %v2878_v40  ;;  %vm2741_vm3 = vweird.f32 %v11845_v27  ;;  %v2822_v49 = vor.u32 1.1754944e-38, %v16281_v48  ;;  %v9134_v18 = vld [vmem:[%s15988_s12 + $0x48] sm:$0xff] }
 0x895   :  { %v2928_v25 = vmul.f32 1.442695, %v2883_v45  ;;  %v2853_v45 = vsel %vm2850_vm11, %v2852_v36, %v2848_v37  ;;  %v2838_v53 = vsel %vm2835_vm15, %v2837_v35, %v2833_v21  ;;  %vm2725_vm4 = vweird.f32 %v11809_v32 }
 0x896   :  { %v2893_v38 = vsel %vm2892_vm12, %v9058_v23, %v2889_v54  ;;  %v2806_v23 = vand.u32 2147483648, %v11824_v19  ;;  %v2924_v30 = vmul.f32 1.442695, %v2853_v45  ;;  %v2754_v40 = vadd.f32 %v11850_v20, %v11928_v39 }
 0x897   :  { %v2898_v14 = vsel %vm2895_vm0, %v2897_v60, %v2893_v38  ;;  %vm12034_vm0 = vmor %vm2815_vm14, %vm2816_vm7  ;;  %vm2711_vm14 = vweird.f32 %v11833_v0  ;;  %v2776_v56 = vand.u32 2147483648, %v11818_v28  ;;  %vm2696_vm11 = vweird.f32 %v11828_v7 }
 0x898   :  { %v2930_v8 = vmul.f32 1.442695, %v2898_v14  ;;  %v2818_v59 = vsel %vm12034_vm0, %v11870_v12, %v2814_v5  ;;  %vm12054_vm7 = vmor %vm2800_vm2, %vm2801_vm13  ;;  %v16282_v12 = vand.u32 2147483647, %v11826_v31  ;;  %vm16283_vm2 = vweird.f32 %v11863_v1 }
 0x899   :  { %v2803_v10 = vsel %vm12054_vm7, %v11865_v57, %v2799_v3  ;;  %vm16284_vm13 = vweird.f32 %v11821_v42  ;;  %v2807_v31 = vor.u32 1.1754944e-38, %v2806_v23  ;;  %vm2710_vm0 = vweird.f32 %v11805_v58 }
 0x89a   :  { %9059 = vpow2.f32 %v2930_v8  ;;  %vm2820_vm12 = vcmp.eq.f32.partialorder %v16282_v12, 8.507059e+37  ;;  %vm12074_vm1 = vmor %vm16284_vm13, %vm16283_vm2  ;;  %v16287_v57 = vand.u32 2147483647, %v11824_v19  ;;  %v2922_v39 = vmul.f32 1.442695, %v2838_v53  ;;  %v9126_v53 = vld [vmem:[%s15988_s12 + $0x8] sm:$0xff] }
 0x89b   :  { %9061 = vpow2.f32 %v2928_v25  ;;  %v2823_v34 = vsel %vm2820_vm12, %v2822_v49, %v2818_v59  ;;  %v2788_v54 = vsel %vm12074_vm1, %v11863_v1, %v2784_v46  ;;  %v2739_v9 = vadd.f32 %v11845_v27, %v11925_v17 }
 0x89c   :  { %vm2805_vm15 = vcmp.eq.f32.partialorder %v16287_v57, 8.507059e+37  ;;  %9063 = vpow2.f32 %v2926_v43  ;;  %v2761_v5 = vand.u32 2147483648, %v11814_v50  ;;  %vm16288_vm7 = vweird.f32 %v11858_v16 }
 0x89d   :  { %vm12092_vm12 = vmor %vm2770_vm10, %vm16288_vm7  ;;  %v2792_v19 = vor.u32 1.1754944e-38, %v2791_v47  ;;  %v2808_v60 = vsel %vm2805_vm15, %v2807_v31, %v2803_v10  ;;  %vm2681_vm2 = vweird.f32 %v11807_v6  ;;  %vm2695_vm13 = vweird.f32 %v11803_v44 }
 0x89e   :  { %v16291_v1 = vand.u32 2147483647, %v11821_v42  ;;  %9065 = vpow2.f32 %v2924_v30  ;;  %v2920_v17 = vmul.f32 1.442695, %v2823_v34  ;;  %v2773_v37 = vsel %vm12092_vm12, %v11858_v16, %v2769_v51  ;;  %vm12112_vm10 = vmor %vm2755_vm9, %vm2756_vm6 }
 0x89f   :  { %v2724_v3 = vadd.f32 %v11838_v22, %v11920_v11  ;;  %v2746_v13 = vand.u32 2147483648, %v11811_v4  ;;  %v2777_v42 = vor.u32 1.1754944e-38, %v2776_v56  ;;  %vm2666_vm15 = vweird.f32 %v11800_v24  ;;  %vm12133_vm6 = vmor %vm2740_vm8, %vm2741_vm3 }
 0x8a0   :  { %v12096_v38 = vpop.eup %9059  ;;  %vm2790_vm1 = vcmp.eq.f32.partialorder %v16291_v1, 8.507059e+37  ;;  %vm2680_vm7 = vweird.f32 %v11798_v26  ;;  %v16294_v16 = vand.u32 2147483647, %v11818_v28  ;;  %9067 = vpow2.f32 %v2922_v39  ;;  %vm12153_vm3 = vmor %vm2725_vm4, %vm2726_vm5 }
 0x8a1   :  { %2933 = vmatpush.msrb.mxu1 %v12096_v38  ;;  %v2793_v14 = vsel %vm2790_vm1, %v2792_v19, %v2788_v54  ;;  %v12117_v62 = vpop.eup %9061  ;;  %v2918_v11 = vmul.f32 1.442695, %v2808_v60  ;;  %v2758_v8 = vsel %vm12112_vm10, %v11850_v20, %v2754_v40  ;;  %v2709_v25 = vadd.f32 %v11833_v0, %v11900_v55  ;;  %vm12172_vm5 = vmor %vm2710_vm0, %vm2711_vm14 }
 0x8a2   :  { %vm2775_vm12 = vcmp.eq.f32.partialorder %v16294_v16, 8.507059e+37  ;;  %v2731_v21 = vand.u32 2147483648, %v11809_v32  ;;  %v2762_v28 = vor.u32 1.1754944e-38, %v2761_v5  ;;  %v12138_v29 = vpop.eup %9063  ;;  %vm2665_vm9 = vweird.f32 %v11795_v41  ;;  %vm12191_vm14 = vmor %vm2695_vm13, %vm2696_vm11 }
 0x8a3   :  { %2934 = vmatpush.msrb.mxu1 %v12117_v62  ;;  %v2778_v23 = vsel %vm2775_vm12, %v2777_v42, %v2773_v37  ;;  %v16297_v20 = vand.u32 2147483647, %v11814_v50  ;;  %9069 = vpow2.f32 %v2920_v17  ;;  %v2916_v55 = vmul.f32 1.442695, %v2793_v14  ;;  %vm12209_vm11 = vmor %vm2680_vm7, %vm2681_vm2 }
 0x8a4   :  { %v2743_v35 = vsel %vm12133_vm6, %v11845_v27, %v2739_v9  ;;  %v2694_v45 = vadd.f32 %v11828_v7, %v11894_v15  ;;  %v2716_v43 = vand.u32 2147483648, %v11805_v58  ;;  %v2747_v50 = vor.u32 1.1754944e-38, %v2746_v13  ;;  %v12158_v47 = vpop.eup %9065  ;;  %vm12225_vm2 = vmor %vm2665_vm9, %vm2666_vm15 }
 0x8a5   :  { %vm2760_vm1 = vcmp.eq.f32.partialorder %v16297_v20, 8.507059e+37  ;;  %2935 = vmatpush.msrb.mxu1 %v12138_v29  ;;  %v16300_v27 = vand.u32 2147483647, %v11811_v4  ;;  %9071 = vpow2.f32 %v2918_v11  ;;  %v2914_v15 = vmul.f32 1.442695, %v2778_v23 }
 0x8a6   :  { %v2763_v51 = vsel %vm2760_vm1, %v2762_v28, %v2758_v8  ;;  %v2728_v33 = vsel %vm12153_vm3, %v11838_v22, %v2724_v3  ;;  %v2679_v48 = vadd.f32 %v11807_v6, %v11885_v2  ;;  %v2701_v49 = vand.u32 2147483648, %v11803_v44  ;;  %v12177_v30 = vpop.eup %9067  ;;  %v2932_v23 = vld [vmem:[%s16313_s3] sm:$0x3] }
 0x8a7   :  { %vm2745_vm8 = vcmp.eq.f32.partialorder %v16300_v27, 8.507059e+37  ;;  %v2732_v4 = vor.u32 1.1754944e-38, %v2731_v21  ;;  %2936 = vmatpush.msrb.mxu1 %v12158_v47  ;;  %v16303_v22 = vand.u32 2147483647, %v11809_v32  ;;  %9073 = vpow2.f32 %v2916_v55 }
 0x8a8   :  { %v2748_v12 = vsel %vm2745_vm8, %v2747_v50, %v2743_v35  ;;  %v2912_v2 = vmul.f32 1.442695, %v2763_v51  ;;  %v2713_v10 = vsel %vm12172_vm5, %v11833_v0, %v2709_v25  ;;  %v2664_v40 = vadd.f32 %v11800_v24, %v11877_v61 }
 0x8a9   :  { %vm2730_vm4 = vcmp.eq.f32.partialorder %v16303_v22, 8.507059e+37  ;;  %v2686_v56 = vand.u32 2147483648, %v11798_v26  ;;  %v2717_v32 = vor.u32 1.1754944e-38, %v2716_v43  ;;  %2937 = vmatpush.msrb.mxu1 %v12177_v30  ;;  %v12196_v34 = vpop.eup %9069  ;;  %v16306_v0 = vand.u32 2147483647, %v11805_v58  ;;  %v9129_v22 = vld [vmem:[%s15988_s12 + $0x20] sm:$0xff] }
 0x8aa   :  { %v2733_v31 = vsel %vm2730_vm4, %v2732_v4, %v2728_v33  ;;  %9075 = vpow2.f32 %v2914_v15  ;;  %v2910_v61 = vmul.f32 1.442695, %v2748_v12  ;;  %v2698_v57 = vsel %vm12191_vm14, %v11828_v7, %v2694_v45  ;;  %v9127_v4 = vld [vmem:[%s15988_s12 + $0x10] sm:$0xff]  ;;  %v9128_v12 = vld [vmem:[%s15988_s12 + $0x18] sm:$0xff] }
 0x8ab   :  { %vm2715_vm0 = vcmp.eq.f32.partialorder %v16306_v0, 8.507059e+37  ;;  %v2669_v39 = vand.u32 2147483647, %v11795_v41  ;;  %v2671_v54 = vand.u32 2147483648, %v11795_v41  ;;  %v2702_v58 = vor.u32 1.1754944e-38, %v2701_v49  ;;  %2938 = vmatpush.msrb.mxu1 %v12196_v34  ;;  %v12214_v63 = vpop.eup %9071  ;;  %v9125_v49 = vld [vmem:[%s15988_s12] sm:$0xff] }
 0x8ac   :  { %v2718_v5 = vsel %vm2715_vm0, %v2717_v32, %v2713_v10  ;;  %v16309_v7 = vand.u32 2147483647, %v11803_v44  ;;  %9077 = vpow2.f32 %v2912_v2  ;;  %v2908_v19 = vmul.f32 1.442695, %v2733_v31  ;;  %v9130_v2 = vld [vmem:[%s15988_s12 + $0x28] sm:$0xff]  ;;  %v9131_v10 = vld [vmem:[%s15988_s12 + $0x30] sm:$0xff] }
 0x8ad   :  { %v2683_v60 = vsel %vm12209_vm11, %v11807_v6, %v2679_v48  ;;  %v2687_v17 = vor.u32 1.1754944e-38, %v2686_v56  ;;  %2939 = vmatpush.msrb.mxu1 %v12214_v63  ;;  %v12230_v44 = vpop.eup %9073  ;;  %v16312_v3 = vand.u32 2147483647, %v11798_v26  ;;  %9079 = vpow2.f32 %v2910_v61  ;;  %v9133_v56 = vld [vmem:[%s15988_s12 + $0x40] sm:$0xff]  ;;  %v9135_v32 = vld [vmem:[%s15988_s12 + $0x50] sm:$0xff]  ;;  %v9136_v31 = vld [vmem:[%s15988_s12 + $0x58] sm:$0xff] }
 0x8ae   :  { %vm2700_vm13 = vcmp.eq.f32.partialorder %v16309_v7, 8.507059e+37  ;;  %v2906_v13 = vmul.f32 1.442695, %v2718_v5  ;;  %v2668_v6 = vsel %vm12225_vm2, %v11800_v24, %v2664_v40  ;;  %v2672_v41 = vor.u32 1.1754944e-38, %v2671_v54  ;;  %v9132_v40 = vld [vmem:[%s15988_s12 + $0x38] sm:$0xff]  ;;  %v9137_v0 = vld [vmem:[%s15988_s12 + $0x60] sm:$0xff] }
 0x8af   :  { %v2703_v37 = vsel %vm2700_vm13, %v2702_v58, %v2698_v57  ;;  %vm2685_vm10 = vcmp.eq.f32.partialorder %v16312_v3, 8.507059e+37  ;;  %2940 = vmatpush.msrb.mxu1 %v12230_v44  ;;  %vm2670_vm15 = vcmp.eq.f32.partialorder %v2669_v39, 8.507059e+37  ;;  %9081 = vpow2.f32 %v2908_v19  ;;  %v9138_v61 = vld [vmem:[%s15988_s12 + $0x68] sm:$0xff]  ;;  %v9139_v57 = vld [vmem:[%s15988_s12 + $0x70] sm:$0xff]  ;;  %v9140_v39 = vld [vmem:[%s15988_s12 + $0x78] sm:$0xff] }
 0x8b0   :  { %v2688_v36 = vsel %vm2685_vm10, %v2687_v17, %v2683_v60  ;;  %v12238_v42 = vpop.eup %9075  ;;  %v2904_v14 = vmul.f32 1.442695, %v2703_v37  ;;  %v2673_v16 = vsel %vm2670_vm15, %v2672_v41, %v2668_v6  ;;  %9083 = vpow2.f32 %v2906_v13 }
 0x8b1   :  { %2941 = vmatpush.msrb.mxu1 %v12238_v42  ;;  %v2902_v11 = vmul.f32 1.442695, %v2688_v36  ;;  %v2900_v24 = vmul.f32 1.442695, %v2673_v16  ;;  %vm16314_vm1 = vcmask 1041408   ;;  %vm16315_vm3 = vcmask 15360  }
 0x8b2   :  { %v12241_v26 = vpop.eup %9077  ;;  %9085 = vpow2.f32 %v2904_v14  ;;  %vm16316_vm8 = vmmov %vm16315_vm3  ;;  %v9202_v1 = vmov 0  }
 0x8b3   :  { %2942 = vmatpush.msrb.mxu1 %v12241_v26  ;;  %v12244_v8 = vpop.eup %9079  ;;  %9087 = vpow2.f32 %v2902_v11  ;;  %vm16317_vm5 = vmmov %vm16315_vm3  ;;  %8991 = vset.pattern.permute.xlu2 %v9202_v1 }
 0x8b4   :  { %9089 = vpow2.f32 %v2900_v24  ;;  %vm16318_vm4 = vmmov %vm16315_vm3  ;;  %8992 = vset.pattern.permute.xlu1 %v9202_v1  ;;  %8993 = vset.pattern.permute.xlu0 %v9202_v1 }
 0x8b5   :  { %2943 = vmatpush.msrb.mxu1 %v12244_v8  ;;  %v12247_v25 = vpop.eup %9081  ;;  %vm16319_vm14 = vmmov %vm16315_vm3 }
 0x8b6   :  { %v12250_v21 = vpop.eup %9083  ;;  %vm16320_vm0 = vmmov %vm16315_vm3 }
 0x8b7   :  { %2944 = vmatpush.msrb.mxu1 %v12247_v25  ;;  %vm16321_vm11 = vmmov %vm16320_vm0 }
 0x8b8   :  { %v12253_v46 = vpop.eup %9085  ;;  %vm16322_vm13 = vmmov %vm16320_vm0 }
 0x8b9   :  { %2945 = vmatpush.msrb.mxu1 %v12250_v21  ;;  %v12256_v28 = vpop.eup %9087  ;;  %vm16323_vm2 = vmmov %vm16320_vm0 }
 0x8ba   :  { %v12262_v20 = vpop.eup %9089  ;;  %vm16324_vm10 = vmmov %vm16320_vm0 }
 0x8bb   :  { %2946 = vmatpush.msrb.mxu1 %v12253_v46  ;;  %vm16325_vm15 = vmmov %vm16320_vm0 }
 0x8bd   :  { %2947 = vmatpush.msrb.mxu1 %v12256_v28 }
 0x8bf   :  { %2948 = vmatpush.msrb.mxu1 %v12262_v20 }
 0x8c0   :  { %2949 = vmatmul.f32.vlgmr.msrb.gmra.mxu1 %v2932_v23 }
 0x93d   :  { %v2950_v55 = vpop.f32.mrf.mxu1 }
 0x93e   :  { %9091 = vrcp.f32 %v2950_v55  ;;  %v2964_v59 = vand.u32 2147483648, %v2950_v55  ;;  %v2962_v51 = vand.u32 2147483647, %v2950_v55  ;;  %vm2958_vm12 = vweird.f32 %v2950_v55 }
 0x940   :  { %v2965_v15 = vor.u32 1.1754944e-38, %v2964_v59  ;;  %vm2963_vm9 = vcmp.eq.f32.partialorder %v2962_v51, 8.507059e+37 }
 0x944   :  { %v9092_v35 = vpop.eup %9091 }
 0x945   :  { %v2954_v45 = vmul.f32 %v9092_v35, %v2950_v55  ;;  %vm2959_vm7 = vweird.f32 %v9092_v35 }
 0x946   :  { %vm2960_vm6 = vmor %vm2958_vm12, %vm2959_vm7 }
 0x947   :  { %v2955_v43 = vsub.f32 1.0, %v2954_v45  ;;  %vm16326_vm7 = vmmov %vm16320_vm0 }
 0x948   :  { %vm16327_vm12 = vmmov %vm16320_vm0 }
 0x949   :  { %v2956_v50 = vmul.f32 %v9092_v35, %v2955_v43 }
 0x94b   :  { %v2957_v27 = vadd.f32 %v9092_v35, %v2956_v50 }
 0x94d   :  { %v2961_v33 = vsel %vm2960_vm6, %v9092_v35, %v2957_v27  ;;  %vm16328_vm6 = vmmov %vm16320_vm0 }
 0x94e   :  { %v2966_v48 = vsel %vm2963_vm9, %v2965_v15, %v2961_v33  ;;  %vm16329_vm9 = vmmov %vm16320_vm0  ;;  %v16332_v15 = vld [vmem:[#allocation32_spill] sm:$0xff] }
 0x94f   :  { %8265 = vmatpush.msk.msrb.mxu3 %vm16314_vm1, %v2966_v48  ;;  %vm16330_vm1 = vmmov %vm16320_vm0 }
 0x950   :  { %8266 = vmatmul.msk.f32.vlgmr.msrb.gmra.mxu3 %vm16315_vm3, %v9125_v49  ;;  %v16333_v49 = vld [vmem:[#allocation31_spill] sm:$0xff]  ;;  %vm16346_vm3 = vcmask 523264  }
 0x958   :  { %8267 = vmatmul.msk.f32.gmra.mxu3 %vm16316_vm8, %v9126_v53  ;;  %vm16347_vm8 = vmmov %vm16346_vm3 }
 0x960   :  { %8268 = vmatmul.msk.f32.gmra.mxu3 %vm16317_vm5, %v9127_v4  ;;  %vm16348_vm5 = vmmov %vm16346_vm3 }
 0x968   :  { %8269 = vmatmul.msk.f32.gmra.mxu3 %vm16318_vm4, %v9128_v12  ;;  %v16334_v12 = vld [vmem:[#allocation30_spill] sm:$0xff]  ;;  %vm16349_vm4 = vmmov %vm16346_vm3 }
 0x970   :  { %8270 = vmatmul.msk.f32.gmra.mxu3 %vm16319_vm14, %v9129_v22  ;;  %vm16350_vm14 = vcmask 130048  }
 0x978   :  { %8271 = vmatmul.msk.f32.gmra.mxu3 %vm16320_vm0, %v9130_v2  ;;  %v16335_v2 = vld [vmem:[#allocation29_spill] sm:$0xff]  ;;  %vm16351_vm0 = vmmov %vm16350_vm14 }
 0x980   :  { %8272 = vmatmul.msk.f32.gmra.mxu3 %vm16321_vm11, %v9131_v10  ;;  %vm16352_vm11 = vmmov %vm16351_vm0 }
 0x988   :  { %8273 = vmatmul.msk.f32.gmra.mxu3 %vm16322_vm13, %v9132_v40  ;;  %v16336_v40 = vld [vmem:[#allocation28_spill] sm:$0xff]  ;;  %vm16353_vm13 = vmmov %vm16351_vm0 }
 0x990   :  { %8274 = vmatmul.msk.f32.gmra.mxu3 %vm16323_vm2, %v9133_v56  ;;  %vm16363_vm2 = vmmov %vm16351_vm0 }
 0x998   :  { %8275 = vmatmul.msk.f32.gmra.mxu3 %vm16324_vm10, %v9134_v18  ;;  %v12394_v18 = vld [vmem:[%s15860_s6 + $0x10] sm:$0xff]  ;;  %vm16366_vm10 = vmmov %vm16351_vm0 }
 0x9a0   :  { %8276 = vmatmul.msk.f32.gmra.mxu3 %vm16325_vm15, %v9135_v32  ;;  %vm16369_vm15 = vmmov %vm16351_vm0 }
 0x9a8   :  { %8277 = vmatmul.msk.f32.gmra.mxu3 %vm16326_vm7, %v9136_v31  ;;  %v16337_v31 = vld [vmem:[#allocation26_spill] sm:$0xff]  ;;  %vm16371_vm7 = vmmov %vm16351_vm0 }
 0x9b0   :  { %8278 = vmatmul.msk.f32.gmra.mxu3 %vm16327_vm12, %v9137_v0  ;;  %vm16373_vm12 = vmmov %vm16351_vm0 }
 0x9b8   :  { %8279 = vmatmul.msk.f32.gmra.mxu3 %vm16328_vm6, %v9138_v61  ;;  %vm16374_vm6 = vmmov %vm16346_vm3 }
 0x9c0   :  { %8280 = vmatmul.msk.f32.gmra.mxu3 %vm16329_vm9, %v9139_v57  ;;  %vm16375_vm9 = vmmov %vm16351_vm0 }
 0x9c8   :  { %8281 = vmatmul.msk.f32.gmra.mxu3 %vm16330_vm1, %v9140_v39  ;;  %v16338_v39 = vld [vmem:[#allocation25_spill] sm:$0xff]  ;;  %vm16377_vm1 = vmmov %vm16346_vm3 }
 0x9d3   :  { %v2988_v54 = vpop.f32.mrf.mxu3 }
 0x9db   :  { %v2991_v9 = vpop.f32.mrf.mxu3 }
 0x9dc   :  { %v3037_v35 = vmul.f32 %v12256_v28, %v2991_v9  ;;  %v3036_v28 = vmul.f32 %v12262_v20, %v2988_v54  ;;  %v16339_v9 = vld [vmem:[#allocation24_spill] sm:$0xff] }
 0x9e3   :  { %v2994_v58 = vpop.f32.mrf.mxu3 }
 0x9eb   :  { %v2997_v5 = vpop.f32.mrf.mxu3 }
 0x9f3   :  { %v3000_v7 = vpop.f32.mrf.mxu3 }
 0x9f4   :  { %v3040_v23 = vmul.f32 %v12247_v25, %v3000_v7 }
 0x9fb   :  { %v3003_v19 = vpop.f32.mrf.mxu3 }
 0xa03   :  { %v3006_v60 = vpop.f32.mrf.mxu3 }
 0xa0b   :  { %v3009_v17 = vpop.f32.mrf.mxu3 }
 0xa0c   :  { %v3043_v16 = vmul.f32 %v12238_v42, %v3009_v17  ;;  %v3041_v42 = vmul.f32 %v12244_v8, %v3003_v19  ;;  %v12420_v19 = vld [vmem:[%s15860_s6 + $0x18] sm:$0xff] }
 0xa13   :  { %v3012_v37 = vpop.f32.mrf.mxu3 }
 0xa1b   :  { %v3015_v3 = vpop.f32.mrf.mxu3 }
 0xa1c   :  { %v3045_v25 = vmul.f32 %v12214_v63, %v3015_v3  ;;  %v12349_v63 = vld [vmem:[%s15860_s6] sm:$0xff]  ;;  %v16342_v3 = vld [vmem:[#allocation21_spill] sm:$0xff] }
 0xa1d   :  { %3168 = vmatmul.f32.vlgmr.msrb.gmra.mxu2 %v12349_v63 }
 0xa23   :  { %v3018_v13 = vpop.f32.mrf.mxu3 }
 0xa24   :  { %v3046_v6 = vmul.f32 %v12196_v34, %v3018_v13 }
 0xa26   :  { %3104 = vperm.xlu2 %8991, %v3046_v6  }
 0xa2b   :  { %v3021_v41 = vpop.f32.mrf.mxu3 }
 0xa2c   :  { %v3047_v36 = vmul.f32 %v12177_v30, %v3021_v41  ;;  %v3044_v30 = vmul.f32 %v12230_v44, %v3012_v37  ;;  %v3042_v44 = vmul.f32 %v12241_v26, %v3006_v60  ;;  %v16341_v60 = vld [vmem:[#allocation22_spill] sm:$0xff]  ;;  %v16343_v41 = vld [vmem:[#allocation20_spill] sm:$0xff] }
 0xa2e   :  { %3109 = vperm.xlu2 %8991, %v3047_v36  }
 0xa33   :  { %v3024_v14 = vpop.f32.mrf.mxu3 }
 0xa34   :  { %v3048_v11 = vmul.f32 %v12158_v47, %v3024_v14  ;;  %v16344_v14 = vld [vmem:[#allocation19_spill] sm:$0xff] }
 0xa36   :  { %3089 = vperm.xlu2 %8991, %v3043_v16   ;;  %3114 = vperm.xlu1 %8992, %v3048_v11  }
 0xa3b   :  { %v3027_v24 = vpop.f32.mrf.mxu3 }
 0xa3c   :  { %v3049_v55 = vmul.f32 %v12138_v29, %v3027_v24  ;;  %v3038_v29 = vmul.f32 %v12253_v46, %v2994_v58  ;;  %v16345_v24 = vld [vmem:[#allocation18_spill] sm:$0xff] }
 0xa3e   :  { %3074 = vperm.xlu2 %8991, %v3040_v23   ;;  %3119 = vperm.xlu1 %8992, %v3049_v55   ;;  %v3217_v55 = vld [vmem:[%s15861_s13 + $0x38] sm:$0xff] }
 0xa43   :  { %v3030_v34 = vpop.f32.mrf.mxu3 }
 0xa44   :  { %v3050_v45 = vmul.f32 %v12117_v62, %v3030_v34  ;;  %v3039_v62 = vmul.f32 %v12250_v21, %v2997_v5  ;;  %v16331_v21 = vld [vmem:[#allocation33_spill] sm:$0xff]  ;;  %v16340_v5 = vld [vmem:[#allocation23_spill] sm:$0xff] }
 0xa45   :  { %v12454_v34 = vld [vmem:[%s15862_s8 + $0x20] sm:$0xff] }
 0xa46   :  { %3059 = vperm.xlu2 %8991, %v3037_v35   ;;  %3094 = vperm.xlu1 %8992, %v3044_v30   ;;  %v3216_v35 = vld [vmem:[%s15861_s13 + $0x30] sm:$0xff]  ;;  %v3215_v30 = vld [vmem:[%s15861_s13 + $0x28] sm:$0xff] }
 0xa47   :  { %3124 = vperm.xlu0 %8993, %v3050_v45   ;;  %v3214_v45 = vld [vmem:[%s15861_s13 + $0x20] sm:$0xff] }
 0xa4b   :  { %v3033_v47 = vpop.f32.mrf.mxu3 }
 0xa4c   :  { %v3051_v43 = vmul.f32 %v12096_v38, %v3033_v47  ;;  %v3213_v47 = vld [vmem:[%s15861_s13 + $0x18] sm:$0xff] }
 0xa4e   :  { %3079 = vperm.xlu1 %8992, %v3041_v42   ;;  %v12479_v42 = vld [vmem:[%s15862_s8 + $0x28] sm:$0xff] }
 0xa4f   :  { %3129 = vperm.xlu0 %8993, %v3051_v43   ;;  %v3212_v43 = vld [vmem:[%s15861_s13 + $0x10] sm:$0xff] }
 0xa56   :  { %3064 = vperm.xlu1 %8992, %v3038_v29   ;;  %v3211_v29 = vld [vmem:[%s15861_s13 + $0x8] sm:$0xff] }
 0xa57   :  { %3099 = vperm.xlu0 %8993, %v3045_v25   ;;  %v3210_v25 = vld [vmem:[%s15861_s13] sm:$0xff] }
 0xa5f   :  { %3084 = vperm.xlu0 %8993, %v3042_v44   ;;  %v12499_v44 = vld [vmem:[%s15862_s8 + $0x30] sm:$0xff] }
 0xa67   :  { %3069 = vperm.xlu0 %8993, %v3039_v62   ;;  %v12514_v62 = vld [vmem:[%s15862_s8 + $0x38] sm:$0xff] }
 0xa6f   :  { %3054 = vperm.xlu0 %8993, %v3036_v28   ;;  %v12530_v28 = vld [vmem:[%s15862_s8 + $0x40] sm:$0xff] }
 0xa80   :  { %v3105_v59 = vpop.permute.xlu2 %3104 }
 0xa81   :  { %v12382_v10 = vmul.f32 %v3105_v59, %v16335_v2  ;;  %v12558_v59 = vld [vmem:[%s15862_s8 + $0x50] sm:$0xff]  ;;  %v12656_v2 = vld [vmem:[%s15989_s11 + $0x60] sm:$0xff] }
 0xa88   :  { %v3110_v51 = vpop.permute.xlu2 %3109 }
 0xa89   :  { %v12377_v22 = vmul.f32 %v3110_v51, %v16334_v12  ;;  %v12589_v51 = vld [vmem:[%s15862_s8 + $0x68] sm:$0xff] }
 0xa90   :  { %v3090_v48 = vpop.permute.xlu2 %3089 }
 0xa91   :  { %v12403_v54 = vmul.f32 %v3090_v48, %v16338_v39  ;;  %v12634_v48 = vld [vmem:[%s15862_s8 + $0x80] sm:$0xff]  ;;  %v12702_v39 = vld [vmem:[%s15989_s11 + $0x38] sm:$0xff] }
 0xa98   :  { %v3075_v61 = vpop.permute.xlu2 %3074 }
 0xa99   :  { %v12423_v1 = vmul.f32 %v3075_v61, %v16341_v60  ;;  %v12732_v60 = vld [vmem:[%s15989_s11 + $0x20] sm:$0xff] }
 0xaa0   :  { %v3060_v6 = vpop.permute.xlu2 %3059 }
 0xaa1   :  { %v12439_v16 = vmul.f32 %v3060_v6, %v16344_v14  ;;  %v12754_v6 = vld [vmem:[%s15862_s8 + $0x98] sm:$0xff] }
 0xaa8   :  { %v3115_v8 = vpop.permute.xlu1 %3114 }
 0xaa9   :  { %v12372_v53 = vmul.f32 %v3115_v8, %v16333_v49  ;;  %v12544_v8 = vld [vmem:[%s15862_s8 + $0x48] sm:$0xff]  ;;  %v12639_v49 = vld [vmem:[%s15989_s11 + $0x70] sm:$0xff] }
 0xab0   :  { %v3120_v50 = vpop.permute.xlu1 %3119 }
 0xab1   :  { %v12361_v33 = vmul.f32 %v3120_v50, %v16332_v15  ;;  %v12579_v50 = vld [vmem:[%s15862_s8 + $0x60] sm:$0xff] }
 0xab2   :  { %v3218_v15 = vld [vmem:[%s15863_s14] sm:$0xff] }
 0xab8   :  { %v3095_v20 = vpop.permute.xlu1 %3094 }
 0xab9   :  { %v3125_v38 = vpop.permute.xlu0 %3124  ;;  %v12398_v0 = vmul.f32 %v3095_v20, %v16337_v31  ;;  %v3169_v20 = vpop.f32.mrf.mxu2  ;;  %v12685_v31 = vld [vmem:[%s15989_s11 + $0x48] sm:$0xff] }
 0xaba   :  { %v12356_v27 = vmul.f32 %v3125_v38, %v16331_v21  ;;  %v12568_v38 = vld [vmem:[%s15862_s8 + $0x58] sm:$0xff]  ;;  %v3219_v21 = vld [vmem:[%s15863_s14 + $0x8] sm:$0xff] }
 0xabb   :  { %3246 = vmatpush.msra.mxu2 %v3219_v21 }
 0xabd   :  { %3247 = vmatpush.msra.mxu2 %v3218_v15  ;;  %v12854_v15 = vld [vmem:[%s15862_s8 + $0xc0] sm:$0xff] }
 0xac0   :  { %v3080_v32 = vpop.permute.xlu1 %3079 }
 0xac1   :  { %v3130_v26 = vpop.permute.xlu0 %3129  ;;  %v12413_v7 = vmul.f32 %v3080_v32, %v16340_v5  ;;  %v12677_v32 = vld [vmem:[%s15989_s11 + $0x50] sm:$0xff] }
 0xac2   :  { %v12353_v46 = vmul.f32 %v3130_v26, %v16107_v52  ;;  %v12368_v52 = vld [vmem:[%s15860_s6 + $0x8] sm:$0xff]  ;;  %v12609_v26 = vld [vmem:[%s15862_s8 + $0x78] sm:$0xff]  ;;  %v12715_v5 = vld [vmem:[%s15989_s11 + $0x30] sm:$0xff] }
 0xac3   :  { %3171 = vmatmul.f32.gmra.mxu2 %v12368_v52 }
 0xac4   :  { %3181 = vmatpush.msra.mxu1 %v12353_v46  ;;  %3498 = vmatpush.msra.mxu3 %v12353_v46 }
 0xac6   :  { %3182 = vmatpush.msra.mxu1 %v12356_v27  ;;  %3499 = vmatpush.msra.mxu3 %v12356_v27 }
 0xac8   :  { %3183 = vmatpush.msra.mxu1 %v12361_v33  ;;  %3500 = vmatpush.msra.mxu3 %v12361_v33  ;;  %v3065_v17 = vpop.permute.xlu1 %3064 }
 0xac9   :  { %v3100_v4 = vpop.permute.xlu0 %3099  ;;  %v12434_v36 = vmul.f32 %v3065_v17, %v16343_v41  ;;  %v12761_v41 = vld [vmem:[%s15989_s11 + $0x8] sm:$0xff] }
 0xaca   :  { %3184 = vmatpush.msra.mxu1 %v12372_v53  ;;  %3501 = vmatpush.msra.mxu3 %v12372_v53  ;;  %v12387_v56 = vmul.f32 %v3100_v4, %v16336_v40  ;;  %v12647_v4 = vld [vmem:[%s15989_s11 + $0x68] sm:$0xff]  ;;  %v12664_v40 = vld [vmem:[%s15989_s11 + $0x58] sm:$0xff] }
 0xacb   :  { %3174 = vmatmul.f32.gmra.mxu2 %v12394_v18 }
 0xacc   :  { %3185 = vmatpush.msra.mxu1 %v12377_v22  ;;  %3502 = vmatpush.msra.mxu3 %v12377_v22 }
 0xace   :  { %3186 = vmatpush.msra.mxu1 %v12382_v10  ;;  %3503 = vmatpush.msra.mxu3 %v12382_v10 }
 0xad0   :  { %3187 = vmatpush.msra.mxu1 %v12387_v56  ;;  %3504 = vmatpush.msra.mxu3 %v12387_v56 }
 0xad1   :  { %v3085_v57 = vpop.permute.xlu0 %3084 }
 0xad2   :  { %3188 = vmatpush.msra.mxu1 %v12398_v0  ;;  %3505 = vmatpush.msra.mxu3 %v12398_v0  ;;  %v12408_v58 = vmul.f32 %v3085_v57, %v16339_v9  ;;  %v12694_v57 = vld [vmem:[%s15989_s11 + $0x40] sm:$0xff]  ;;  %v12710_v9 = vld [vmem:[%s15862_s8 + $0x90] sm:$0xff] }
 0xad3   :  { %3177 = vmatmul.f32.gmra.mxu2 %v12420_v19 }
 0xad4   :  { %3189 = vmatpush.msra.mxu1 %v12403_v54  ;;  %3506 = vmatpush.msra.mxu3 %v12403_v54 }
 0xad6   :  { %3190 = vmatpush.msra.mxu1 %v12408_v58  ;;  %3507 = vmatpush.msra.mxu3 %v12408_v58 }
 0xad8   :  { %3191 = vmatpush.msra.mxu1 %v12413_v7  ;;  %3508 = vmatpush.msra.mxu3 %v12413_v7 }
 0xad9   :  { %v3070_v37 = vpop.permute.xlu0 %3069 }
 0xada   :  { %v12429_v13 = vmul.f32 %v3070_v37, %v16342_v3  ;;  %3192 = vmatpush.msra.mxu1 %v12423_v1  ;;  %3509 = vmatpush.msra.mxu3 %v12423_v1  ;;  %v12740_v37 = vld [vmem:[%s15989_s11 + $0x18] sm:$0xff]  ;;  %v12748_v3 = vld [vmem:[%s15989_s11 + $0x10] sm:$0xff] }
 0xadc   :  { %3193 = vmatpush.msra.mxu1 %v12429_v13  ;;  %3510 = vmatpush.msra.mxu3 %v12429_v13 }
 0xade   :  { %3194 = vmatpush.msra.mxu1 %v12434_v36  ;;  %3511 = vmatpush.msra.mxu3 %v12434_v36 }
 0xae0   :  { %3195 = vmatpush.msra.mxu1 %v12439_v16  ;;  %3512 = vmatpush.msra.mxu3 %v12439_v16 }
 0xae1   :  { %v3055_v11 = vpop.permute.xlu0 %3054 }
 0xae2   :  { %v12446_v23 = vmul.f32 %v3055_v11, %v16345_v24  ;;  %v12770_v11 = vld [vmem:[%s15989_s11] sm:$0xff] }
 0xae3   :  { %v3310_v24 = vld [vmem:[%s15862_s8] sm:$0xff] }
 0xae4   :  { %3196 = vmatpush.msra.mxu1 %v12446_v23  ;;  %3513 = vmatpush.msra.mxu3 %v12446_v23 }
 0xae5   :  { %3197 = vmatmul.f32.vlgmr.msra.gmra.mxu1 %v12349_v63  ;;  %3514 = vmatmul.f32.vlgmr.msra.gmra.mxu3 %v12454_v34  ;;  %v12599_v63 = vld [vmem:[%s15862_s8 + $0x70] sm:$0xff] }
 0xae6   :  { %3659 = vmatpush.msrb.mxu3 %v12353_v46  ;;  %3281 = vmatpush.msrb.mxu1 %v3217_v55  ;;  %v12785_v55 = vld [vmem:[%s15862_s8 + $0xa0] sm:$0xff] }
 0xae8   :  { %3660 = vmatpush.msrb.mxu3 %v12356_v27  ;;  %3282 = vmatpush.msrb.mxu1 %v3216_v35 }
 0xaea   :  { %3661 = vmatpush.msrb.mxu3 %v12361_v33  ;;  %3283 = vmatpush.msrb.mxu1 %v3215_v30  ;;  %v3311_v30 = vld [vmem:[%s15862_s8 + $0x8] sm:$0xff] }
 0xaec   :  { %3662 = vmatpush.msrb.mxu3 %v12372_v53  ;;  %3284 = vmatpush.msrb.mxu1 %v3214_v45  ;;  %v12803_v45 = vld [vmem:[%s15862_s8 + $0xa8] sm:$0xff] }
 0xaed   :  { %3200 = vmatmul.f32.gmra.mxu1 %v12368_v52  ;;  %3517 = vmatmul.f32.gmra.mxu3 %v12479_v42  ;;  %v12626_v52 = vld [vmem:[%s15989_s11 + $0x78] sm:$0xff] }
 0xaee   :  { %3663 = vmatpush.msrb.mxu3 %v12377_v22  ;;  %3285 = vmatpush.msrb.mxu1 %v3213_v47  ;;  %v3312_v47 = vld [vmem:[%s15862_s8 + $0x10] sm:$0xff] }
 0xaef   :  { %3314 = vmatpush.msrb.mxu2 %v12626_v52 }
 0xaf0   :  { %3664 = vmatpush.msrb.mxu3 %v12382_v10  ;;  %3286 = vmatpush.msrb.mxu1 %v3212_v43 }
 0xaf1   :  { %3315 = vmatpush.msrb.mxu2 %v12639_v49 }
 0xaf2   :  { %3665 = vmatpush.msrb.mxu3 %v12387_v56  ;;  %3287 = vmatpush.msrb.mxu1 %v3211_v29  ;;  %v12821_v29 = vld [vmem:[%s15862_s8 + $0xb0] sm:$0xff] }
 0xaf3   :  { %3316 = vmatpush.msrb.mxu2 %v12647_v4 }
 0xaf4   :  { %3666 = vmatpush.msrb.mxu3 %v12398_v0  ;;  %3288 = vmatpush.msrb.mxu1 %v3210_v25  ;;  %v3313_v25 = vld [vmem:[%s15862_s8 + $0x18] sm:$0xff] }
 0xaf5   :  { %3203 = vmatmul.f32.gmra.mxu1 %v12394_v18  ;;  %3520 = vmatmul.f32.gmra.mxu3 %v12499_v44  ;;  %v12672_v18 = vld [vmem:[%s15862_s8 + $0x88] sm:$0xff] }
 0xaf6   :  { %3343 = vmatpush.msra.mxu1 %v12353_v46  ;;  %3667 = vmatpush.msrb.mxu3 %v12403_v54 }
 0xaf7   :  { %3317 = vmatpush.msrb.mxu2 %v12656_v2 }
 0xaf8   :  { %3344 = vmatpush.msra.mxu1 %v12356_v27  ;;  %3668 = vmatpush.msrb.mxu3 %v12408_v58 }
 0xaf9   :  { %3318 = vmatpush.msrb.mxu2 %v12664_v40 }
 0xafa   :  { %3345 = vmatpush.msra.mxu1 %v12361_v33  ;;  %3669 = vmatpush.msrb.mxu3 %v12413_v7 }
 0xafb   :  { %3319 = vmatpush.msrb.mxu2 %v12677_v32 }
 0xafc   :  { %3346 = vmatpush.msra.mxu1 %v12372_v53  ;;  %3670 = vmatpush.msrb.mxu3 %v12423_v1 }
 0xafd   :  { %3206 = vmatmul.f32.gmra.mxu1 %v12420_v19  ;;  %3523 = vmatmul.f32.gmra.mxu3 %v12514_v62  ;;  %v12723_v19 = vld [vmem:[%s15989_s11 + $0x28] sm:$0xff] }
 0xafe   :  { %3347 = vmatpush.msra.mxu1 %v12377_v22  ;;  %3671 = vmatpush.msrb.mxu3 %v12429_v13 }
 0xaff   :  { %3320 = vmatpush.msrb.mxu2 %v12685_v31 }
 0xb00   :  { %3348 = vmatpush.msra.mxu1 %v12382_v10  ;;  %3672 = vmatpush.msrb.mxu3 %v12434_v36 }
 0xb01   :  { %3321 = vmatpush.msrb.mxu2 %v12694_v57 }
 0xb02   :  { %3349 = vmatpush.msra.mxu1 %v12387_v56  ;;  %3673 = vmatpush.msrb.mxu3 %v12439_v16 }
 0xb03   :  { %3322 = vmatpush.msrb.mxu2 %v12702_v39 }
 0xb04   :  { %3350 = vmatpush.msra.mxu1 %v12398_v0  ;;  %3674 = vmatpush.msrb.mxu3 %v12446_v23 }
 0xb05   :  { %3675 = vmatmul.f32.vlgmr.msrb.gmra.mxu3 %v12530_v28  ;;  %8286 = vmatmul.msk.f32.vlgmr.msrb.gmra.mxu1 %vm16346_vm3, %v3169_v20  ;;  %v12840_v20 = vld [vmem:[%s15862_s8 + $0xb8] sm:$0xff]  ;;  %vm16378_vm3 = vmmov %vm16351_vm0 }
 0xb06   :  { %3820 = vmatpush.msra.mxu3 %v12353_v46  ;;  %3351 = vmatpush.msra.mxu1 %v12403_v54 }
 0xb07   :  { %3323 = vmatpush.msrb.mxu2 %v12715_v5 }
 0xb08   :  { %3821 = vmatpush.msra.mxu3 %v12356_v27  ;;  %3352 = vmatpush.msra.mxu1 %v12408_v58 }
 0xb09   :  { %3324 = vmatpush.msrb.mxu2 %v12723_v19 }
 0xb0a   :  { %3822 = vmatpush.msra.mxu3 %v12361_v33  ;;  %3353 = vmatpush.msra.mxu1 %v12413_v7 }
 0xb0b   :  { %3325 = vmatpush.msrb.mxu2 %v12732_v60 }
 0xb0c   :  { %3823 = vmatpush.msra.mxu3 %v12372_v53  ;;  %3354 = vmatpush.msra.mxu1 %v12423_v1 }
 0xb0d   :  { %3678 = vmatmul.f32.gmra.mxu3 %v12544_v8  ;;  %3326 = vmatpush.msrb.mxu2 %v12740_v37 }
 0xb0e   :  { %3824 = vmatpush.msra.mxu3 %v12377_v22  ;;  %3355 = vmatpush.msra.mxu1 %v12429_v13 }
 0xb0f   :  { %3327 = vmatpush.msrb.mxu2 %v12748_v3 }
 0xb10   :  { %3825 = vmatpush.msra.mxu3 %v12382_v10  ;;  %3356 = vmatpush.msra.mxu1 %v12434_v36 }
 0xb11   :  { %3328 = vmatpush.msrb.mxu2 %v12761_v41 }
 0xb12   :  { %3826 = vmatpush.msra.mxu3 %v12387_v56  ;;  %3357 = vmatpush.msra.mxu1 %v12439_v16 }
 0xb13   :  { %3329 = vmatpush.msrb.mxu2 %v12770_v11 }
 0xb14   :  { %3827 = vmatpush.msra.mxu3 %v12398_v0  ;;  %3358 = vmatpush.msra.mxu1 %v12446_v23 }
 0xb15   :  { %3681 = vmatmul.f32.gmra.mxu3 %v12558_v59 }
 0xb16   :  { %3828 = vmatpush.msra.mxu3 %v12403_v54  ;;  %3469 = vmatpush.msrb.mxu1 %v12626_v52 }
 0xb18   :  { %3829 = vmatpush.msra.mxu3 %v12408_v58  ;;  %3470 = vmatpush.msrb.mxu1 %v12639_v49 }
 0xb1a   :  { %3830 = vmatpush.msra.mxu3 %v12413_v7  ;;  %3471 = vmatpush.msrb.mxu1 %v12647_v4 }
 0xb1c   :  { %3831 = vmatpush.msra.mxu3 %v12423_v1  ;;  %3472 = vmatpush.msrb.mxu1 %v12656_v2 }
 0xb1d   :  { %3684 = vmatmul.f32.gmra.mxu3 %v12568_v38 }
 0xb1e   :  { %3832 = vmatpush.msra.mxu3 %v12429_v13  ;;  %3473 = vmatpush.msrb.mxu1 %v12664_v40 }
 0xb20   :  { %3833 = vmatpush.msra.mxu3 %v12434_v36  ;;  %3474 = vmatpush.msrb.mxu1 %v12677_v32 }
 0xb22   :  { %3834 = vmatpush.msra.mxu3 %v12439_v16  ;;  %3475 = vmatpush.msrb.mxu1 %v12685_v31 }
 0xb24   :  { %3835 = vmatpush.msra.mxu3 %v12446_v23  ;;  %3476 = vmatpush.msrb.mxu1 %v12694_v57 }
 0xb25   :  { %3836 = vmatmul.f32.vlgmr.msra.gmra.mxu3 %v12579_v50 }
 0xb26   :  { %3981 = vmatpush.msrb.mxu3 %v12353_v46  ;;  %3477 = vmatpush.msrb.mxu1 %v12702_v39 }
 0xb28   :  { %3982 = vmatpush.msrb.mxu3 %v12356_v27  ;;  %3478 = vmatpush.msrb.mxu1 %v12715_v5 }
 0xb2a   :  { %3983 = vmatpush.msrb.mxu3 %v12361_v33  ;;  %3479 = vmatpush.msrb.mxu1 %v12723_v19 }
 0xb2c   :  { %3984 = vmatpush.msrb.mxu3 %v12372_v53  ;;  %3480 = vmatpush.msrb.mxu1 %v12732_v60 }
 0xb2d   :  { %3839 = vmatmul.f32.gmra.mxu3 %v12589_v51 }
 0xb2e   :  { %3985 = vmatpush.msrb.mxu3 %v12377_v22  ;;  %3481 = vmatpush.msrb.mxu1 %v12740_v37 }
 0xb30   :  { %3986 = vmatpush.msrb.mxu3 %v12382_v10  ;;  %3482 = vmatpush.msrb.mxu1 %v12748_v3 }
 0xb32   :  { %3987 = vmatpush.msrb.mxu3 %v12387_v56  ;;  %3483 = vmatpush.msrb.mxu1 %v12761_v41 }
 0xb34   :  { %3988 = vmatpush.msrb.mxu3 %v12398_v0  ;;  %3484 = vmatpush.msrb.mxu1 %v12770_v11 }
 0xb35   :  { %3842 = vmatmul.f32.gmra.mxu3 %v12599_v63 }
 0xb36   :  { %3989 = vmatpush.msrb.mxu3 %v12403_v54 }
 0xb38   :  { %3990 = vmatpush.msrb.mxu3 %v12408_v58 }
 0xb3a   :  { %3991 = vmatpush.msrb.mxu3 %v12413_v7 }
 0xb3c   :  { %3992 = vmatpush.msrb.mxu3 %v12423_v1 }
 0xb3d   :  { %3845 = vmatmul.f32.gmra.mxu3 %v12609_v26 }
 0xb3e   :  { %3993 = vmatpush.msrb.mxu3 %v12429_v13 }
 0xb40   :  { %3994 = vmatpush.msrb.mxu3 %v12434_v36 }
 0xb42   :  { %3995 = vmatpush.msrb.mxu3 %v12439_v16 }
 0xb44   :  { %3996 = vmatpush.msrb.mxu3 %v12446_v23 }
 0xb45   :  { %3997 = vmatmul.f32.vlgmr.msrb.gmra.mxu3 %v12634_v48 }
 0xb46   :  { %4142 = vmatpush.msra.mxu3 %v12353_v46  ;;  %v3172_v12 = vpop.f32.mrf.mxu2 }
 0xb47   :  { %8287 = vmatmul.msk.f32.gmra.mxu1 %vm16347_vm8, %v3172_v12  ;;  %v12885_v12 = vld [vmem:[%s15862_s8 + $0xd0] sm:$0xff]  ;;  %vm16380_vm8 = vmmov %vm16377_vm1 }
 0xb48   :  { %4143 = vmatpush.msra.mxu3 %v12356_v27 }
 0xb4a   :  { %4144 = vmatpush.msra.mxu3 %v12361_v33 }
 0xb4c   :  { %4145 = vmatpush.msra.mxu3 %v12372_v53 }
 0xb4d   :  { %4000 = vmatmul.f32.gmra.mxu3 %v12672_v18 }
 0xb4e   :  { %4146 = vmatpush.msra.mxu3 %v12377_v22  ;;  %v3175_v61 = vpop.f32.mrf.mxu2 }
 0xb4f   :  { %8288 = vmatmul.msk.f32.gmra.mxu1 %vm16348_vm5, %v3175_v61  ;;  %v12903_v61 = vld [vmem:[%s15862_s8 + $0xd8] sm:$0xff]  ;;  %vm16381_vm5 = vmmov %vm16351_vm0 }
 0xb50   :  { %4147 = vmatpush.msra.mxu3 %v12382_v10 }
 0xb52   :  { %4148 = vmatpush.msra.mxu3 %v12387_v56 }
 0xb54   :  { %4149 = vmatpush.msra.mxu3 %v12398_v0 }
 0xb55   :  { %4003 = vmatmul.f32.gmra.mxu3 %v12710_v9 }
 0xb56   :  { %4150 = vmatpush.msra.mxu3 %v12403_v54  ;;  %v3178_v17 = vpop.f32.mrf.mxu2 }
 0xb57   :  { %8289 = vmatmul.msk.f32.gmra.mxu1 %vm16349_vm4, %v3178_v17  ;;  %v12920_v17 = vld [vmem:[%s15862_s8 + $0xe0] sm:$0xff]  ;;  %vm16382_vm4 = vmmov %vm16377_vm1 }
 0xb58   :  { %4151 = vmatpush.msra.mxu3 %v12408_v58 }
 0xb5a   :  { %4152 = vmatpush.msra.mxu3 %v12413_v7 }
 0xb5c   :  { %4153 = vmatpush.msra.mxu3 %v12423_v1 }
 0xb5d   :  { %4006 = vmatmul.f32.gmra.mxu3 %v12754_v6 }
 0xb5e   :  { %4154 = vmatpush.msra.mxu3 %v12429_v13 }
 0xb5f   :  { %3359 = vmatmul.f32.vlgmr.msra.gmra.mxu1 %v3310_v24 }
 0xb60   :  { %4155 = vmatpush.msra.mxu3 %v12434_v36  ;;  %3630 = vmatpush.msra.mxu1 %v12626_v52 }
 0xb62   :  { %4156 = vmatpush.msra.mxu3 %v12439_v16  ;;  %v3198_v14 = vpop.f32.mrf.mxu1  ;;  %3631 = vmatpush.msra.mxu1 %v12639_v49 }
 0xb63   :  { %8282 = vmatmul.msk.f32.vlgmr.msra.gmra.mxu2 %vm16350_vm14, %v3198_v14  ;;  %v12937_v14 = vld [vmem:[%s15862_s8 + $0xe8] sm:$0xff]  ;;  %vm16383_vm14 = vmmov %vm16351_vm0 }
 0xb64   :  { %4157 = vmatpush.msra.mxu3 %v12446_v23  ;;  %3632 = vmatpush.msra.mxu1 %v12647_v4 }
 0xb65   :  { %4158 = vmatmul.f32.vlgmr.msra.gmra.mxu3 %v12785_v55 }
 0xb66   :  { %4303 = vmatpush.msrb.mxu3 %v12353_v46  ;;  %3633 = vmatpush.msra.mxu1 %v12656_v2 }
 0xb67   :  { %3362 = vmatmul.f32.gmra.mxu1 %v3311_v30 }
 0xb68   :  { %4304 = vmatpush.msrb.mxu3 %v12356_v27  ;;  %3634 = vmatpush.msra.mxu1 %v12664_v40 }
 0xb6a   :  { %4305 = vmatpush.msrb.mxu3 %v12361_v33  ;;  %v3201_v35 = vpop.f32.mrf.mxu1  ;;  %3635 = vmatpush.msra.mxu1 %v12677_v32 }
 0xb6b   :  { %8283 = vmatmul.msk.f32.gmra.mxu2 %vm16351_vm0, %v3201_v35  ;;  %vm16384_vm0 = vmmov %vm16377_vm1 }
 0xb6c   :  { %4306 = vmatpush.msrb.mxu3 %v12372_v53  ;;  %3636 = vmatpush.msra.mxu1 %v12685_v31 }
 0xb6d   :  { %4161 = vmatmul.f32.gmra.mxu3 %v12803_v45 }
 0xb6e   :  { %4307 = vmatpush.msrb.mxu3 %v12377_v22  ;;  %3637 = vmatpush.msra.mxu1 %v12694_v57 }
 0xb6f   :  { %3365 = vmatmul.f32.gmra.mxu1 %v3312_v47 }
 0xb70   :  { %4308 = vmatpush.msrb.mxu3 %v12382_v10  ;;  %3638 = vmatpush.msra.mxu1 %v12702_v39 }
 0xb72   :  { %4309 = vmatpush.msrb.mxu3 %v12387_v56  ;;  %v3204_v43 = vpop.f32.mrf.mxu1  ;;  %3639 = vmatpush.msra.mxu1 %v12715_v5 }
 0xb73   :  { %8284 = vmatmul.msk.f32.gmra.mxu2 %vm16352_vm11, %v3204_v43  ;;  %v12993_v43 = vld [vmem:[%s15862_s8 + $0x100] sm:$0xff]  ;;  %vm16385_vm11 = vmmov %vm16363_vm2 }
 0xb74   :  { %4310 = vmatpush.msrb.mxu3 %v12398_v0  ;;  %3640 = vmatpush.msra.mxu1 %v12723_v19  ;;  %16357 = vst [vmem:[#allocation64_spill] sm:$0xff] %v12993_v43 }
 0xb75   :  { %4164 = vmatmul.f32.gmra.mxu3 %v12821_v29 }
 0xb76   :  { %4311 = vmatpush.msrb.mxu3 %v12403_v54  ;;  %3641 = vmatpush.msra.mxu1 %v12732_v60 }
 0xb77   :  { %3368 = vmatmul.f32.gmra.mxu1 %v3313_v25 }
 0xb78   :  { %4312 = vmatpush.msrb.mxu3 %v12408_v58  ;;  %3642 = vmatpush.msra.mxu1 %v12740_v37 }
 0xb7a   :  { %4313 = vmatpush.msrb.mxu3 %v12413_v7  ;;  %v3207_v21 = vpop.f32.mrf.mxu1  ;;  %3643 = vmatpush.msra.mxu1 %v12748_v3 }
 0xb7b   :  { %8285 = vmatmul.msk.f32.gmra.mxu2 %vm16353_vm13, %v3207_v21  ;;  %v3379_v21 = vld [vmem:[%s15865_s16 + $0x38] sm:$0xff]  ;;  %vm16386_vm13 = vmmov %vm16384_vm0 }
 0xb7c   :  { %4314 = vmatpush.msrb.mxu3 %v12423_v1  ;;  %3644 = vmatpush.msra.mxu1 %v12761_v41 }
 0xb7d   :  { %4167 = vmatmul.f32.gmra.mxu3 %v12840_v20  ;;  %3443 = vmatpush.msra.mxu0 %v3379_v21  ;;  %v3377_v21 = vld [vmem:[%s15865_s16 + $0x28] sm:$0xff] }
 0xb7e   :  { %4315 = vmatpush.msrb.mxu3 %v12429_v13  ;;  %3645 = vmatpush.msra.mxu1 %v12770_v11 }
 0xb7f   :  { %3485 = vmatmul.f32.vlgmr.msrb.gmra.mxu1 %v12454_v34  ;;  %v12869_v34 = vld [vmem:[%s15862_s8 + $0xc8] sm:$0xff] }
 0xb80   :  { %4316 = vmatpush.msrb.mxu3 %v12434_v36  ;;  %3791 = vmatpush.msrb.mxu1 %v12626_v52 }
 0xb82   :  { %4317 = vmatpush.msrb.mxu3 %v12439_v16  ;;  %3792 = vmatpush.msrb.mxu1 %v12639_v49  ;;  %v12967_v35 = vpop.f32.mrf.mxu1 }
 0xb83   :  { %3330 = vmatmul.f32.vlgmr.msrb.gmra.mxu2 %v3310_v24  ;;  %v12954_v24 = vld [vmem:[%s15862_s8 + $0xf0] sm:$0xff]  ;;  %16354 = vst [vmem:[#allocation12_spill] sm:$0xff] %v12967_v35 }
 0xb84   :  { %4318 = vmatpush.msrb.mxu3 %v12446_v23  ;;  %3793 = vmatpush.msrb.mxu1 %v12647_v4  ;;  %v13038_v35 = vld [vmem:[%s15862_s8 + $0x110] sm:$0xff] }
 0xb85   :  { %4319 = vmatmul.f32.vlgmr.msrb.gmra.mxu3 %v12854_v15  ;;  %16361 = vst [vmem:[#allocation61_spill] sm:$0xff] %v13038_v35 }
 0xb86   :  { %4464 = vmatpush.msra.mxu3 %v12353_v46  ;;  %3794 = vmatpush.msrb.mxu1 %v12656_v2 }
 0xb87   :  { %3488 = vmatmul.f32.gmra.mxu1 %v12479_v42  ;;  %v12879_v42 = vpop.f32.mrf.mxu3 }
 0xb88   :  { %4465 = vmatpush.msra.mxu3 %v12356_v27  ;;  %3795 = vmatpush.msrb.mxu1 %v12664_v40 }
 0xb8a   :  { %4466 = vmatpush.msra.mxu3 %v12361_v33  ;;  %3796 = vmatpush.msrb.mxu1 %v12677_v32 }
 0xb8b   :  { %3333 = vmatmul.f32.gmra.mxu2 %v3311_v30  ;;  %v12974_v30 = vld [vmem:[%s15862_s8 + $0xf8] sm:$0xff] }
 0xb8c   :  { %4467 = vmatpush.msra.mxu3 %v12372_v53  ;;  %3797 = vmatpush.msrb.mxu1 %v12685_v31  ;;  %16355 = vst [vmem:[#allocation11_spill] sm:$0xff] %v12974_v30 }
 0xb8d   :  { %4322 = vmatmul.f32.gmra.mxu3 %v12869_v34 }
 0xb8e   :  { %4468 = vmatpush.msra.mxu3 %v12377_v22  ;;  %3798 = vmatpush.msrb.mxu1 %v12694_v57 }
 0xb8f   :  { %3491 = vmatmul.f32.gmra.mxu1 %v12499_v44  ;;  %v12896_v44 = vpop.f32.mrf.mxu3 }
 0xb90   :  { %4469 = vmatpush.msra.mxu3 %v12382_v10  ;;  %3799 = vmatpush.msrb.mxu1 %v12702_v39 }
 0xb92   :  { %4470 = vmatpush.msra.mxu3 %v12387_v56  ;;  %3800 = vmatpush.msrb.mxu1 %v12715_v5 }
 0xb93   :  { %3336 = vmatmul.f32.gmra.mxu2 %v3312_v47 }
 0xb94   :  { %4471 = vmatpush.msra.mxu3 %v12398_v0  ;;  %3801 = vmatpush.msrb.mxu1 %v12723_v19 }
 0xb95   :  { %4325 = vmatmul.f32.gmra.mxu3 %v12885_v12 }
 0xb96   :  { %4472 = vmatpush.msra.mxu3 %v12403_v54  ;;  %3802 = vmatpush.msrb.mxu1 %v12732_v60 }
 0xb97   :  { %3494 = vmatmul.f32.gmra.mxu1 %v12514_v62  ;;  %v12913_v62 = vpop.f32.mrf.mxu3 }
 0xb98   :  { %4473 = vmatpush.msra.mxu3 %v12408_v58  ;;  %3803 = vmatpush.msrb.mxu1 %v12740_v37 }
 0xb9a   :  { %4474 = vmatpush.msra.mxu3 %v12413_v7  ;;  %3804 = vmatpush.msrb.mxu1 %v12748_v3 }
 0xb9b   :  { %3339 = vmatmul.f32.gmra.mxu2 %v3313_v25 }
 0xb9c   :  { %4475 = vmatpush.msra.mxu3 %v12423_v1  ;;  %3805 = vmatpush.msrb.mxu1 %v12761_v41 }
 0xb9d   :  { %4328 = vmatmul.f32.gmra.mxu3 %v12903_v61 }
 0xb9e   :  { %4476 = vmatpush.msra.mxu3 %v12429_v13  ;;  %3806 = vmatpush.msrb.mxu1 %v12770_v11 }
 0xb9f   :  { %3646 = vmatmul.f32.vlgmr.msra.gmra.mxu1 %v12530_v28  ;;  %v12930_v28 = vpop.f32.mrf.mxu3 }
 0xba0   :  { %4477 = vmatpush.msra.mxu3 %v12434_v36  ;;  %3952 = vmatpush.msra.mxu1 %v12626_v52 }
 0xba2   :  { %4478 = vmatpush.msra.mxu3 %v12439_v16  ;;  %3953 = vmatpush.msra.mxu1 %v12639_v49 }
 0xba4   :  { %4479 = vmatpush.msra.mxu3 %v12446_v23  ;;  %3954 = vmatpush.msra.mxu1 %v12647_v4 }
 0xba5   :  { %4480 = vmatmul.f32.vlgmr.msra.gmra.mxu3 %v12920_v17 }
 0xba6   :  { %4625 = vmatpush.msrb.mxu3 %v12353_v46  ;;  %3955 = vmatpush.msra.mxu1 %v12656_v2 }
 0xba7   :  { %3649 = vmatmul.f32.gmra.mxu1 %v12544_v8  ;;  %v12947_v8 = vpop.f32.mrf.mxu3 }
 0xba8   :  { %4626 = vmatpush.msrb.mxu3 %v12356_v27  ;;  %3956 = vmatpush.msra.mxu1 %v12664_v40 }
 0xbaa   :  { %4627 = vmatpush.msrb.mxu3 %v12361_v33  ;;  %3957 = vmatpush.msra.mxu1 %v12677_v32 }
 0xbac   :  { %4628 = vmatpush.msrb.mxu3 %v12372_v53  ;;  %3958 = vmatpush.msra.mxu1 %v12685_v31 }
 0xbad   :  { %4483 = vmatmul.f32.gmra.mxu3 %v12937_v14 }
 0xbae   :  { %4629 = vmatpush.msrb.mxu3 %v12377_v22  ;;  %3959 = vmatpush.msra.mxu1 %v12694_v57 }
 0xbaf   :  { %3652 = vmatmul.f32.gmra.mxu1 %v12558_v59  ;;  %v12964_v59 = vpop.f32.mrf.mxu3 }
 0xbb0   :  { %4630 = vmatpush.msrb.mxu3 %v12382_v10  ;;  %3960 = vmatpush.msra.mxu1 %v12702_v39 }
 0xbb2   :  { %4631 = vmatpush.msrb.mxu3 %v12387_v56  ;;  %3961 = vmatpush.msra.mxu1 %v12715_v5 }
 0xbb4   :  { %4632 = vmatpush.msrb.mxu3 %v12398_v0  ;;  %3962 = vmatpush.msra.mxu1 %v12723_v19 }
 0xbb5   :  { %4486 = vmatmul.f32.gmra.mxu3 %v12954_v24 }
 0xbb6   :  { %4633 = vmatpush.msrb.mxu3 %v12403_v54  ;;  %3963 = vmatpush.msra.mxu1 %v12732_v60 }
 0xbb7   :  { %3655 = vmatmul.f32.gmra.mxu1 %v12568_v38  ;;  %v12987_v47 = vpop.f32.mrf.mxu3 }
 0xbb8   :  { %4634 = vmatpush.msrb.mxu3 %v12408_v58  ;;  %3964 = vmatpush.msra.mxu1 %v12740_v37 }
 0xbba   :  { %4635 = vmatpush.msrb.mxu3 %v12413_v7  ;;  %3965 = vmatpush.msra.mxu1 %v12748_v3 }
 0xbbc   :  { %4636 = vmatpush.msrb.mxu3 %v12423_v1  ;;  %3966 = vmatpush.msra.mxu1 %v12761_v41 }
 0xbbd   :  { %4489 = vmatmul.f32.gmra.mxu3 %v12974_v30 }
 0xbbe   :  { %4637 = vmatpush.msrb.mxu3 %v12429_v13  ;;  %3967 = vmatpush.msra.mxu1 %v12770_v11 }
 0xbbf   :  { %3807 = vmatmul.f32.vlgmr.msrb.gmra.mxu1 %v12579_v50  ;;  %v13006_v25 = vpop.f32.mrf.mxu3 }
 0xbc0   :  { %4638 = vmatpush.msrb.mxu3 %v12434_v36  ;;  %4113 = vmatpush.msrb.mxu1 %v12626_v52 }
 0xbc2   :  { %4639 = vmatpush.msrb.mxu3 %v12439_v16  ;;  %4114 = vmatpush.msrb.mxu1 %v12639_v49 }
 0xbc4   :  { %4640 = vmatpush.msrb.mxu3 %v12446_v23  ;;  %v12985_v38 = vpop.f32.mrf.mxu1  ;;  %4115 = vmatpush.msrb.mxu1 %v12647_v4 }
 0xbc5   :  { %16356 = vst [vmem:[#allocation60_spill] sm:$0xff] %v12985_v38  ;;  %4641 = vmatmul.f32.vlgmr.msrb.gmra.mxu3 %v12993_v43  ;;  %v3372_v43 = vld [vmem:[%s15865_s16] sm:$0xff] }
 0xbc6   :  { %4786 = vmatpush.msra.mxu3 %v12353_v46  ;;  %4116 = vmatpush.msrb.mxu1 %v12656_v2 }
 0xbc7   :  { %3810 = vmatmul.f32.gmra.mxu1 %v12589_v51  ;;  %v13013_v51 = vld [vmem:[%s15862_s8 + $0x108] sm:$0xff] }
 0xbc8   :  { %4787 = vmatpush.msra.mxu3 %v12356_v27  ;;  %16359 = vst [vmem:[#allocation14_spill] sm:$0xff] %v13013_v51  ;;  %4117 = vmatpush.msrb.mxu1 %v12664_v40 }
 0xbca   :  { %4788 = vmatpush.msra.mxu3 %v12361_v33  ;;  %4118 = vmatpush.msrb.mxu1 %v12677_v32 }
 0xbcc   :  { %4789 = vmatpush.msra.mxu3 %v12372_v53  ;;  %v13004_v50 = vpop.f32.mrf.mxu1  ;;  %4119 = vmatpush.msrb.mxu1 %v12685_v31 }
 0xbcd   :  { %16358 = vst [vmem:[#allocation42_spill] sm:$0xff] %v13004_v50  ;;  %4644 = vmatmul.f32.gmra.mxu3 %v13013_v51  ;;  %v13026_v50 = vpop.f32.mrf.mxu3 }
 0xbce   :  { %4790 = vmatpush.msra.mxu3 %v12377_v22  ;;  %4120 = vmatpush.msrb.mxu1 %v12694_v57 }
 0xbcf   :  { %3813 = vmatmul.f32.gmra.mxu1 %v12599_v63  ;;  %v3378_v63 = vld [vmem:[%s15865_s16 + $0x30] sm:$0xff] }
 0xbd0   :  { %4791 = vmatpush.msra.mxu3 %v12382_v10  ;;  %3444 = vmatpush.msra.mxu0 %v3378_v63  ;;  %v3376_v63 = vld [vmem:[%s15865_s16 + $0x20] sm:$0xff] }
 0xbd1   :  { %4121 = vmatpush.msrb.mxu1 %v12702_v39 }
 0xbd2   :  { %4792 = vmatpush.msra.mxu3 %v12387_v56  ;;  %3445 = vmatpush.msra.mxu0 %v3377_v21  ;;  %v3380_v21 = vld [vmem:[%s15866_s17] sm:$0xff] }
 0xbd3   :  { %4122 = vmatpush.msrb.mxu1 %v12715_v5 }
 0xbd4   :  { %4793 = vmatpush.msra.mxu3 %v12398_v0  ;;  %v13029_v38 = vpop.f32.mrf.mxu1  ;;  %3446 = vmatpush.msra.mxu0 %v3376_v63  ;;  %v13073_v63 = vld [vmem:[%s15862_s8 + $0x118] sm:$0xff] }
 0xbd5   :  { %16360 = vst [vmem:[#allocation13_spill] sm:$0xff] %v13029_v38  ;;  %4647 = vmatmul.f32.gmra.mxu3 %v13038_v35  ;;  %v3381_v38 = vld [vmem:[%s15866_s17 + $0x8] sm:$0xff]  ;;  %v3375_v35 = vld [vmem:[%s15865_s16 + $0x18] sm:$0xff]  ;;  %v13063_v51 = vpop.f32.mrf.mxu3  ;;  %4123 = vmatpush.msrb.mxu1 %v12723_v19 }
 0xbd6   :  { %4794 = vmatpush.msra.mxu3 %v12403_v54  ;;  %3408 = vmatpush.msra.mxu2 %v3381_v38  ;;  %v3374_v38 = vld [vmem:[%s15865_s16 + $0x10] sm:$0xff]  ;;  %16362 = vst [vmem:[#allocation66_spill] sm:$0xff] %v13073_v63 }
 0xbd7   :  { %3816 = vmatmul.f32.gmra.mxu1 %v12609_v26  ;;  %3447 = vmatpush.msra.mxu0 %v3375_v35 }
 0xbd8   :  { %4795 = vmatpush.msra.mxu3 %v12408_v58  ;;  %3409 = vmatpush.msra.mxu2 %v3380_v21  ;;  %v3373_v21 = vld [vmem:[%s15865_s16 + $0x8] sm:$0xff] }
 0xbd9   :  { %3448 = vmatpush.msra.mxu0 %v3374_v38  ;;  %4124 = vmatpush.msrb.mxu1 %v12732_v60 }
 0xbda   :  { %4796 = vmatpush.msra.mxu3 %v12413_v7 }
 0xbdb   :  { %3449 = vmatpush.msra.mxu0 %v3373_v21  ;;  %v13098_v21 = vld [vmem:[%s15862_s8 + $0x120] sm:$0xff]  ;;  %4125 = vmatpush.msrb.mxu1 %v12740_v37 }
 0xbdc   :  { %4797 = vmatpush.msra.mxu3 %v12423_v1  ;;  %v3360_v26 = vpop.f32.mrf.mxu1  ;;  %16365 = vst [vmem:[#allocation16_spill] sm:$0xff] %v13098_v21 }
 0xbdd   :  { %8290 = vmatmul.msk.f32.vlgmr.msra.gmra.mxu2 %vm16363_vm2, %v3360_v26  ;;  %4650 = vmatmul.f32.gmra.mxu3 %v13073_v63  ;;  %v13091_v26 = vpop.f32.mrf.mxu3 }
 0xbde   :  { %4798 = vmatpush.msra.mxu3 %v12429_v13  ;;  %3450 = vmatpush.msra.mxu0 %v3372_v43 }
 0xbdf   :  { %3968 = vmatmul.f32.vlgmr.msra.gmra.mxu1 %v12634_v48 }
 0xbe0   :  { %4799 = vmatpush.msra.mxu3 %v12434_v36  ;;  %4126 = vmatpush.msrb.mxu1 %v12748_v3 }
 0xbe2   :  { %4800 = vmatpush.msra.mxu3 %v12439_v16  ;;  %4127 = vmatpush.msrb.mxu1 %v12761_v41 }
 0xbe4   :  { %4801 = vmatpush.msra.mxu3 %v12446_v23  ;;  %v3363_v38 = vpop.f32.mrf.mxu1  ;;  %4128 = vmatpush.msrb.mxu1 %v12770_v11 }
 0xbe5   :  { %8291 = vmatmul.msk.f32.gmra.mxu2 %vm16366_vm10, %v3363_v38  ;;  %4802 = vmatmul.f32.vlgmr.msra.gmra.mxu3 %v13098_v21  ;;  %v13111_v43 = vpop.f32.mrf.mxu3  ;;  %v8306_v21 = vld [vmem:[%s15865_s16 + $0x60] sm:$0xff]  ;;  %vm16387_vm10 = vmmov %vm16384_vm0 }
 0xbe6   :  { %4947 = vmatpush.msrb.mxu3 %v12353_v46  ;;  %v13081_v35 = vpop.f32.mrf.mxu2  ;;  %4274 = vmatpush.msra.mxu1 %v12626_v52 }
 0xbe7   :  { %16364 = vst [vmem:[#allocation27_spill] sm:$0xff] %v13081_v35  ;;  %3971 = vmatmul.f32.gmra.mxu1 %v12672_v18  ;;  %v8309_v35 = vld [vmem:[%s15865_s16 + $0x78] sm:$0xff] }
 0xbe8   :  { %4948 = vmatpush.msrb.mxu3 %v12356_v27  ;;  %4275 = vmatpush.msra.mxu1 %v12639_v49 }
 0xbe9   :  { %3600 = vmatpush.msrb.mxu0 %v8309_v35  ;;  %v13149_v35 = vld [vmem:[%s15862_s8 + $0x130] sm:$0xff] }
 0xbea   :  { %4949 = vmatpush.msrb.mxu3 %v12361_v33  ;;  %4276 = vmatpush.msra.mxu1 %v12647_v4 }
 0xbec   :  { %4950 = vmatpush.msrb.mxu3 %v12372_v53  ;;  %v3366_v38 = vpop.f32.mrf.mxu1  ;;  %4277 = vmatpush.msra.mxu1 %v12656_v2 }
 0xbed   :  { %8292 = vmatmul.msk.f32.gmra.mxu2 %vm16369_vm15, %v3366_v38  ;;  %v13134_v38 = vpop.f32.mrf.mxu3  ;;  %vm16388_vm15 = vmmov %vm16363_vm2 }
 0xbee   :  { %4951 = vmatpush.msrb.mxu3 %v12377_v22  ;;  %v13103_v48 = vpop.f32.mrf.mxu2  ;;  %4278 = vmatpush.msra.mxu1 %v12664_v40 }
 0xbef   :  { %16367 = vst [vmem:[#allocation15_spill] sm:$0xff] %v13103_v48  ;;  %v13118_v48 = vld [vmem:[%s15862_s8 + $0x128] sm:$0xff]  ;;  %3974 = vmatmul.f32.gmra.mxu1 %v12710_v9 }
 0xbf0   :  { %4952 = vmatpush.msrb.mxu3 %v12382_v10  ;;  %16368 = vst [vmem:[#allocation63_spill] sm:$0xff] %v13118_v48  ;;  %v8307_v9 = vld [vmem:[%s15865_s16 + $0x68] sm:$0xff]  ;;  %4279 = vmatpush.msra.mxu1 %v12677_v32 }
 0xbf1   :  { %4805 = vmatmul.f32.gmra.mxu3 %v13118_v48  ;;  %v8308_v48 = vld [vmem:[%s15865_s16 + $0x70] sm:$0xff] }
 0xbf2   :  { %4953 = vmatpush.msrb.mxu3 %v12387_v56  ;;  %3601 = vmatpush.msrb.mxu0 %v8308_v48  ;;  %v8310_v48 = vld [vmem:[%s15866_s17 + $0x10] sm:$0xff] }
 0xbf3   :  { %4280 = vmatpush.msra.mxu1 %v12685_v31 }
 0xbf4   :  { %4954 = vmatpush.msrb.mxu3 %v12398_v0  ;;  %3602 = vmatpush.msrb.mxu0 %v8307_v9  ;;  %v8305_v9 = vld [vmem:[%s15865_s16 + $0x58] sm:$0xff] }
 0xbf5   :  { %v13169_v30 = vpop.f32.mrf.mxu3  ;;  %4281 = vmatpush.msra.mxu1 %v12694_v57 }
 0xbf6   :  { %4955 = vmatpush.msrb.mxu3 %v12403_v54  ;;  %v13125_v18 = vpop.f32.mrf.mxu2  ;;  %3603 = vmatpush.msrb.mxu0 %v8306_v21  ;;  %v8303_v21 = vld [vmem:[%s15865_s16 + $0x48] sm:$0xff] }
 0xbf7   :  { %16370 = vst [vmem:[#allocation68_spill] sm:$0xff] %v13125_v18  ;;  %v3369_v18 = vpop.f32.mrf.mxu1  ;;  %3977 = vmatmul.f32.gmra.mxu1 %v12754_v6  ;;  %v13186_v6 = vld [vmem:[%s15862_s8 + $0x138] sm:$0xff] }
 0xbf8   :  { %4956 = vmatpush.msrb.mxu3 %v12408_v58  ;;  %8293 = vmatmul.msk.f32.gmra.mxu2 %vm16371_vm7, %v3369_v18  ;;  %v8311_v18 = vld [vmem:[%s15866_s17 + $0x18] sm:$0xff]  ;;  %vm16389_vm7 = vmmov %vm16384_vm0 }
 0xbf9   :  { %4808 = vmatmul.f32.gmra.mxu3 %v13149_v35  ;;  %3565 = vmatpush.msrb.mxu2 %v8311_v18  ;;  %v8304_v18 = vld [vmem:[%s15865_s16 + $0x50] sm:$0xff] }
 0xbfa   :  { %4957 = vmatpush.msrb.mxu3 %v12413_v7  ;;  %3604 = vmatpush.msrb.mxu0 %v8305_v9 }
 0xbfb   :  { %3566 = vmatpush.msrb.mxu2 %v8310_v48  ;;  %4282 = vmatpush.msra.mxu1 %v12702_v39 }
 0xbfc   :  { %4958 = vmatpush.msrb.mxu3 %v12423_v1  ;;  %3605 = vmatpush.msrb.mxu0 %v8304_v18 }
 0xbfd   :  { %v13202_v18 = vpop.f32.mrf.mxu3  ;;  %4283 = vmatpush.msra.mxu1 %v12715_v5 }
 0xbfe   :  { %4959 = vmatpush.msrb.mxu3 %v12429_v13  ;;  %v13159_v63 = vpop.f32.mrf.mxu2  ;;  %3606 = vmatpush.msrb.mxu0 %v8303_v21  ;;  %v13210_v21 = vld [vmem:[%s15862_s8 + $0x140] sm:$0xff] }
 0xbff   :  { %16372 = vst [vmem:[#allocation50_spill] sm:$0xff] %v13159_v63  ;;  %v13188_v48 = vpop.f32.mrf.mxu1  ;;  %4129 = vmatmul.f32.vlgmr.msrb.gmra.mxu1 %v12785_v55  ;;  %v8330_v63 = vld [vmem:[%s15865_s16 + $0xb0] sm:$0xff] }
 0xc00   :  { %4960 = vmatpush.msrb.mxu3 %v12434_v36  ;;  %8312 = vmatmul.msk.f32.vlgmr.msrb.gmra.mxu2 %vm16373_vm12, %v12879_v42  ;;  %v8302_v42 = vld [vmem:[%s15865_s16 + $0x40] sm:$0xff]  ;;  %16376 = vst [vmem:[#allocation46_spill] sm:$0xff] %v13210_v21  ;;  %vm16390_vm12 = vmmov %vm16363_vm2 }
 0xc01   :  { %4811 = vmatmul.f32.gmra.mxu3 %v13186_v6  ;;  %3607 = vmatpush.msrb.mxu0 %v8302_v42 }
 0xc02   :  { %4961 = vmatpush.msrb.mxu3 %v12439_v16  ;;  %4284 = vmatpush.msra.mxu1 %v12723_v19 }
 0xc04   :  { %4962 = vmatpush.msrb.mxu3 %v12446_v23  ;;  %4285 = vmatpush.msra.mxu1 %v12732_v60 }
 0xc06   :  { %5108 = vmatpush.msra.mxu3 %v12353_v46  ;;  %v3331_v9 = vpop.f32.mrf.mxu2  ;;  %4286 = vmatpush.msra.mxu1 %v12740_v37 }
 0xc07   :  { %8294 = vmatmul.msk.f32.vlgmr.msra.gmra.mxu0 %vm16374_vm6, %v3331_v9  ;;  %v13213_v42 = vpop.f32.mrf.mxu1  ;;  %4132 = vmatmul.f32.gmra.mxu1 %v12803_v45  ;;  %v13232_v9 = vpop.f32.mrf.mxu3  ;;  %vm16391_vm6 = vmmov %vm16384_vm0 }
 0xc08   :  { %5109 = vmatpush.msra.mxu3 %v12356_v27  ;;  %8313 = vmatmul.msk.f32.gmra.mxu2 %vm16375_vm9, %v12896_v44  ;;  %v13229_v44 = vld [vmem:[%s15862_s8 + $0x148] sm:$0xff]  ;;  %vm16392_vm9 = vmmov %vm16363_vm2 }
 0xc09   :  { %4963 = vmatmul.f32.vlgmr.msrb.gmra.mxu3 %v13210_v21  ;;  %16379 = vst [vmem:[#allocation17_spill] sm:$0xff] %v13229_v44  ;;  %4287 = vmatpush.msra.mxu1 %v12748_v3 }
 0xc0a   :  { %5110 = vmatpush.msra.mxu3 %v12361_v33 }
 0xc0b   :  { %4288 = vmatpush.msra.mxu1 %v12761_v41 }
 0xc0c   :  { %5111 = vmatpush.msra.mxu3 %v12372_v53 }
 0xc0d   :  { %4289 = vmatpush.msra.mxu1 %v12770_v11 }
 0xc0e   :  { %5112 = vmatpush.msra.mxu3 %v12377_v22  ;;  %v3334_v55 = vpop.f32.mrf.mxu2 }
 0xc0f   :  { %8295 = vmatmul.msk.f32.gmra.mxu0 %vm16377_vm1, %v3334_v55  ;;  %v13234_v55 = vpop.f32.mrf.mxu1  ;;  %4135 = vmatmul.f32.gmra.mxu1 %v12821_v29  ;;  %v8333_v29 = vld [vmem:[%s15866_s17 + $0x28] sm:$0xff]  ;;  %v13273_v21 = vpop.f32.mrf.mxu3  ;;  %vm16393_vm1 = vmmov %vm16384_vm0 }
 0xc10   :  { %5113 = vmatpush.msra.mxu3 %v12382_v10  ;;  %8314 = vmatmul.msk.f32.gmra.mxu2 %vm16378_vm3, %v12913_v62  ;;  %v8331_v62 = vld [vmem:[%s15865_s16 + $0xb8] sm:$0xff]  ;;  %vm16394_vm3 = vmmov %vm16363_vm2 }
 0xc11   :  { %4966 = vmatmul.f32.gmra.mxu3 %v13229_v44  ;;  %3761 = vmatpush.msra.mxu0 %v8331_v62  ;;  %v13264_v62 = vld [vmem:[%s15862_s8 + $0x150] sm:$0xff] }
 0xc12   :  { %5114 = vmatpush.msra.mxu3 %v12387_v56  ;;  %3726 = vmatpush.msra.mxu2 %v8333_v29  ;;  %v8327_v29 = vld [vmem:[%s15865_s16 + $0x98] sm:$0xff] }
 0xc13   :  { %3762 = vmatpush.msra.mxu0 %v8330_v63  ;;  %4435 = vmatpush.msrb.mxu1 %v12626_v52  ;;  %v8326_v52 = vld [vmem:[%s15865_s16 + $0x90] sm:$0xff] }
 0xc14   :  { %5115 = vmatpush.msra.mxu3 %v12398_v0 }
 0xc15   :  { %4436 = vmatpush.msrb.mxu1 %v12639_v49 }
 0xc16   :  { %5116 = vmatpush.msra.mxu3 %v12403_v54  ;;  %v3337_v45 = vpop.f32.mrf.mxu2 }
 0xc17   :  { %8296 = vmatmul.msk.f32.gmra.mxu0 %vm16380_vm8, %v3337_v45  ;;  %v8329_v45 = vld [vmem:[%s15865_s16 + $0xa8] sm:$0xff]  ;;  %v13266_v44 = vpop.f32.mrf.mxu1  ;;  %4138 = vmatmul.f32.gmra.mxu1 %v12840_v20  ;;  %v13300_v20 = vld [vmem:[%s15862_s8 + $0x158] sm:$0xff]  ;;  %v13313_v49 = vpop.f32.mrf.mxu3  ;;  %vm16395_vm8 = vmmov %vm16384_vm0 }
 0xc18   :  { %5117 = vmatpush.msra.mxu3 %v12408_v58  ;;  %8315 = vmatmul.msk.f32.gmra.mxu2 %vm16381_vm5, %v12930_v28  ;;  %v8328_v28 = vld [vmem:[%s15865_s16 + $0xa0] sm:$0xff]  ;;  %vm16396_vm5 = vmmov %vm16363_vm2 }
 0xc19   :  { %3763 = vmatpush.msra.mxu0 %v8329_v45  ;;  %4969 = vmatmul.f32.gmra.mxu3 %v13264_v62  ;;  %v8332_v45 = vld [vmem:[%s15866_s17 + $0x20] sm:$0xff] }
 0xc1a   :  { %5118 = vmatpush.msra.mxu3 %v12413_v7  ;;  %3727 = vmatpush.msra.mxu2 %v8332_v45 }
 0xc1b   :  { %3764 = vmatpush.msra.mxu0 %v8328_v28  ;;  %4437 = vmatpush.msrb.mxu1 %v12647_v4  ;;  %v13324_v4 = vld [vmem:[%s15862_s8 + $0x160] sm:$0xff] }
 0xc1c   :  { %5119 = vmatpush.msra.mxu3 %v12423_v1 }
 0xc1d   :  { %3765 = vmatpush.msra.mxu0 %v8327_v29  ;;  %4438 = vmatpush.msrb.mxu1 %v12656_v2  ;;  %v13486_v29 = vld [vmem:[%s15989_s11 + $0x58] sm:$0xff] }
 0xc1e   :  { %5120 = vmatpush.msra.mxu3 %v12429_v13  ;;  %v3340_v63 = vpop.f32.mrf.mxu2 }
 0xc1f   :  { %8297 = vmatmul.msk.f32.gmra.mxu0 %vm16382_vm4, %v3340_v63  ;;  %v8325_v63 = vld [vmem:[%s15865_s16 + $0x88] sm:$0xff]  ;;  %v13302_v28 = vpop.f32.mrf.mxu1  ;;  %4290 = vmatmul.f32.vlgmr.msra.gmra.mxu1 %v12854_v15  ;;  %v13338_v2 = vpop.f32.mrf.mxu3  ;;  %vm16397_vm4 = vmmov %vm16384_vm0 }
 0xc20   :  { %5121 = vmatpush.msra.mxu3 %v12434_v36  ;;  %8334 = vmatmul.msk.f32.vlgmr.msra.gmra.mxu2 %vm16383_vm14, %v12947_v8  ;;  %v8324_v8 = vld [vmem:[%s15865_s16 + $0x80] sm:$0xff]  ;;  %vm16398_vm14 = vmmov %vm16363_vm2 }
 0xc21   :  { %3766 = vmatpush.msra.mxu0 %v8326_v52  ;;  %4972 = vmatmul.f32.gmra.mxu3 %v13300_v20  ;;  %v13492_v52 = vld [vmem:[%s15862_s8 + $0x188] sm:$0xff] }
 0xc22   :  { %5122 = vmatpush.msra.mxu3 %v12439_v16  ;;  %4439 = vmatpush.msrb.mxu1 %v12664_v40  ;;  %v13347_v40 = vld [vmem:[%s15862_s8 + $0x168] sm:$0xff] }
 0xc23   :  { %3767 = vmatpush.msra.mxu0 %v8325_v63  ;;  %v8374_v63 = vld [vmem:[%s15865_s16 + $0x130] sm:$0xff] }
 0xc24   :  { %5123 = vmatpush.msra.mxu3 %v12446_v23  ;;  %4440 = vmatpush.msrb.mxu1 %v12677_v32 }
 0xc25   :  { %3768 = vmatpush.msra.mxu0 %v8324_v8  ;;  %v13517_v8 = vld [vmem:[%s15989_s11 + $0x48] sm:$0xff] }
 0xc26   :  { %5269 = vmatpush.msrb.mxu3 %v12353_v46  ;;  %4441 = vmatpush.msrb.mxu1 %v12685_v31  ;;  %v8353_v31 = vld [vmem:[%s15865_s16 + $0xf8] sm:$0xff] }
 0xc27   :  { %8316 = vmatmul.msk.f32.vlgmr.msrb.gmra.mxu0 %vm16384_vm0, %v13188_v48  ;;  %v13326_v48 = vpop.f32.mrf.mxu1  ;;  %4293 = vmatmul.f32.gmra.mxu1 %v12869_v34  ;;  %v8355_v34 = vld [vmem:[%s15866_s17 + $0x38] sm:$0xff] }
 0xc28   :  { %5270 = vmatpush.msrb.mxu3 %v12356_v27  ;;  %8335 = vmatmul.msk.f32.gmra.mxu2 %vm16385_vm11, %v12964_v59  ;;  %v8349_v59 = vld [vmem:[%s15865_s16 + $0xd8] sm:$0xff]  ;;  %vm16401_vm11 = vmmov %vm16363_vm2 }
 0xc29   :  { %5124 = vmatmul.f32.vlgmr.msra.gmra.mxu3 %v13324_v4  ;;  %4442 = vmatpush.msrb.mxu1 %v12694_v57  ;;  %v8352_v57 = vld [vmem:[%s15865_s16 + $0xf0] sm:$0xff] }
 0xc2a   :  { %5271 = vmatpush.msrb.mxu3 %v12361_v33  ;;  %3922 = vmatpush.msrb.mxu0 %v8353_v31 }
 0xc2b   :  { %4443 = vmatpush.msrb.mxu1 %v12702_v39  ;;  %v8351_v39 = vld [vmem:[%s15865_s16 + $0xe8] sm:$0xff]  ;;  %3887 = vmatpush.msrb.mxu2 %v8355_v34  ;;  %v8372_v34 = vld [vmem:[%s15865_s16 + $0x120] sm:$0xff] }
 0xc2c   :  { %5272 = vmatpush.msrb.mxu3 %v12372_v53  ;;  %3923 = vmatpush.msrb.mxu0 %v8352_v57  ;;  %v8377_v57 = vld [vmem:[%s15866_s17 + $0x48] sm:$0xff] }
 0xc2d   :  { %4444 = vmatpush.msrb.mxu1 %v12715_v5  ;;  %v13373_v5 = vpop.f32.mrf.mxu3 }
 0xc2e   :  { %5273 = vmatpush.msrb.mxu3 %v12377_v22  ;;  %3924 = vmatpush.msrb.mxu0 %v8351_v39  ;;  %v13547_v39 = vld [vmem:[%s15989_s11 + $0x38] sm:$0xff] }
 0xc2f   :  { %8317 = vmatmul.msk.f32.gmra.mxu0 %vm16386_vm13, %v13213_v42  ;;  %v13349_v32 = vpop.f32.mrf.mxu1  ;;  %4296 = vmatmul.f32.gmra.mxu1 %v12885_v12  ;;  %v8350_v12 = vld [vmem:[%s15865_s16 + $0xe0] sm:$0xff]  ;;  %vm16404_vm13 = vmmov %vm16384_vm0 }
 0xc30   :  { %5274 = vmatpush.msrb.mxu3 %v12382_v10  ;;  %8336 = vmatmul.msk.f32.gmra.mxu2 %vm16363_vm2, %v12987_v47  ;;  %v8347_v47 = vld [vmem:[%s15865_s16 + $0xc8] sm:$0xff] }
 0xc31   :  { %5127 = vmatmul.f32.gmra.mxu3 %v13347_v40  ;;  %4445 = vmatpush.msrb.mxu1 %v12723_v19  ;;  %v13388_v19 = vld [vmem:[%s15862_s8 + $0x170] sm:$0xff] }
 0xc32   :  { %5275 = vmatpush.msrb.mxu3 %v12387_v56  ;;  %3925 = vmatpush.msrb.mxu0 %v8350_v12  ;;  %v8376_v12 = vld [vmem:[%s15866_s17 + $0x40] sm:$0xff] }
 0xc33   :  { %4446 = vmatpush.msrb.mxu1 %v12732_v60  ;;  %v8354_v60 = vld [vmem:[%s15866_s17 + $0x30] sm:$0xff] }
 0xc34   :  { %5276 = vmatpush.msrb.mxu3 %v12398_v0  ;;  %3888 = vmatpush.msrb.mxu2 %v8354_v60  ;;  %v8371_v60 = vld [vmem:[%s15865_s16 + $0x118] sm:$0xff] }
 0xc35   :  { %4447 = vmatpush.msrb.mxu1 %v12740_v37  ;;  %3926 = vmatpush.msrb.mxu0 %v8349_v59  ;;  %v8348_v37 = vld [vmem:[%s15865_s16 + $0xd0] sm:$0xff]  ;;  %v13424_v42 = vpop.f32.mrf.mxu3 }
 0xc36   :  { %5277 = vmatpush.msrb.mxu3 %v12403_v54  ;;  %4048 = vmatpush.msra.mxu2 %v8377_v57  ;;  %v8370_v59 = vld [vmem:[%s15865_s16 + $0x110] sm:$0xff]  ;;  %v13602_v57 = vld [vmem:[%s15862_s8 + $0x198] sm:$0xff] }
 0xc37   :  { %8318 = vmatmul.msk.f32.gmra.mxu0 %vm16387_vm10, %v13234_v55  ;;  %v13375_v15 = vpop.f32.mrf.mxu1  ;;  %4299 = vmatmul.f32.gmra.mxu1 %v12903_v61  ;;  %v13419_v61 = vld [vmem:[%s15862_s8 + $0x178] sm:$0xff]  ;;  %v13473_v55 = vld [vmem:[%s15989_s11 + $0x60] sm:$0xff]  ;;  %16400 = vst [vmem:[#allocation65_spill] sm:$0xff] %v13602_v57  ;;  %vm16406_vm10 = vmmov %vm16384_vm0 }
 0xc38   :  { %5278 = vmatpush.msrb.mxu3 %v12408_v58  ;;  %8337 = vmatmul.msk.f32.gmra.mxu2 %vm16388_vm15, %v13006_v25  ;;  %vm16407_vm15 = vmmov %vm16363_vm2 }
 0xc39   :  { %5130 = vmatmul.f32.gmra.mxu3 %v13388_v19  ;;  %3927 = vmatpush.msrb.mxu0 %v8348_v37 }
 0xc3a   :  { %5279 = vmatpush.msrb.mxu3 %v12413_v7  ;;  %4448 = vmatpush.msrb.mxu1 %v12748_v3  ;;  %v13440_v3 = vld [vmem:[%s15989_s11 + $0x78] sm:$0xff] }
 0xc3b   :  { %3928 = vmatpush.msrb.mxu0 %v8347_v47  ;;  %4049 = vmatpush.msra.mxu2 %v8376_v12  ;;  %v13585_v47 = vld [vmem:[%s15989_s11 + $0x20] sm:$0xff]  ;;  %v13627_v12 = vld [vmem:[%s15989_s11 + $0x8] sm:$0xff] }
 0xc3c   :  { %5280 = vmatpush.msrb.mxu3 %v12423_v1  ;;  %4449 = vmatpush.msrb.mxu1 %v12761_v41 }
 0xc3e   :  { %5281 = vmatpush.msrb.mxu3 %v12429_v13  ;;  %4450 = vmatpush.msrb.mxu1 %v12770_v11  ;;  %v13449_v11 = vld [vmem:[%s15862_s8 + $0x180] sm:$0xff] }
 0xc3f   :  { %8319 = vmatmul.msk.f32.gmra.mxu0 %vm16389_vm7, %v13266_v44  ;;  %v13413_v25 = vpop.f32.mrf.mxu1  ;;  %4451 = vmatmul.f32.vlgmr.msrb.gmra.mxu1 %v12920_v17  ;;  %v13454_v17 = vld [vmem:[%s15989_s11 + $0x70] sm:$0xff]  ;;  %v13466_v44 = vld [vmem:[%s15989_s11 + $0x68] sm:$0xff]  ;;  %vm16408_vm7 = vmmov %vm16384_vm0 }
 0xc40   :  { %5282 = vmatpush.msrb.mxu3 %v12434_v36  ;;  %8356 = vmatmul.msk.f32.vlgmr.msrb.gmra.mxu2 %vm16390_vm12, %v13026_v50  ;;  %v8346_v50 = vld [vmem:[%s15865_s16 + $0xc0] sm:$0xff]  ;;  %vm16410_vm12 = vmmov %vm16363_vm2 }
 0xc41   :  { %5133 = vmatmul.f32.gmra.mxu3 %v13419_v61  ;;  %3929 = vmatpush.msrb.mxu0 %v8346_v50  ;;  %v16399_v50 = vld [vmem:[#allocation11_spill] sm:$0xff] }
 0xc42   :  { %5283 = vmatpush.msrb.mxu3 %v12439_v16  ;;  %4596 = vmatpush.msra.mxu1 %v13440_v3 }
 0xc44   :  { %5284 = vmatpush.msrb.mxu3 %v12446_v23  ;;  %4597 = vmatpush.msra.mxu1 %v13454_v17 }
 0xc46   :  { %5430 = vmatpush.msra.mxu3 %v12353_v46  ;;  %4598 = vmatpush.msra.mxu1 %v13466_v44 }
 0xc47   :  { %8338 = vmatmul.msk.f32.vlgmr.msra.gmra.mxu0 %vm16391_vm6, %v13302_v28  ;;  %v13443_v41 = vpop.f32.mrf.mxu1  ;;  %4454 = vmatmul.f32.gmra.mxu1 %v12937_v14  ;;  %v8375_v14 = vld [vmem:[%s15865_s16 + $0x138] sm:$0xff]  ;;  %vm16411_vm6 = vmmov %vm16384_vm0 }
 0xc48   :  { %5431 = vmatpush.msra.mxu3 %v12356_v27  ;;  %8357 = vmatmul.msk.f32.gmra.mxu2 %vm16392_vm9, %v13063_v51  ;;  %v13461_v51 = vpop.f32.mrf.mxu3  ;;  %vm16413_vm9 = vmmov %vm16363_vm2 }
 0xc49   :  { %5285 = vmatmul.f32.vlgmr.msrb.gmra.mxu3 %v13449_v11  ;;  %4599 = vmatpush.msra.mxu1 %v13473_v55 }
 0xc4a   :  { %5432 = vmatpush.msra.mxu3 %v12361_v33  ;;  %4083 = vmatpush.msra.mxu0 %v8375_v14 }
 0xc4b   :  { %4600 = vmatpush.msra.mxu1 %v13486_v29 }
 0xc4c   :  { %5433 = vmatpush.msra.mxu3 %v12372_v53  ;;  %4084 = vmatpush.msra.mxu0 %v8374_v63  ;;  %v8369_v63 = vld [vmem:[%s15865_s16 + $0x108] sm:$0xff] }
 0xc4e   :  { %5434 = vmatpush.msra.mxu3 %v12377_v22 }
 0xc4f   :  { %8339 = vmatmul.msk.f32.gmra.mxu0 %vm16393_vm1, %v13326_v48  ;;  %v13480_v45 = vpop.f32.mrf.mxu1  ;;  %v8373_v48 = vld [vmem:[%s15865_s16 + $0x128] sm:$0xff]  ;;  %4457 = vmatmul.f32.gmra.mxu1 %v12954_v24  ;;  %v13559_v24 = vld [vmem:[%s15989_s11 + $0x30] sm:$0xff]  ;;  %vm16414_vm1 = vmmov %vm16384_vm0 }
 0xc50   :  { %5435 = vmatpush.msra.mxu3 %v12382_v10  ;;  %8358 = vmatmul.msk.f32.gmra.mxu2 %vm16394_vm3, %v13091_v26  ;;  %v13504_v26 = vld [vmem:[%s15989_s11 + $0x50] sm:$0xff]  ;;  %v13512_v28 = vpop.f32.mrf.mxu3  ;;  %vm16416_vm3 = vmmov %vm16363_vm2 }
 0xc51   :  { %4601 = vmatpush.msra.mxu1 %v13504_v26  ;;  %5288 = vmatmul.f32.gmra.mxu3 %v13492_v52 }
 0xc52   :  { %5436 = vmatpush.msra.mxu3 %v12387_v56  ;;  %4085 = vmatpush.msra.mxu0 %v8373_v48 }
 0xc53   :  { %4602 = vmatpush.msra.mxu1 %v13517_v8 }
 0xc54   :  { %5437 = vmatpush.msra.mxu3 %v12398_v0  ;;  %4086 = vmatpush.msra.mxu0 %v8372_v34  ;;  %v8368_v34 = vld [vmem:[%s15865_s16 + $0x100] sm:$0xff] }
 0xc56   :  { %5438 = vmatpush.msra.mxu3 %v12403_v54  ;;  %4087 = vmatpush.msra.mxu0 %v8371_v60  ;;  %v13634_v60 = vld [vmem:[%s15989_s11] sm:$0xff] }
 0xc57   :  { %8340 = vmatmul.msk.f32.gmra.mxu0 %vm16395_vm8, %v13349_v32  ;;  %v13529_v32 = vld [vmem:[%s15989_s11 + $0x40] sm:$0xff]  ;;  %v13532_v31 = vpop.f32.mrf.mxu1  ;;  %4460 = vmatmul.f32.gmra.mxu1 %v16399_v50  ;;  %vm16417_vm8 = vmmov %vm16384_vm0 }
 0xc58   :  { %5439 = vmatpush.msra.mxu3 %v12408_v58  ;;  %8359 = vmatmul.msk.f32.gmra.mxu2 %vm16396_vm5, %v13111_v43  ;;  %v13542_v43 = vld [vmem:[%s15862_s8 + $0x190] sm:$0xff]  ;;  %v13580_v37 = vpop.f32.mrf.mxu3  ;;  %vm16419_vm5 = vmmov %vm16363_vm2 }
 0xc59   :  { %4603 = vmatpush.msra.mxu1 %v13529_v32  ;;  %5291 = vmatmul.f32.gmra.mxu3 %v13542_v43 }
 0xc5a   :  { %5440 = vmatpush.msra.mxu3 %v12413_v7  ;;  %4088 = vmatpush.msra.mxu0 %v8370_v59 }
 0xc5b   :  { %4604 = vmatpush.msra.mxu1 %v13547_v39 }
 0xc5c   :  { %5441 = vmatpush.msra.mxu3 %v12423_v1  ;;  %4089 = vmatpush.msra.mxu0 %v8369_v63  ;;  %v13647_v63 = vld [vmem:[%s15862_s8 + $0x1a0] sm:$0xff] }
 0xc5d   :  { %4605 = vmatpush.msra.mxu1 %v13559_v24  ;;  %16402 = vst [vmem:[#allocation70_spill] sm:$0xff] %v13647_v63 }
 0xc5e   :  { %5442 = vmatpush.msra.mxu3 %v12429_v13  ;;  %4090 = vmatpush.msra.mxu0 %v8368_v34  ;;  %v16403_v34 = vld [vmem:[#allocation64_spill] sm:$0xff] }
 0xc5f   :  { %8341 = vmatmul.msk.f32.gmra.mxu0 %vm16397_vm4, %v13375_v15  ;;  %v13573_v15 = vld [vmem:[%s15989_s11 + $0x28] sm:$0xff]  ;;  %v13596_v48 = vpop.f32.mrf.mxu1  ;;  %vm16420_vm4 = vmmov %vm16384_vm0 }
 0xc60   :  { %5443 = vmatpush.msra.mxu3 %v12434_v36  ;;  %4606 = vmatpush.msra.mxu1 %v13573_v15  ;;  %v13591_v14 = vpop.f32.mrf.mxu2 }
 0xc61   :  { %8378 = vmatmul.msk.f32.vlgmr.msra.gmra.mxu2 %vm16398_vm14, %v13134_v38  ;;  %v13609_v38 = vld [vmem:[%s15989_s11 + $0x18] sm:$0xff]  ;;  %5294 = vmatmul.f32.gmra.mxu3 %v13602_v57  ;;  %v13652_v57 = vpop.f32.mrf.mxu3  ;;  %vm16421_vm14 = vmmov %vm16363_vm2 }
 0xc62   :  { %5444 = vmatpush.msra.mxu3 %v12439_v16  ;;  %4607 = vmatpush.msra.mxu1 %v13585_v47 }
 0xc64   :  { %5445 = vmatpush.msra.mxu3 %v12446_v23  ;;  %4608 = vmatpush.msra.mxu1 %v13609_v38 }
 0xc66   :  { %5591 = vmatpush.msrb.mxu3 %v12353_v46 }
 0xc67   :  { %8360 = vmatmul.msk.f32.vlgmr.msrb.gmra.mxu0 %vm16384_vm0, %v13413_v25  ;;  %v13620_v25 = vld [vmem:[%s15989_s11 + $0x10] sm:$0xff]  ;;  %v13641_v50 = vpop.f32.mrf.mxu1 }
 0xc68   :  { %5592 = vmatpush.msrb.mxu3 %v12356_v27  ;;  %4609 = vmatpush.msra.mxu1 %v13620_v25  ;;  %v13639_v59 = vpop.f32.mrf.mxu2 }
 0xc69   :  { %8379 = vmatmul.msk.f32.gmra.mxu2 %vm16401_vm11, %v13169_v30  ;;  %5446 = vmatmul.f32.vlgmr.msra.gmra.mxu3 %v13647_v63  ;;  %v8397_v63 = vld [vmem:[%s15865_s16 + $0x178] sm:$0xff]  ;;  %vm16422_vm11 = vmmov %vm16363_vm2 }
 0xc6a   :  { %5593 = vmatpush.msrb.mxu3 %v12361_v33  ;;  %4610 = vmatpush.msra.mxu1 %v13627_v12 }
 0xc6b   :  { %4244 = vmatpush.msrb.mxu0 %v8397_v63  ;;  %v8394_v63 = vld [vmem:[%s15865_s16 + $0x160] sm:$0xff] }
 0xc6c   :  { %5594 = vmatpush.msrb.mxu3 %v12372_v53  ;;  %4611 = vmatpush.msra.mxu1 %v13634_v60 }
 0xc6d   :  { %4612 = vmatmul.f32.vlgmr.msra.gmra.mxu1 %v16403_v34  ;;  %v16405_v34 = vld [vmem:[#allocation14_spill] sm:$0xff] }
 0xc6e   :  { %5595 = vmatpush.msrb.mxu3 %v12377_v22  ;;  %4757 = vmatpush.msrb.mxu1 %v13440_v3 }
 0xc6f   :  { %8361 = vmatmul.msk.f32.gmra.mxu0 %vm16404_vm13, %v13443_v41  ;;  %v13666_v41 = vpop.f32.mrf.mxu1  ;;  %vm16423_vm13 = vmmov %vm16384_vm0 }
 0xc70   :  { %5596 = vmatpush.msrb.mxu3 %v12382_v10  ;;  %4758 = vmatpush.msrb.mxu1 %v13454_v17  ;;  %v13664_v30 = vpop.f32.mrf.mxu2 }
 0xc71   :  { %8380 = vmatmul.msk.f32.gmra.mxu2 %vm16363_vm2, %v13202_v18  ;;  %v8396_v18 = vld [vmem:[%s15865_s16 + $0x170] sm:$0xff] }
 0xc72   :  { %5597 = vmatpush.msrb.mxu3 %v12387_v56  ;;  %4759 = vmatpush.msrb.mxu1 %v13466_v44 }
 0xc73   :  { %4245 = vmatpush.msrb.mxu0 %v8396_v18 }
 0xc74   :  { %5598 = vmatpush.msrb.mxu3 %v12398_v0  ;;  %4760 = vmatpush.msrb.mxu1 %v13473_v55 }
 0xc75   :  { %4615 = vmatmul.f32.gmra.mxu1 %v16405_v34  ;;  %v16409_v34 = vld [vmem:[#allocation61_spill] sm:$0xff] }
 0xc76   :  { %5599 = vmatpush.msrb.mxu3 %v12403_v54  ;;  %4761 = vmatpush.msrb.mxu1 %v13486_v29 }
 0xc77   :  { %8362 = vmatmul.msk.f32.gmra.mxu0 %vm16406_vm10, %v13480_v45  ;;  %vm16425_vm10 = vmmov %vm16384_vm0 }
 0xc78   :  { %5600 = vmatpush.msrb.mxu3 %v12408_v58  ;;  %4762 = vmatpush.msrb.mxu1 %v13504_v26 }
 0xc79   :  { %8381 = vmatmul.msk.f32.gmra.mxu2 %vm16407_vm15, %v13232_v9  ;;  %v8393_v9 = vld [vmem:[%s15865_s16 + $0x158] sm:$0xff]  ;;  %vm16427_vm15 = vmmov %vm16363_vm2 }
 0xc7a   :  { %5601 = vmatpush.msrb.mxu3 %v12413_v7  ;;  %4763 = vmatpush.msrb.mxu1 %v13517_v8 }
 0xc7b   :  { %v13690_v45 = vpop.f32.mrf.mxu2 }
 0xc7c   :  { %5602 = vmatpush.msrb.mxu3 %v12423_v1  ;;  %4764 = vmatpush.msrb.mxu1 %v13529_v32 }
 0xc7d   :  { %4618 = vmatmul.f32.gmra.mxu1 %v16409_v34 }
 0xc7e   :  { %5603 = vmatpush.msrb.mxu3 %v12429_v13  ;;  %4765 = vmatpush.msrb.mxu1 %v13547_v39 }
 0xc7f   :  { %8363 = vmatmul.msk.f32.gmra.mxu0 %vm16408_vm7, %v13532_v31  ;;  %v8392_v31 = vld [vmem:[%s15865_s16 + $0x150] sm:$0xff]  ;;  %vm16428_vm7 = vmmov %vm16384_vm0 }
 0xc80   :  { %5604 = vmatpush.msrb.mxu3 %v12434_v36  ;;  %4766 = vmatpush.msrb.mxu1 %v13559_v24 }
 0xc82   :  { %5605 = vmatpush.msrb.mxu3 %v12439_v16  ;;  %4767 = vmatpush.msrb.mxu1 %v13573_v15 }
 0xc84   :  { %5606 = vmatpush.msrb.mxu3 %v12446_v23  ;;  %v13721_v18 = vpop.f32.mrf.mxu0  ;;  %4768 = vmatpush.msrb.mxu1 %v13585_v47 }
 0xc85   :  { %v3453_v34 = vadd.f32 %v13721_v18, %v13591_v14  ;;  %v8412_v14 = vld [vmem:[%s15865_s16 + $0x180] sm:$0xff] }
 0xc86   :  { %5752 = vmatpush.msra.mxu3 %v12353_v46  ;;  %v8395_v46 = vld [vmem:[%s15865_s16 + $0x168] sm:$0xff]  ;;  %4769 = vmatpush.msrb.mxu1 %v13609_v38 }
 0xc87   :  { %4246 = vmatpush.msrb.mxu0 %v8395_v46  ;;  %v8390_v46 = vld [vmem:[%s15865_s16 + $0x140] sm:$0xff] }
 0xc88   :  { %5753 = vmatpush.msra.mxu3 %v12356_v27  ;;  %v13692_v27 = vpop.f32.mrf.mxu1  ;;  %8382 = vmatmul.msk.f32.vlgmr.msra.gmra.mxu0 %vm16411_vm6, %v13596_v48  ;;  %vm16430_vm6 = vmmov %vm16384_vm0 }
 0xc89   :  { %4247 = vmatpush.msrb.mxu0 %v8394_v63  ;;  %4770 = vmatpush.msrb.mxu1 %v13620_v25 }
 0xc8a   :  { %5754 = vmatpush.msra.mxu3 %v12361_v33  ;;  %v8399_v33 = vld [vmem:[%s15866_s17 + $0x58] sm:$0xff] }
 0xc8b   :  { %4209 = vmatpush.msrb.mxu2 %v8399_v33  ;;  %4248 = vmatpush.msrb.mxu0 %v8393_v9  ;;  %v8416_v33 = vld [vmem:[%s15865_s16 + $0x1a0] sm:$0xff]  ;;  %v8415_v9 = vld [vmem:[%s15865_s16 + $0x198] sm:$0xff] }
 0xc8c   :  { %5755 = vmatpush.msra.mxu3 %v12372_v53  ;;  %v8398_v53 = vld [vmem:[%s15866_s17 + $0x50] sm:$0xff]  ;;  %4771 = vmatpush.msrb.mxu1 %v13627_v12 }
 0xc8d   :  { %4210 = vmatpush.msrb.mxu2 %v8398_v53  ;;  %4249 = vmatpush.msrb.mxu0 %v8392_v31  ;;  %v8420_v53 = vld [vmem:[%s15866_s17 + $0x60] sm:$0xff] }
 0xc8e   :  { %5756 = vmatpush.msra.mxu3 %v12377_v22  ;;  %v8391_v22 = vld [vmem:[%s15865_s16 + $0x148] sm:$0xff]  ;;  %8400 = vmatmul.msk.f32.vlgmr.msrb.gmra.mxu2 %vm16410_vm12, %v13273_v21  ;;  %v13742_v21 = vpop.f32.mrf.mxu0  ;;  %vm16429_vm12 = vmmov %vm16363_vm2 }
 0xc8f   :  { %4250 = vmatpush.msrb.mxu0 %v8391_v22  ;;  %4772 = vmatpush.msrb.mxu1 %v13634_v60  ;;  %v3456_v18 = vadd.f32 %v13742_v21, %v13639_v59 }
 0xc90   :  { %5757 = vmatpush.msra.mxu3 %v12382_v10  ;;  %v13725_v10 = vpop.f32.mrf.mxu2  ;;  %8383 = vmatmul.msk.f32.gmra.mxu0 %vm16414_vm1, %v13641_v50  ;;  %vm16432_vm1 = vmmov %vm16384_vm0 }
 0xc91   :  { %4251 = vmatpush.msrb.mxu0 %v8390_v46  ;;  %4918 = vmatpush.msra.mxu1 %v13440_v3 }
 0xc92   :  { %5758 = vmatpush.msra.mxu3 %v12387_v56  ;;  %v13732_v56 = vpop.f32.mrf.mxu1 }
 0xc93   :  { %4919 = vmatpush.msra.mxu1 %v13454_v17 }
 0xc94   :  { %5759 = vmatpush.msra.mxu3 %v12398_v0  ;;  %v16412_v0 = vld [vmem:[#allocation66_spill] sm:$0xff] }
 0xc95   :  { %4621 = vmatmul.f32.gmra.mxu1 %v16412_v0 }
 0xc96   :  { %5760 = vmatpush.msra.mxu3 %v12403_v54  ;;  %8401 = vmatmul.msk.f32.gmra.mxu2 %vm16413_vm9, %v13313_v49  ;;  %v8417_v49 = vld [vmem:[%s15865_s16 + $0x1a8] sm:$0xff]  ;;  %vm16431_vm9 = vmmov %vm16363_vm2 }
 0xc97   :  { %4920 = vmatpush.msra.mxu1 %v13466_v44 }
 0xc98   :  { %5761 = vmatpush.msra.mxu3 %v12408_v58  ;;  %v13746_v48 = vpop.f32.mrf.mxu2  ;;  %v16415_v58 = vld [vmem:[#allocation16_spill] sm:$0xff]  ;;  %8384 = vmatmul.msk.f32.gmra.mxu0 %vm16417_vm8, %v13666_v41  ;;  %vm16434_vm8 = vmmov %vm16384_vm0 }
 0xc99   :  { %4921 = vmatpush.msra.mxu1 %v13473_v55  ;;  %v8421_v41 = vld [vmem:[%s15866_s17 + $0x68] sm:$0xff] }
 0xc9a   :  { %5762 = vmatpush.msra.mxu3 %v12413_v7  ;;  %v13751_v54 = vpop.f32.mrf.mxu1  ;;  %v13761_v7 = vpop.f32.mrf.mxu0  ;;  %4370 = vmatpush.msra.mxu2 %v8421_v41  ;;  %v8443_v41 = vld [vmem:[%s15866_s17 + $0x78] sm:$0xff] }
 0xc9b   :  { %4922 = vmatpush.msra.mxu1 %v13486_v29 }
 0xc9c   :  { %5763 = vmatpush.msra.mxu3 %v12423_v1  ;;  %4371 = vmatpush.msra.mxu2 %v8420_v53 }
 0xc9d   :  { %4773 = vmatmul.f32.vlgmr.msrb.gmra.mxu1 %v16415_v58 }
 0xc9e   :  { %5764 = vmatpush.msra.mxu3 %v12429_v13  ;;  %8402 = vmatmul.msk.f32.gmra.mxu2 %vm16416_vm3, %v13338_v2  ;;  %vm16433_vm3 = vmmov %vm16363_vm2 }
 0xc9f   :  { %4923 = vmatpush.msra.mxu1 %v13504_v26  ;;  %4531 = vmatpush.msrb.mxu2 %v8443_v41 }
 0xca0   :  { %5765 = vmatpush.msra.mxu3 %v12434_v36  ;;  %v13765_v1 = vpop.f32.mrf.mxu2  ;;  %v8419_v36 = vld [vmem:[%s15865_s16 + $0x1b8] sm:$0xff]  ;;  %8385 = vmatmul.msk.f32.gmra.mxu0 %vm16420_vm4, %v13692_v27  ;;  %vm16436_vm4 = vmmov %vm16384_vm0 }
 0xca1   :  { %4405 = vmatpush.msra.mxu0 %v8419_v36  ;;  %4924 = vmatpush.msra.mxu1 %v13517_v8  ;;  %v16424_v36 = vld [vmem:[#allocation46_spill] sm:$0xff] }
 0xca2   :  { %5766 = vmatpush.msra.mxu3 %v12439_v16  ;;  %v13770_v13 = vpop.f32.mrf.mxu1  ;;  %v8418_v16 = vld [vmem:[%s15865_s16 + $0x1b0] sm:$0xff]  ;;  %v13786_v2 = vpop.f32.mrf.mxu0 }
 0xca3   :  { %4406 = vmatpush.msra.mxu0 %v8418_v16  ;;  %4925 = vmatpush.msra.mxu1 %v13529_v32 }
 0xca4   :  { %5767 = vmatpush.msra.mxu3 %v12446_v23  ;;  %v16418_v23 = vld [vmem:[#allocation63_spill] sm:$0xff] }
 0xca5   :  { %4776 = vmatmul.f32.gmra.mxu1 %v16418_v23  ;;  %4407 = vmatpush.msra.mxu0 %v8417_v49  ;;  %v3462_v23 = vadd.f32 %v13786_v2, %v13690_v45  ;;  %v8442_v2 = vld [vmem:[%s15866_s17 + $0x70] sm:$0xff] }
 0xca6   :  { %8403 = vmatmul.msk.f32.gmra.mxu2 %vm16419_vm5, %v13373_v5  ;;  %v8414_v5 = vld [vmem:[%s15865_s16 + $0x190] sm:$0xff]  ;;  %4926 = vmatpush.msra.mxu1 %v13547_v39  ;;  %vm16435_vm5 = vmmov %vm16363_vm2 }
 0xca7   :  { %4408 = vmatpush.msra.mxu0 %v8416_v33  ;;  %v8438_v33 = vld [vmem:[%s15865_s16 + $0x1e0] sm:$0xff]  ;;  %4532 = vmatpush.msrb.mxu2 %v8442_v2 }
 0xca8   :  { %v13789_v50 = vpop.f32.mrf.mxu2  ;;  %4927 = vmatpush.msra.mxu1 %v13559_v24  ;;  %8404 = vmatmul.msk.f32.vlgmr.msrb.gmra.mxu0 %vm16384_vm0, %v13732_v56 }
 0xca9   :  { %4409 = vmatpush.msra.mxu0 %v8415_v9 }
 0xcaa   :  { %v13800_v63 = vpop.f32.mrf.mxu1  ;;  %v3609_v27 = vpop.f32.mrf.mxu0  ;;  %4928 = vmatpush.msra.mxu1 %v13573_v15 }
 0xcab   :  { %4410 = vmatpush.msra.mxu0 %v8414_v5  ;;  %v3610_v31 = vadd.f32 %v3609_v27, %v13725_v10  ;;  %v8435_v27 = vld [vmem:[%s15865_s16 + $0x1c8] sm:$0xff] }
 0xcac   :  { %4929 = vmatpush.msra.mxu1 %v13585_v47 }
 0xcad   :  { %4779 = vmatmul.f32.gmra.mxu1 %v13149_v35  ;;  %v8413_v35 = vld [vmem:[%s15865_s16 + $0x188] sm:$0xff]  ;;  %v13830_v0 = vadd.f32 %v3610_v31, %v3453_v34 }
 0xcae   :  { %8422 = vmatmul.msk.f32.vlgmr.msra.gmra.mxu2 %vm16421_vm14, %v13424_v42  ;;  %4411 = vmatpush.msra.mxu0 %v8413_v35  ;;  %v8434_v35 = vld [vmem:[%s15865_s16 + $0x1c0] sm:$0xff]  ;;  %vm16437_vm14 = vmmov %vm16363_vm2 }
 0xcaf   :  { %4930 = vmatpush.msra.mxu1 %v13609_v38 }
 0xcb0   :  { %v13826_v22 = vpop.f32.mrf.mxu2  ;;  %4412 = vmatpush.msra.mxu0 %v8412_v14 }
 0xcb1   :  { %4931 = vmatpush.msra.mxu1 %v13620_v25  ;;  %8405 = vmatmul.msk.f32.gmra.mxu0 %vm16423_vm13, %v13751_v54  ;;  %vm16439_vm13 = vmmov %vm16384_vm0 }
 0xcb2   :  { %v13828_v46 = vpop.f32.mrf.mxu1  ;;  %v3612_v42 = vpop.f32.mrf.mxu0 }
 0xcb3   :  { %v3613_v10 = vadd.f32 %v3612_v42, %v13746_v48  ;;  %4932 = vmatpush.msra.mxu1 %v13627_v12 }
 0xcb5   :  { %4782 = vmatmul.f32.gmra.mxu1 %v13186_v6  ;;  %v13851_v6 = vadd.f32 %v3613_v10, %v3456_v18 }
 0xcb6   :  { %8423 = vmatmul.msk.f32.gmra.mxu2 %vm16422_vm11, %v13461_v51  ;;  %4933 = vmatpush.msra.mxu1 %v13634_v60  ;;  %v3459_v51 = vadd.f32 %v13761_v7, %v13664_v30  ;;  %v8441_v30 = vld [vmem:[%s15865_s16 + $0x1f8] sm:$0xff]  ;;  %v8440_v7 = vld [vmem:[%s15865_s16 + $0x1f0] sm:$0xff]  ;;  %vm16438_vm11 = vmmov %vm16363_vm2 }
 0xcb7   :  { %4566 = vmatpush.msrb.mxu0 %v8441_v30 }
 0xcb8   :  { %v13847_v56 = vpop.f32.mrf.mxu2  ;;  %5079 = vmatpush.msrb.mxu1 %v13440_v3 }
 0xcb9   :  { %8406 = vmatmul.msk.f32.gmra.mxu0 %vm16425_vm10, %v13770_v13  ;;  %vm16440_vm10 = vmmov %vm16384_vm0 }
 0xcba   :  { %v13849_v58 = vpop.f32.mrf.mxu1  ;;  %v3615_v59 = vpop.f32.mrf.mxu0  ;;  %5080 = vmatpush.msrb.mxu1 %v13454_v17  ;;  %4567 = vmatpush.msrb.mxu0 %v8440_v7 }
 0xcbb   :  { %v3616_v21 = vadd.f32 %v3615_v59, %v13765_v1  ;;  %v8439_v1 = vld [vmem:[%s15865_s16 + $0x1e8] sm:$0xff] }
 0xcbc   :  { %5081 = vmatpush.msrb.mxu1 %v13466_v44  ;;  %4568 = vmatpush.msrb.mxu0 %v8439_v1  ;;  %v8459_v1 = vld [vmem:[%s15865_s16 + $0x218] sm:$0xff] }
 0xcbd   :  { %4934 = vmatmul.f32.vlgmr.msra.gmra.mxu1 %v16424_v36  ;;  %v13869_v16 = vadd.f32 %v3616_v21, %v3459_v51  ;;  %v8462_v36 = vld [vmem:[%s15865_s16 + $0x230] sm:$0xff]  ;;  %v8461_v51 = vld [vmem:[%s15865_s16 + $0x228] sm:$0xff] }
 0xcbe   :  { %8424 = vmatmul.msk.f32.gmra.mxu2 %vm16363_vm2, %v13512_v28  ;;  %5082 = vmatpush.msrb.mxu1 %v13473_v55  ;;  %v16426_v28 = vld [vmem:[#allocation17_spill] sm:$0xff] }
 0xcbf   :  { %4569 = vmatpush.msrb.mxu0 %v8438_v33  ;;  %v8457_v33 = vld [vmem:[%s15865_s16 + $0x208] sm:$0xff] }
 0xcc0   :  { %v13865_v48 = vpop.f32.mrf.mxu2  ;;  %5083 = vmatpush.msrb.mxu1 %v13486_v29 }
 0xcc1   :  { %8407 = vmatmul.msk.f32.gmra.mxu0 %vm16428_vm7, %v13800_v63  ;;  %vm16442_vm7 = vmmov %vm16384_vm0 }
 0xcc2   :  { %v13867_v54 = vpop.f32.mrf.mxu1  ;;  %v3618_v13 = vpop.f32.mrf.mxu0  ;;  %5084 = vmatpush.msrb.mxu1 %v13504_v26 }
 0xcc3   :  { %v3619_v49 = vadd.f32 %v3618_v13, %v13789_v50  ;;  %v8437_v50 = vld [vmem:[%s15865_s16 + $0x1d8] sm:$0xff]  ;;  %v8458_v13 = vld [vmem:[%s15865_s16 + $0x210] sm:$0xff] }
 0xcc4   :  { %5085 = vmatpush.msrb.mxu1 %v13517_v8  ;;  %4570 = vmatpush.msrb.mxu0 %v8437_v50 }
 0xcc5   :  { %4937 = vmatmul.f32.gmra.mxu1 %v16426_v28  ;;  %v13900_v9 = vadd.f32 %v3619_v49, %v3462_v23  ;;  %v8464_v28 = vld [vmem:[%s15866_s17 + $0x80] sm:$0xff] }
 0xcc6   :  { %8425 = vmatmul.msk.f32.gmra.mxu2 %vm16427_vm15, %v13580_v37  ;;  %5086 = vmatpush.msrb.mxu1 %v13529_v32  ;;  %v8436_v37 = vld [vmem:[%s15865_s16 + $0x1d0] sm:$0xff]  ;;  %vm16441_vm15 = vmmov %vm16363_vm2 }
 0xcc7   :  { %4571 = vmatpush.msrb.mxu0 %v8436_v37 }
 0xcc8   :  { %v13898_v53 = vpop.f32.mrf.mxu2  ;;  %5087 = vmatpush.msrb.mxu1 %v13547_v39 }
 0xcc9   :  { %8426 = vmatmul.msk.f32.vlgmr.msra.gmra.mxu0 %vm16430_vm6, %v13828_v46  ;;  %vm16444_vm6 = vmmov %vm16384_vm0 }
 0xcca   :  { %v13904_v45 = vpop.f32.mrf.mxu1  ;;  %v3770_v63 = vpop.f32.mrf.mxu0  ;;  %5088 = vmatpush.msrb.mxu1 %v13559_v24  ;;  %4572 = vmatpush.msrb.mxu0 %v8435_v27 }
 0xccb   :  { %v3771_v5 = vadd.f32 %v3770_v63, %v13826_v22  ;;  %v4484_v22 = vpop.f32.mrf.mxu3 }
 0xccc   :  { %5089 = vmatpush.msrb.mxu1 %v13573_v15  ;;  %4573 = vmatpush.msrb.mxu0 %v8434_v35  ;;  %v8485_v35 = vld [vmem:[%s15865_s16 + $0x278] sm:$0xff] }
 0xccd   :  { %4940 = vmatmul.f32.gmra.mxu1 %v13264_v62  ;;  %v13929_v34 = vadd.f32 %v3771_v5, %v13830_v0 }
 0xcce   :  { %8444 = vmatmul.msk.f32.vlgmr.msrb.gmra.mxu2 %vm16429_vm12, %v13652_v57  ;;  %5090 = vmatpush.msrb.mxu1 %v13585_v47  ;;  %vm16443_vm12 = vmmov %vm16363_vm2 }
 0xcd0   :  { %v13926_v62 = vpop.f32.mrf.mxu2  ;;  %5091 = vmatpush.msrb.mxu1 %v13609_v38 }
 0xcd1   :  { %8427 = vmatmul.msk.f32.gmra.mxu0 %vm16432_vm1, %v13849_v58  ;;  %vm16447_vm1 = vmmov %vm16384_vm0 }
 0xcd2   :  { %v13933_v31 = vpop.f32.mrf.mxu1  ;;  %v3773_v57 = vpop.f32.mrf.mxu0  ;;  %5092 = vmatpush.msrb.mxu1 %v13620_v25 }
 0xcd3   :  { %v3774_v46 = vadd.f32 %v3773_v57, %v13847_v56 }
 0xcd4   :  { %5093 = vmatpush.msrb.mxu1 %v13627_v12 }
 0xcd5   :  { %4943 = vmatmul.f32.gmra.mxu1 %v13300_v20  ;;  %v13948_v14 = vadd.f32 %v3774_v46, %v13851_v6  ;;  %v4487_v20 = vpop.f32.mrf.mxu3  ;;  %v8463_v6 = vld [vmem:[%s15865_s16 + $0x238] sm:$0xff]  ;;  %v8483_v46 = vld [vmem:[%s15865_s16 + $0x268] sm:$0xff] }
 0xcd6   :  { %8445 = vmatmul.msk.f32.gmra.mxu2 %vm16431_vm9, %v4484_v22  ;;  %5094 = vmatpush.msrb.mxu1 %v13634_v60  ;;  %v8484_v22 = vld [vmem:[%s15865_s16 + $0x270] sm:$0xff]  ;;  %vm16446_vm9 = vmmov %vm16363_vm2 }
 0xcd7   :  { %4727 = vmatpush.msra.mxu0 %v8463_v6  ;;  %v8480_v6 = vld [vmem:[%s15865_s16 + $0x250] sm:$0xff] }
 0xcd8   :  { %v13945_v0 = vpop.f32.mrf.mxu2  ;;  %5240 = vmatpush.msra.mxu1 %v13440_v3 }
 0xcd9   :  { %8428 = vmatmul.msk.f32.gmra.mxu0 %vm16434_vm8, %v13867_v54  ;;  %v8465_v54 = vld [vmem:[%s15866_s17 + $0x88] sm:$0xff]  ;;  %vm16450_vm8 = vmmov %vm16384_vm0 }
 0xcda   :  { %v13954_v42 = vpop.f32.mrf.mxu1  ;;  %v3776_v18 = vpop.f32.mrf.mxu0  ;;  %5241 = vmatpush.msra.mxu1 %v13454_v17  ;;  %4728 = vmatpush.msra.mxu0 %v8462_v36 }
 0xcdb   :  { %v3777_v10 = vadd.f32 %v3776_v18, %v13865_v48  ;;  %4692 = vmatpush.msra.mxu2 %v8465_v54  ;;  %v8478_v54 = vld [vmem:[%s15865_s16 + $0x240] sm:$0xff] }
 0xcdc   :  { %5242 = vmatpush.msra.mxu1 %v13466_v44  ;;  %4729 = vmatpush.msra.mxu0 %v8461_v51 }
 0xcdd   :  { %5095 = vmatmul.f32.vlgmr.msrb.gmra.mxu1 %v13324_v4  ;;  %v13964_v58 = vadd.f32 %v3777_v10, %v13869_v16  ;;  %v4490_v4 = vpop.f32.mrf.mxu3  ;;  %4693 = vmatpush.msra.mxu2 %v8464_v28  ;;  %v8564_v28 = vld [vmem:[%s15862_s8 + $0x1b0] sm:$0xff] }
 0xcde   :  { %8446 = vmatmul.msk.f32.gmra.mxu2 %vm16433_vm3, %v4487_v20  ;;  %5243 = vmatpush.msra.mxu1 %v13473_v55  ;;  %vm16449_vm3 = vmmov %vm16363_vm2 }
 0xce0   :  { %v13961_v56 = vpop.f32.mrf.mxu2  ;;  %5244 = vmatpush.msra.mxu1 %v13486_v29 }
 0xce1   :  { %8429 = vmatmul.msk.f32.gmra.mxu0 %vm16436_vm4, %v13904_v45  ;;  %vm16452_vm4 = vmmov %vm16384_vm0 }
 0xce2   :  { %v13977_v59 = vpop.f32.mrf.mxu1  ;;  %v3779_v21 = vpop.f32.mrf.mxu0  ;;  %5245 = vmatpush.msra.mxu1 %v13504_v26 }
 0xce3   :  { %v3780_v48 = vadd.f32 %v3779_v21, %v13898_v53  ;;  %v8456_v53 = vld [vmem:[%s15865_s16 + $0x200] sm:$0xff] }
 0xce4   :  { %5246 = vmatpush.msra.mxu1 %v13517_v8 }
 0xce5   :  { %5098 = vmatmul.f32.gmra.mxu1 %v13347_v40  ;;  %v8460_v40 = vld [vmem:[%s15865_s16 + $0x220] sm:$0xff]  ;;  %v13995_v30 = vadd.f32 %v3780_v48, %v13900_v9  ;;  %v4642_v7 = vpop.f32.mrf.mxu3 }
 0xce6   :  { %8447 = vmatmul.msk.f32.gmra.mxu2 %vm16435_vm5, %v4490_v4  ;;  %5247 = vmatpush.msra.mxu1 %v13529_v32  ;;  %vm16451_vm5 = vmmov %vm16363_vm2 }
 0xce7   :  { %4730 = vmatpush.msra.mxu0 %v8460_v40 }
 0xce8   :  { %v13992_v16 = vpop.f32.mrf.mxu2  ;;  %5248 = vmatpush.msra.mxu1 %v13547_v39 }
 0xce9   :  { %4731 = vmatpush.msra.mxu0 %v8459_v1 }
 0xcea   :  { %v4461_v23 = vpop.f32.mrf.mxu1  ;;  %v3931_v49 = vpop.f32.mrf.mxu0  ;;  %5249 = vmatpush.msra.mxu1 %v13559_v24  ;;  %8448 = vmatmul.msk.f32.vlgmr.msrb.gmra.mxu0 %vm16384_vm0, %v13933_v31 }
 0xceb   :  { %4732 = vmatpush.msra.mxu0 %v8458_v13  ;;  %v3932_v41 = vadd.f32 %v3931_v49, %v13926_v62 }
 0xcec   :  { %5250 = vmatpush.msra.mxu1 %v13573_v15 }
 0xced   :  { %5101 = vmatmul.f32.gmra.mxu1 %v13388_v19  ;;  %v14019_v19 = vadd.f32 %v3932_v41, %v13929_v34  ;;  %v4645_v9 = vpop.f32.mrf.mxu3  ;;  %4733 = vmatpush.msra.mxu0 %v8457_v33  ;;  %v16448_v41 = vld [vmem:[#allocation70_spill] sm:$0xff] }
 0xcee   :  { %8466 = vmatmul.msk.f32.vlgmr.msra.gmra.mxu2 %vm16437_vm14, %v4642_v7  ;;  %5251 = vmatpush.msra.mxu1 %v13585_v47  ;;  %vm16453_vm14 = vmmov %vm16363_vm2 }
 0xcef   :  { %4734 = vmatpush.msra.mxu0 %v8456_v53  ;;  %v8565_v53 = vld [vmem:[%s15862_s8 + $0x1b8] sm:$0xff] }
 0xcf0   :  { %v14027_v45 = vpop.f32.mrf.mxu2  ;;  %5252 = vmatpush.msra.mxu1 %v13609_v38 }
 0xcf1   :  { %4888 = vmatpush.msrb.mxu0 %v8485_v35 }
 0xcf2   :  { %v14031_v2 = vpop.f32.mrf.mxu1  ;;  %v3934_v50 = vpop.f32.mrf.mxu0  ;;  %5253 = vmatpush.msra.mxu1 %v13620_v25  ;;  %8449 = vmatmul.msk.f32.gmra.mxu0 %vm16439_vm13, %v13954_v42  ;;  %v8487_v42 = vld [vmem:[%s15866_s17 + $0x98] sm:$0xff]  ;;  %vm16455_vm13 = vmmov %vm16384_vm0 }
 0xcf3   :  { %v3935_v37 = vadd.f32 %v3934_v50, %v13945_v0  ;;  %4889 = vmatpush.msrb.mxu0 %v8484_v22  ;;  %4853 = vmatpush.msrb.mxu2 %v8487_v42  ;;  %v8506_v50 = vld [vmem:[%s15865_s16 + $0x2b0] sm:$0xff] }
 0xcf4   :  { %5254 = vmatpush.msra.mxu1 %v13627_v12 }
 0xcf5   :  { %5104 = vmatmul.f32.gmra.mxu1 %v13419_v61  ;;  %v14038_v63 = vadd.f32 %v3935_v37, %v13948_v14  ;;  %v4648_v61 = vpop.f32.mrf.mxu3  ;;  %4890 = vmatpush.msrb.mxu0 %v8483_v46  ;;  %v8505_v37 = vld [vmem:[%s15865_s16 + $0x2a8] sm:$0xff] }
 0xcf6   :  { %8467 = vmatmul.msk.f32.gmra.mxu2 %vm16438_vm11, %v4645_v9  ;;  %5255 = vmatpush.msra.mxu1 %v13634_v60  ;;  %vm16454_vm11 = vmmov %vm16363_vm2 }
 0xcf8   :  { %v14043_v5 = vpop.f32.mrf.mxu2  ;;  %5401 = vmatpush.msrb.mxu1 %v13440_v3 }
 0xcfa   :  { %v14047_v27 = vpop.f32.mrf.mxu1  ;;  %v3937_v62 = vpop.f32.mrf.mxu0  ;;  %5402 = vmatpush.msrb.mxu1 %v13454_v17  ;;  %8450 = vmatmul.msk.f32.gmra.mxu0 %vm16440_vm10, %v13977_v59  ;;  %v8563_v59 = vld [vmem:[%s15862_s8 + $0x1a8] sm:$0xff]  ;;  %vm16456_vm10 = vmmov %vm16384_vm0 }
 0xcfb   :  { %v3938_v34 = vadd.f32 %v3937_v62, %v13961_v56  ;;  %v8486_v56 = vld [vmem:[%s15866_s17 + $0x90] sm:$0xff]  ;;  %5449 = vmatmul.f32.gmra.mxu3 %v8563_v59 }
 0xcfc   :  { %5403 = vmatpush.msrb.mxu1 %v13466_v44  ;;  %4854 = vmatpush.msrb.mxu2 %v8486_v56  ;;  %v14253_v56 = vld [vmem:[%s15862_s8 + $0x1d8] sm:$0xff] }
 0xcfd   :  { %5256 = vmatmul.f32.vlgmr.msra.gmra.mxu1 %v13449_v11  ;;  %v14054_v31 = vadd.f32 %v3938_v34, %v13964_v58  ;;  %v4651_v11 = vpop.f32.mrf.mxu3  ;;  %v8481_v58 = vld [vmem:[%s15865_s16 + $0x258] sm:$0xff]  ;;  %v8508_v34 = vld [vmem:[%s15866_s17 + $0xa0] sm:$0xff] }
 0xcfe   :  { %8468 = vmatmul.msk.f32.gmra.mxu2 %vm16363_vm2, %v4648_v61  ;;  %5404 = vmatpush.msrb.mxu1 %v13473_v55  ;;  %v8584_v61 = vld [vmem:[%s15862_s8 + $0x1c0] sm:$0xff] }
 0xd00   :  { %v14065_v57 = vpop.f32.mrf.mxu2  ;;  %5405 = vmatpush.msrb.mxu1 %v13486_v29 }
 0xd02   :  { %v3940_v0 = vpop.f32.mrf.mxu0  ;;  %5406 = vmatpush.msrb.mxu1 %v13504_v26  ;;  %v14074_v20 = vpop.f32.mrf.mxu1  ;;  %8451 = vmatmul.msk.f32.gmra.mxu0 %vm16442_vm7, %v4461_v23  ;;  %vm16458_vm7 = vmmov %vm16384_vm0 }
 0xd03   :  { %v3941_v14 = vadd.f32 %v3940_v0, %v13992_v16  ;;  %v16445_v16 = vld [vmem:[#allocation65_spill] sm:$0xff]  ;;  %5452 = vmatmul.f32.gmra.mxu3 %v8564_v28 }
 0xd04   :  { %5407 = vmatpush.msrb.mxu1 %v13517_v8 }
 0xd05   :  { %5259 = vmatmul.f32.gmra.mxu1 %v13492_v52  ;;  %v8482_v52 = vld [vmem:[%s15865_s16 + $0x260] sm:$0xff]  ;;  %v14085_v18 = vadd.f32 %v3941_v14, %v13995_v30  ;;  %v4803_v10 = vpop.f32.mrf.mxu3 }
 0xd06   :  { %8469 = vmatmul.msk.f32.gmra.mxu2 %vm16441_vm15, %v4651_v11  ;;  %5408 = vmatpush.msrb.mxu1 %v13529_v32  ;;  %v8502_v11 = vld [vmem:[%s15865_s16 + $0x290] sm:$0xff]  ;;  %vm16457_vm15 = vmmov %vm16363_vm2 }
 0xd07   :  { %4891 = vmatpush.msrb.mxu0 %v8482_v52 }
 0xd08   :  { %v14095_v4 = vpop.f32.mrf.mxu2  ;;  %5409 = vmatpush.msrb.mxu1 %v13547_v39 }
 0xd09   :  { %4892 = vmatpush.msrb.mxu0 %v8481_v58 }
 0xd0a   :  { %v4092_v36 = vpop.f32.mrf.mxu0  ;;  %5410 = vmatpush.msrb.mxu1 %v13559_v24  ;;  %8470 = vmatmul.msk.f32.vlgmr.msra.gmra.mxu0 %vm16444_vm6, %v14031_v2  ;;  %vm16460_vm6 = vmmov %vm16384_vm0 }
 0xd0b   :  { %4893 = vmatpush.msrb.mxu0 %v8480_v6  ;;  %v4093_v51 = vadd.f32 %v4092_v36, %v14027_v45  ;;  %5455 = vmatmul.f32.gmra.mxu3 %v8565_v53 }
 0xd0c   :  { %5411 = vmatpush.msrb.mxu1 %v13573_v15 }
 0xd0d   :  { %5262 = vmatmul.f32.gmra.mxu1 %v13542_v43  ;;  %v8479_v43 = vld [vmem:[%s15865_s16 + $0x248] sm:$0xff]  ;;  %v14113_v48 = vadd.f32 %v4093_v51, %v14019_v19  ;;  %v4806_v40 = vpop.f32.mrf.mxu3  ;;  %v8528_v51 = vld [vmem:[%s15865_s16 + $0x2f0] sm:$0xff] }
 0xd0e   :  { %8488 = vmatmul.msk.f32.vlgmr.msrb.gmra.mxu2 %vm16443_vm12, %v4803_v10  ;;  %5412 = vmatpush.msrb.mxu1 %v13585_v47  ;;  %v9174_v10 = vld [vmem:[%s15989_s11 + $0x70] sm:$0xff]  ;;  %vm16459_vm12 = vmmov %vm16363_vm2 }
 0xd0f   :  { %4894 = vmatpush.msrb.mxu0 %v8479_v43  ;;  %v9176_v43 = vld [vmem:[%s15989_s11 + $0x60] sm:$0xff] }
 0xd10   :  { %5413 = vmatpush.msrb.mxu1 %v13609_v38 }
 0xd11   :  { %v14122_v30 = vpop.f32.mrf.mxu2  ;;  %4895 = vmatpush.msrb.mxu0 %v8478_v54  ;;  %v8527_v54 = vld [vmem:[%s15865_s16 + $0x2e8] sm:$0xff] }
 0xd12   :  { %v4622_v21 = vpop.f32.mrf.mxu1  ;;  %v4095_v7 = vpop.f32.mrf.mxu0  ;;  %5414 = vmatpush.msrb.mxu1 %v13620_v25  ;;  %8471 = vmatmul.msk.f32.gmra.mxu0 %vm16447_vm1, %v14047_v27  ;;  %vm16462_vm1 = vmmov %vm16384_vm0 }
 0xd13   :  { %v4096_v1 = vadd.f32 %v4095_v7, %v14043_v5  ;;  %5607 = vmatmul.f32.vlgmr.msrb.gmra.mxu3 %v8584_v61  ;;  %v8504_v5 = vld [vmem:[%s15865_s16 + $0x2a0] sm:$0xff] }
 0xd14   :  { %5415 = vmatpush.msrb.mxu1 %v13627_v12 }
 0xd15   :  { %5265 = vmatmul.f32.gmra.mxu1 %v16445_v16  ;;  %v14135_v23 = vadd.f32 %v4096_v1, %v14038_v63  ;;  %v4809_v49 = vpop.f32.mrf.mxu3  ;;  %v9178_v16 = vld [vmem:[%s15989_s11 + $0x50] sm:$0xff]  ;;  %v8526_v1 = vld [vmem:[%s15865_s16 + $0x2e0] sm:$0xff] }
 0xd16   :  { %8489 = vmatmul.msk.f32.gmra.mxu2 %vm16446_vm9, %v4806_v40  ;;  %5416 = vmatpush.msrb.mxu1 %v13634_v60  ;;  %vm16461_vm9 = vmmov %vm16363_vm2 }
 0xd18   :  { %5562 = vmatpush.msra.mxu1 %v13440_v3 }
 0xd19   :  { %v14141_v33 = vpop.f32.mrf.mxu2 }
 0xd1a   :  { %v14130_v13 = vpop.f32.mrf.mxu1  ;;  %v4098_v19 = vpop.f32.mrf.mxu0  ;;  %5563 = vmatpush.msra.mxu1 %v13454_v17  ;;  %8472 = vmatmul.msk.f32.gmra.mxu0 %vm16450_vm8, %v14074_v20  ;;  %v8507_v17 = vld [vmem:[%s15865_s16 + $0x2b8] sm:$0xff]  ;;  %v8586_v20 = vld [vmem:[%s15862_s8 + $0x1d0] sm:$0xff]  ;;  %vm16464_vm8 = vmmov %vm16384_vm0 }
 0xd1b   :  { %v4099_v9 = vadd.f32 %v4098_v19, %v14065_v57  ;;  %5049 = vmatpush.msra.mxu0 %v8507_v17  ;;  %v8501_v57 = vld [vmem:[%s15865_s16 + $0x288] sm:$0xff]  ;;  %v8525_v19 = vld [vmem:[%s15865_s16 + $0x2d8] sm:$0xff]  ;;  %v9182_v17 = vld [vmem:[%s15989_s11 + $0x30] sm:$0xff] }
 0xd1c   :  { %5564 = vmatpush.msra.mxu1 %v13466_v44 }
 0xd1d   :  { %5417 = vmatmul.f32.vlgmr.msrb.gmra.mxu1 %v16448_v41  ;;  %v14154_v2 = vadd.f32 %v4099_v9, %v14054_v31  ;;  %v4812_v3 = vpop.f32.mrf.mxu3  ;;  %5050 = vmatpush.msra.mxu0 %v8506_v50  ;;  %v8503_v31 = vld [vmem:[%s15865_s16 + $0x298] sm:$0xff]  ;;  %v8607_v50 = vld [vmem:[%s15862_s8 + $0x1e8] sm:$0xff] }
 0xd1e   :  { %8490 = vmatmul.msk.f32.gmra.mxu2 %vm16449_vm3, %v4809_v49  ;;  %5565 = vmatpush.msra.mxu1 %v13473_v55  ;;  %vm16463_vm3 = vmmov %vm16363_vm2 }
 0xd1f   :  { %5051 = vmatpush.msra.mxu0 %v8505_v37  ;;  %v8523_v37 = vld [vmem:[%s15865_s16 + $0x2c8] sm:$0xff] }
 0xd20   :  { %5566 = vmatpush.msra.mxu1 %v13486_v29  ;;  %v8509_v29 = vld [vmem:[%s15866_s17 + $0xa8] sm:$0xff] }
 0xd21   :  { %v14165_v44 = vpop.f32.mrf.mxu2  ;;  %5014 = vmatpush.msra.mxu2 %v8509_v29  ;;  %5052 = vmatpush.msra.mxu0 %v8504_v5  ;;  %v8522_v29 = vld [vmem:[%s15865_s16 + $0x2c0] sm:$0xff] }
 0xd22   :  { %v14149_v45 = vpop.f32.mrf.mxu1  ;;  %v4101_v63 = vpop.f32.mrf.mxu0  ;;  %5567 = vmatpush.msra.mxu1 %v13504_v26  ;;  %8473 = vmatmul.msk.f32.gmra.mxu0 %vm16452_vm4, %v4622_v21  ;;  %vm16466_vm4 = vmmov %vm16384_vm0 }
 0xd23   :  { %v4102_v55 = vadd.f32 %v4101_v63, %v14095_v4  ;;  %5015 = vmatpush.msra.mxu2 %v8508_v34  ;;  %5053 = vmatpush.msra.mxu0 %v8503_v31  ;;  %v9175_v4 = vld [vmem:[%s15989_s11 + $0x68] sm:$0xff]  ;;  %v9186_v31 = vld [vmem:[%s15989_s11 + $0x10] sm:$0xff] }
 0xd24   :  { %5568 = vmatpush.msra.mxu1 %v13517_v8 }
 0xd25   :  { %5420 = vmatmul.f32.gmra.mxu1 %v8563_v59  ;;  %v14187_v26 = vadd.f32 %v4102_v55, %v14085_v18  ;;  %v4964_v62 = vpop.f32.mrf.mxu3  ;;  %5054 = vmatpush.msra.mxu0 %v8502_v11  ;;  %v9173_v18 = vld [vmem:[%s15989_s11 + $0x78] sm:$0xff] }
 0xd26   :  { %8491 = vmatmul.msk.f32.gmra.mxu2 %vm16451_vm5, %v4812_v3  ;;  %5569 = vmatpush.msra.mxu1 %v13529_v32  ;;  %v8585_v32 = vld [vmem:[%s15862_s8 + $0x1c8] sm:$0xff]  ;;  %v8529_v59 = vld [vmem:[%s15865_s16 + $0x2f8] sm:$0xff]  ;;  %vm16465_vm5 = vmmov %vm16363_vm2 }
 0xd27   :  { %5610 = vmatmul.f32.gmra.mxu3 %v8585_v32  ;;  %5055 = vmatpush.msra.mxu0 %v8501_v57 }
 0xd28   :  { %5570 = vmatpush.msra.mxu1 %v13547_v39 }
 0xd29   :  { %v14197_v8 = vpop.f32.mrf.mxu2 }
 0xd2a   :  { %v14182_v27 = vpop.f32.mrf.mxu1  ;;  %v4253_v35 = vpop.f32.mrf.mxu0  ;;  %5571 = vmatpush.msra.mxu1 %v13559_v24  ;;  %8492 = vmatmul.msk.f32.vlgmr.msrb.gmra.mxu0 %vm16384_vm0, %v14130_v13  ;;  %v8500_v24 = vld [vmem:[%s15865_s16 + $0x280] sm:$0xff] }
 0xd2b   :  { %v4254_v22 = vadd.f32 %v4253_v35, %v14122_v30  ;;  %5056 = vmatpush.msra.mxu0 %v8500_v24  ;;  %v14291_v30 = vld [vmem:[%s15862_s8 + $0x1e0] sm:$0xff] }
 0xd2c   :  { %5572 = vmatpush.msra.mxu1 %v13573_v15 }
 0xd2d   :  { %5423 = vmatmul.f32.gmra.mxu1 %v8564_v28  ;;  %v14216_v39 = vadd.f32 %v4254_v22, %v14113_v48  ;;  %v4967_v0 = vpop.f32.mrf.mxu3  ;;  %5210 = vmatpush.msrb.mxu0 %v8529_v59  ;;  %v9177_v48 = vld [vmem:[%s15989_s11 + $0x58] sm:$0xff]  ;;  %v8546_v59 = vld [vmem:[%s15865_s16 + $0x310] sm:$0xff] }
 0xd2e   :  { %8510 = vmatmul.msk.f32.vlgmr.msra.gmra.mxu2 %vm16453_vm14, %v4964_v62  ;;  %5573 = vmatpush.msra.mxu1 %v13585_v47  ;;  %v8531_v28 = vld [vmem:[%s15866_s17 + $0xb8] sm:$0xff]  ;;  %vm16467_vm14 = vmmov %vm16363_vm2 }
 0xd2f   :  { %5613 = vmatmul.f32.gmra.mxu3 %v8586_v20  ;;  %5211 = vmatpush.msrb.mxu0 %v8528_v51  ;;  %v9185_v62 = vld [vmem:[%s15989_s11 + $0x18] sm:$0xff] }
 0xd30   :  { %5574 = vmatpush.msra.mxu1 %v13609_v38  ;;  %5175 = vmatpush.msrb.mxu2 %v8531_v28 }
 0xd31   :  { %v14224_v14 = vpop.f32.mrf.mxu2  ;;  %5212 = vmatpush.msrb.mxu0 %v8527_v54  ;;  %v8544_v54 = vld [vmem:[%s15865_s16 + $0x300] sm:$0xff] }
 0xd32   :  { %v14211_v46 = vpop.f32.mrf.mxu1  ;;  %v4256_v15 = vpop.f32.mrf.mxu0  ;;  %5575 = vmatpush.msra.mxu1 %v13620_v25  ;;  %8493 = vmatmul.msk.f32.gmra.mxu0 %vm16455_vm13, %v14149_v45  ;;  %v8524_v45 = vld [vmem:[%s15865_s16 + $0x2d0] sm:$0xff]  ;;  %vm16469_vm13 = vmmov %vm16384_vm0 }
 0xd33   :  { %v4257_v42 = vadd.f32 %v4256_v15, %v14141_v33  ;;  %v8530_v33 = vld [vmem:[%s15866_s17 + $0xb0] sm:$0xff]  ;;  %5213 = vmatpush.msrb.mxu0 %v8526_v1 }
 0xd34   :  { %5576 = vmatpush.msra.mxu1 %v13627_v12  ;;  %5176 = vmatpush.msrb.mxu2 %v8530_v33 }
 0xd35   :  { %5426 = vmatmul.f32.gmra.mxu1 %v8565_v53  ;;  %v14237_v47 = vadd.f32 %v4257_v42, %v14135_v23  ;;  %v4970_v38 = vpop.f32.mrf.mxu3  ;;  %v9179_v23 = vld [vmem:[%s15989_s11 + $0x48] sm:$0xff]  ;;  %v9180_v53 = vld [vmem:[%s15989_s11 + $0x40] sm:$0xff]  ;;  %5214 = vmatpush.msrb.mxu0 %v8525_v19 }
 0xd36   :  { %8511 = vmatmul.msk.f32.gmra.mxu2 %vm16454_vm11, %v4967_v0  ;;  %5577 = vmatpush.msra.mxu1 %v13634_v60  ;;  %v8609_v0 = vld [vmem:[%s15862_s8 + $0x1f8] sm:$0xff]  ;;  %vm16468_vm11 = vmmov %vm16363_vm2 }
 0xd37   :  { %5616 = vmatmul.f32.gmra.mxu3 %v14253_v56  ;;  %5215 = vmatpush.msrb.mxu0 %v8524_v45 }
 0xd38   :  { %5723 = vmatpush.msrb.mxu1 %v9173_v18 }
 0xd39   :  { %v14242_v25 = vpop.f32.mrf.mxu2  ;;  %5216 = vmatpush.msrb.mxu0 %v8523_v37 }
 0xd3a   :  { %v14232_v52 = vpop.f32.mrf.mxu1  ;;  %v4259_v12 = vpop.f32.mrf.mxu0  ;;  %5724 = vmatpush.msrb.mxu1 %v9174_v10  ;;  %8494 = vmatmul.msk.f32.gmra.mxu0 %vm16456_vm10, %v14182_v27  ;;  %v9184_v27 = vld [vmem:[%s15989_s11 + $0x20] sm:$0xff]  ;;  %v8553_v10 = vld [vmem:[%s15866_s17 + $0xc8] sm:$0xff]  ;;  %vm16470_vm10 = vmmov %vm16384_vm0 }
 0xd3b   :  { %v4260_v60 = vadd.f32 %v4259_v12, %v14165_v44  ;;  %5217 = vmatpush.msrb.mxu0 %v8522_v29  ;;  %5336 = vmatpush.msra.mxu2 %v8553_v10 }
 0xd3c   :  { %5725 = vmatpush.msrb.mxu1 %v9175_v4 }
 0xd3d   :  { %5578 = vmatmul.f32.vlgmr.msra.gmra.mxu1 %v8584_v61  ;;  %v14264_v6 = vadd.f32 %v4260_v60, %v14154_v2  ;;  %v4973_v36 = vpop.f32.mrf.mxu3  ;;  %v9181_v2 = vld [vmem:[%s15989_s11 + $0x38] sm:$0xff]  ;;  %v9183_v61 = vld [vmem:[%s15989_s11 + $0x28] sm:$0xff] }
 0xd3e   :  { %8512 = vmatmul.msk.f32.gmra.mxu2 %vm16363_vm2, %v4970_v38  ;;  %5726 = vmatpush.msrb.mxu1 %v9176_v43  ;;  %v8545_v43 = vld [vmem:[%s15865_s16 + $0x308] sm:$0xff] }
 0xd3f   :  { %5768 = vmatmul.f32.vlgmr.msra.gmra.mxu3 %v14291_v30 }
 0xd40   :  { %5727 = vmatpush.msrb.mxu1 %v9177_v48 }
 0xd41   :  { %v14277_v21 = vpop.f32.mrf.mxu2 }
 0xd42   :  { %v14257_v58 = vpop.f32.mrf.mxu1  ;;  %v4262_v40 = vpop.f32.mrf.mxu0  ;;  %5728 = vmatpush.msrb.mxu1 %v9178_v16  ;;  %8495 = vmatmul.msk.f32.gmra.mxu0 %vm16458_vm7, %v14211_v46  ;;  %v9188_v46 = vld [vmem:[%s15989_s11] sm:$0xff]  ;;  %vm16472_vm7 = vmmov %vm16384_vm0 }
 0xd43   :  { %v4263_v7 = vadd.f32 %v4262_v40, %v14197_v8  ;;  %v8608_v8 = vld [vmem:[%s15862_s8 + $0x1f0] sm:$0xff] }
 0xd44   :  { %5729 = vmatpush.msrb.mxu1 %v9179_v23 }
 0xd45   :  { %5581 = vmatmul.f32.gmra.mxu1 %v8585_v32  ;;  %v14308_v49 = vadd.f32 %v4263_v7, %v14187_v26  ;;  %v5125_v41 = vpop.f32.mrf.mxu3  ;;  %v9187_v32 = vld [vmem:[%s15989_s11 + $0x8] sm:$0xff] }
 0xd46   :  { %8513 = vmatmul.msk.f32.gmra.mxu2 %vm16457_vm15, %v4973_v36  ;;  %5730 = vmatpush.msrb.mxu1 %v9180_v53  ;;  %v8547_v36 = vld [vmem:[%s15865_s16 + $0x318] sm:$0xff]  ;;  %vm16471_vm15 = vmmov %vm16363_vm2 }
 0xd47   :  { %5771 = vmatmul.f32.gmra.mxu3 %v8607_v50 }
 0xd48   :  { %5731 = vmatpush.msrb.mxu1 %v9181_v2  ;;  %v8573_v2 = vld [vmem:[%s15865_s16 + $0x378] sm:$0xff] }
 0xd49   :  { %v14321_v9 = vpop.f32.mrf.mxu2 }
 0xd4a   :  { %v14301_v13 = vpop.f32.mrf.mxu1  ;;  %v4414_v3 = vpop.f32.mrf.mxu0  ;;  %5732 = vmatpush.msrb.mxu1 %v9182_v17  ;;  %8514 = vmatmul.msk.f32.vlgmr.msra.gmra.mxu0 %vm16460_vm6, %v14232_v52  ;;  %v8551_v52 = vld [vmem:[%s15865_s16 + $0x338] sm:$0xff]  ;;  %vm16474_vm6 = vmmov %vm16384_vm0 }
 0xd4b   :  { %v4415_v44 = vadd.f32 %v4414_v3, %v14224_v14  ;;  %5371 = vmatpush.msra.mxu0 %v8551_v52  ;;  %v8572_v3 = vld [vmem:[%s15865_s16 + $0x370] sm:$0xff] }
 0xd4c   :  { %5733 = vmatpush.msrb.mxu1 %v9183_v61  ;;  %v8570_v61 = vld [vmem:[%s15865_s16 + $0x360] sm:$0xff] }
 0xd4d   :  { %5584 = vmatmul.f32.gmra.mxu1 %v8586_v20  ;;  %v14344_v55 = vadd.f32 %v4415_v44, %v14216_v39  ;;  %v5128_v5 = vpop.f32.mrf.mxu3 }
 0xd4e   :  { %8532 = vmatmul.msk.f32.vlgmr.msrb.gmra.mxu2 %vm16459_vm12, %v5125_v41  ;;  %5734 = vmatpush.msrb.mxu1 %v9184_v27  ;;  %v8574_v27 = vld [vmem:[%s15866_s17 + $0xd0] sm:$0xff]  ;;  %vm16473_vm12 = vmmov %vm16363_vm2 }
 0xd4f   :  { %5774 = vmatmul.f32.gmra.mxu3 %v8608_v8 }
 0xd50   :  { %5735 = vmatpush.msrb.mxu1 %v9185_v62  ;;  %v8568_v62 = vld [vmem:[%s15865_s16 + $0x350] sm:$0xff] }
 0xd51   :  { %v4534_v26 = vpop.f32.mrf.mxu2 }
 0xd52   :  { %v4944_v63 = vpop.f32.mrf.mxu1  ;;  %v4417_v34 = vpop.f32.mrf.mxu0  ;;  %5736 = vmatpush.msrb.mxu1 %v9186_v31  ;;  %8515 = vmatmul.msk.f32.gmra.mxu0 %vm16462_vm1, %v14257_v58  ;;  %v8567_v31 = vld [vmem:[%s15865_s16 + $0x348] sm:$0xff]  ;;  %vm16476_vm1 = vmmov %vm16384_vm0 }
 0xd53   :  { %v4418_v11 = vadd.f32 %v4417_v34, %v14242_v25  ;;  %v8549_v25 = vld [vmem:[%s15865_s16 + $0x328] sm:$0xff] }
 0xd54   :  { %5737 = vmatpush.msrb.mxu1 %v9187_v32 }
 0xd55   :  { %5587 = vmatmul.f32.gmra.mxu1 %v14253_v56  ;;  %v4427_v22 = vadd.f32 %v4418_v11, %v14237_v47  ;;  %v5131_v57 = vpop.f32.mrf.mxu3  ;;  %v8550_v47 = vld [vmem:[%s15865_s16 + $0x330] sm:$0xff]  ;;  %v8548_v56 = vld [vmem:[%s15865_s16 + $0x320] sm:$0xff] }
 0xd56   :  { %8533 = vmatmul.msk.f32.gmra.mxu2 %vm16461_vm9, %v5128_v5  ;;  %5738 = vmatpush.msrb.mxu1 %v9188_v46  ;;  %vm16475_vm9 = vmmov %vm16363_vm2 }
 0xd57   :  { %5777 = vmatmul.f32.gmra.mxu3 %v8609_v0  ;;  %5372 = vmatpush.msra.mxu0 %v8550_v47 }
 0xd59   :  { %v4537_v39 = vpop.f32.mrf.mxu2  ;;  %5373 = vmatpush.msra.mxu0 %v8549_v25  ;;  %v8594_v25 = vld [vmem:[%s15865_s16 + $0x3b0] sm:$0xff] }
 0xd5a   :  { %v5096_v35 = vpop.f32.mrf.mxu1  ;;  %v4420_v24 = vpop.f32.mrf.mxu0  ;;  %8516 = vmatmul.msk.f32.gmra.mxu0 %vm16464_vm8, %v14301_v13  ;;  %vm16478_vm8 = vmmov %vm16384_vm0 }
 0xd5b   :  { %v4421_v14 = vadd.f32 %v4420_v24, %v14277_v21  ;;  %5374 = vmatpush.msra.mxu0 %v8548_v56  ;;  %v8593_v56 = vld [vmem:[%s15865_s16 + $0x3a8] sm:$0xff] }
 0xd5d   :  { %5739 = vmatmul.f32.vlgmr.msrb.gmra.mxu1 %v14291_v30  ;;  %v4428_v20 = vadd.f32 %v4421_v14, %v14264_v6  ;;  %v5134_v42 = vpop.f32.mrf.mxu3  ;;  %v8552_v6 = vld [vmem:[%s15866_s17 + $0xc0] sm:$0xff]  ;;  %5375 = vmatpush.msra.mxu0 %v8547_v36 }
 0xd5e   :  { %8534 = vmatmul.msk.f32.gmra.mxu2 %vm16463_vm3, %v5131_v57  ;;  %vm16477_vm3 = vmmov %vm16363_vm2 }
 0xd5f   :  { %5337 = vmatpush.msra.mxu2 %v8552_v6  ;;  %5376 = vmatpush.msra.mxu0 %v8546_v59  ;;  %v8592_v6 = vld [vmem:[%s15865_s16 + $0x3a0] sm:$0xff] }
 0xd60   :  { %v8596_v59 = vld [vmem:[%s15866_s17 + $0xe0] sm:$0xff] }
 0xd61   :  { %v4540_v38 = vpop.f32.mrf.mxu2  ;;  %5377 = vmatpush.msra.mxu0 %v8545_v43  ;;  %v8590_v43 = vld [vmem:[%s15865_s16 + $0x390] sm:$0xff] }
 0xd62   :  { %v5099_v15 = vpop.f32.mrf.mxu1  ;;  %v4423_v18 = vpop.f32.mrf.mxu0  ;;  %8517 = vmatmul.msk.f32.gmra.mxu0 %vm16466_vm4, %v4944_v63  ;;  %v8575_v63 = vld [vmem:[%s15866_s17 + $0xd8] sm:$0xff]  ;;  %vm16480_vm4 = vmmov %vm16384_vm0 }
 0xd63   :  { %v4424_v12 = vadd.f32 %v4423_v18, %v14321_v9  ;;  %5378 = vmatpush.msra.mxu0 %v8544_v54  ;;  %5497 = vmatpush.msrb.mxu2 %v8575_v63  ;;  %v8615_v63 = vld [vmem:[%s15865_s16 + $0x3e8] sm:$0xff] }
 0xd65   :  { %5742 = vmatmul.f32.gmra.mxu1 %v8607_v50  ;;  %v4429_v58 = vadd.f32 %v4424_v12, %v14308_v49  ;;  %v5286_v4 = vpop.f32.mrf.mxu3  ;;  %v8571_v50 = vld [vmem:[%s15865_s16 + $0x368] sm:$0xff]  ;;  %5498 = vmatpush.msrb.mxu2 %v8574_v27 }
 0xd66   :  { %8535 = vmatmul.msk.f32.gmra.mxu2 %vm16465_vm5, %v5134_v42  ;;  %vm16479_vm5 = vmmov %vm16363_vm2 }
 0xd69   :  { %v4543_v51 = vpop.f32.mrf.mxu2 }
 0xd6a   :  { %v5102_v60 = vpop.f32.mrf.mxu1  ;;  %v4575_v21 = vpop.f32.mrf.mxu0  ;;  %8536 = vmatmul.msk.f32.vlgmr.msrb.gmra.mxu0 %vm16384_vm0, %v5096_v35  ;;  %v8566_v35 = vld [vmem:[%s15865_s16 + $0x340] sm:$0xff] }
 0xd6b   :  { %v4576_v48 = vadd.f32 %v4575_v21, %v4534_v26  ;;  %5532 = vmatpush.msrb.mxu0 %v8573_v2  ;;  %v8569_v26 = vld [vmem:[%s15865_s16 + $0x358] sm:$0xff] }
 0xd6d   :  { %5745 = vmatmul.f32.gmra.mxu1 %v8608_v8  ;;  %v4587_v16 = vadd.f32 %v4576_v48, %v14344_v55  ;;  %v5289_v30 = vpop.f32.mrf.mxu3  ;;  %5533 = vmatpush.msrb.mxu0 %v8572_v3 }
 0xd6e   :  { %8554 = vmatmul.msk.f32.vlgmr.msra.gmra.mxu2 %vm16467_vm14, %v5286_v4  ;;  %v8597_v4 = vld [vmem:[%s15866_s17 + $0xe8] sm:$0xff]  ;;  %vm16481_vm14 = vmmov %vm16363_vm2 }
 0xd6f   :  { %5534 = vmatpush.msrb.mxu0 %v8571_v50  ;;  %5658 = vmatpush.msra.mxu2 %v8597_v4  ;;  %v8616_v50 = vld [vmem:[%s15865_s16 + $0x3f0] sm:$0xff] }
 0xd71   :  { %v4695_v7 = vpop.f32.mrf.mxu2  ;;  %5535 = vmatpush.msrb.mxu0 %v8570_v61  ;;  %5659 = vmatpush.msra.mxu2 %v8596_v59 }
 0xd72   :  { %v5105_v40 = vpop.f32.mrf.mxu1  ;;  %v4578_v28 = vpop.f32.mrf.mxu0  ;;  %8537 = vmatmul.msk.f32.gmra.mxu0 %vm16469_vm13, %v5099_v15  ;;  %vm16483_vm13 = vmmov %vm16384_vm0 }
 0xd73   :  { %v4579_v1 = vadd.f32 %v4578_v28, %v4537_v39  ;;  %5536 = vmatpush.msrb.mxu0 %v8569_v26  ;;  %v8618_v26 = vld [vmem:[%s15866_s17 + $0xf0] sm:$0xff] }
 0xd75   :  { %5748 = vmatmul.f32.gmra.mxu1 %v8609_v0  ;;  %v4588_v23 = vadd.f32 %v4579_v1, %v4427_v22  ;;  %v5292_v49 = vpop.f32.mrf.mxu3  ;;  %5537 = vmatpush.msrb.mxu0 %v8568_v62  ;;  %v8613_v62 = vld [vmem:[%s15865_s16 + $0x3d8] sm:$0xff] }
 0xd76   :  { %8555 = vmatmul.msk.f32.gmra.mxu2 %vm16468_vm11, %v5289_v30  ;;  %vm16482_vm11 = vmmov %vm16363_vm2 }
 0xd77   :  { %5538 = vmatpush.msrb.mxu0 %v8567_v31 }
 0xd79   :  { %v4698_v41 = vpop.f32.mrf.mxu2  ;;  %5539 = vmatpush.msrb.mxu0 %v8566_v35  ;;  %v8611_v35 = vld [vmem:[%s15865_s16 + $0x3c8] sm:$0xff] }
 0xd7a   :  { %v5257_v13 = vpop.f32.mrf.mxu1  ;;  %v4581_v33 = vpop.f32.mrf.mxu0  ;;  %8538 = vmatmul.msk.f32.gmra.mxu0 %vm16470_vm10, %v5102_v60  ;;  %vm16484_vm10 = vmmov %vm16384_vm0 }
 0xd7b   :  { %v4582_v19 = vadd.f32 %v4581_v33, %v4540_v38  ;;  %v8595_v38 = vld [vmem:[%s15865_s16 + $0x3b8] sm:$0xff] }
 0xd7d   :  { %v4589_v9 = vadd.f32 %v4582_v19, %v4428_v20  ;;  %v5295_v45 = vpop.f32.mrf.mxu3 }
 0xd7e   :  { %8556 = vmatmul.msk.f32.gmra.mxu2 %vm16363_vm2, %v5292_v49 }
 0xd81   :  { %v4701_v17 = vpop.f32.mrf.mxu2 }
 0xd82   :  { %v5260_v53 = vpop.f32.mrf.mxu1  ;;  %v4584_v44 = vpop.f32.mrf.mxu0  ;;  %8539 = vmatmul.msk.f32.gmra.mxu0 %vm16472_vm7, %v5105_v40  ;;  %v8589_v40 = vld [vmem:[%s15865_s16 + $0x388] sm:$0xff]  ;;  %vm16486_vm7 = vmmov %vm16384_vm0 }
 0xd83   :  { %v4585_v37 = vadd.f32 %v4584_v44, %v4543_v51  ;;  %v8591_v51 = vld [vmem:[%s15865_s16 + $0x398] sm:$0xff] }
 0xd85   :  { %v4590_v29 = vadd.f32 %v4585_v37, %v4429_v58  ;;  %v5447_v5 = vpop.f32.mrf.mxu3 }
 0xd86   :  { %8557 = vmatmul.msk.f32.gmra.mxu2 %vm16471_vm15, %v5295_v45  ;;  %vm16485_vm15 = vmmov %vm16363_vm2 }
 0xd89   :  { %v4704_v34 = vpop.f32.mrf.mxu2 }
 0xd8a   :  { %v5263_v55 = vpop.f32.mrf.mxu1  ;;  %v4736_v8 = vpop.f32.mrf.mxu0  ;;  %8558 = vmatmul.msk.f32.vlgmr.msra.gmra.mxu0 %vm16474_vm6, %v5257_v13  ;;  %vm16488_vm6 = vmmov %vm16384_vm0 }
 0xd8b   :  { %v4737_v11 = vadd.f32 %v4736_v8, %v4695_v7  ;;  %5693 = vmatpush.msra.mxu0 %v8595_v38  ;;  %v8588_v7 = vld [vmem:[%s15865_s16 + $0x380] sm:$0xff] }
 0xd8d   :  { %v4748_v22 = vadd.f32 %v4737_v11, %v4587_v16  ;;  %v5450_v57 = vpop.f32.mrf.mxu3  ;;  %5694 = vmatpush.msra.mxu0 %v8594_v25 }
 0xd8e   :  { %8576 = vmatmul.msk.f32.vlgmr.msrb.gmra.mxu2 %vm16473_vm12, %v5447_v5  ;;  %v8614_v5 = vld [vmem:[%s15865_s16 + $0x3e0] sm:$0xff]  ;;  %vm16487_vm12 = vmmov %vm16363_vm2 }
 0xd8f   :  { %5695 = vmatpush.msra.mxu0 %v8593_v56 }
 0xd91   :  { %v4856_v46 = vpop.f32.mrf.mxu2  ;;  %5696 = vmatpush.msra.mxu0 %v8592_v6 }
 0xd92   :  { %v5266_v32 = vpop.f32.mrf.mxu1  ;;  %v4739_v39 = vpop.f32.mrf.mxu0  ;;  %8559 = vmatmul.msk.f32.gmra.mxu0 %vm16476_vm1, %v5260_v53  ;;  %vm16490_vm1 = vmmov %vm16384_vm0 }
 0xd93   :  { %v4740_v24 = vadd.f32 %v4739_v39, %v4698_v41  ;;  %5697 = vmatpush.msra.mxu0 %v8591_v51 }
 0xd95   :  { %v4749_v14 = vadd.f32 %v4740_v24, %v4588_v23  ;;  %v5453_v15 = vpop.f32.mrf.mxu3  ;;  %5698 = vmatpush.msra.mxu0 %v8590_v43 }
 0xd96   :  { %8577 = vmatmul.msk.f32.gmra.mxu2 %vm16475_vm9, %v5450_v57  ;;  %vm16489_vm9 = vmmov %vm16363_vm2 }
 0xd97   :  { %5699 = vmatpush.msra.mxu0 %v8589_v40 }
 0xd99   :  { %v4859_v20 = vpop.f32.mrf.mxu2  ;;  %5700 = vmatpush.msra.mxu0 %v8588_v7 }
 0xd9a   :  { %v5418_v0 = vpop.f32.mrf.mxu1  ;;  %v4742_v42 = vpop.f32.mrf.mxu0  ;;  %8560 = vmatmul.msk.f32.gmra.mxu0 %vm16478_vm8, %v5263_v55  ;;  %vm16492_vm8 = vmmov %vm16384_vm0 }
 0xd9b   :  { %v4743_v52 = vadd.f32 %v4742_v42, %v4701_v17  ;;  %v8617_v17 = vld [vmem:[%s15865_s16 + $0x3f8] sm:$0xff] }
 0xd9d   :  { %v4750_v47 = vadd.f32 %v4743_v52, %v4589_v9  ;;  %v5456_v12 = vpop.f32.mrf.mxu3 }
 0xd9e   :  { %8578 = vmatmul.msk.f32.gmra.mxu2 %vm16477_vm3, %v5453_v15  ;;  %vm16491_vm3 = vmmov %vm16363_vm2 }
 0xda1   :  { %v4862_v10 = vpop.f32.mrf.mxu2 }
 0xda2   :  { %v5421_v18 = vpop.f32.mrf.mxu1  ;;  %v4745_v60 = vpop.f32.mrf.mxu0  ;;  %8561 = vmatmul.msk.f32.gmra.mxu0 %vm16480_vm4, %v5266_v32  ;;  %vm16494_vm4 = vmmov %vm16384_vm0 }
 0xda3   :  { %v4746_v58 = vadd.f32 %v4745_v60, %v4704_v34  ;;  %v8612_v34 = vld [vmem:[%s15865_s16 + $0x3d0] sm:$0xff] }
 0xda5   :  { %v4751_v36 = vadd.f32 %v4746_v58, %v4590_v29  ;;  %v5608_v21 = vpop.f32.mrf.mxu3  ;;  %v8619_v29 = vld [vmem:[%s15866_s17 + $0xf8] sm:$0xff] }
 0xda6   :  { %8579 = vmatmul.msk.f32.gmra.mxu2 %vm16479_vm5, %v5456_v12  ;;  %vm16493_vm5 = vmmov %vm16363_vm2 }
 0xda7   :  { %5819 = vmatpush.msrb.mxu2 %v8619_v29 }
 0xda9   :  { %v4865_v48 = vpop.f32.mrf.mxu2  ;;  %5820 = vmatpush.msrb.mxu2 %v8618_v26  ;;  %v8639_v26 = vld [vmem:[%s15867_s18 + $0x58] sm:$0xff] }
 0xdaa   :  { %v5424_v54 = vpop.f32.mrf.mxu1  ;;  %v4897_v16 = vpop.f32.mrf.mxu0  ;;  %8580 = vmatmul.msk.f32.vlgmr.msrb.gmra.mxu0 %vm16384_vm0, %v5418_v0 }
 0xdab   :  { %v4898_v30 = vadd.f32 %v4897_v16, %v4856_v46  ;;  %5854 = vmatpush.msrb.mxu0 %v8617_v17  ;;  %v5897_v17 = vld [vmem:[%s15867_s18 + $0x30] sm:$0xff] }
 0xdad   :  { %v14496_v28 = vadd.f32 %v4898_v30, %v4748_v22  ;;  %v5611_v1 = vpop.f32.mrf.mxu3  ;;  %5855 = vmatpush.msrb.mxu0 %v8616_v50  ;;  %v8610_v22 = vld [vmem:[%s15865_s16 + $0x3c0] sm:$0xff]  ;;  %v8642_v50 = vld [vmem:[%s15867_s18 + $0x70] sm:$0xff] }
 0xdae   :  { %8598 = vmatmul.msk.f32.vlgmr.msra.gmra.mxu2 %vm16481_vm14, %v5608_v21  ;;  %vm16495_vm14 = vmmov %vm16384_vm0 }
 0xdaf   :  { %5856 = vmatpush.msrb.mxu0 %v8615_v63  ;;  %v8641_v63 = vld [vmem:[%s15867_s18 + $0x68] sm:$0xff] }
 0xdb1   :  { %v14499_v13 = vpop.f32.mrf.mxu2  ;;  %5857 = vmatpush.msrb.mxu0 %v8614_v5  ;;  %v5894_v5 = vld [vmem:[%s15867_s18 + $0x18] sm:$0xff] }
 0xdb2   :  { %v4900_v23 = vpop.f32.mrf.mxu0  ;;  %v5427_v49 = vpop.f32.mrf.mxu1  ;;  %8581 = vmatmul.msk.f32.gmra.mxu0 %vm16483_vm13, %v5421_v18  ;;  %vm16497_vm13 = vmmov %vm16384_vm0 }
 0xdb3   :  { %v4901_v41 = vadd.f32 %v4900_v23, %v4859_v20  ;;  %5858 = vmatpush.msrb.mxu0 %v8613_v62  ;;  %v5893_v62 = vld [vmem:[%s15867_s18 + $0x10] sm:$0xff] }
 0xdb5   :  { %v14502_v33 = vadd.f32 %v4901_v41, %v4749_v14  ;;  %v5614_v19 = vpop.f32.mrf.mxu3  ;;  %5859 = vmatpush.msrb.mxu0 %v8612_v34  ;;  %v8638_v34 = vld [vmem:[%s15867_s18 + $0x50] sm:$0xff] }
 0xdb6   :  { %8599 = vmatmul.msk.f32.gmra.mxu2 %vm16482_vm11, %v5611_v1  ;;  %vm16496_vm11 = vmmov %vm16384_vm0 }
 0xdb7   :  { %5860 = vmatpush.msrb.mxu0 %v8611_v35  ;;  %v8637_v35 = vld [vmem:[%s15867_s18 + $0x48] sm:$0xff] }
 0xdb9   :  { %v14505_v53 = vpop.f32.mrf.mxu2  ;;  %5861 = vmatpush.msrb.mxu0 %v8610_v22  ;;  %v5891_v22 = vld [vmem:[%s15867_s18] sm:$0xff] }
 0xdba   :  { %v4903_v9 = vpop.f32.mrf.mxu0  ;;  %v5579_v2 = vpop.f32.mrf.mxu1  ;;  %8582 = vmatmul.msk.f32.gmra.mxu0 %vm16484_vm10, %v5424_v54  ;;  %vm16499_vm10 = vmmov %vm16384_vm0 }
 0xdbb   :  { %v4904_v45 = vadd.f32 %v4903_v9, %v4862_v10  ;;  %v5898_v9 = vld [vmem:[%s15867_s18 + $0x38] sm:$0xff] }
 0xdbc   :  { %5919 = vmatpush.msra.mxu1 %v5898_v9 }
 0xdbd   :  { %v14508_v3 = vadd.f32 %v4904_v45, %v4750_v47  ;;  %v5617_v44 = vpop.f32.mrf.mxu3  ;;  %v8643_v45 = vld [vmem:[%s15867_s18 + $0x78] sm:$0xff] }
 0xdbe   :  { %8600 = vmatmul.msk.f32.gmra.mxu2 %vm16363_vm2, %v5614_v19  ;;  %5962 = vmatpush.msrb.mxu3 %v8643_v45  ;;  %v8667_v45 = vld [vmem:[%s15867_s18 + $0xb8] sm:$0xff]  ;;  %vm16498_vm2 = vmmov %vm16384_vm0 }
 0xdbf   :  { %5920 = vmatpush.msra.mxu1 %v5897_v17 }
 0xdc0   :  { %5963 = vmatpush.msrb.mxu3 %v8642_v50 }
 0xdc1   :  { %v14517_v37 = vpop.f32.mrf.mxu2 }
 0xdc2   :  { %v4906_v61 = vpop.f32.mrf.mxu0  ;;  %8583 = vmatmul.msk.f32.gmra.mxu0 %vm16486_vm7, %v5427_v49  ;;  %v5582_v31 = vpop.f32.mrf.mxu1  ;;  %5964 = vmatpush.msrb.mxu3 %v8641_v63  ;;  %v8663_v63 = vld [vmem:[%s15867_s18 + $0x98] sm:$0xff]  ;;  %vm16501_vm7 = vmmov %vm16384_vm0 }
 0xdc3   :  { %v4907_v55 = vadd.f32 %v4906_v61, %v4865_v48  ;;  %v5895_v61 = vld [vmem:[%s15867_s18 + $0x20] sm:$0xff] }
 0xdc5   :  { %v14529_v27 = vadd.f32 %v4907_v55, %v4751_v36  ;;  %v5769_v8 = vpop.f32.mrf.mxu3  ;;  %v8640_v55 = vld [vmem:[%s15867_s18 + $0x60] sm:$0xff] }
 0xdc6   :  { %8601 = vmatmul.msk.f32.gmra.mxu2 %vm16485_vm15, %v5617_v44  ;;  %v5896_v44 = vld [vmem:[%s15867_s18 + $0x28] sm:$0xff]  ;;  %5965 = vmatpush.msrb.mxu3 %v8640_v55  ;;  %vm16500_vm15 = vmmov %vm16384_vm0 }
 0xdc7   :  { %5921 = vmatpush.msra.mxu1 %v5896_v44 }
 0xdc8   :  { %5966 = vmatpush.msrb.mxu3 %v8639_v26 }
 0xdc9   :  { %v14541_v11 = vpop.f32.mrf.mxu2  ;;  %5922 = vmatpush.msra.mxu1 %v5895_v61 }
 0xdca   :  { %v14546_v32 = vpop.f32.mrf.mxu0  ;;  %8602 = vmatmul.msk.f32.vlgmr.msra.gmra.mxu0 %vm16488_vm6, %v5579_v2  ;;  %v5585_v39 = vpop.f32.mrf.mxu1  ;;  %5967 = vmatpush.msrb.mxu3 %v8638_v34  ;;  %vm16503_vm6 = vmmov %vm16384_vm0 }
 0xdcb   :  { %5923 = vmatpush.msra.mxu1 %v5894_v5 }
 0xdcc   :  { %5968 = vmatpush.msrb.mxu3 %v8637_v35 }
 0xdcd   :  { %v5772_v57 = vpop.f32.mrf.mxu3  ;;  %5924 = vmatpush.msra.mxu1 %v5893_v62  ;;  %v8660_v62 = vld [vmem:[%s15867_s18 + $0x80] sm:$0xff] }
 0xdce   :  { %8620 = vmatmul.msk.f32.vlgmr.msrb.gmra.mxu2 %vm16487_vm12, %v5769_v8  ;;  %v5892_v8 = vld [vmem:[%s15867_s18 + $0x8] sm:$0xff]  ;;  %vm16502_vm12 = vmmov %vm16384_vm0 }
 0xdcf   :  { %5925 = vmatpush.msra.mxu1 %v5892_v8 }
 0xdd1   :  { %v14553_v46 = vpop.f32.mrf.mxu2  ;;  %5926 = vmatpush.msra.mxu1 %v5891_v22 }
 0xdd2   :  { %v14555_v24 = vpop.f32.mrf.mxu0  ;;  %8603 = vmatmul.msk.f32.gmra.mxu0 %vm16490_vm1, %v5582_v31  ;;  %v5588_v20 = vpop.f32.mrf.mxu1  ;;  %vm16505_vm1 = vmmov %vm16384_vm0 }
 0xdd3   :  { %6088 = vmatpush.msrb.mxu1 %v8667_v45 }
 0xdd5   :  { %v5775_v14 = vpop.f32.mrf.mxu3 }
 0xdd6   :  { %8621 = vmatmul.msk.f32.gmra.mxu2 %vm16489_vm9, %v5772_v57  ;;  %v8636_v57 = vld [vmem:[%s15867_s18 + $0x40] sm:$0xff]  ;;  %vm16504_vm9 = vmmov %vm16384_vm0 }
 0xdd7   :  { %5969 = vmatpush.msrb.mxu3 %v8636_v57 }
 0xdd9   :  { %v14559_v0 = vpop.f32.mrf.mxu2 }
 0xdda   :  { %v14561_v15 = vpop.f32.mrf.mxu0  ;;  %8604 = vmatmul.msk.f32.gmra.mxu0 %vm16492_vm8, %v5585_v39  ;;  %v5740_v38 = vpop.f32.mrf.mxu1  ;;  %vm16507_vm8 = vmmov %vm16384_vm0 }
 0xddd   :  { %v5778_v52 = vpop.f32.mrf.mxu3 }
 0xdde   :  { %8622 = vmatmul.msk.f32.gmra.mxu2 %vm16491_vm3, %v5775_v14  ;;  %vm16506_vm3 = vmmov %vm16384_vm0 }
 0xde1   :  { %v14565_v42 = vpop.f32.mrf.mxu2 }
 0xde2   :  { %v14567_v47 = vpop.f32.mrf.mxu0  ;;  %8605 = vmatmul.msk.f32.gmra.mxu0 %vm16494_vm4, %v5588_v20  ;;  %v5743_v12 = vpop.f32.mrf.mxu1  ;;  %vm16509_vm4 = vmmov %vm16384_vm0 }
 0xde6   :  { %8623 = vmatmul.msk.f32.gmra.mxu2 %vm16493_vm5, %v5778_v52  ;;  %v5059_v52 = vadd.f32 %v14546_v32, %v14499_v13  ;;  %v8666_v13 = vld [vmem:[%s15867_s18 + $0xb0] sm:$0xff]  ;;  %v5062_v32 = vadd.f32 %v14555_v24, %v14505_v53  ;;  %vm16508_vm5 = vmmov %vm16384_vm0 }
 0xde7   :  { %6089 = vmatpush.msrb.mxu1 %v8666_v13 }
 0xde8   :  { %v5071_v44 = vadd.f32 %v5062_v32, %v14502_v33 }
 0xde9   :  { %v14571_v25 = vpop.f32.mrf.mxu2 }
 0xdea   :  { %v14573_v18 = vpop.f32.mrf.mxu0  ;;  %8624 = vmatmul.msk.f32.vlgmr.msrb.gmra.mxu0 %vm16495_vm14, %v5740_v38  ;;  %v5746_v58 = vpop.f32.mrf.mxu1  ;;  %vm16510_vm14 = vmmov %vm16384_vm0 }
 0xdeb   :  { %v5220_v38 = vadd.f32 %v14573_v18, %v14553_v46 }
 0xdf1   :  { %v14576_v10 = vpop.f32.mrf.mxu2 }
 0xdf2   :  { %v14578_v56 = vpop.f32.mrf.mxu0  ;;  %8625 = vmatmul.msk.f32.gmra.mxu0 %vm16384_vm0, %v5743_v12  ;;  %v5749_v59 = vpop.f32.mrf.mxu1 }
 0xdf9   :  { %v14581_v60 = vpop.f32.mrf.mxu2 }
 0xdfa   :  { %v14583_v4 = vpop.f32.mrf.mxu0  ;;  %8626 = vmatmul.msk.f32.gmra.mxu0 %vm16496_vm11, %v5746_v58  ;;  %vm16511_vm11 = vmmov %vm16384_vm0 }
 0xe01   :  { %v14586_v6 = vpop.f32.mrf.mxu2 }
 0xe02   :  { %v14588_v36 = vpop.f32.mrf.mxu0  ;;  %8627 = vmatmul.msk.f32.gmra.mxu0 %vm16497_vm13, %v5749_v59  ;;  %v5070_v59 = vadd.f32 %v5059_v52, %v14496_v28  ;;  %v8665_v28 = vld [vmem:[%s15867_s18 + $0xa8] sm:$0xff]  ;;  %vm16512_vm13 = vmmov %vm16384_vm0 }
 0xe03   :  { %6090 = vmatpush.msrb.mxu1 %v8665_v28  ;;  %v5229_v52 = vadd.f32 %v14588_v36, %v14571_v25  ;;  %v8703_v28 = vld [vmem:[%s15867_s18 + $0x118] sm:$0xff] }
 0xe04   :  { %v5231_v17 = vadd.f32 %v5220_v38, %v5070_v59 }
 0xe09   :  { %v14591_v51 = vpop.f32.mrf.mxu2 }
 0xe0a   :  { %v5380_v43 = vpop.f32.mrf.mxu0 }
 0xe0b   :  { %v5381_v9 = vadd.f32 %v5380_v43, %v14576_v10  ;;  %v5223_v10 = vadd.f32 %v14578_v56, %v14559_v0  ;;  %v8662_v0 = vld [vmem:[%s15867_s18 + $0x90] sm:$0xff] }
 0xe0d   :  { %v5392_v46 = vadd.f32 %v5381_v9, %v5231_v17  ;;  %v5232_v61 = vadd.f32 %v5223_v10, %v5071_v44  ;;  %v8702_v10 = vld [vmem:[%s15867_s18 + $0x110] sm:$0xff] }
 0xe0e   :  { %v8746_v44 = vld [vmem:[%s15867_s18 + $0x1b0] sm:$0xff] }
 0xe11   :  { %v5500_v48 = vpop.f32.mrf.mxu2 }
 0xe12   :  { %v14593_v21 = vpop.f32.mrf.mxu0 }
 0xe13   :  { %v5384_v53 = vadd.f32 %v14593_v21, %v14581_v60  ;;  %v8661_v60 = vld [vmem:[%s15867_s18 + $0x88] sm:$0xff]  ;;  %v5065_v21 = vadd.f32 %v14561_v15, %v14517_v37 }
 0xe15   :  { %v5072_v8 = vadd.f32 %v5065_v21, %v14508_v3  ;;  %v5068_v3 = vadd.f32 %v14567_v47, %v14541_v11  ;;  %v8783_v21 = vld [vmem:[%s15867_s18 + $0x218] sm:$0xff] }
 0xe17   :  { %v5073_v59 = vadd.f32 %v5068_v3, %v14529_v27  ;;  %v8687_v3 = vld [vmem:[%s15867_s18 + $0xf8] sm:$0xff] }
 0xe19   :  { %v14597_v40 = vpop.f32.mrf.mxu2  ;;  %v5234_v11 = vadd.f32 %v5229_v52, %v5073_v59  ;;  %v8684_v52 = vld [vmem:[%s15867_s18 + $0xe0] sm:$0xff]  ;;  %v8683_v59 = vld [vmem:[%s15867_s18 + $0xd8] sm:$0xff] }
 0xe1a   :  { %v14595_v54 = vpop.f32.mrf.mxu0 }
 0xe1b   :  { %v5387_v37 = vadd.f32 %v14595_v54, %v14586_v6 }
 0xe21   :  { %v14601_v30 = vpop.f32.mrf.mxu2 }
 0xe22   :  { %v14599_v16 = vpop.f32.mrf.mxu0 }
 0xe29   :  { %v14603_v1 = vpop.f32.mrf.mxu2 }
 0xe2a   :  { %v5541_v7 = vpop.f32.mrf.mxu0 }
 0xe2b   :  { %v5542_v50 = vadd.f32 %v5541_v7, %v5500_v48  ;;  %v8664_v48 = vld [vmem:[%s15867_s18 + $0xa0] sm:$0xff] }
 0xe2c   :  { %6091 = vmatpush.msrb.mxu1 %v8664_v48  ;;  %v8700_v48 = vld [vmem:[%s15867_s18 + $0x100] sm:$0xff] }
 0xe2d   :  { %v5553_v43 = vadd.f32 %v5542_v50, %v5392_v46  ;;  %v8704_v46 = vld [vmem:[%s15867_s18 + $0x120] sm:$0xff] }
 0xe2e   :  { %6092 = vmatpush.msrb.mxu1 %v8663_v63  ;;  %v8742_v63 = vld [vmem:[%s15867_s18 + $0x190] sm:$0xff] }
 0xe30   :  { %6093 = vmatpush.msrb.mxu1 %v8662_v0  ;;  %v8741_v0 = vld [vmem:[%s15867_s18 + $0x188] sm:$0xff] }
 0xe31   :  { %v5661_v41 = vpop.f32.mrf.mxu2 }
 0xe32   :  { %v14605_v23 = vpop.f32.mrf.mxu0  ;;  %6094 = vmatpush.msrb.mxu1 %v8661_v60  ;;  %v8784_v60 = vld [vmem:[%s15867_s18 + $0x220] sm:$0xff] }
 0xe33   :  { %v5545_v55 = vadd.f32 %v14605_v23, %v14597_v40  ;;  %v5226_v40 = vadd.f32 %v14583_v4, %v14565_v42 }
 0xe34   :  { %6095 = vmatpush.msrb.mxu1 %v8660_v62 }
 0xe35   :  { %v5233_v22 = vadd.f32 %v5226_v40, %v5072_v8 }
 0xe39   :  { %v14617_v2 = vpop.f32.mrf.mxu2 }
 0xe3a   :  { %v14607_v49 = vpop.f32.mrf.mxu0 }
 0xe3b   :  { %v5548_v42 = vadd.f32 %v14607_v49, %v14601_v30  ;;  %v5390_v30 = vadd.f32 %v14599_v16, %v14591_v51 }
 0xe3d   :  { %v5395_v36 = vadd.f32 %v5390_v30, %v5234_v11  ;;  %v8682_v30 = vld [vmem:[%s15867_s18 + $0xd0] sm:$0xff]  ;;  %v8680_v11 = vld [vmem:[%s15867_s18 + $0xc0] sm:$0xff] }
 0xe41   :  { %v14649_v31 = vpop.f32.mrf.mxu2 }
 0xe42   :  { %v14609_v19 = vpop.f32.mrf.mxu0 }
 0xe43   :  { %v5551_v47 = vadd.f32 %v14609_v19, %v14603_v1  ;;  %v8707_v1 = vld [vmem:[%s15867_s18 + $0x138] sm:$0xff]  ;;  %v8706_v19 = vld [vmem:[%s15867_s18 + $0x130] sm:$0xff] }
 0xe45   :  { %v5556_v51 = vadd.f32 %v5551_v47, %v5395_v36  ;;  %v14918_v47 = vld [vmem:[%s15868_s9 + $0x30] sm:$0xff]  ;;  %v8727_v36 = vld [vmem:[%s15867_s18 + $0x178] sm:$0xff] }
 0xe49   :  { %v14663_v14 = vpop.f32.mrf.mxu2 }
 0xe4a   :  { %v5702_v29 = vpop.f32.mrf.mxu0 }
 0xe4b   :  { %v5703_v18 = vadd.f32 %v5702_v29, %v5661_v41  ;;  %v5393_v29 = vadd.f32 %v5384_v53, %v5232_v61  ;;  %v8745_v53 = vld [vmem:[%s15867_s18 + $0x1a8] sm:$0xff]  ;;  %v8787_v61 = vld [vmem:[%s15867_s18 + $0x238] sm:$0xff] }
 0xe4d   :  { %v5714_v24 = vadd.f32 %v5703_v18, %v5553_v43  ;;  %v5554_v23 = vadd.f32 %v5545_v55, %v5393_v29  ;;  %v8701_v43 = vld [vmem:[%s15867_s18 + $0x108] sm:$0xff]  ;;  %v8786_v55 = vld [vmem:[%s15867_s18 + $0x230] sm:$0xff] }
 0xe4e   :  { %v8782_v29 = vld [vmem:[%s15867_s18 + $0x210] sm:$0xff] }
 0xe51   :  { %v5822_v58 = vpop.f32.mrf.mxu2 }
 0xe52   :  { %v5705_v39 = vpop.f32.mrf.mxu0 }
 0xe53   :  { %v5706_v5 = vadd.f32 %v5705_v39, %v14617_v2  ;;  %v5394_v39 = vadd.f32 %v5387_v37, %v5233_v22 }
 0xe55   :  { %v5715_v15 = vadd.f32 %v5706_v5, %v5554_v23  ;;  %v5555_v38 = vadd.f32 %v5548_v42, %v5394_v39  ;;  %v8781_v5 = vld [vmem:[%s15867_s18 + $0x208] sm:$0xff]  ;;  %v8686_v39 = vld [vmem:[%s15867_s18 + $0xf0] sm:$0xff] }
 0xe59   :  { %v5825_v56 = vpop.f32.mrf.mxu2 }
 0xe5a   :  { %v5708_v20 = vpop.f32.mrf.mxu0 }
 0xe5b   :  { %v5709_v6 = vadd.f32 %v5708_v20, %v14649_v31 }
 0xe5d   :  { %v5716_v49 = vadd.f32 %v5709_v6, %v5555_v38  ;;  %v14892_v38 = vld [vmem:[%s15868_s9 + $0x28] sm:$0xff] }
 0xe61   :  { %v5828_v57 = vpop.f32.mrf.mxu2 }
 0xe62   :  { %v14669_v12 = vpop.f32.mrf.mxu0 }
 0xe63   :  { %v5712_v27 = vadd.f32 %v14669_v12, %v14663_v14  ;;  %v8705_v12 = vld [vmem:[%s15867_s18 + $0x128] sm:$0xff] }
 0xe65   :  { %v5717_v50 = vadd.f32 %v5712_v27, %v5556_v51  ;;  %v14941_v51 = vld [vmem:[%s15868_s9 + $0x38] sm:$0xff] }
 0xe69   :  { %v5831_v20 = vpop.f32.mrf.mxu2 }
 0xe6a   :  { %v5863_v7 = vpop.f32.mrf.mxu0 }
 0xe6b   :  { %v5864_v41 = vadd.f32 %v5863_v7, %v5822_v58  ;;  %v8747_v7 = vld [vmem:[%s15867_s18 + $0x1b8] sm:$0xff] }
 0xe6d   :  { %v5875_v33 = vadd.f32 %v5864_v41, %v5714_v24  ;;  %v8744_v24 = vld [vmem:[%s15867_s18 + $0x1a0] sm:$0xff]  ;;  %v8743_v41 = vld [vmem:[%s15867_s18 + $0x198] sm:$0xff] }
 0xe6f   :  { %v5879_v26 = vmul.f32 0.2, %v5875_v33 }
 0xe71   :  { %v14711_v34 = vmax.f32 %v5875_v33, %v5879_v26  ;;  %v8785_v33 = vld [vmem:[%s15867_s18 + $0x228] sm:$0xff]  ;;  %v8780_v26 = vld [vmem:[%s15867_s18 + $0x200] sm:$0xff] }
 0xe72   :  { %v5866_v35 = vpop.f32.mrf.mxu0 }
 0xe73   :  { %v5867_v2 = vadd.f32 %v5866_v35, %v5825_v56  ;;  %8628 = vmatmul.msk.f32.vlgmr.msra.gmra.mxu1 %vm16498_vm2, %v14711_v34  ;;  %8644 = vmatmul.msk.f32.vlgmr.msrb.gmra.mxu3 %vm16499_vm10, %v14711_v34  ;;  %v8740_v56 = vld [vmem:[%s15867_s18 + $0x180] sm:$0xff]  ;;  %vm16513_vm2 = vmmov %vm16384_vm0 }
 0xe74   :  { %6264 = vmatpush.msra.mxu1 %v8707_v1  ;;  %vm16514_vm10 = vmmov %vm16384_vm0 }
 0xe75   :  { %v5876_v4 = vadd.f32 %v5867_v2, %v5715_v15  ;;  %v14859_v2 = vld [vmem:[%s15868_s9] sm:$0xff] }
 0xe76   :  { %6265 = vmatpush.msra.mxu1 %v8706_v19  ;;  %v8722_v19 = vld [vmem:[%s15867_s18 + $0x150] sm:$0xff] }
 0xe77   :  { %v5880_v54 = vmul.f32 0.2, %v5876_v4 }
 0xe78   :  { %6266 = vmatpush.msra.mxu1 %v8705_v12  ;;  %v8720_v12 = vld [vmem:[%s15867_s18 + $0x140] sm:$0xff] }
 0xe79   :  { %v14727_v58 = vmax.f32 %v5876_v4, %v5880_v54  ;;  %v14866_v4 = vld [vmem:[%s15868_s9 + $0x20] sm:$0xff]  ;;  %v8685_v54 = vld [vmem:[%s15867_s18 + $0xe8] sm:$0xff] }
 0xe7a   :  { %v5869_v9 = vpop.f32.mrf.mxu0  ;;  %6267 = vmatpush.msra.mxu1 %v8704_v46 }
 0xe7b   :  { %v5870_v45 = vadd.f32 %v5869_v9, %v5828_v57  ;;  %8629 = vmatmul.msk.f32.gmra.mxu1 %vm16500_vm15, %v14727_v58  ;;  %8645 = vmatmul.msk.f32.gmra.mxu3 %vm16501_vm7, %v14727_v58  ;;  %vm16515_vm15 = vmmov %vm16384_vm0  ;;  %v14874_v57 = vld [vmem:[%s15868_s9 + $0x8] sm:$0xff]  ;;  %v14900_v9 = vld [vmem:[%s15868_s9 + $0x10] sm:$0xff] }
 0xe7c   :  { %6268 = vmatpush.msra.mxu1 %v8703_v28  ;;  %vm16516_vm7 = vmmov %vm16384_vm0  ;;  %v14979_v28 = vld [vmem:[%s15868_s9 + $0x50] sm:$0xff] }
 0xe7d   :  { %v5877_v25 = vadd.f32 %v5870_v45, %v5716_v49  ;;  %v8681_v45 = vld [vmem:[%s15867_s18 + $0xc8] sm:$0xff] }
 0xe7e   :  { %6269 = vmatpush.msra.mxu1 %v8702_v10 }
 0xe7f   :  { %v5881_v31 = vmul.f32 0.2, %v5877_v25 }
 0xe80   :  { %6270 = vmatpush.msra.mxu1 %v8701_v43  ;;  %v14988_v43 = vld [vmem:[%s15868_s9 + $0x58] sm:$0xff] }
 0xe81   :  { %v14740_v16 = vmax.f32 %v5877_v25, %v5881_v31  ;;  %v14923_v25 = vld [vmem:[%s15868_s9 + $0x18] sm:$0xff]  ;;  %v8726_v31 = vld [vmem:[%s15867_s18 + $0x170] sm:$0xff] }
 0xe82   :  { %v5872_v17 = vpop.f32.mrf.mxu0  ;;  %6271 = vmatpush.msra.mxu1 %v8700_v48  ;;  %v8767_v48 = vld [vmem:[%s15867_s18 + $0x1f8] sm:$0xff] }
 0xe83   :  { %v5873_v13 = vadd.f32 %v5872_v17, %v5831_v20  ;;  %8630 = vmatmul.msk.f32.gmra.mxu1 %vm16502_vm12, %v14740_v16  ;;  %8646 = vmatmul.msk.f32.gmra.mxu3 %vm16503_vm6, %v14740_v16  ;;  %vm16517_vm12 = vmmov %vm16384_vm0  ;;  %v8725_v20 = vld [vmem:[%s15867_s18 + $0x168] sm:$0xff]  ;;  %v8724_v17 = vld [vmem:[%s15867_s18 + $0x160] sm:$0xff] }
 0xe84   :  { %vm16518_vm6 = vmmov %vm16384_vm0 }
 0xe85   :  { %v5878_v14 = vadd.f32 %v5873_v13, %v5717_v50  ;;  %v14949_v50 = vld [vmem:[%s15868_s9 + $0x40] sm:$0xff]  ;;  %v8723_v13 = vld [vmem:[%s15867_s18 + $0x158] sm:$0xff] }
 0xe87   :  { %v5882_v32 = vmul.f32 0.2, %v5878_v14 }
 0xe89   :  { %v14758_v18 = vmax.f32 %v5878_v14, %v5882_v32  ;;  %v8721_v14 = vld [vmem:[%s15867_s18 + $0x148] sm:$0xff] }
 0xe8a   :  { %v14970_v32 = vld [vmem:[%s15868_s9 + $0x48] sm:$0xff] }
 0xe8b   :  { %8631 = vmatmul.msk.f32.gmra.mxu1 %vm16504_vm9, %v14758_v18  ;;  %8647 = vmatmul.msk.f32.gmra.mxu3 %vm16505_vm1, %v14758_v18  ;;  %vm16519_vm9 = vmmov %vm16384_vm0 }
 0xe8c   :  { %vm16520_vm1 = vmmov %vm16384_vm0 }
 0xe93   :  { %8668 = vmatmul.msk.f32.vlgmr.msrb.gmra.mxu1 %vm16506_vm3, %v14711_v34  ;;  %vm5983_vm3 = vcmask 261120  }
 0xe94   :  { %6440 = vmatpush.msrb.mxu1 %v8747_v7 }
 0xe96   :  { %6441 = vmatpush.msrb.mxu1 %v8746_v44  ;;  %v8766_v44 = vld [vmem:[%s15867_s18 + $0x1f0] sm:$0xff] }
 0xe98   :  { %6442 = vmatpush.msrb.mxu1 %v8745_v53  ;;  %v8765_v53 = vld [vmem:[%s15867_s18 + $0x1e8] sm:$0xff] }
 0xe9a   :  { %6443 = vmatpush.msrb.mxu1 %v8744_v24  ;;  %v8764_v24 = vld [vmem:[%s15867_s18 + $0x1e0] sm:$0xff] }
 0xe9b   :  { %8669 = vmatmul.msk.f32.gmra.mxu1 %vm16507_vm8, %v14727_v58  ;;  %vm16521_vm8 = vmmov %vm16384_vm0 }
 0xe9c   :  { %6444 = vmatpush.msrb.mxu1 %v8743_v41  ;;  %v8763_v41 = vld [vmem:[%s15867_s18 + $0x1d8] sm:$0xff] }
 0xe9e   :  { %6445 = vmatpush.msrb.mxu1 %v8742_v63 }
 0xea0   :  { %6446 = vmatpush.msrb.mxu1 %v8741_v0  ;;  %v8762_v0 = vld [vmem:[%s15867_s18 + $0x1d0] sm:$0xff] }
 0xea2   :  { %6447 = vmatpush.msrb.mxu1 %v8740_v56  ;;  %v8761_v56 = vld [vmem:[%s15867_s18 + $0x1c8] sm:$0xff] }
 0xea3   :  { %8670 = vmatmul.msk.f32.gmra.mxu1 %vm16508_vm5, %v14740_v16  ;;  %vm16522_vm5 = vmmov %vm16384_vm0 }
 0xeab   :  { %8671 = vmatmul.msk.f32.gmra.mxu1 %vm16509_vm4, %v14758_v18  ;;  %vm16523_vm4 = vmmov %vm16384_vm0 }
 0xeb3   :  { %8708 = vmatmul.msk.f32.vlgmr.msra.gmra.mxu1 %vm16510_vm14, %v14711_v34  ;;  %vm16524_vm14 = vmmov %vm16384_vm0 }
 0xeb4   :  { %6616 = vmatpush.msra.mxu1 %v8787_v61  ;;  %v8760_v61 = vld [vmem:[%s15867_s18 + $0x1c0] sm:$0xff] }
 0xeb6   :  { %6617 = vmatpush.msra.mxu1 %v8786_v55  ;;  %v9189_v55 = vld [vmem:[%s15986_s24] sm:$0x3] }
 0xeb8   :  { %6618 = vmatpush.msra.mxu1 %v8785_v33 }
 0xeba   :  { %6619 = vmatpush.msra.mxu1 %v8784_v60 }
 0xebb   :  { %8709 = vmatmul.msk.f32.gmra.mxu1 %vm16384_vm0, %v14727_v58 }
 0xebc   :  { %6620 = vmatpush.msra.mxu1 %v8783_v21 }
 0xebe   :  { %6621 = vmatpush.msra.mxu1 %v8782_v29  ;;  %v15033_v29 = vld [vmem:[%s15868_s9 + $0x80] sm:$0xff] }
 0xec0   :  { %6622 = vmatpush.msra.mxu1 %v8781_v5 }
 0xec2   :  { %6623 = vmatpush.msra.mxu1 %v8780_v26 }
 0xec3   :  { %8710 = vmatmul.msk.f32.gmra.mxu1 %vm16511_vm11, %v14740_v16  ;;  %vm16525_vm11 = vcmask 1041408  }
 0xecb   :  { %8711 = vmatmul.msk.f32.gmra.mxu1 %vm16512_vm13, %v14758_v18  ;;  %vm16526_vm13 = vmmov %vm16384_vm0 }
 0xed3   :  { %8748 = vmatmul.msk.f32.vlgmr.msrb.gmra.mxu1 %vm16513_vm2, %v14711_v34  ;;  %vm16527_vm2 = vmmov %vm16384_vm0 }
 0xedb   :  { %8749 = vmatmul.msk.f32.gmra.mxu1 %vm16514_vm10, %v14727_v58  ;;  %vm16528_vm10 = vmmov %vm16384_vm0 }
 0xee3   :  { %8750 = vmatmul.msk.f32.gmra.mxu1 %vm16515_vm15, %v14740_v16  ;;  %vm16529_vm15 = vmmov %vm16384_vm0 }
 0xeeb   :  { %8751 = vmatmul.msk.f32.gmra.mxu1 %vm16516_vm7, %v14758_v18  ;;  %vm16530_vm7 = vmmov %vm16384_vm0 }
 0xef0   :  { %v5928_v62 = vpop.f32.mrf.mxu1 }
 0xef3   :  { %8788 = vmatmul.msk.f32.vlgmr.msra.gmra.mxu1 %vm16517_vm12, %v14711_v34  ;;  %vm16531_vm12 = vmmov %vm16384_vm0 }
 0xef6   :  { %v5971_v40 = vpop.f32.mrf.mxu3 }
 0xef8   :  { %v5931_v23 = vpop.f32.mrf.mxu1 }
 0xefb   :  { %8789 = vmatmul.msk.f32.gmra.mxu1 %vm16518_vm6, %v14727_v58  ;;  %vm16532_vm6 = vmmov %vm16384_vm0 }
 0xefe   :  { %v5974_v8 = vpop.f32.mrf.mxu3 }
 0xf00   :  { %v5934_v35 = vpop.f32.mrf.mxu1 }
 0xf03   :  { %8790 = vmatmul.msk.f32.gmra.mxu1 %vm16519_vm9, %v14740_v16  ;;  %vm16533_vm9 = vcmask 15360  }
 0xf06   :  { %v5977_v37 = vpop.f32.mrf.mxu3 }
 0xf08   :  { %v5937_v15 = vpop.f32.mrf.mxu1 }
 0xf09   :  { %6049 = vmatpush.msra.mxu0 %v5937_v15  ;;  %v15069_v15 = vld [vmem:[%s15868_s9 + $0x90] sm:$0xff] }
 0xf0b   :  { %6050 = vmatpush.msra.mxu0 %v5934_v35  ;;  %8791 = vmatmul.msk.f32.gmra.mxu1 %vm16520_vm1, %v14758_v18  ;;  %vm16534_vm1 = vmmov %vm16533_vm9 }
 0xf0d   :  { %6051 = vmatpush.msra.mxu0 %v5931_v23 }
 0xf0e   :  { %v5980_v22 = vpop.f32.mrf.mxu3 }
 0xf0f   :  { %6008 = vmatpush.msra.mxu2 %v5980_v22  ;;  %6052 = vmatpush.msra.mxu0 %v5928_v62  ;;  %v6701_v22 = vld [vmem:[%s15869_s4 + $0x8] sm:$0xff] }
 0xf10   :  { %v6097_v42 = vpop.f32.mrf.mxu1  ;;  %8652 = vmatmul.msk.f32.vlgmr.msra.gmra.mxu0 %vm5983_vm3, %v14859_v2 }
 0xf11   :  { %6009 = vmatpush.msra.mxu2 %v5977_v37  ;;  %v6700_v37 = vld [vmem:[%s15869_s4] sm:$0xff] }
 0xf13   :  { %6010 = vmatpush.msra.mxu2 %v5974_v8 }
 0xf15   :  { %6011 = vmatpush.msra.mxu2 %v5971_v40 }
 0xf16   :  { %8648 = vmatmul.msk.f32.vlgmr.msra.gmra.mxu2 %vm5983_vm3, %v14866_v4 }
 0xf17   :  { %6176 = vmatpush.msrb.mxu2 %v8687_v3  ;;  %v15080_v3 = vld [vmem:[%s15868_s9 + $0x98] sm:$0xff] }
 0xf18   :  { %v6100_v6 = vpop.f32.mrf.mxu1  ;;  %8653 = vmatmul.msk.f32.gmra.mxu0 %vm5983_vm3, %v14874_v57 }
 0xf19   :  { %6177 = vmatpush.msrb.mxu2 %v8686_v39  ;;  %v6702_v39 = vld [vmem:[%s15869_s4 + $0x10] sm:$0xff] }
 0xf1b   :  { %6178 = vmatpush.msrb.mxu2 %v8685_v54  ;;  %v8736_v54 = vld [vmem:[%s15868_s9 + $0xc0] sm:$0xff] }
 0xf1d   :  { %6179 = vmatpush.msrb.mxu2 %v8684_v52  ;;  %v15095_v52 = vld [vmem:[%s15868_s9 + $0x60] sm:$0xff] }
 0xf1e   :  { %8649 = vmatmul.msk.f32.gmra.mxu2 %vm5983_vm3, %v14892_v38 }
 0xf1f   :  { %6180 = vmatpush.msrb.mxu2 %v8683_v59  ;;  %v6703_v59 = vld [vmem:[%s15869_s4 + $0x18] sm:$0xff] }
 0xf20   :  { %v6103_v49 = vpop.f32.mrf.mxu1  ;;  %8654 = vmatmul.msk.f32.gmra.mxu0 %vm5983_vm3, %v14900_v9 }
 0xf21   :  { %6181 = vmatpush.msrb.mxu2 %v8682_v30 }
 0xf23   :  { %6182 = vmatpush.msrb.mxu2 %v8681_v45  ;;  %v15110_v45 = vld [vmem:[%s15868_s9 + $0x68] sm:$0xff] }
 0xf25   :  { %6183 = vmatpush.msrb.mxu2 %v8680_v11 }
 0xf26   :  { %8650 = vmatmul.msk.f32.gmra.mxu2 %vm5983_vm3, %v14918_v47 }
 0xf27   :  { %6352 = vmatpush.msra.mxu2 %v8727_v36  ;;  %v8738_v36 = vld [vmem:[%s15868_s9 + $0xd0] sm:$0xff] }
 0xf28   :  { %v6106_v27 = vpop.f32.mrf.mxu1  ;;  %8655 = vmatmul.msk.f32.gmra.mxu0 %vm5983_vm3, %v14923_v25 }
 0xf29   :  { %6133 = vmatpush.msra.mxu3 %v6106_v27  ;;  %6353 = vmatpush.msra.mxu2 %v8726_v31  ;;  %v15121_v27 = vld [vmem:[%s15868_s9 + $0x70] sm:$0xff] }
 0xf2b   :  { %6134 = vmatpush.msra.mxu3 %v6103_v49  ;;  %6354 = vmatpush.msra.mxu2 %v8725_v20  ;;  %v8737_v49 = vld [vmem:[%s15868_s9 + $0xc8] sm:$0xff]  ;;  %v8739_v20 = vld [vmem:[%s15868_s9 + $0xd8] sm:$0xff] }
 0xf2d   :  { %6135 = vmatpush.msra.mxu3 %v6100_v6  ;;  %6355 = vmatpush.msra.mxu2 %v8724_v17  ;;  %v15132_v17 = vld [vmem:[%s15868_s9 + $0x78] sm:$0xff] }
 0xf2e   :  { %8651 = vmatmul.msk.f32.gmra.mxu2 %vm5983_vm3, %v14941_v51 }
 0xf2f   :  { %6136 = vmatpush.msra.mxu3 %v6097_v42  ;;  %6356 = vmatpush.msra.mxu2 %v8723_v13 }
 0xf30   :  { %v6273_v1 = vpop.f32.mrf.mxu1  ;;  %8672 = vmatmul.msk.f32.vlgmr.msra.gmra.mxu3 %vm5983_vm3, %v14949_v50 }
 0xf31   :  { %6357 = vmatpush.msra.mxu2 %v8722_v19  ;;  %v15143_v19 = vld [vmem:[%s15868_s9 + $0xa0] sm:$0xff] }
 0xf33   :  { %6358 = vmatpush.msra.mxu2 %v8721_v14 }
 0xf35   :  { %6359 = vmatpush.msra.mxu2 %v8720_v12  ;;  %v8777_v12 = vld [vmem:[%s15868_s9 + $0x108] sm:$0xff] }
 0xf36   :  { %8688 = vmatmul.msk.f32.vlgmr.msrb.gmra.mxu2 %vm16521_vm8, %v14711_v34  ;;  %vm16535_vm8 = vmmov %vm16534_vm1 }
 0xf37   :  { %6528 = vmatpush.msrb.mxu2 %v8767_v48  ;;  %v8778_v48 = vld [vmem:[%s15868_s9 + $0x110] sm:$0xff] }
 0xf38   :  { %v6276_v46 = vpop.f32.mrf.mxu1  ;;  %8673 = vmatmul.msk.f32.gmra.mxu3 %vm5983_vm3, %v14970_v32 }
 0xf39   :  { %6529 = vmatpush.msrb.mxu2 %v8766_v44 }
 0xf3b   :  { %6530 = vmatpush.msrb.mxu2 %v8765_v53  ;;  %v8779_v53 = vld [vmem:[%s15868_s9 + $0x118] sm:$0xff] }
 0xf3d   :  { %6531 = vmatpush.msrb.mxu2 %v8764_v24  ;;  %v15176_v24 = vld [vmem:[%s15868_s9 + $0xb8] sm:$0xff] }
 0xf3e   :  { %8689 = vmatmul.msk.f32.gmra.mxu2 %vm16522_vm5, %v14727_v58  ;;  %vm16536_vm5 = vmmov %vm16534_vm1 }
 0xf3f   :  { %6532 = vmatpush.msrb.mxu2 %v8763_v41 }
 0xf40   :  { %v6279_v10 = vpop.f32.mrf.mxu1  ;;  %8674 = vmatmul.msk.f32.gmra.mxu3 %vm5983_vm3, %v14979_v28 }
 0xf41   :  { %6533 = vmatpush.msrb.mxu2 %v8762_v0 }
 0xf43   :  { %6534 = vmatpush.msrb.mxu2 %v8761_v56  ;;  %v8757_v56 = vld [vmem:[%s15868_s9 + $0xe8] sm:$0xff] }
 0xf45   :  { %6535 = vmatpush.msrb.mxu2 %v8760_v61 }
 0xf46   :  { %8690 = vmatmul.msk.f32.gmra.mxu2 %vm16523_vm4, %v14740_v16  ;;  %vm16537_vm4 = vcmask 130048  }
 0xf48   :  { %v6282_v7 = vpop.f32.mrf.mxu1  ;;  %8675 = vmatmul.msk.f32.gmra.mxu3 %vm5983_vm3, %v14988_v43 }
 0xf49   :  { %6309 = vmatpush.msrb.mxu3 %v6282_v7  ;;  %v15165_v7 = vld [vmem:[%s15868_s9 + $0xb0] sm:$0xff] }
 0xf4b   :  { %6310 = vmatpush.msrb.mxu3 %v6279_v10 }
 0xf4d   :  { %6311 = vmatpush.msrb.mxu3 %v6276_v46  ;;  %v15154_v46 = vld [vmem:[%s15868_s9 + $0xa8] sm:$0xff] }
 0xf4e   :  { %8691 = vmatmul.msk.f32.gmra.mxu2 %vm16524_vm14, %v14758_v18  ;;  %vm16538_vm14 = vmmov %vm16537_vm4 }
 0xf4f   :  { %6312 = vmatpush.msrb.mxu3 %v6273_v1  ;;  %v8776_v1 = vld [vmem:[%s15868_s9 + $0x100] sm:$0xff] }
 0xf50   :  { %v6449_v63 = vpop.f32.mrf.mxu1  ;;  %8712 = vmatmul.msk.f32.vlgmr.msrb.gmra.mxu3 %vm5983_vm3, %v15033_v29 }
 0xf56   :  { %8728 = vmatmul.msk.f32.vlgmr.msra.gmra.mxu2 %vm16384_vm0, %v14711_v34  ;;  %vm16539_vm0 = vmmov %vm16537_vm4 }
 0xf57   :  { %8796 = vmatpush.msk.msra.mxu2 %vm16525_vm11, %v9189_v55  ;;  %v8758_v55 = vld [vmem:[%s15868_s9 + $0xf0] sm:$0xff]  ;;  %vm16540_vm11 = vmmov %vm16539_vm0 }
 0xf58   :  { %v6452_v33 = vpop.f32.mrf.mxu1 }
 0xf5e   :  { %8729 = vmatmul.msk.f32.gmra.mxu2 %vm16526_vm13, %v14727_v58  ;;  %vm16541_vm13 = vmmov %vm16539_vm0 }
 0xf60   :  { %v6455_v60 = vpop.f32.mrf.mxu1 }
 0xf66   :  { %8730 = vmatmul.msk.f32.gmra.mxu2 %vm16527_vm2, %v14740_v16  ;;  %vm16542_vm2 = vmmov %vm16539_vm0 }
 0xf68   :  { %v6458_v21 = vpop.f32.mrf.mxu1 }
 0xf69   :  { %6485 = vmatpush.msra.mxu3 %v6458_v21 }
 0xf6b   :  { %6486 = vmatpush.msra.mxu3 %v6455_v60  ;;  %v8759_v60 = vld [vmem:[%s15868_s9 + $0xf8] sm:$0xff] }
 0xf6d   :  { %6487 = vmatpush.msra.mxu3 %v6452_v33 }
 0xf6e   :  { %8731 = vmatmul.msk.f32.gmra.mxu2 %vm16528_vm10, %v14758_v18  ;;  %vm16543_vm10 = vmmov %vm16539_vm0 }
 0xf6f   :  { %6488 = vmatpush.msra.mxu3 %v6449_v63  ;;  %v8756_v63 = vld [vmem:[%s15868_s9 + $0xe0] sm:$0xff] }
 0xf70   :  { %v6625_v5 = vpop.f32.mrf.mxu1 }
 0xf76   :  { %8768 = vmatmul.msk.f32.vlgmr.msrb.gmra.mxu2 %vm16529_vm15, %v14711_v34  ;;  %vm16544_vm15 = vmmov %vm16539_vm0 }
 0xf78   :  { %v6628_v26 = vpop.f32.mrf.mxu1 }
 0xf7e   :  { %8769 = vmatmul.msk.f32.gmra.mxu2 %vm16530_vm7, %v14727_v58  ;;  %vm16545_vm7 = vmmov %vm16539_vm0 }
 0xf80   :  { %v6631_v62 = vpop.f32.mrf.mxu1 }
 0xf86   :  { %8770 = vmatmul.msk.f32.gmra.mxu2 %vm16531_vm12, %v14740_v16  ;;  %v15058_v16 = vld [vmem:[%s15868_s9 + $0x88] sm:$0xff]  ;;  %vm16546_vm12 = vmmov %vm16539_vm0 }
 0xf87   :  { %8713 = vmatmul.msk.f32.gmra.mxu3 %vm5983_vm3, %v15058_v16 }
 0xf88   :  { %v6634_v40 = vpop.f32.mrf.mxu1 }
 0xf89   :  { %6661 = vmatpush.msrb.mxu3 %v6634_v40 }
 0xf8b   :  { %6662 = vmatpush.msrb.mxu3 %v6631_v62  ;;  %v8818_v62 = vld [vmem:[%s15870_s20 + $0x18] sm:$0xff] }
 0xf8d   :  { %6663 = vmatpush.msrb.mxu3 %v6628_v26  ;;  %v15201_v21 = vpop.f32.mrf.mxu0 }
 0xf8e   :  { %8771 = vmatmul.msk.f32.gmra.mxu2 %vm16532_vm6, %v14758_v18  ;;  %vm16547_vm6 = vmmov %vm16539_vm0 }
 0xf8f   :  { %6664 = vmatpush.msrb.mxu3 %v6625_v5 }
 0xf90   :  { %8714 = vmatmul.msk.f32.gmra.mxu3 %vm5983_vm3, %v15069_v15 }
 0xf95   :  { %v15206_v26 = vpop.f32.mrf.mxu0 }
 0xf96   :  { %8797 = vmatmul.msk.f32.vlgmr.msra.gmra.mxu2 %vm16533_vm9, %v6700_v37  ;;  %v8817_v37 = vld [vmem:[%s15870_s20 + $0x10] sm:$0xff]  ;;  %vm16550_vm9 = vmmov %vm16539_vm0 }
 0xf98   :  { %8715 = vmatmul.msk.f32.gmra.mxu3 %vm5983_vm3, %v15080_v3 }
 0xf99   :  { %v15047_v23 = vpop.f32.mrf.mxu2 }
 0xf9e   :  { %8798 = vmatmul.msk.f32.gmra.mxu2 %vm16534_vm1, %v6701_v22  ;;  %vm16553_vm1 = vcmask 523264  }
 0xfa0   :  { %8752 = vmatmul.msk.f32.vlgmr.msra.gmra.mxu3 %vm5983_vm3, %v8736_v54 }
 0xfa1   :  { %v15049_v8 = vpop.f32.mrf.mxu2  ;;  %6863 = vmatpush.msra.mxu3 %v8818_v62  ;;  %v6749_v62 = vld [vmem:[%s15871_s19 + $0x20] sm:$0xff] }
 0xfa3   :  { %6864 = vmatpush.msra.mxu3 %v8817_v37  ;;  %v8813_v37 = vld [vmem:[%s15871_s19 + $0x60] sm:$0xff] }
 0xfa6   :  { %8799 = vmatmul.msk.f32.gmra.mxu2 %vm16535_vm8, %v6702_v39  ;;  %vm16554_vm8 = vmmov %vm16553_vm1 }
 0xfa8   :  { %8753 = vmatmul.msk.f32.gmra.mxu3 %vm5983_vm3, %v8737_v49 }
 0xfa9   :  { %v15051_v34 = vpop.f32.mrf.mxu2 }
 0xfae   :  { %8800 = vmatmul.msk.f32.gmra.mxu2 %vm16536_vm5, %v6703_v59  ;;  %vm16555_vm5 = vmmov %vm16553_vm1 }
 0xfb0   :  { %8754 = vmatmul.msk.f32.gmra.mxu3 %vm5983_vm3, %v8738_v36  ;;  %v8844_v36 = vld [vmem:[%s15870_s20 + $0x28] sm:$0xff] }
 0xfb1   :  { %v15053_v35 = vpop.f32.mrf.mxu2 }
 0xfb3   :  { %v15184_v0 = vpop.f32.mrf.mxu3 }
 0xfb8   :  { %8755 = vmatmul.msk.f32.gmra.mxu3 %vm5983_vm3, %v8739_v20 }
 0xfb9   :  { %v6185_v58 = vpop.f32.mrf.mxu2 }
 0xfbb   :  { %v15190_v61 = vpop.f32.mrf.mxu3 }
 0xfc0   :  { %8792 = vmatmul.msk.f32.vlgmr.msrb.gmra.mxu3 %vm5983_vm3, %v8776_v1 }
 0xfc1   :  { %v6188_v18 = vpop.f32.mrf.mxu2  ;;  %6991 = vmatpush.msrb.mxu3 %v8844_v36  ;;  %v8861_v36 = vld [vmem:[%s15871_s19 + $0xe0] sm:$0xff] }
 0xfc3   :  { %v15196_v33 = vpop.f32.mrf.mxu3 }
 0xfc8   :  { %8793 = vmatmul.msk.f32.gmra.mxu3 %vm5983_vm3, %v8777_v12  ;;  %v8816_v12 = vld [vmem:[%s15871_s19 + $0x78] sm:$0xff] }
 0xfc9   :  { %v6191_v42 = vpop.f32.mrf.mxu2  ;;  %6886 = vmatpush.msrb.mxu2 %v8816_v12  ;;  %v8860_v12 = vld [vmem:[%s15871_s19 + $0xd8] sm:$0xff] }
 0xfcb   :  { %v15204_v5 = vpop.f32.mrf.mxu3 }
 0xfd0   :  { %8794 = vmatmul.msk.f32.gmra.mxu3 %vm5983_vm3, %v8778_v48 }
 0xfd1   :  { %v6194_v6 = vpop.f32.mrf.mxu2 }
 0xfd2   :  { %6221 = vmatpush.msrb.mxu0 %v6194_v6 }
 0xfd3   :  { %v15211_v40 = vpop.f32.mrf.mxu3 }
 0xfd4   :  { %6222 = vmatpush.msrb.mxu0 %v6191_v42 }
 0xfd6   :  { %6223 = vmatpush.msrb.mxu0 %v6188_v18  ;;  %v15220_v18 = vpop.f32.mrf.mxu0 }
 0xfd8   :  { %6224 = vmatpush.msrb.mxu0 %v6185_v58  ;;  %8795 = vmatmul.msk.f32.gmra.mxu3 %vm5983_vm3, %v8779_v53  ;;  %v8815_v53 = vld [vmem:[%s15871_s19 + $0x70] sm:$0xff] }
 0xfd9   :  { %8692 = vmatmul.msk.f32.vlgmr.msrb.gmra.mxu0 %vm5983_vm3, %v15095_v52  ;;  %v6361_v30 = vpop.f32.mrf.mxu2  ;;  %6887 = vmatpush.msrb.mxu2 %v8815_v53  ;;  %v8811_v53 = vld [vmem:[%s15871_s19 + $0x50] sm:$0xff] }
 0xfde   :  { %v15228_v39 = vpop.f32.mrf.mxu0 }
 0xfe1   :  { %8693 = vmatmul.msk.f32.gmra.mxu0 %vm5983_vm3, %v15110_v45  ;;  %v6364_v11 = vpop.f32.mrf.mxu2 }
 0xfe9   :  { %8694 = vmatmul.msk.f32.gmra.mxu0 %vm5983_vm3, %v15121_v27  ;;  %v6367_v31 = vpop.f32.mrf.mxu2 }
 0xff1   :  { %8695 = vmatmul.msk.f32.gmra.mxu0 %vm5983_vm3, %v15132_v17  ;;  %v6370_v13 = vpop.f32.mrf.mxu2 }
 0xff2   :  { %6397 = vmatpush.msra.mxu0 %v6370_v13 }
 0xff4   :  { %6398 = vmatpush.msra.mxu0 %v6367_v31  ;;  %v8843_v31 = vld [vmem:[%s15870_s20 + $0x20] sm:$0xff] }
 0xff5   :  { %6992 = vmatpush.msrb.mxu3 %v8843_v31  ;;  %v6748_v31 = vld [vmem:[%s15871_s19 + $0x18] sm:$0xff] }
 0xff6   :  { %6399 = vmatpush.msra.mxu0 %v6364_v11 }
 0xff8   :  { %6400 = vmatpush.msra.mxu0 %v6361_v30 }
 0xff9   :  { %8732 = vmatmul.msk.f32.vlgmr.msra.gmra.mxu0 %vm5983_vm3, %v15143_v19  ;;  %v6537_v14 = vpop.f32.mrf.mxu2 }
0x1001   :  { %8733 = vmatmul.msk.f32.gmra.mxu0 %vm5983_vm3, %v15154_v46  ;;  %v6540_v10 = vpop.f32.mrf.mxu2 }
0x1009   :  { %8734 = vmatmul.msk.f32.gmra.mxu0 %vm5983_vm3, %v15165_v7  ;;  %v6543_v44 = vpop.f32.mrf.mxu2 }
0x100a   :  { %v15224_v42 = vpop.f32.mrf.mxu3 }
0x1011   :  { %8735 = vmatmul.msk.f32.gmra.mxu0 %vm5983_vm3, %v15176_v24  ;;  %v6546_v41 = vpop.f32.mrf.mxu2 }
0x1012   :  { %6573 = vmatpush.msrb.mxu0 %v6546_v41  ;;  %v8863_v41 = vld [vmem:[%s15871_s19 + $0xf0] sm:$0xff] }
0x1013   :  { %v15234_v54 = vpop.f32.mrf.mxu3 }
0x1014   :  { %6574 = vmatpush.msrb.mxu0 %v6543_v44  ;;  %v6751_v44 = vld [vmem:[%s15871_s19 + $0x30] sm:$0xff] }
0x1016   :  { %6575 = vmatpush.msrb.mxu0 %v6540_v10  ;;  %v8864_v10 = vld [vmem:[%s15871_s19 + $0xf8] sm:$0xff] }
0x1018   :  { %6576 = vmatpush.msrb.mxu0 %v6537_v14  ;;  %v6752_v14 = vld [vmem:[%s15871_s19 + $0x38] sm:$0xff] }
0x1019   :  { %8772 = vmatmul.msk.f32.vlgmr.msrb.gmra.mxu0 %vm5983_vm3, %v8756_v63  ;;  %v15213_v58 = vpop.f32.mrf.mxu2  ;;  %6816 = vmatpush.msrb.mxu1 %v6752_v14  ;;  %v8812_v14 = vld [vmem:[%s15871_s19 + $0x58] sm:$0xff] }
0x101a   :  { %8819 = vmatmul.msk.f32.vlgmr.msra.gmra.mxu3 %vm16537_vm4, %v15213_v58  ;;  %vm16558_vm4 = vmmov %vm16553_vm1 }
0x101b   :  { %v15244_v11 = vpop.f32.mrf.mxu3  ;;  %7117 = vmatpush.msra.mxu3 %v8864_v10  ;;  %6817 = vmatpush.msrb.mxu1 %v6751_v44  ;;  %v6747_v44 = vld [vmem:[%s15871_s19 + $0x10] sm:$0xff] }
0x101d   :  { %7118 = vmatpush.msra.mxu3 %v8863_v41  ;;  %v8859_v41 = vld [vmem:[%s15871_s19 + $0xd0] sm:$0xff] }
0x1021   :  { %8773 = vmatmul.msk.f32.gmra.mxu0 %vm5983_vm3, %v8757_v56  ;;  %v15222_v22 = vpop.f32.mrf.mxu2  ;;  %v6750_v56 = vld [vmem:[%s15871_s19 + $0x28] sm:$0xff] }
0x1022   :  { %8820 = vmatmul.msk.f32.gmra.mxu3 %vm16538_vm14, %v15222_v22  ;;  %6818 = vmatpush.msrb.mxu1 %v6750_v56  ;;  %vm16559_vm14 = vmmov %vm16553_vm1 }
0x1023   :  { %v15256_v13 = vpop.f32.mrf.mxu3 }
0x1024   :  { %6819 = vmatpush.msrb.mxu1 %v6749_v62  ;;  %v8810_v62 = vld [vmem:[%s15871_s19 + $0x48] sm:$0xff] }
0x1026   :  { %6820 = vmatpush.msrb.mxu1 %v6748_v31  ;;  %v6745_v31 = vld [vmem:[%s15871_s19] sm:$0xff] }
0x1028   :  { %6821 = vmatpush.msrb.mxu1 %v6747_v44 }
0x1029   :  { %8774 = vmatmul.msk.f32.gmra.mxu0 %vm5983_vm3, %v8758_v55  ;;  %v15230_v6 = vpop.f32.mrf.mxu2  ;;  %v8814_v55 = vld [vmem:[%s15871_s19 + $0x68] sm:$0xff] }
0x102a   :  { %8821 = vmatmul.msk.f32.gmra.mxu3 %vm16539_vm0, %v15230_v6  ;;  %6888 = vmatpush.msrb.mxu2 %v8814_v55  ;;  %v6754_v55 = vld [vmem:[%s15870_s20 + $0x8] sm:$0xff]  ;;  %vm16560_vm0 = vmmov %vm16553_vm1 }
0x102b   :  { %v15271_v48 = vpop.f32.mrf.mxu3  ;;  %6781 = vmatpush.msra.mxu0 %v6754_v55 }
0x102c   :  { %6889 = vmatpush.msrb.mxu2 %v8813_v37  ;;  %v8858_v37 = vld [vmem:[%s15871_s19 + $0xc8] sm:$0xff] }
0x102e   :  { %6890 = vmatpush.msrb.mxu2 %v8812_v14  ;;  %v8809_v14 = vld [vmem:[%s15871_s19 + $0x40] sm:$0xff] }
0x1030   :  { %6891 = vmatpush.msrb.mxu2 %v8811_v53 }
0x1031   :  { %8775 = vmatmul.msk.f32.gmra.mxu0 %vm5983_vm3, %v8759_v60  ;;  %v15238_v30 = vpop.f32.mrf.mxu2  ;;  %v8862_v60 = vld [vmem:[%s15871_s19 + $0xe8] sm:$0xff] }
0x1032   :  { %8822 = vmatmul.msk.f32.gmra.mxu3 %vm16540_vm11, %v15238_v30  ;;  %6892 = vmatpush.msrb.mxu2 %v8810_v62  ;;  %vm16563_vm11 = vmmov %vm16560_vm0 }
0x1033   :  { %7119 = vmatpush.msra.mxu3 %v8862_v60  ;;  %v15311_v10 = vpop.f32.mrf.mxu3  ;;  %v6746_v60 = vld [vmem:[%s15871_s19 + $0x8] sm:$0xff] }
0x1034   :  { %6822 = vmatpush.msrb.mxu1 %v6746_v60  ;;  %6893 = vmatpush.msrb.mxu2 %v8809_v14 }
0x1035   :  { %7120 = vmatpush.msra.mxu3 %v8861_v36  ;;  %v6753_v36 = vld [vmem:[%s15870_s20] sm:$0xff] }
0x1036   :  { %6782 = vmatpush.msra.mxu0 %v6753_v36  ;;  %6823 = vmatpush.msrb.mxu1 %v6745_v31 }
0x1037   :  { %7121 = vmatpush.msra.mxu3 %v8860_v12  ;;  %v8857_v12 = vld [vmem:[%s15871_s19 + $0xc0] sm:$0xff] }
0x1039   :  { %7122 = vmatpush.msra.mxu3 %v8859_v41  ;;  %8801 = vmatmul.msk.f32.vlgmr.msra.gmra.mxu0 %vm16545_vm7, %v15213_v58  ;;  %v6055_v41 = vadd.f32 %v15201_v21, %v15047_v23  ;;  %vm16568_vm7 = vmmov %vm16560_vm0 }
0x103a   :  { %8845 = vmatmul.msk.f32.vlgmr.msrb.gmra.mxu3 %vm16541_vm13, %v15213_v58  ;;  %vm16564_vm13 = vmmov %vm16560_vm0 }
0x103b   :  { %7123 = vmatpush.msra.mxu3 %v8858_v37  ;;  %v15350_v53 = vpop.f32.mrf.mxu3  ;;  %v6150_v55 = vadd.f32 %v15184_v0, %v6055_v41  ;;  %v6058_v37 = vadd.f32 %v15206_v26, %v15049_v8  ;;  %v8842_v0 = vld [vmem:[%s15871_s19 + $0xb8] sm:$0xff]  ;;  %v8841_v8 = vld [vmem:[%s15871_s19 + $0xb0] sm:$0xff] }
0x103c   :  { %7014 = vmatpush.msra.mxu2 %v8842_v0 }
0x103d   :  { %7124 = vmatpush.msra.mxu3 %v8857_v12  ;;  %v6151_v14 = vadd.f32 %v15190_v61, %v6058_v37  ;;  %v6061_v61 = vadd.f32 %v15220_v18, %v15051_v34  ;;  %v16549_v37 = vld [vmem:[#allocation12_spill] sm:$0xff]  ;;  %v15389_v18 = vld [vmem:[%s15864_s15] ss:$0 sm:$0xff] }
0x103e   :  { %7015 = vmatpush.msra.mxu2 %v8841_v8 }
0x1041   :  { %8802 = vmatmul.msk.f32.gmra.mxu0 %vm16546_vm12, %v15222_v22  ;;  %vm16569_vm12 = vmmov %vm16560_vm0 }
0x1042   :  { %8846 = vmatmul.msk.f32.gmra.mxu3 %vm16542_vm2, %v15222_v22  ;;  %vm16565_vm2 = vmmov %vm16560_vm0 }
0x1043   :  { %v6666_v31 = vpop.f32.mrf.mxu3 }
0x1049   :  { %8803 = vmatmul.msk.f32.gmra.mxu0 %vm16547_vm6, %v15230_v6  ;;  %vm16570_vm6 = vmmov %vm16560_vm0 }
0x104a   :  { %8847 = vmatmul.msk.f32.gmra.mxu3 %vm16543_vm10, %v15230_v6  ;;  %vm16566_vm10 = vmmov %vm16560_vm0 }
0x1051   :  { %8804 = vmatmul.msk.f32.gmra.mxu0 %vm16550_vm9, %v15238_v30  ;;  %vm16571_vm9 = vmmov %vm16560_vm0 }
0x1052   :  { %8848 = vmatmul.msk.f32.gmra.mxu3 %vm16544_vm15, %v15238_v30  ;;  %vm16567_vm15 = vmmov %vm16560_vm0 }
0x1056   :  { %v15236_v59 = vpop.f32.mrf.mxu0 }
0x1057   :  { %v6238_v60 = vadd.f32 %v15236_v59, %v6150_v55  ;;  %v8839_v55 = vld [vmem:[%s15871_s19 + $0xa0] sm:$0xff] }
0x1059   :  { %v6326_v36 = vadd.f32 %v15211_v40, %v6238_v60  ;;  %v16548_v60 = vld [vmem:[#allocation27_spill] sm:$0xff] }
0x105a   :  { %v3291_v34 = vadd.f32 %v16549_v37, %v16548_v60 }
0x105e   :  { %v15242_v49 = vpop.f32.mrf.mxu0 }
0x105f   :  { %v6239_v23 = vadd.f32 %v15242_v49, %v6151_v14  ;;  %v8840_v49 = vld [vmem:[%s15871_s19 + $0xa8] sm:$0xff] }
0x1060   :  { %7016 = vmatpush.msra.mxu2 %v8840_v49 }
0x1061   :  { %v6327_v26 = vadd.f32 %v15224_v42, %v6239_v23  ;;  %v6669_v42 = vpop.f32.mrf.mxu3  ;;  %v3306_v23 = vadd.f32 %v15389_v18, %v3291_v34 }
0x1062   :  { %7017 = vmatpush.msra.mxu2 %v8839_v55  ;;  %v16552_v55 = vld [vmem:[#allocation60_spill] sm:$0xff] }
0x1066   :  { %v15254_v20 = vpop.f32.mrf.mxu0 }
0x106e   :  { %v15260_v1 = vpop.f32.mrf.mxu0 }
0x1076   :  { %v6402_v63 = vpop.f32.mrf.mxu0 }
0x1077   :  { %v6414_v12 = vadd.f32 %v6402_v63, %v6326_v36  ;;  %v6152_v63 = vadd.f32 %v15196_v33, %v6061_v61  ;;  %v6691_v33 = vstv %s15872_s22 }
0x1079   :  { %v6502_v21 = vadd.f32 %v15256_v13, %v6414_v12  ;;  %v6240_v36 = vadd.f32 %v15254_v20, %v6152_v63 }
0x107b   :  { %v6328_v8 = vadd.f32 %v15234_v54, %v6240_v36 }
0x107e   :  { %v6405_v56 = vpop.f32.mrf.mxu0 }
0x107f   :  { %v6415_v13 = vadd.f32 %v6405_v56, %v6327_v26  ;;  %v8838_v56 = vld [vmem:[%s15871_s19 + $0x98] sm:$0xff] }
0x1080   :  { %7018 = vmatpush.msra.mxu2 %v8838_v56 }
0x1081   :  { %v6503_v12 = vadd.f32 %v15271_v48, %v6415_v13  ;;  %v8835_v13 = vld [vmem:[%s15871_s19 + $0x80] sm:$0xff] }
0x1086   :  { %v6408_v44 = vpop.f32.mrf.mxu0 }
0x1087   :  { %v6416_v48 = vadd.f32 %v6408_v44, %v6328_v8 }
0x1089   :  { %v6504_v54 = vadd.f32 %v15311_v10, %v6416_v48  ;;  %v16561_v48 = vld [vmem:[#allocation50_spill] sm:$0xff] }
0x108e   :  { %v15358_v62 = vpop.f32.mrf.mxu0 }
0x1096   :  { %v6578_v59 = vpop.f32.mrf.mxu0 }
0x1097   :  { %v6590_v40 = vadd.f32 %v6578_v59, %v6502_v21  ;;  %v8836_v21 = vld [vmem:[%s15871_s19 + $0x88] sm:$0xff]  ;;  %v6064_v59 = vadd.f32 %v15228_v39, %v15053_v35 }
0x1099   :  { %v6678_v41 = vadd.f32 %v6666_v31, %v6590_v40  ;;  %v8837_v31 = vld [vmem:[%s15871_s19 + $0x90] sm:$0xff]  ;;  %v6153_v40 = vadd.f32 %v15204_v5, %v6064_v59  ;;  %v6672_v5 = vpop.f32.mrf.mxu3 }
0x109a   :  { %7019 = vmatpush.msra.mxu2 %v8837_v31 }
0x109b   :  { %v6682_v14 = vmul.f32 0.2, %v6678_v41  ;;  %v6241_v35 = vadd.f32 %v15260_v1, %v6153_v40 }
0x109c   :  { %7020 = vmatpush.msra.mxu2 %v8836_v21 }
0x109d   :  { %v6686_v20 = vmax.f32 %v6678_v41, %v6682_v14  ;;  %v16551_v41 = vld [vmem:[#allocation15_spill] sm:$0xff]  ;;  %v6329_v1 = vadd.f32 %v15244_v11, %v6241_v35 }
0x109e   :  { %v6581_v0 = vpop.f32.mrf.mxu0  ;;  %v3294_v60 = vadd.f32 %v16552_v55, %v16551_v41  ;;  %7021 = vmatpush.msra.mxu2 %v8835_v13 }
0x109f   :  { %v6692_v61 = vmul.f32 %v6691_v33, %v6686_v20  ;;  %v6591_v26 = vadd.f32 %v6581_v0, %v6503_v12  ;;  %v6417_v14 = vadd.f32 %v15358_v62, %v6329_v1  ;;  %v16556_v12 = vld [vmem:[#allocation68_spill] sm:$0xff]  ;;  %v16557_v20 = vld [vmem:[#allocation42_spill] sm:$0xff] }
0x10a0   :  { %v3307_v34 = vadd.f32 %v15389_v18, %v3294_v60 }
0x10a1   :  { %v15412_v49 = vadd.f32 %v6692_v61, %v3306_v23  ;;  %v6679_v63 = vadd.f32 %v6669_v42, %v6591_v26  ;;  %v3297_v23 = vadd.f32 %v16557_v20, %v16556_v12  ;;  %v6505_v11 = vadd.f32 %v15350_v53, %v6417_v14  ;;  %v6675_v21 = vpop.f32.mrf.mxu3 }
0x10a3   :  { %v6683_v39 = vmul.f32 0.2, %v6679_v63  ;;  %8805 = vmatmul.msk.f32.vlgmr.msrb.gmra.mxu1 %vm16553_vm1, %v15412_v49  ;;  %8823 = vmatmul.msk.f32.vlgmr.msrb.gmra.mxu2 %vm16554_vm8, %v15412_v49  ;;  %v3308_v59 = vadd.f32 %v15389_v18, %v3297_v23  ;;  %vm16572_vm1 = vmmov %vm16560_vm0  ;;  %vm16573_vm8 = vcmask 130048  }
0x10a4   :  { %8871 = vmatmul.msk.f32.vlgmr.msra.gmra.mxu3 %vm16555_vm5, %v15412_v49  ;;  %vm16574_vm5 = vmmov %vm16573_vm8 }
0x10a5   :  { %v6687_v44 = vmax.f32 %v6679_v63, %v6683_v39  ;;  %v16562_v63 = vld [vmem:[#allocation13_spill] sm:$0xff] }
0x10a6   :  { %v6584_v37 = vpop.f32.mrf.mxu0  ;;  %v3300_v13 = vadd.f32 %v16562_v63, %v16561_v48 }
0x10a7   :  { %v6693_v42 = vmul.f32 %v6691_v33, %v6687_v44  ;;  %v6592_v36 = vadd.f32 %v6584_v37, %v6504_v54 }
0x10a8   :  { %v3309_v55 = vadd.f32 %v15389_v18, %v3300_v13 }
0x10a9   :  { %v15430_v56 = vadd.f32 %v6693_v42, %v3307_v34  ;;  %v6680_v31 = vadd.f32 %v6672_v5, %v6592_v36  ;;  %v6866_v18 = vpop.f32.mrf.mxu3 }
0x10ab   :  { %v6684_v0 = vmul.f32 0.2, %v6680_v31  ;;  %8806 = vmatmul.msk.f32.gmra.mxu1 %vm16558_vm4, %v15430_v56  ;;  %8824 = vmatmul.msk.f32.gmra.mxu2 %vm16559_vm14, %v15430_v56  ;;  %vm16575_vm4 = vmmov %vm16574_vm5 }
0x10ac   :  { %8872 = vmatmul.msk.f32.gmra.mxu3 %vm16560_vm0, %v15430_v56  ;;  %vm16576_vm14 = vmmov %vm16575_vm4 }
0x10ad   :  { %v6688_v10 = vmax.f32 %v6680_v31, %v6684_v0 }
0x10ae   :  { %v6587_v62 = vpop.f32.mrf.mxu0 }
0x10af   :  { %v6694_v8 = vmul.f32 %v6691_v33, %v6688_v10  ;;  %v6593_v61 = vadd.f32 %v6587_v62, %v6505_v11 }
0x10b1   :  { %v15442_v26 = vadd.f32 %v6694_v8, %v3308_v59  ;;  %v6681_v40 = vadd.f32 %v6675_v21, %v6593_v61  ;;  %v6869_v5 = vpop.f32.mrf.mxu3  ;;  %v8866_v8 = vld [vmem:[%s15870_s20 + $0x38] sm:$0xff] }
0x10b3   :  { %v6685_v41 = vmul.f32 0.2, %v6681_v40  ;;  %8807 = vmatmul.msk.f32.gmra.mxu1 %vm16563_vm11, %v15442_v26  ;;  %8825 = vmatmul.msk.f32.gmra.mxu2 %vm16564_vm13, %v15442_v26  ;;  %vm16577_vm11 = vmmov %vm16575_vm4 }
0x10b4   :  { %8873 = vmatmul.msk.f32.gmra.mxu3 %vm16565_vm2, %v15442_v26  ;;  %vm16578_vm13 = vmmov %vm16560_vm0 }
0x10b5   :  { %v6689_v53 = vmax.f32 %v6681_v40, %v6685_v41  ;;  %v8865_v40 = vld [vmem:[%s15870_s20 + $0x30] sm:$0xff]  ;;  %vm16579_vm2 = vmmov %vm16575_vm4 }
0x10b7   :  { %v6695_v60 = vmul.f32 %v6691_v33, %v6689_v53  ;;  %v6784_v33 = vpop.f32.mrf.mxu0  ;;  %v8886_v53 = vld [vmem:[%s15871_s19 + $0x138] sm:$0xff] }
0x10b9   :  { %v15453_v35 = vadd.f32 %v6695_v60, %v3309_v55  ;;  %v6872_v34 = vpop.f32.mrf.mxu3  ;;  %v8885_v55 = vld [vmem:[%s15871_s19 + $0x130] sm:$0xff] }
0x10bb   :  { %8808 = vmatmul.msk.f32.gmra.mxu1 %vm16566_vm10, %v15453_v35  ;;  %8826 = vmatmul.msk.f32.gmra.mxu2 %vm16567_vm15, %v15453_v35  ;;  %vm16580_vm10 = vmmov %vm16560_vm0 }
0x10bc   :  { %8874 = vmatmul.msk.f32.gmra.mxu3 %vm16568_vm7, %v15453_v35  ;;  %vm16581_vm15 = vmmov %vm16579_vm2 }
0x10bd   :  { %vm16582_vm7 = vmmov %vm16560_vm0 }
0x10bf   :  { %v6787_v54 = vpop.f32.mrf.mxu0 }
0x10c1   :  { %v6875_v14 = vpop.f32.mrf.mxu3 }
0x10c3   :  { %8849 = vmatmul.msk.f32.vlgmr.msra.gmra.mxu2 %vm16569_vm12, %v15412_v49  ;;  %vm16583_vm12 = vmmov %vm16579_vm2 }
0x10c7   :  { %v6790_v1 = vpop.f32.mrf.mxu0 }
0x10c9   :  { %v6994_v59 = vpop.f32.mrf.mxu3 }
0x10cb   :  { %8850 = vmatmul.msk.f32.gmra.mxu2 %vm16570_vm6, %v15430_v56  ;;  %vm16584_vm6 = vmmov %vm16560_vm0 }
0x10cf   :  { %v6793_v12 = vpop.f32.mrf.mxu0 }
0x10d1   :  { %v6997_v41 = vpop.f32.mrf.mxu3 }
0x10d3   :  { %8851 = vmatmul.msk.f32.gmra.mxu2 %vm16571_vm9, %v15442_v26  ;;  %vm16585_vm9 = vmmov %vm16560_vm0 }
0x10db   :  { %8852 = vmatmul.msk.f32.gmra.mxu2 %vm16572_vm1, %v15453_v35  ;;  %vm16586_vm1 = vmmov %vm16560_vm0 }
0x1120   :  { %v6825_v39 = vpop.f32.mrf.mxu1 }
0x1121   :  { %v6826_v62 = vadd.f32 %v6825_v39, %v6784_v33 }
0x1126   :  { %v6895_v44 = vpop.f32.mrf.mxu2 }
0x1127   :  { %v6896_v63 = vadd.f32 %v6895_v44, %v6866_v18  ;;  %v8881_v18 = vld [vmem:[%s15871_s19 + $0x110] sm:$0xff] }
0x1128   :  { %v6828_v37 = vpop.f32.mrf.mxu1 }
0x1129   :  { %v6829_v11 = vadd.f32 %v6828_v37, %v6787_v54 }
0x112e   :  { %v6898_v42 = vpop.f32.mrf.mxu2 }
0x112f   :  { %v6899_v48 = vadd.f32 %v6898_v42, %v6869_v5  ;;  %v8904_v42 = vld [vmem:[%s15871_s19 + $0x158] sm:$0xff] }
0x1130   :  { %v6831_v36 = vpop.f32.mrf.mxu1 }
0x1131   :  { %v6832_v0 = vadd.f32 %v6831_v36, %v6790_v1  ;;  %v8907_v1 = vld [vmem:[%s15871_s19 + $0x170] sm:$0xff] }
0x1132   :  { %v8903_v36 = vld [vmem:[%s15871_s19 + $0x150] sm:$0xff] }
0x1136   :  { %v6901_v31 = vpop.f32.mrf.mxu2 }
0x1137   :  { %v6902_v61 = vadd.f32 %v6901_v31, %v6872_v34  ;;  %v8888_v34 = vld [vmem:[%s15870_s20 + $0x48] sm:$0xff] }
0x1138   :  { %v6834_v20 = vpop.f32.mrf.mxu1 }
0x1139   :  { %v6835_v23 = vadd.f32 %v6834_v20, %v6793_v12 }
0x113b   :  { %6948 = vmatpush.msra.mxu1 %v6835_v23 }
0x113d   :  { %6949 = vmatpush.msra.mxu1 %v6832_v0 }
0x113e   :  { %v6904_v10 = vpop.f32.mrf.mxu2 }
0x113f   :  { %v6905_v21 = vadd.f32 %v6904_v10, %v6875_v14  ;;  %6950 = vmatpush.msra.mxu1 %v6829_v11  ;;  %v8902_v14 = vld [vmem:[%s15871_s19 + $0x148] sm:$0xff] }
0x1141   :  { %6919 = vmatpush.msrb.mxu0 %v6905_v21  ;;  %6951 = vmatpush.msra.mxu1 %v6826_v62 }
0x1142   :  { %8831 = vmatmul.msk.f32.vlgmr.msra.gmra.mxu1 %vm5983_vm3, %v14859_v2 }
0x1143   :  { %6920 = vmatpush.msrb.mxu0 %v6902_v61  ;;  %7094 = vmatpush.msrb.mxu1 %v8866_v8 }
0x1145   :  { %6921 = vmatpush.msrb.mxu0 %v6899_v48  ;;  %7095 = vmatpush.msrb.mxu1 %v8865_v40 }
0x1146   :  { %v7023_v13 = vpop.f32.mrf.mxu2 }
0x1147   :  { %6922 = vmatpush.msrb.mxu0 %v6896_v63  ;;  %7220 = vmatpush.msra.mxu1 %v8886_v53  ;;  %v7024_v37 = vadd.f32 %v7023_v13, %v6994_v59 }
0x1148   :  { %8827 = vmatmul.msk.f32.vlgmr.msrb.gmra.mxu0 %vm5983_vm3, %v14866_v4  ;;  %v7000_v4 = vpop.f32.mrf.mxu3 }
0x1149   :  { %7221 = vmatpush.msra.mxu1 %v8885_v55 }
0x114a   :  { %8832 = vmatmul.msk.f32.gmra.mxu1 %vm5983_vm3, %v14874_v57  ;;  %v8884_v57 = vld [vmem:[%s15871_s19 + $0x128] sm:$0xff] }
0x114b   :  { %7222 = vmatpush.msra.mxu1 %v8884_v57 }
0x114e   :  { %v7026_v2 = vpop.f32.mrf.mxu2 }
0x114f   :  { %v7027_v44 = vadd.f32 %v7026_v2, %v6997_v41 }
0x1150   :  { %8828 = vmatmul.msk.f32.gmra.mxu0 %vm5983_vm3, %v14892_v38  ;;  %v8883_v38 = vld [vmem:[%s15871_s19 + $0x120] sm:$0xff]  ;;  %v7003_v33 = vpop.f32.mrf.mxu3 }
0x1151   :  { %7223 = vmatpush.msra.mxu1 %v8883_v38 }
0x1152   :  { %8833 = vmatmul.msk.f32.gmra.mxu1 %vm5983_vm3, %v14900_v9  ;;  %v8882_v9 = vld [vmem:[%s15871_s19 + $0x118] sm:$0xff] }
0x1153   :  { %7224 = vmatpush.msra.mxu1 %v8882_v9 }
0x1155   :  { %7225 = vmatpush.msra.mxu1 %v8881_v18 }
0x1156   :  { %v7029_v60 = vpop.f32.mrf.mxu2 }
0x1157   :  { %v7030_v54 = vadd.f32 %v7029_v60, %v7000_v4 }
0x1158   :  { %8829 = vmatmul.msk.f32.gmra.mxu0 %vm5983_vm3, %v14918_v47  ;;  %v8880_v47 = vld [vmem:[%s15871_s19 + $0x108] sm:$0xff]  ;;  %v7126_v8 = vpop.f32.mrf.mxu3 }
0x1159   :  { %7226 = vmatpush.msra.mxu1 %v8880_v47 }
0x115a   :  { %8834 = vmatmul.msk.f32.gmra.mxu1 %vm5983_vm3, %v14923_v25  ;;  %v8879_v25 = vld [vmem:[%s15871_s19 + $0x100] sm:$0xff] }
0x115b   :  { %7227 = vmatpush.msra.mxu1 %v8879_v25 }
0x115e   :  { %v7032_v39 = vpop.f32.mrf.mxu2 }
0x115f   :  { %v7033_v5 = vadd.f32 %v7032_v39, %v7003_v33 }
0x1160   :  { %8830 = vmatmul.msk.f32.gmra.mxu0 %vm5983_vm3, %v14941_v51  ;;  %v8887_v51 = vld [vmem:[%s15870_s20 + $0x40] sm:$0xff]  ;;  %v7129_v63 = vpop.f32.mrf.mxu3 }
0x1161   :  { %7047 = vmatpush.msra.mxu0 %v7033_v5 }
0x1162   :  { %8867 = vmatmul.msk.f32.vlgmr.msrb.gmra.mxu1 %vm16573_vm8, %v15213_v58  ;;  %vm16587_vm8 = vmmov %vm16560_vm0 }
0x1163   :  { %7048 = vmatpush.msra.mxu0 %v7030_v54 }
0x1165   :  { %7049 = vmatpush.msra.mxu0 %v7027_v44 }
0x1167   :  { %7050 = vmatpush.msra.mxu0 %v7024_v37  ;;  %v8910_v37 = vld [vmem:[%s15870_s20 + $0x58] sm:$0xff] }
0x1168   :  { %8853 = vmatmul.msk.f32.vlgmr.msra.gmra.mxu0 %vm5983_vm3, %v14949_v50  ;;  %v8908_v50 = vld [vmem:[%s15871_s19 + $0x178] sm:$0xff]  ;;  %v7132_v53 = vpop.f32.mrf.mxu3 }
0x1169   :  { %7197 = vmatpush.msrb.mxu0 %v8888_v34  ;;  %v8909_v34 = vld [vmem:[%s15870_s20 + $0x50] sm:$0xff] }
0x116a   :  { %8868 = vmatmul.msk.f32.gmra.mxu1 %vm16574_vm5, %v15222_v22  ;;  %vm16588_vm5 = vmmov %vm16579_vm2 }
0x116b   :  { %7198 = vmatpush.msrb.mxu0 %v8887_v51 }
0x116d   :  { %7323 = vmatpush.msra.mxu0 %v8908_v50 }
0x116f   :  { %7324 = vmatpush.msra.mxu0 %v8907_v1 }
0x1170   :  { %8854 = vmatmul.msk.f32.gmra.mxu0 %vm5983_vm3, %v14970_v32  ;;  %v8906_v32 = vld [vmem:[%s15871_s19 + $0x168] sm:$0xff]  ;;  %v7135_v9 = vpop.f32.mrf.mxu3 }
0x1171   :  { %7325 = vmatpush.msra.mxu0 %v8906_v32  ;;  %v8930_v32 = vld [vmem:[%s15871_s19 + $0x1b8] sm:$0xff] }
0x1172   :  { %8869 = vmatmul.msk.f32.gmra.mxu1 %vm16575_vm4, %v15230_v6  ;;  %vm16589_vm4 = vmmov %vm16579_vm2 }
0x1178   :  { %8855 = vmatmul.msk.f32.gmra.mxu0 %vm5983_vm3, %v14979_v28  ;;  %v8905_v28 = vld [vmem:[%s15871_s19 + $0x160] sm:$0xff] }
0x1179   :  { %7326 = vmatpush.msra.mxu0 %v8905_v28 }
0x117a   :  { %8870 = vmatmul.msk.f32.gmra.mxu1 %vm16576_vm14, %v15238_v30  ;;  %vm16590_vm14 = vmmov %vm16579_vm2 }
0x117b   :  { %7327 = vmatpush.msra.mxu0 %v8904_v42 }
0x117d   :  { %7328 = vmatpush.msra.mxu0 %v8903_v36  ;;  %v8926_v36 = vld [vmem:[%s15871_s19 + $0x198] sm:$0xff] }
0x117f   :  { %7329 = vmatpush.msra.mxu0 %v8902_v14  ;;  %v8925_v14 = vld [vmem:[%s15871_s19 + $0x190] sm:$0xff] }
0x1180   :  { %8856 = vmatmul.msk.f32.gmra.mxu0 %vm5983_vm3, %v14988_v43  ;;  %v8901_v43 = vld [vmem:[%s15871_s19 + $0x140] sm:$0xff] }
0x1181   :  { %7330 = vmatpush.msra.mxu0 %v8901_v43 }
0x1182   :  { %8893 = vmatmul.msk.f32.vlgmr.msra.gmra.mxu1 %vm16560_vm0, %v15412_v49  ;;  %vm16591_vm0 = vmmov %vm16579_vm2 }
0x1188   :  { %8889 = vmatmul.msk.f32.vlgmr.msrb.gmra.mxu0 %vm16577_vm11, %v15213_v58  ;;  %vm16592_vm11 = vmmov %vm16586_vm1 }
0x118a   :  { %8894 = vmatmul.msk.f32.gmra.mxu1 %vm16578_vm13, %v15430_v56  ;;  %vm16593_vm13 = vmmov %vm16591_vm0 }
0x1190   :  { %8890 = vmatmul.msk.f32.gmra.mxu0 %vm16579_vm2, %v15222_v22  ;;  %vm16594_vm2 = vmmov %vm16586_vm1 }
0x1192   :  { %8895 = vmatmul.msk.f32.gmra.mxu1 %vm16580_vm10, %v15442_v26  ;;  %vm16595_vm10 = vmmov %vm16591_vm0 }
0x1198   :  { %8891 = vmatmul.msk.f32.gmra.mxu0 %vm16581_vm15, %v15230_v6  ;;  %vm16596_vm15 = vmmov %vm16586_vm1 }
0x119a   :  { %8896 = vmatmul.msk.f32.gmra.mxu1 %vm16582_vm7, %v15453_v35  ;;  %vm16597_vm7 = vmmov %vm16591_vm0 }
0x11a0   :  { %8892 = vmatmul.msk.f32.gmra.mxu0 %vm16583_vm12, %v15238_v30  ;;  %vm16598_vm12 = vmmov %vm16586_vm1 }
0x11a8   :  { %8915 = vmatmul.msk.f32.vlgmr.msra.gmra.mxu0 %vm16584_vm6, %v15412_v49  ;;  %vm16599_vm6 = vmmov %vm16591_vm0 }
0x11b0   :  { %8916 = vmatmul.msk.f32.gmra.mxu0 %vm16585_vm9, %v15430_v56  ;;  %vm16600_vm9 = vmmov %vm16586_vm1 }
0x11b8   :  { %8917 = vmatmul.msk.f32.gmra.mxu0 %vm16586_vm1, %v15442_v26 }
0x11bf   :  { %v6953_v31 = vpop.f32.mrf.mxu1 }
0x11c0   :  { %8918 = vmatmul.msk.f32.gmra.mxu0 %vm16587_vm8, %v15453_v35  ;;  %vm16601_vm8 = vmmov %vm16586_vm1 }
0x11c5   :  { %v6924_v12 = vpop.f32.mrf.mxu0 }
0x11c6   :  { %v6954_v20 = vadd.f32 %v6953_v31, %v6924_v12  ;;  %v8924_v12 = vld [vmem:[%s15871_s19 + $0x188] sm:$0xff] }
0x11c7   :  { %v6956_v23 = vpop.f32.mrf.mxu1 }
0x11cd   :  { %v6927_v0 = vpop.f32.mrf.mxu0 }
0x11ce   :  { %v6957_v11 = vadd.f32 %v6956_v23, %v6927_v0 }
0x11cf   :  { %v6959_v10 = vpop.f32.mrf.mxu1 }
0x11d5   :  { %v6930_v62 = vpop.f32.mrf.mxu0 }
0x11d6   :  { %v6960_v21 = vadd.f32 %v6959_v10, %v6930_v62  ;;  %v8932_v10 = vld [vmem:[%s15870_s20 + $0x68] sm:$0xff]  ;;  %v8931_v62 = vld [vmem:[%s15870_s20 + $0x60] sm:$0xff] }
0x11d7   :  { %v6962_v59 = vpop.f32.mrf.mxu1 }
0x11dd   :  { %v6933_v61 = vpop.f32.mrf.mxu0 }
0x11de   :  { %v6963_v40 = vadd.f32 %v6962_v59, %v6933_v61  ;;  %v8948_v59 = vld [vmem:[%s15871_s19 + $0x1d8] sm:$0xff]  ;;  %v8946_v61 = vld [vmem:[%s15871_s19 + $0x1c8] sm:$0xff] }
0x11df   :  { %v7097_v48 = vpop.f32.mrf.mxu1 }
0x11e0   :  { %v7127_v25 = vadd.f32 %v7126_v8, %v7097_v48  ;;  %v8947_v8 = vld [vmem:[%s15871_s19 + $0x1d0] sm:$0xff] }
0x11e5   :  { %v7052_v13 = vpop.f32.mrf.mxu0 }
0x11e6   :  { %v15585_v41 = vadd.f32 %v7052_v13, %v6954_v20 }
0x11e7   :  { %v7100_v2 = vpop.f32.mrf.mxu1 }
0x11e8   :  { %v7130_v39 = vadd.f32 %v7129_v63, %v7100_v2 }
0x11ed   :  { %v7055_v55 = vpop.f32.mrf.mxu0 }
0x11ee   :  { %v15587_v4 = vadd.f32 %v7055_v55, %v6957_v11 }
0x11ef   :  { %v7103_v57 = vpop.f32.mrf.mxu1 }
0x11f0   :  { %v7133_v33 = vadd.f32 %v7132_v53, %v7103_v57 }
0x11f5   :  { %v7058_v60 = vpop.f32.mrf.mxu0 }
0x11f6   :  { %v15589_v38 = vadd.f32 %v7058_v60, %v6960_v21  ;;  %v8951_v21 = vld [vmem:[%s15871_s19 + $0x1f0] sm:$0xff] }
0x11f7   :  { %v7106_v18 = vpop.f32.mrf.mxu1 }
0x11f8   :  { %v7136_v47 = vadd.f32 %v7135_v9, %v7106_v18 }
0x11fa   :  { %7150 = vmatpush.msrb.mxu2 %v7136_v47 }
0x11fc   :  { %7151 = vmatpush.msrb.mxu2 %v7133_v33 }
0x11fd   :  { %v7061_v5 = vpop.f32.mrf.mxu0 }
0x11fe   :  { %v15591_v54 = vadd.f32 %v7061_v5, %v6963_v40  ;;  %7152 = vmatpush.msrb.mxu2 %v7130_v39 }
0x11ff   :  { %v7229_v44 = vpop.f32.mrf.mxu1 }
0x1200   :  { %7153 = vmatpush.msrb.mxu2 %v7127_v25 }
0x1201   :  { %8875 = vmatmul.msk.f32.vlgmr.msrb.gmra.mxu2 %vm5983_vm3, %v15095_v52  ;;  %v8929_v52 = vld [vmem:[%s15871_s19 + $0x1b0] sm:$0xff] }
0x1202   :  { %7300 = vmatpush.msra.mxu2 %v8910_v37 }
0x1204   :  { %7301 = vmatpush.msra.mxu2 %v8909_v34 }
0x1205   :  { %v7200_v51 = vpop.f32.mrf.mxu0 }
0x1206   :  { %7426 = vmatpush.msrb.mxu2 %v8930_v32  ;;  %v7230_v11 = vadd.f32 %v7229_v44, %v7200_v51 }
0x1207   :  { %v7232_v50 = vpop.f32.mrf.mxu1 }
0x1208   :  { %7427 = vmatpush.msrb.mxu2 %v8929_v52 }
0x1209   :  { %8876 = vmatmul.msk.f32.gmra.mxu2 %vm5983_vm3, %v15110_v45  ;;  %v8928_v45 = vld [vmem:[%s15871_s19 + $0x1a8] sm:$0xff] }
0x120a   :  { %7428 = vmatpush.msrb.mxu2 %v8928_v45  ;;  %v8953_v45 = vld [vmem:[%s15870_s20 + $0x70] sm:$0xff] }
0x120d   :  { %v7203_v1 = vpop.f32.mrf.mxu0 }
0x120e   :  { %v7233_v0 = vadd.f32 %v7232_v50, %v7203_v1 }
0x120f   :  { %v7235_v28 = vpop.f32.mrf.mxu1 }
0x1211   :  { %8877 = vmatmul.msk.f32.gmra.mxu2 %vm5983_vm3, %v15121_v27  ;;  %v8927_v27 = vld [vmem:[%s15871_s19 + $0x1a0] sm:$0xff] }
0x1212   :  { %7429 = vmatpush.msrb.mxu2 %v8927_v27 }
0x1214   :  { %7430 = vmatpush.msrb.mxu2 %v8926_v36 }
0x1215   :  { %v7206_v42 = vpop.f32.mrf.mxu0 }
0x1216   :  { %7431 = vmatpush.msrb.mxu2 %v8925_v14  ;;  %v7236_v23 = vadd.f32 %v7235_v28, %v7206_v42  ;;  %v8954_v42 = vld [vmem:[%s15870_s20 + $0x78] sm:$0xff] }
0x1217   :  { %v7238_v43 = vpop.f32.mrf.mxu1 }
0x1218   :  { %7432 = vmatpush.msrb.mxu2 %v8924_v12 }
0x1219   :  { %8878 = vmatmul.msk.f32.gmra.mxu2 %vm5983_vm3, %v15132_v17  ;;  %v8923_v17 = vld [vmem:[%s15871_s19 + $0x180] sm:$0xff] }
0x121a   :  { %7433 = vmatpush.msrb.mxu2 %v8923_v17  ;;  %v8969_v17 = vld [vmem:[%s15871_s19 + $0x210] sm:$0xff] }
0x121d   :  { %v7209_v31 = vpop.f32.mrf.mxu0 }
0x121e   :  { %v7239_v20 = vadd.f32 %v7238_v43, %v7209_v31  ;;  %v8974_v43 = vld [vmem:[%s15871_s19 + $0x238] sm:$0xff] }
0x1220   :  { %7253 = vmatpush.msrb.mxu3 %v7239_v20  ;;  %v8970_v20 = vld [vmem:[%s15871_s19 + $0x218] sm:$0xff] }
0x1221   :  { %8911 = vmatmul.msk.f32.vlgmr.msra.gmra.mxu2 %vm16588_vm5, %v15213_v58  ;;  %vm16602_vm5 = vmmov %vm16586_vm1 }
0x1222   :  { %7254 = vmatpush.msrb.mxu3 %v7236_v23 }
0x1224   :  { %7255 = vmatpush.msrb.mxu3 %v7233_v0 }
0x1225   :  { %v7332_v60 = vpop.f32.mrf.mxu0 }
0x1226   :  { %7256 = vmatpush.msrb.mxu3 %v7230_v11  ;;  %v8968_v11 = vld [vmem:[%s15871_s19 + $0x208] sm:$0xff] }
0x1227   :  { %8897 = vmatmul.msk.f32.vlgmr.msrb.gmra.mxu3 %vm5983_vm3, %v15033_v29  ;;  %v8952_v29 = vld [vmem:[%s15871_s19 + $0x1f8] sm:$0xff] }
0x1228   :  { %7403 = vmatpush.msra.mxu3 %v8932_v10 }
0x1229   :  { %8912 = vmatmul.msk.f32.gmra.mxu2 %vm16589_vm4, %v15222_v22  ;;  %vm16603_vm4 = vmmov %vm16591_vm0 }
0x122a   :  { %7404 = vmatpush.msra.mxu3 %v8931_v62 }
0x122c   :  { %7529 = vmatpush.msrb.mxu3 %v8952_v29 }
0x122d   :  { %v7335_v18 = vpop.f32.mrf.mxu0 }
0x122e   :  { %7530 = vmatpush.msrb.mxu3 %v8951_v21 }
0x122f   :  { %8898 = vmatmul.msk.f32.gmra.mxu3 %vm5983_vm3, %v15058_v16  ;;  %v8950_v16 = vld [vmem:[%s15871_s19 + $0x1e8] sm:$0xff] }
0x1230   :  { %7531 = vmatpush.msrb.mxu3 %v8950_v16  ;;  %v8976_v16 = vld [vmem:[%s15870_s20 + $0x88] sm:$0xff] }
0x1231   :  { %8913 = vmatmul.msk.f32.gmra.mxu2 %vm16590_vm14, %v15230_v6  ;;  %vm16604_vm14 = vmmov %vm16591_vm0 }
0x1235   :  { %v7338_v5 = vpop.f32.mrf.mxu0 }
0x1237   :  { %8899 = vmatmul.msk.f32.gmra.mxu3 %vm5983_vm3, %v15069_v15  ;;  %v8949_v15 = vld [vmem:[%s15871_s19 + $0x1e0] sm:$0xff] }
0x1238   :  { %7532 = vmatpush.msrb.mxu3 %v8949_v15  ;;  %v9190_v15 = vld [vmem:[%s15868_s9 + $0xc0] sm:$0xff] }
0x1239   :  { %8914 = vmatmul.msk.f32.gmra.mxu2 %vm16591_vm0, %v15238_v30 }
0x123a   :  { %7533 = vmatpush.msrb.mxu3 %v8948_v59  ;;  %v8975_v59 = vld [vmem:[%s15870_s20 + $0x80] sm:$0xff] }
0x123c   :  { %7534 = vmatpush.msrb.mxu3 %v8947_v8  ;;  %v9191_v8 = vld [vmem:[%s15868_s9 + $0xc8] sm:$0xff] }
0x123d   :  { %v7341_v34 = vpop.f32.mrf.mxu0 }
0x123e   :  { %7535 = vmatpush.msrb.mxu3 %v8946_v61  ;;  %v9192_v61 = vld [vmem:[%s15868_s9 + $0xd0] sm:$0xff] }
0x123f   :  { %8900 = vmatmul.msk.f32.gmra.mxu3 %vm5983_vm3, %v15080_v3  ;;  %v8945_v3 = vld [vmem:[%s15871_s19 + $0x1c0] sm:$0xff] }
0x1240   :  { %7536 = vmatpush.msrb.mxu3 %v8945_v3  ;;  %v9193_v3 = vld [vmem:[%s15868_s9 + $0xd8] sm:$0xff] }
0x1241   :  { %8937 = vmatmul.msk.f32.vlgmr.msrb.gmra.mxu2 %vm16592_vm11, %v15412_v49  ;;  %vm16605_vm11 = vmmov %vm16591_vm0 }
0x1247   :  { %8933 = vmatmul.msk.f32.vlgmr.msra.gmra.mxu3 %vm16593_vm13, %v15213_v58  ;;  %vm16606_vm13 = vmmov %vm16586_vm1 }
0x1249   :  { %8938 = vmatmul.msk.f32.gmra.mxu2 %vm16594_vm2, %v15430_v56  ;;  %vm16607_vm2 = vmmov %vm16591_vm0 }
0x124f   :  { %8934 = vmatmul.msk.f32.gmra.mxu3 %vm16595_vm10, %v15222_v22  ;;  %vm16608_vm10 = vmmov %vm16586_vm1 }
0x1251   :  { %8939 = vmatmul.msk.f32.gmra.mxu2 %vm16596_vm15, %v15442_v26  ;;  %vm16609_vm15 = vmmov %vm16591_vm0 }
0x1257   :  { %8935 = vmatmul.msk.f32.gmra.mxu3 %vm16597_vm7, %v15230_v6  ;;  %vm16610_vm7 = vmmov %vm16586_vm1 }
0x1259   :  { %8940 = vmatmul.msk.f32.gmra.mxu2 %vm16598_vm12, %v15453_v35  ;;  %vm16611_vm12 = vmmov %vm16591_vm0 }
0x125f   :  { %8936 = vmatmul.msk.f32.gmra.mxu3 %vm16599_vm6, %v15238_v30  ;;  %vm16612_vm6 = vmmov %vm16586_vm1 }
0x1267   :  { %8959 = vmatmul.msk.f32.vlgmr.msrb.gmra.mxu3 %vm16600_vm9, %v15412_v49  ;;  %vm16613_vm9 = vmmov %vm16591_vm0 }
0x126f   :  { %8960 = vmatmul.msk.f32.gmra.mxu3 %vm16586_vm1, %v15430_v56  ;;  %vm7726_vm1 = vcmask 58368  }
0x1277   :  { %8961 = vmatmul.msk.f32.gmra.mxu3 %vm16601_vm8, %v15442_v26  ;;  %vm7730_vm8 = vcmask 1024  }
0x127f   :  { %8962 = vmatmul.msk.f32.gmra.mxu3 %vm16602_vm5, %v15453_v35 }
0x1284   :  { %v7155_v40 = vpop.f32.mrf.mxu2 }
0x1285   :  { %v7167_v48 = vadd.f32 %v7155_v40, %v15585_v41 }
0x128c   :  { %v7158_v63 = vpop.f32.mrf.mxu2 }
0x128d   :  { %v7168_v13 = vadd.f32 %v7158_v63, %v15587_v4 }
0x1294   :  { %v7161_v2 = vpop.f32.mrf.mxu2 }
0x1295   :  { %v7169_v53 = vadd.f32 %v7161_v2, %v15589_v38 }
0x129c   :  { %v7164_v55 = vpop.f32.mrf.mxu2 }
0x129d   :  { %v7170_v57 = vadd.f32 %v7164_v55, %v15591_v54 }
0x12a4   :  { %v7303_v9 = vpop.f32.mrf.mxu2 }
0x12a5   :  { %v7333_v32 = vadd.f32 %v7332_v60, %v7303_v9 }
0x12aa   :  { %v7258_v47 = vpop.f32.mrf.mxu3 }
0x12ab   :  { %v15705_v33 = vadd.f32 %v7258_v47, %v7167_v48 }
0x12ac   :  { %v7306_v39 = vpop.f32.mrf.mxu2 }
0x12ad   :  { %v7336_v54 = vadd.f32 %v7335_v18, %v7306_v39 }
0x12b2   :  { %v7261_v25 = vpop.f32.mrf.mxu3 }
0x12b3   :  { %v15707_v44 = vadd.f32 %v7261_v25, %v7168_v13 }
0x12b4   :  { %v7309_v41 = vpop.f32.mrf.mxu2 }
0x12b5   :  { %v7339_v50 = vadd.f32 %v7338_v5, %v7309_v41 }
0x12ba   :  { %v7264_v37 = vpop.f32.mrf.mxu3 }
0x12bb   :  { %v15709_v4 = vadd.f32 %v7264_v37, %v7169_v53 }
0x12bc   :  { %v7312_v38 = vpop.f32.mrf.mxu2 }
0x12bd   :  { %v7342_v51 = vadd.f32 %v7341_v34, %v7312_v38  ;;  %v9194_v38 = vld [vmem:[%s15868_s9 + $0xe0] sm:$0xff] }
0x12bf   :  { %7356 = vmatpush.msrb.mxu1 %v7342_v51 }
0x12c1   :  { %7357 = vmatpush.msrb.mxu1 %v7339_v50 }
0x12c2   :  { %v7267_v1 = vpop.f32.mrf.mxu3 }
0x12c3   :  { %v15711_v52 = vadd.f32 %v7267_v1, %v7170_v57  ;;  %7358 = vmatpush.msrb.mxu1 %v7336_v54  ;;  %v9195_v54 = vld [vmem:[%s15868_s9 + $0xe8] sm:$0xff] }
0x12c4   :  { %v7435_v28 = vpop.f32.mrf.mxu2 }
0x12c5   :  { %7359 = vmatpush.msrb.mxu1 %v7333_v32  ;;  %v9196_v32 = vld [vmem:[%s15868_s9 + $0xf0] sm:$0xff] }
0x12c6   :  { %8919 = vmatmul.msk.f32.vlgmr.msrb.gmra.mxu1 %vm5983_vm3, %v15143_v19  ;;  %v8973_v19 = vld [vmem:[%s15871_s19 + $0x230] sm:$0xff] }
0x12c7   :  { %7506 = vmatpush.msra.mxu1 %v8954_v42  ;;  %v9197_v42 = vld [vmem:[%s15868_s9 + $0xf8] sm:$0xff] }
0x12c9   :  { %7507 = vmatpush.msra.mxu1 %v8953_v45 }
0x12ca   :  { %v7406_v27 = vpop.f32.mrf.mxu3 }
0x12cb   :  { %7632 = vmatpush.msrb.mxu1 %v8974_v43  ;;  %v7436_v21 = vadd.f32 %v7435_v28, %v7406_v27 }
0x12cc   :  { %v7438_v36 = vpop.f32.mrf.mxu2 }
0x12cd   :  { %7633 = vmatpush.msrb.mxu1 %v8973_v19 }
0x12ce   :  { %8920 = vmatmul.msk.f32.gmra.mxu1 %vm5983_vm3, %v15154_v46  ;;  %v8972_v46 = vld [vmem:[%s15871_s19 + $0x228] sm:$0xff] }
0x12cf   :  { %7634 = vmatpush.msrb.mxu1 %v8972_v46  ;;  %v9200_v46 = vld [vmem:[%s15868_s9 + $0x110] sm:$0xff] }
0x12d2   :  { %v7409_v14 = vpop.f32.mrf.mxu3 }
0x12d3   :  { %v7439_v29 = vadd.f32 %v7438_v36, %v7409_v14 }
0x12d4   :  { %v7441_v31 = vpop.f32.mrf.mxu2 }
0x12d6   :  { %8921 = vmatmul.msk.f32.gmra.mxu1 %vm5983_vm3, %v15165_v7  ;;  %v8971_v7 = vld [vmem:[%s15871_s19 + $0x220] sm:$0xff] }
0x12d7   :  { %7635 = vmatpush.msrb.mxu1 %v8971_v7  ;;  %v9201_v7 = vld [vmem:[%s15868_s9 + $0x118] sm:$0xff] }
0x12d9   :  { %7636 = vmatpush.msrb.mxu1 %v8970_v20 }
0x12da   :  { %v7412_v12 = vpop.f32.mrf.mxu3 }
0x12db   :  { %7637 = vmatpush.msrb.mxu1 %v8969_v17  ;;  %v7442_v62 = vadd.f32 %v7441_v31, %v7412_v12  ;;  %v9198_v31 = vld [vmem:[%s15868_s9 + $0x100] sm:$0xff]  ;;  %v9199_v12 = vld [vmem:[%s15868_s9 + $0x108] sm:$0xff] }
0x12dc   :  { %v7444_v23 = vpop.f32.mrf.mxu2 }
0x12dd   :  { %7638 = vmatpush.msrb.mxu1 %v8968_v11 }
0x12de   :  { %8922 = vmatmul.msk.f32.gmra.mxu1 %vm5983_vm3, %v15176_v24  ;;  %v8967_v24 = vld [vmem:[%s15871_s19 + $0x200] sm:$0xff] }
0x12df   :  { %7639 = vmatpush.msrb.mxu1 %v8967_v24 }
0x12e2   :  { %v7415_v0 = vpop.f32.mrf.mxu3 }
0x12e3   :  { %v7445_v10 = vadd.f32 %v7444_v23, %v7415_v0 }
0x12e5   :  { %7459 = vmatpush.msrb.mxu0 %v7445_v10 }
0x12e6   :  { %8955 = vmatmul.msk.f32.vlgmr.msra.gmra.mxu1 %vm16603_vm4, %v15213_v58 }
0x12e7   :  { %7460 = vmatpush.msrb.mxu0 %v7442_v62 }
0x12e9   :  { %7461 = vmatpush.msrb.mxu0 %v7439_v29 }
0x12ea   :  { %v7538_v13 = vpop.f32.mrf.mxu3 }
0x12eb   :  { %7462 = vmatpush.msrb.mxu0 %v7436_v21 }
0x12ec   :  { %8941 = vmatmul.msk.f32.vlgmr.msrb.gmra.mxu0 %vm5983_vm3, %v9190_v15 }
0x12ed   :  { %7609 = vmatpush.msra.mxu0 %v8976_v16 }
0x12ee   :  { %8956 = vmatmul.msk.f32.gmra.mxu1 %vm16604_vm14, %v15222_v22 }
0x12ef   :  { %7610 = vmatpush.msra.mxu0 %v8975_v59 }
0x12f2   :  { %v7541_v2 = vpop.f32.mrf.mxu3 }
0x12f4   :  { %8942 = vmatmul.msk.f32.gmra.mxu0 %vm5983_vm3, %v9191_v8 }
0x12f6   :  { %8957 = vmatmul.msk.f32.gmra.mxu1 %vm16591_vm0, %v15230_v6 }
0x12fa   :  { %v7544_v57 = vpop.f32.mrf.mxu3 }
0x12fc   :  { %8943 = vmatmul.msk.f32.gmra.mxu0 %vm5983_vm3, %v9192_v61 }
0x12fe   :  { %8958 = vmatmul.msk.f32.gmra.mxu1 %vm16605_vm11, %v15238_v30 }
0x1304   :  { %8944 = vmatmul.msk.f32.gmra.mxu0 %vm5983_vm3, %v9193_v3 }
0x1306   :  { %8981 = vmatmul.msk.f32.vlgmr.msrb.gmra.mxu1 %vm16606_vm13, %v15412_v49 }
0x130c   :  { %8977 = vmatmul.msk.f32.vlgmr.msra.gmra.mxu0 %vm16607_vm2, %v15213_v58 }
0x130e   :  { %8982 = vmatmul.msk.f32.gmra.mxu1 %vm16608_vm10, %v15430_v56 }
0x1314   :  { %8978 = vmatmul.msk.f32.gmra.mxu0 %vm16609_vm15, %v15222_v22 }
0x1316   :  { %8983 = vmatmul.msk.f32.gmra.mxu1 %vm16610_vm7, %v15442_v26 }
0x131c   :  { %8979 = vmatmul.msk.f32.gmra.mxu0 %vm16611_vm12, %v15230_v6 }
0x131e   :  { %8984 = vmatmul.msk.f32.gmra.mxu1 %vm16612_vm6, %v15453_v35 }
0x1324   :  { %8980 = vmatmul.msk.f32.gmra.mxu0 %vm16613_vm9, %v15238_v30 }
0x1343   :  { %v7361_v49 = vpop.f32.mrf.mxu1 }
0x1344   :  { %v7373_v58 = vadd.f32 %v7361_v49, %v15705_v33  ;;  %v7547_v33 = vpop.f32.mrf.mxu3 }
0x134b   :  { %v7364_v40 = vpop.f32.mrf.mxu1 }
0x134c   :  { %v7374_v56 = vadd.f32 %v7364_v40, %v15707_v44 }
0x1353   :  { %v7367_v48 = vpop.f32.mrf.mxu1 }
0x1354   :  { %v7375_v22 = vadd.f32 %v7367_v48, %v15709_v4 }
0x135b   :  { %v7370_v63 = vpop.f32.mrf.mxu1 }
0x135c   :  { %v7376_v26 = vadd.f32 %v7370_v63, %v15711_v52 }
0x1363   :  { %v7509_v6 = vpop.f32.mrf.mxu1 }
0x1364   :  { %v7539_v37 = vadd.f32 %v7538_v13, %v7509_v6 }
0x1369   :  { %v7464_v53 = vpop.f32.mrf.mxu0 }
0x136a   :  { %v7476_v35 = vadd.f32 %v7464_v53, %v7373_v58 }
0x136b   :  { %v7512_v55 = vpop.f32.mrf.mxu1 }
0x136c   :  { %v7542_v44 = vadd.f32 %v7541_v2, %v7512_v55  ;;  %v7696_v2 = vld [vmem:[%s15873_s21 + $0x8] sm:$0xff]  ;;  %v7695_v55 = vld [vmem:[%s15873_s21] sm:$0xff] }
0x1371   :  { %v7467_v30 = vpop.f32.mrf.mxu0 }
0x1372   :  { %v7477_v60 = vadd.f32 %v7467_v30, %v7374_v56  ;;  %v7698_v56 = vld [vmem:[%s15873_s21 + $0x18] sm:$0xff] }
0x1373   :  { %v7515_v9 = vpop.f32.mrf.mxu1 }
0x1374   :  { %v7545_v25 = vadd.f32 %v7544_v57, %v7515_v9 }
0x1379   :  { %v7470_v18 = vpop.f32.mrf.mxu0 }
0x137a   :  { %v7478_v47 = vadd.f32 %v7470_v18, %v7375_v22 }
0x137b   :  { %v7518_v39 = vpop.f32.mrf.mxu1 }
0x137c   :  { %v7548_v5 = vadd.f32 %v7547_v33, %v7518_v39 }
0x137e   :  { %7562 = vmatpush.msra.mxu2 %v7548_v5 }
0x1380   :  { %7563 = vmatpush.msra.mxu2 %v7545_v25 }
0x1381   :  { %v7473_v41 = vpop.f32.mrf.mxu0 }
0x1382   :  { %v7479_v4 = vadd.f32 %v7473_v41, %v7376_v26  ;;  %7564 = vmatpush.msra.mxu2 %v7542_v44  ;;  %v7697_v26 = vld [vmem:[%s15873_s21 + $0x10] sm:$0xff]  ;;  %s16614_s21 = sld [smem:[#allocation81_spill]] }
0x1383   :  { %v7641_v34 = vpop.f32.mrf.mxu1 }
0x1384   :  { %7565 = vmatpush.msra.mxu2 %v7539_v37 }
0x1385   :  { %8963 = vmatmul.msk.f32.vlgmr.msra.gmra.mxu2 %vm5983_vm3, %v9194_v38 }
0x1389   :  { %v7612_v51 = vpop.f32.mrf.mxu0 }
0x138a   :  { %v7642_v19 = vadd.f32 %v7641_v34, %v7612_v51 }
0x138b   :  { %v7644_v50 = vpop.f32.mrf.mxu1 }
0x138d   :  { %8964 = vmatmul.msk.f32.gmra.mxu2 %vm5983_vm3, %v9195_v54 }
0x1391   :  { %v7615_v1 = vpop.f32.mrf.mxu0 }
0x1392   :  { %v7645_v43 = vadd.f32 %v7644_v50, %v7615_v1 }
0x1393   :  { %v7647_v52 = vpop.f32.mrf.mxu1 }
0x1395   :  { %8965 = vmatmul.msk.f32.gmra.mxu2 %vm5983_vm3, %v9196_v32 }
0x1399   :  { %v7618_v28 = vpop.f32.mrf.mxu0 }
0x139a   :  { %v7648_v14 = vadd.f32 %v7647_v52, %v7618_v28 }
0x139b   :  { %v7650_v45 = vpop.f32.mrf.mxu1 }
0x139d   :  { %8966 = vmatmul.msk.f32.gmra.mxu2 %vm5983_vm3, %v9197_v42 }
0x13a1   :  { %v7621_v27 = vpop.f32.mrf.mxu0 }
0x13a2   :  { %v7651_v36 = vadd.f32 %v7650_v45, %v7621_v27 }
0x13a4   :  { %7665 = vmatpush.msra.mxu3 %v7651_v36 }
0x13a6   :  { %7666 = vmatpush.msra.mxu3 %v7648_v14 }
0x13a8   :  { %7667 = vmatpush.msra.mxu3 %v7645_v43 }
0x13aa   :  { %7668 = vmatpush.msra.mxu3 %v7642_v19 }
0x13ab   :  { %8985 = vmatmul.msk.f32.vlgmr.msra.gmra.mxu3 %vm5983_vm3, %v9198_v31 }
0x13b3   :  { %8986 = vmatmul.msk.f32.gmra.mxu3 %vm5983_vm3, %v9199_v12 }
0x13bb   :  { %8987 = vmatmul.msk.f32.gmra.mxu3 %vm5983_vm3, %v9200_v46 }
0x13c3   :  { %8988 = vmatmul.msk.f32.gmra.mxu3 %vm5983_vm3, %v9201_v7 }
0x1408   :  { %v7567_v20 = vpop.f32.mrf.mxu2 }
0x1409   :  { %v7579_v16 = vadd.f32 %v7567_v20, %v7476_v35 }
0x1410   :  { %v7570_v17 = vpop.f32.mrf.mxu2 }
0x1411   :  { %v7580_v29 = vadd.f32 %v7570_v17, %v7477_v60  ;;  %v7694_v60 = vld [vmem:[%s15874_s5] sm:$0x3] }
0x1418   :  { %v7573_v11 = vpop.f32.mrf.mxu2 }
0x1419   :  { %v7581_v24 = vadd.f32 %v7573_v11, %v7478_v47 }
0x1420   :  { %v7576_v62 = vpop.f32.mrf.mxu2 }
0x1421   :  { %v7582_v15 = vadd.f32 %v7576_v62, %v7479_v4 }
0x142e   :  { %v7670_v23 = vpop.f32.mrf.mxu3 }
0x142f   :  { %v7682_v61 = vadd.f32 %v7670_v23, %v7579_v16 }
0x1431   :  { %v7686_v48 = vmul.f32 0.2, %v7682_v61 }
0x1433   :  { %v7690_v53 = vmax.f32 %v7682_v61, %v7686_v48 }
0x1435   :  { %v7699_v30 = vmul.f32 %v7695_v55, %v7690_v53 }
0x1436   :  { %v7673_v0 = vpop.f32.mrf.mxu3 }
0x1437   :  { %v7683_v59 = vadd.f32 %v7673_v0, %v7580_v29 }
0x1439   :  { %v7687_v58 = vmul.f32 0.2, %v7683_v59 }
0x143b   :  { %v7691_v13 = vmax.f32 %v7683_v59, %v7687_v58 }
0x143d   :  { %v7700_v57 = vmul.f32 %v7696_v2, %v7691_v13 }
0x143e   :  { %v7676_v10 = vpop.f32.mrf.mxu3 }
0x143f   :  { %v7684_v21 = vadd.f32 %v7676_v10, %v7581_v24 }
0x1441   :  { %v7688_v3 = vmul.f32 0.2, %v7684_v21 }
0x1443   :  { %v7692_v22 = vmax.f32 %v7684_v21, %v7688_v3 }
0x1445   :  { %v7701_v35 = vmul.f32 %v7697_v26, %v7692_v22 }
0x1446   :  { %v7679_v8 = vpop.f32.mrf.mxu3 }
0x1447   :  { %v7685_v49 = vadd.f32 %v7679_v8, %v7582_v15 }
0x1449   :  { %v7689_v40 = vmul.f32 0.2, %v7685_v49 }
0x144b   :  { %v7693_v63 = vmax.f32 %v7685_v49, %v7689_v40 }
0x144d   :  { %v7702_v6 = vmul.f32 %v7698_v56, %v7693_v63 }
0x144f   :  { %7718 = vmatpush.msrb.mxu2 %v7702_v6 }
0x1451   :  { %7719 = vmatpush.msrb.mxu2 %v7701_v35 }
0x1453   :  { %7720 = vmatpush.msrb.mxu2 %v7700_v57 }
0x1455   :  { %7721 = vmatpush.msrb.mxu2 %v7699_v30 }
0x1456   :  { %8989 = vmatmul.msk.f32.vlgmr.msrb.gmra.mxu2 %vm5983_vm3, %v7694_v60 }
0x14d9   :  { %v7723_v9 = vpop.f32.mrf.mxu2 }
0x14da   :  { %v7727_v18 = vsel %vm7726_vm1, %v7723_v9, 0.0 }
0x14db   :  { %7728 = vadd.xlane.f32.xlu1 %v7727_v18 }
0x154e   :  { %v7729_v47 = vpop.xlane.xlu1 %7728 }
0x154f   :  { %7731 = vst.msk [vmem:[%s16614_s21] sm:$0x3] %vm7730_vm8, %v7729_v47 }

</bundles_post_ra>
